<compile_context>
chip_gen: v7x
topology: tpu7x:2x2x1
jax: 0.10.0
libtpu: 0.0.40
codegen_flags: <defaults>
</compile_context>

<pallas_src>
import functools
import numpy as np

import jax
import jax.numpy as jnp
from jax import lax
from jax.experimental import pallas as pl
from jax.experimental.pallas import tpu as pltpu


# --------------------------------------------------------------------------- #
# kernel
# --------------------------------------------------------------------------- #
def _window_attn_block_kernel(x_ref, wqkv_ref, bqkv_ref, bias_ref, *rest,
                              num_heads, scale, has_mask):
    """One grid step == one block of Bw windows.

    x_ref     : (Bw, N, C)      input tokens for this block of windows
    wqkv_ref  : (C, 3C)         qkv weight (transposed for x @ W), compute dtype
    bqkv_ref  : (1, 3C)         qkv bias (f32)
    bias_ref  : (H, N, N)       relative position bias (f32, resident)
    mask_ref  : (Bw, N, N)      pre-tiled attention mask (f32, only if has_mask)
    wproj_ref : (C, C)          output projection weight, compute dtype
    bproj_ref : (1, C)          output projection bias (f32)
    out_ref   : (Bw, N, C)
    o_scratch : (Bw*N, C)       VMEM scratch holding concatenated head outputs
    """
    if has_mask:
        mask_ref, wproj_ref, bproj_ref, out_ref, o_scratch = rest
    else:
        wproj_ref, bproj_ref, out_ref, o_scratch = rest
        mask_ref = None

    Bw, N, C = x_ref.shape
    hd = C // num_heads
    dtype = x_ref.dtype

    # Fused QKV projection over all Bw windows at once (M = Bw*N rows).
    x2 = x_ref[...].reshape(Bw * N, C)
    qkv = jnp.dot(x2, wqkv_ref[...], preferred_element_type=jnp.float32)
    qkv = qkv + bqkv_ref[...]                                 # (Bw*N, 3C) f32

    if has_mask:
        mask = mask_ref[...]                                  # (Bw, N, N) f32

    for h in range(num_heads):
        lo = h * hd
        qh = (qkv[:, lo:lo + hd] * scale).astype(dtype).reshape(Bw, N, hd)
        kh = qkv[:, C + lo:C + lo + hd].astype(dtype).reshape(Bw, N, hd)
        vh = qkv[:, 2 * C + lo:2 * C + lo + hd].astype(dtype).reshape(Bw, N, hd)

        # attn = q @ k^T, batched over the Bw windows.
        attn = jnp.einsum("bnd,bmd->bnm", qh, kh,
                          preferred_element_type=jnp.float32)  # (Bw, N, N) f32
        attn = attn + bias_ref[h][None]
        if has_mask:
            attn = attn + mask

        # softmax over the last axis — exact f32 statistics (no approx recip).
        m = jnp.max(attn, axis=-1, keepdims=True)
        e = jnp.exp(attn - m)
        s = jnp.sum(e, axis=-1, keepdims=True)
        p = (e / s).astype(dtype)

        oh = jnp.einsum("bnm,bmd->bnd", p, vh,
                        preferred_element_type=jnp.float32)    # (Bw, N, hd)

        # Write this head straight into its lane slot (== torch concat of heads).
        o_scratch[:, lo:lo + hd] = oh.reshape(Bw * N, hd).astype(o_scratch.dtype)

    # Output projection over all Bw windows at once.
    y = jnp.dot(o_scratch[...], wproj_ref[...],
                preferred_element_type=jnp.float32)
    y = y + bproj_ref[...]
    out_ref[...] = y.reshape(Bw, N, C).astype(out_ref.dtype)


# --------------------------------------------------------------------------- #
# helpers
# --------------------------------------------------------------------------- #
def make_relative_position_index(window_size):
    Wh, Ww = window_size
    coords = np.stack(np.meshgrid(np.arange(Wh), np.arange(Ww), indexing="ij"))
    coords_flatten = coords.reshape(2, -1)                             # (2, N)
    relative_coords = coords_flatten[:, :, None] - coords_flatten[:, None, :]
    relative_coords = relative_coords.transpose(1, 2, 0).astype(np.int64)
    relative_coords[:, :, 0] += Wh - 1
    relative_coords[:, :, 1] += Ww - 1
    relative_coords[:, :, 0] *= 2 * Ww - 1
    return relative_coords.sum(-1)                                     # (N, N)


def _pick_block_windows(B_, step, per_window_bytes, budget_bytes, min_grid=2):
    """Largest Bw that divides B_, is a multiple of `step` (nW when masked),
    fits the VMEM budget, and (preferably) keeps the grid length >= min_grid
    so both v7x TensorCores stay busy."""
    cands = [bw for bw in range(step, B_ + 1, step) if B_ % bw == 0]
    if not cands:
        cands = [B_]
    fit = [bw for bw in cands if bw * per_window_bytes <= budget_bytes] or [cands[0]]
    pref = [bw for bw in fit if B_ // bw >= min_grid] or fit
    return max(pref)


# --------------------------------------------------------------------------- #
# wrapper
# --------------------------------------------------------------------------- #
def window_attention(x, params, window_size, num_heads, mask=None,
                     qk_scale=None, block_windows=None,
                     vmem_budget_bytes=8 << 20):
    """Pallas implementation of WindowAttention.forward (dropout prob = 0).

    Computes in x.dtype (f32 or bf16) with f32 accumulation / softmax stats.
    """
    B_, N, C = x.shape
    assert N == window_size[0] * window_size[1]
    H = num_heads
    head_dim = C // H
    scale = qk_scale if qk_scale is not None else head_dim ** (-0.5)
    dtype = x.dtype

    # relative position bias: gather table -> (H, N, N), f32, VMEM-resident.
    rel_idx = jnp.asarray(make_relative_position_index(window_size))
    bias = params["rel_pos_bias_table"].astype(jnp.float32)[rel_idx.reshape(-1)]
    bias = bias.reshape(N, N, H).transpose(2, 0, 1)                    # (H,N,N)

    has_mask = mask is not None
    if has_mask:
        nW = mask.shape[0]
        assert B_ % nW == 0
    else:
        nW = 1

    # pick the window-block size against a conservative VMEM budget
    # (double-buffered x/out blocks + f32 qkv intermediate + attn temporaries).
    itemsize = np.dtype(dtype).itemsize
    per_win = (N * C * itemsize * (2 + 2 + 1)      # x (x2), out (x2), o_scratch
               + N * 3 * C * 4                     # qkv f32 intermediate
               + 4 * N * N * 4)                    # attn temporaries + mask
    if block_windows is None:
        Bw = _pick_block_windows(B_, nW if has_mask else 1, per_win,
                                 vmem_budget_bytes)
    else:
        Bw = block_windows
    assert B_ % Bw == 0
    if has_mask:
        assert Bw % nW == 0
        # pre-tile the mask so window w inside a block uses mask[w % nW].
        mask_tiled = jnp.tile(mask.astype(jnp.float32), (Bw // nW, 1, 1))

    wqkv = params["qkv_w"].astype(dtype)                   # (C, 3C)
    bqkv = params["qkv_b"].astype(jnp.float32).reshape(1, 3 * C)
    wproj = params["proj_w"].astype(dtype)                 # (C, C)
    bproj = params["proj_b"].astype(jnp.float32).reshape(1, C)

    kernel = functools.partial(_window_attn_block_kernel,
                               num_heads=H, scale=scale, has_mask=has_mask)

    in_specs = [
        pl.BlockSpec((Bw, N, C), lambda g: (g, 0, 0)),         # x
        pl.BlockSpec((C, 3 * C), lambda g: (0, 0)),            # wqkv (resident)
        pl.BlockSpec((1, 3 * C), lambda g: (0, 0)),            # bqkv
        pl.BlockSpec((H, N, N), lambda g: (0, 0, 0)),          # bias (resident)
    ]
    inputs = [x, wqkv, bqkv, bias]
    if has_mask:
        in_specs.append(pl.BlockSpec((Bw, N, N), lambda g: (0, 0, 0)))  # mask
        inputs.append(mask_tiled)
    in_specs += [
        pl.BlockSpec((C, C), lambda g: (0, 0)),                # wproj (resident)
        pl.BlockSpec((1, C), lambda g: (0, 0)),                # bproj
    ]
    inputs += [wproj, bproj]

    out = pl.pallas_call(
        kernel,
        out_shape=jax.ShapeDtypeStruct((B_, N, C), dtype),
        grid_spec=pltpu.PrefetchScalarGridSpec(
            num_scalar_prefetch=0,
            grid=(B_ // Bw,),
            in_specs=in_specs,
            out_specs=pl.BlockSpec((Bw, N, C), lambda g: (g, 0, 0)),
            scratch_shapes=[pltpu.VMEM((Bw * N, C), dtype)],
        ),
        compiler_params=pltpu.CompilerParams(
            dimension_semantics=("parallel",)),
    )(*inputs)
    return out


# ------------------------- pure-JAX reference -------------------------------
def window_attention_ref(x, params, window_size, num_heads, mask=None,
                         qk_scale=None):
    B_, N, C = x.shape
    head_dim = C // num_heads
    scale = qk_scale if qk_scale is not None else head_dim ** (-0.5)

    qkv = x @ params["qkv_w"] + params["qkv_b"]
    qkv = qkv.reshape(B_, N, 3, num_heads, head_dim).transpose(2, 0, 3, 1, 4)
    q, k, v = qkv[0], qkv[1], qkv[2]
    q = q * scale
    attn = jnp.einsum("bhnd,bhmd->bhnm", q, k)

    rel_idx = jnp.asarray(make_relative_position_index(window_size))
    bias = params["rel_pos_bias_table"][rel_idx.reshape(-1)]
    bias = bias.reshape(N, N, num_heads).transpose(2, 0, 1)
    attn = attn + bias[None]

    if mask is not None:
        nW = mask.shape[0]
        attn = attn.reshape(B_ // nW, nW, num_heads, N, N) \
            + mask[None, :, None, :, :]
        attn = attn.reshape(-1, num_heads, N, N)
    attn = jax.nn.softmax(attn, axis=-1)

    out = jnp.einsum("bhnm,bhmd->bhnd", attn, v)
    out = out.transpose(0, 2, 1, 3).reshape(B_, N, C)
    out = out @ params["proj_w"] + params["proj_b"]
    return out


# ------------------------------- main ----------------------------------------
if __name__ == "__main__":
    dim = 32
    window_size = (8, 8)
    num_heads = 4
    N = window_size[0] * window_size[1]          # 64
    batch = 2
    nW = 4
    B_ = batch * nW                              # 8

    key = jax.random.PRNGKey(0)
    k_x, k_qw, k_qb, k_pw, k_pb, k_tab, k_mask = jax.random.split(key, 7)

    params = {
        "qkv_w": (jax.random.normal(k_qw, (dim, 3 * dim), jnp.float32)
                  * (1.0 / np.sqrt(dim))),
        "qkv_b": jax.random.normal(k_qb, (3 * dim,), jnp.float32) * 0.02,
        "proj_w": (jax.random.normal(k_pw, (dim, dim), jnp.float32)
                   * (1.0 / np.sqrt(dim))),
        "proj_b": jax.random.normal(k_pb, (dim,), jnp.float32) * 0.02,
        "rel_pos_bias_table": 0.02 * jax.random.truncated_normal(
            k_tab, -2.0, 2.0,
            ((2 * window_size[0] - 1) * (2 * window_size[1] - 1), num_heads),
            jnp.float32),
    }

    x = jax.random.normal(k_x, (B_, N, dim), jnp.float32)

    # shifted-window style mask: 0 / -100 pattern
    mask_bits = jax.random.bernoulli(k_mask, 0.2, (nW, N, N))
    mask = jnp.where(mask_bits, -100.0, 0.0).astype(jnp.float32)

    # --- f32, mask=None path (no-mask kernel variant) -----------------------
    out_nomask = jax.block_until_ready(
        window_attention(x, params, window_size, num_heads, mask=None))
    ref_nomask = window_attention_ref(x, params, window_size, num_heads, None)
    np.testing.assert_allclose(np.asarray(out_nomask), np.asarray(ref_nomask),
                               rtol=2e-2, atol=2e-2)

    # --- f32, masked path ----------------------------------------------------
    out_mask = jax.block_until_ready(
        window_attention(x, params, window_size, num_heads, mask=mask))
    ref_mask = window_attention_ref(x, params, window_size, num_heads, mask)
    np.testing.assert_allclose(np.asarray(out_mask), np.asarray(ref_mask),
                               rtol=2e-2, atol=2e-2)

    # --- bf16 compute path (MXU-native), loose tolerance ---------------------
    x_bf = x.astype(jnp.bfloat16)
    params_rt = dict(params)
    params_rt["qkv_w"] = params["qkv_w"].astype(jnp.bfloat16).astype(jnp.float32)
    params_rt["proj_w"] = params["proj_w"].astype(jnp.bfloat16).astype(jnp.float32)
    out_bf = jax.block_until_ready(
        window_attention(x_bf, params, window_size, num_heads, mask=mask))
    ref_bf = window_attention_ref(x_bf.astype(jnp.float32), params_rt,
                                  window_size, num_heads, mask)
    np.testing.assert_allclose(np.asarray(out_bf, dtype=np.float32),
                               np.asarray(ref_bf),
                               rtol=1e-1, atol=1e-1)

    # TODO(synk): attn_drop / proj_drop are prob=0.0 in this module config -> no-op.
    print("KERNEL_OK")
</pallas_src>

<mosaic_0001>
module attributes {stable_mosaic.version = 11 : i64} {
  func.func @_window_attn_block_kernel(%arg0: i32, %arg1: memref<4x64x32xf32, #tpu.memory_space<vmem>>, %arg2: memref<32x96xf32, #tpu.memory_space<vmem>>, %arg3: memref<1x96xf32, #tpu.memory_space<vmem>>, %arg4: memref<4x64x64xf32, #tpu.memory_space<vmem>>, %arg5: memref<32x32xf32, #tpu.memory_space<vmem>>, %arg6: memref<1x32xf32, #tpu.memory_space<vmem>>, %arg7: memref<4x64x32xf32, #tpu.memory_space<vmem>>, %arg8: memref<256x32xf32, #tpu.memory_space<vmem>>) attributes {dimension_semantics = [#tpu.dimension_semantics<parallel>], iteration_bounds = array<i64: 2>, scalar_prefetch = 0 : i64, scratch_operands = 1 : i64, tpu.core_type = #tpu.core_type<tc>, window_params = [{transform_indices = @transform_0, window_bounds = array<i64: 4, 64, 32>}, {pipeline_mode = #tpu.pipeline_mode<synchronous>, transform_indices = @transform_1, window_bounds = array<i64: 32, 96>}, {pipeline_mode = #tpu.pipeline_mode<synchronous>, transform_indices = @transform_2, window_bounds = array<i64: 1, 96>}, {pipeline_mode = #tpu.pipeline_mode<synchronous>, transform_indices = @transform_3, window_bounds = array<i64: 4, 64, 64>}, {pipeline_mode = #tpu.pipeline_mode<synchronous>, transform_indices = @transform_4, window_bounds = array<i64: 32, 32>}, {pipeline_mode = #tpu.pipeline_mode<synchronous>, transform_indices = @transform_5, window_bounds = array<i64: 1, 32>}, {transform_indices = @transform_6, window_bounds = array<i64: 4, 64, 32>}]} {
    %c0 = arith.constant 0 : index
    %c0_0 = arith.constant 0 : index
    %c0_1 = arith.constant 0 : index
    %0 = vector.load %arg1[%c0, %c0_0, %c0_1] : memref<4x64x32xf32, #tpu.memory_space<vmem>>, vector<4x64x32xf32>
    %1 = vector.shape_cast %0 : vector<4x64x32xf32> to vector<256x32xf32>
    %c0_2 = arith.constant 0 : index
    %c0_3 = arith.constant 0 : index
    %2 = vector.load %arg2[%c0_2, %c0_3] : memref<32x96xf32, #tpu.memory_space<vmem>>, vector<32x96xf32>
    %cst = arith.constant dense<0.000000e+00> : vector<256x96xf32>
    %3 = tpu.matmul %1, %2, %cst {dimension_numbers = #tpu.dot_dimension_numbers<[1], [0], [0], [1], [0, 0, 1, 1], [], []>} : vector<256x32xf32>, vector<32x96xf32>, vector<256x96xf32> -> vector<256x96xf32>
    %c0_4 = arith.constant 0 : index
    %c0_5 = arith.constant 0 : index
    %4 = vector.load %arg3[%c0_4, %c0_5] : memref<1x96xf32, #tpu.memory_space<vmem>>, vector<1x96xf32>
    %5 = vector.broadcast %4 : vector<1x96xf32> to vector<256x96xf32>
    %6 = arith.addf %3, %5 : vector<256x96xf32>
    %7 = vector.extract_strided_slice %6 {offsets = [0, 0], sizes = [256, 8], strides = [1, 1]} : vector<256x96xf32> to vector<256x8xf32>
    %cst_6 = arith.constant 0.353553385 : f32
    %8 = vector.broadcast %cst_6 : f32 to vector<256x8xf32>
    %9 = arith.mulf %7, %8 : vector<256x8xf32>
    %10 = vector.shape_cast %9 : vector<256x8xf32> to vector<4x64x8xf32>
    %11 = vector.extract_strided_slice %6 {offsets = [0, 32], sizes = [256, 8], strides = [1, 1]} : vector<256x96xf32> to vector<256x8xf32>
    %12 = vector.shape_cast %11 : vector<256x8xf32> to vector<4x64x8xf32>
    %13 = vector.extract_strided_slice %6 {offsets = [0, 64], sizes = [256, 8], strides = [1, 1]} : vector<256x96xf32> to vector<256x8xf32>
    %14 = vector.shape_cast %13 : vector<256x8xf32> to vector<4x64x8xf32>
    "tpu.trace_start"() <{level = 10 : i32, message = "bnd,bmd->bnm"}> : () -> ()
    %cst_7 = arith.constant dense<0.000000e+00> : vector<4x64x64xf32>
    %15 = tpu.matmul %10, %12, %cst_7 {dimension_numbers = #tpu.dot_dimension_numbers<[2], [2], [1], [1], [0, 0, 0, 1, 1, 1], [0], [0]>} : vector<4x64x8xf32>, vector<4x64x8xf32>, vector<4x64x64xf32> -> vector<4x64x64xf32>
    "tpu.trace_stop"() : () -> ()
    %c0_8 = arith.constant 0 : index
    %c0_9 = arith.constant 0 : index
    %c0_10 = arith.constant 0 : index
    %16 = vector.load %arg4[%c0_8, %c0_9, %c0_10] : memref<4x64x64xf32, #tpu.memory_space<vmem>>, vector<1x64x64xf32>
    %17 = vector.shape_cast %16 : vector<1x64x64xf32> to vector<64x64xf32>
    %18 = vector.shape_cast %17 : vector<64x64xf32> to vector<1x64x64xf32>
    %19 = vector.broadcast %18 : vector<1x64x64xf32> to vector<4x64x64xf32>
    %20 = arith.addf %15, %19 : vector<4x64x64xf32>
    %cst_11 = arith.constant dense<0xFF800000> : vector<4x64xf32>
    %21 = vector.multi_reduction <maximumf>, %20, %cst_11 [2] : vector<4x64x64xf32> to vector<4x64xf32>
    %22 = vector.shape_cast %21 : vector<4x64xf32> to vector<4x64x1xf32>
    %23 = vector.broadcast %22 : vector<4x64x1xf32> to vector<4x64x64xf32>
    %24 = arith.subf %20, %23 : vector<4x64x64xf32>
    %25 = math.exp %24 : vector<4x64x64xf32>
    %cst_12 = arith.constant dense<0.000000e+00> : vector<4x64xf32>
    %26 = vector.multi_reduction <add>, %25, %cst_12 [2] : vector<4x64x64xf32> to vector<4x64xf32>
    %27 = vector.shape_cast %26 : vector<4x64xf32> to vector<4x64x1xf32>
    %28 = vector.broadcast %27 : vector<4x64x1xf32> to vector<4x64x64xf32>
    %29 = arith.divf %25, %28 : vector<4x64x64xf32>
    "tpu.trace_start"() <{level = 10 : i32, message = "bnm,bmd->bnd"}> : () -> ()
    %cst_13 = arith.constant dense<0.000000e+00> : vector<4x64x8xf32>
    %30 = tpu.matmul %29, %14, %cst_13 {dimension_numbers = #tpu.dot_dimension_numbers<[2], [1], [1], [2], [0, 0, 0, 1, 1, 2], [0], [0]>} : vector<4x64x64xf32>, vector<4x64x8xf32>, vector<4x64x8xf32> -> vector<4x64x8xf32>
    "tpu.trace_stop"() : () -> ()
    %31 = vector.shape_cast %30 : vector<4x64x8xf32> to vector<256x8xf32>
    %c0_14 = arith.constant 0 : index
    %c0_15 = arith.constant 0 : index
    %32 = vector.load %arg8[%c0_14, %c0_15] : memref<256x32xf32, #tpu.memory_space<vmem>>, vector<256x8xf32>
    tpu.vector_store %arg8[%c0_14, %c0_15], %31 {strides = array<i32>} : memref<256x32xf32, #tpu.memory_space<vmem>>, vector<256x8xf32>,
    %33 = vector.extract_strided_slice %6 {offsets = [0, 8], sizes = [256, 8], strides = [1, 1]} : vector<256x96xf32> to vector<256x8xf32>
    %cst_16 = arith.constant 0.353553385 : f32
    %34 = vector.broadcast %cst_16 : f32 to vector<256x8xf32>
    %35 = arith.mulf %33, %34 : vector<256x8xf32>
    %36 = vector.shape_cast %35 : vector<256x8xf32> to vector<4x64x8xf32>
    %37 = vector.extract_strided_slice %6 {offsets = [0, 40], sizes = [256, 8], strides = [1, 1]} : vector<256x96xf32> to vector<256x8xf32>
    %38 = vector.shape_cast %37 : vector<256x8xf32> to vector<4x64x8xf32>
    %39 = vector.extract_strided_slice %6 {offsets = [0, 72], sizes = [256, 8], strides = [1, 1]} : vector<256x96xf32> to vector<256x8xf32>
    %40 = vector.shape_cast %39 : vector<256x8xf32> to vector<4x64x8xf32>
    "tpu.trace_start"() <{level = 10 : i32, message = "bnd,bmd->bnm"}> : () -> ()
    %cst_17 = arith.constant dense<0.000000e+00> : vector<4x64x64xf32>
    %41 = tpu.matmul %36, %38, %cst_17 {dimension_numbers = #tpu.dot_dimension_numbers<[2], [2], [1], [1], [0, 0, 0, 1, 1, 1], [0], [0]>} : vector<4x64x8xf32>, vector<4x64x8xf32>, vector<4x64x64xf32> -> vector<4x64x64xf32>
    "tpu.trace_stop"() : () -> ()
    %c1 = arith.constant 1 : index
    %c0_18 = arith.constant 0 : index
    %c0_19 = arith.constant 0 : index
    %42 = vector.load %arg4[%c1, %c0_18, %c0_19] : memref<4x64x64xf32, #tpu.memory_space<vmem>>, vector<1x64x64xf32>
    %43 = vector.shape_cast %42 : vector<1x64x64xf32> to vector<64x64xf32>
    %44 = vector.shape_cast %43 : vector<64x64xf32> to vector<1x64x64xf32>
    %45 = vector.broadcast %44 : vector<1x64x64xf32> to vector<4x64x64xf32>
    %46 = arith.addf %41, %45 : vector<4x64x64xf32>
    %cst_20 = arith.constant dense<0xFF800000> : vector<4x64xf32>
    %47 = vector.multi_reduction <maximumf>, %46, %cst_20 [2] : vector<4x64x64xf32> to vector<4x64xf32>
    %48 = vector.shape_cast %47 : vector<4x64xf32> to vector<4x64x1xf32>
    %49 = vector.broadcast %48 : vector<4x64x1xf32> to vector<4x64x64xf32>
    %50 = arith.subf %46, %49 : vector<4x64x64xf32>
    %51 = math.exp %50 : vector<4x64x64xf32>
    %cst_21 = arith.constant dense<0.000000e+00> : vector<4x64xf32>
    %52 = vector.multi_reduction <add>, %51, %cst_21 [2] : vector<4x64x64xf32> to vector<4x64xf32>
    %53 = vector.shape_cast %52 : vector<4x64xf32> to vector<4x64x1xf32>
    %54 = vector.broadcast %53 : vector<4x64x1xf32> to vector<4x64x64xf32>
    %55 = arith.divf %51, %54 : vector<4x64x64xf32>
    "tpu.trace_start"() <{level = 10 : i32, message = "bnm,bmd->bnd"}> : () -> ()
    %cst_22 = arith.constant dense<0.000000e+00> : vector<4x64x8xf32>
    %56 = tpu.matmul %55, %40, %cst_22 {dimension_numbers = #tpu.dot_dimension_numbers<[2], [1], [1], [2], [0, 0, 0, 1, 1, 2], [0], [0]>} : vector<4x64x64xf32>, vector<4x64x8xf32>, vector<4x64x8xf32> -> vector<4x64x8xf32>
    "tpu.trace_stop"() : () -> ()
    %57 = vector.shape_cast %56 : vector<4x64x8xf32> to vector<256x8xf32>
    %c0_23 = arith.constant 0 : index
    %c8 = arith.constant 8 : index
    %58 = vector.load %arg8[%c0_23, %c8] : memref<256x32xf32, #tpu.memory_space<vmem>>, vector<256x8xf32>
    tpu.vector_store %arg8[%c0_23, %c8], %57 {strides = array<i32>} : memref<256x32xf32, #tpu.memory_space<vmem>>, vector<256x8xf32>,
    %59 = vector.extract_strided_slice %6 {offsets = [0, 16], sizes = [256, 8], strides = [1, 1]} : vector<256x96xf32> to vector<256x8xf32>
    %cst_24 = arith.constant 0.353553385 : f32
    %60 = vector.broadcast %cst_24 : f32 to vector<256x8xf32>
    %61 = arith.mulf %59, %60 : vector<256x8xf32>
    %62 = vector.shape_cast %61 : vector<256x8xf32> to vector<4x64x8xf32>
    %63 = vector.extract_strided_slice %6 {offsets = [0, 48], sizes = [256, 8], strides = [1, 1]} : vector<256x96xf32> to vector<256x8xf32>
    %64 = vector.shape_cast %63 : vector<256x8xf32> to vector<4x64x8xf32>
    %65 = vector.extract_strided_slice %6 {offsets = [0, 80], sizes = [256, 8], strides = [1, 1]} : vector<256x96xf32> to vector<256x8xf32>
    %66 = vector.shape_cast %65 : vector<256x8xf32> to vector<4x64x8xf32>
    "tpu.trace_start"() <{level = 10 : i32, message = "bnd,bmd->bnm"}> : () -> ()
    %cst_25 = arith.constant dense<0.000000e+00> : vector<4x64x64xf32>
    %67 = tpu.matmul %62, %64, %cst_25 {dimension_numbers = #tpu.dot_dimension_numbers<[2], [2], [1], [1], [0, 0, 0, 1, 1, 1], [0], [0]>} : vector<4x64x8xf32>, vector<4x64x8xf32>, vector<4x64x64xf32> -> vector<4x64x64xf32>
    "tpu.trace_stop"() : () -> ()
    %c2 = arith.constant 2 : index
    %c0_26 = arith.constant 0 : index
    %c0_27 = arith.constant 0 : index
    %68 = vector.load %arg4[%c2, %c0_26, %c0_27] : memref<4x64x64xf32, #tpu.memory_space<vmem>>, vector<1x64x64xf32>
    %69 = vector.shape_cast %68 : vector<1x64x64xf32> to vector<64x64xf32>
    %70 = vector.shape_cast %69 : vector<64x64xf32> to vector<1x64x64xf32>
    %71 = vector.broadcast %70 : vector<1x64x64xf32> to vector<4x64x64xf32>
    %72 = arith.addf %67, %71 : vector<4x64x64xf32>
    %cst_28 = arith.constant dense<0xFF800000> : vector<4x64xf32>
    %73 = vector.multi_reduction <maximumf>, %72, %cst_28 [2] : vector<4x64x64xf32> to vector<4x64xf32>
    %74 = vector.shape_cast %73 : vector<4x64xf32> to vector<4x64x1xf32>
    %75 = vector.broadcast %74 : vector<4x64x1xf32> to vector<4x64x64xf32>
    %76 = arith.subf %72, %75 : vector<4x64x64xf32>
    %77 = math.exp %76 : vector<4x64x64xf32>
    %cst_29 = arith.constant dense<0.000000e+00> : vector<4x64xf32>
    %78 = vector.multi_reduction <add>, %77, %cst_29 [2] : vector<4x64x64xf32> to vector<4x64xf32>
    %79 = vector.shape_cast %78 : vector<4x64xf32> to vector<4x64x1xf32>
    %80 = vector.broadcast %79 : vector<4x64x1xf32> to vector<4x64x64xf32>
    %81 = arith.divf %77, %80 : vector<4x64x64xf32>
    "tpu.trace_start"() <{level = 10 : i32, message = "bnm,bmd->bnd"}> : () -> ()
    %cst_30 = arith.constant dense<0.000000e+00> : vector<4x64x8xf32>
    %82 = tpu.matmul %81, %66, %cst_30 {dimension_numbers = #tpu.dot_dimension_numbers<[2], [1], [1], [2], [0, 0, 0, 1, 1, 2], [0], [0]>} : vector<4x64x64xf32>, vector<4x64x8xf32>, vector<4x64x8xf32> -> vector<4x64x8xf32>
    "tpu.trace_stop"() : () -> ()
    %83 = vector.shape_cast %82 : vector<4x64x8xf32> to vector<256x8xf32>
    %c0_31 = arith.constant 0 : index
    %c16 = arith.constant 16 : index
    %84 = vector.load %arg8[%c0_31, %c16] : memref<256x32xf32, #tpu.memory_space<vmem>>, vector<256x8xf32>
    tpu.vector_store %arg8[%c0_31, %c16], %83 {strides = array<i32>} : memref<256x32xf32, #tpu.memory_space<vmem>>, vector<256x8xf32>,
    %85 = vector.extract_strided_slice %6 {offsets = [0, 24], sizes = [256, 8], strides = [1, 1]} : vector<256x96xf32> to vector<256x8xf32>
    %cst_32 = arith.constant 0.353553385 : f32
    %86 = vector.broadcast %cst_32 : f32 to vector<256x8xf32>
    %87 = arith.mulf %85, %86 : vector<256x8xf32>
    %88 = vector.shape_cast %87 : vector<256x8xf32> to vector<4x64x8xf32>
    %89 = vector.extract_strided_slice %6 {offsets = [0, 56], sizes = [256, 8], strides = [1, 1]} : vector<256x96xf32> to vector<256x8xf32>
    %90 = vector.shape_cast %89 : vector<256x8xf32> to vector<4x64x8xf32>
    %91 = vector.extract_strided_slice %6 {offsets = [0, 88], sizes = [256, 8], strides = [1, 1]} : vector<256x96xf32> to vector<256x8xf32>
    %92 = vector.shape_cast %91 : vector<256x8xf32> to vector<4x64x8xf32>
    "tpu.trace_start"() <{level = 10 : i32, message = "bnd,bmd->bnm"}> : () -> ()
    %cst_33 = arith.constant dense<0.000000e+00> : vector<4x64x64xf32>
    %93 = tpu.matmul %88, %90, %cst_33 {dimension_numbers = #tpu.dot_dimension_numbers<[2], [2], [1], [1], [0, 0, 0, 1, 1, 1], [0], [0]>} : vector<4x64x8xf32>, vector<4x64x8xf32>, vector<4x64x64xf32> -> vector<4x64x64xf32>
    "tpu.trace_stop"() : () -> ()
    %c3 = arith.constant 3 : index
    %c0_34 = arith.constant 0 : index
    %c0_35 = arith.constant 0 : index
    %94 = vector.load %arg4[%c3, %c0_34, %c0_35] : memref<4x64x64xf32, #tpu.memory_space<vmem>>, vector<1x64x64xf32>
    %95 = vector.shape_cast %94 : vector<1x64x64xf32> to vector<64x64xf32>
    %96 = vector.shape_cast %95 : vector<64x64xf32> to vector<1x64x64xf32>
    %97 = vector.broadcast %96 : vector<1x64x64xf32> to vector<4x64x64xf32>
    %98 = arith.addf %93, %97 : vector<4x64x64xf32>
    %cst_36 = arith.constant dense<0xFF800000> : vector<4x64xf32>
    %99 = vector.multi_reduction <maximumf>, %98, %cst_36 [2] : vector<4x64x64xf32> to vector<4x64xf32>
    %100 = vector.shape_cast %99 : vector<4x64xf32> to vector<4x64x1xf32>
    %101 = vector.broadcast %100 : vector<4x64x1xf32> to vector<4x64x64xf32>
    %102 = arith.subf %98, %101 : vector<4x64x64xf32>
    %103 = math.exp %102 : vector<4x64x64xf32>
    %cst_37 = arith.constant dense<0.000000e+00> : vector<4x64xf32>
    %104 = vector.multi_reduction <add>, %103, %cst_37 [2] : vector<4x64x64xf32> to vector<4x64xf32>
    %105 = vector.shape_cast %104 : vector<4x64xf32> to vector<4x64x1xf32>
    %106 = vector.broadcast %105 : vector<4x64x1xf32> to vector<4x64x64xf32>
    %107 = arith.divf %103, %106 : vector<4x64x64xf32>
    "tpu.trace_start"() <{level = 10 : i32, message = "bnm,bmd->bnd"}> : () -> ()
    %cst_38 = arith.constant dense<0.000000e+00> : vector<4x64x8xf32>
    %108 = tpu.matmul %107, %92, %cst_38 {dimension_numbers = #tpu.dot_dimension_numbers<[2], [1], [1], [2], [0, 0, 0, 1, 1, 2], [0], [0]>} : vector<4x64x64xf32>, vector<4x64x8xf32>, vector<4x64x8xf32> -> vector<4x64x8xf32>
    "tpu.trace_stop"() : () -> ()
    %109 = vector.shape_cast %108 : vector<4x64x8xf32> to vector<256x8xf32>
    %c0_39 = arith.constant 0 : index
    %c24 = arith.constant 24 : index
    %110 = vector.load %arg8[%c0_39, %c24] : memref<256x32xf32, #tpu.memory_space<vmem>>, vector<256x8xf32>
    tpu.vector_store %arg8[%c0_39, %c24], %109 {strides = array<i32>} : memref<256x32xf32, #tpu.memory_space<vmem>>, vector<256x8xf32>,
    %c0_40 = arith.constant 0 : index
    %c0_41 = arith.constant 0 : index
    %111 = vector.load %arg8[%c0_40, %c0_41] : memref<256x32xf32, #tpu.memory_space<vmem>>, vector<256x32xf32>
    %c0_42 = arith.constant 0 : index
    %c0_43 = arith.constant 0 : index
    %112 = vector.load %arg5[%c0_42, %c0_43] : memref<32x32xf32, #tpu.memory_space<vmem>>, vector<32x32xf32>
    %cst_44 = arith.constant dense<0.000000e+00> : vector<256x32xf32>
    %113 = tpu.matmul %111, %112, %cst_44 {dimension_numbers = #tpu.dot_dimension_numbers<[1], [0], [0], [1], [0, 0, 1, 1], [], []>} : vector<256x32xf32>, vector<32x32xf32>, vector<256x32xf32> -> vector<256x32xf32>
    %c0_45 = arith.constant 0 : index
    %c0_46 = arith.constant 0 : index
    %114 = vector.load %arg6[%c0_45, %c0_46] : memref<1x32xf32, #tpu.memory_space<vmem>>, vector<1x32xf32>
    %115 = vector.broadcast %114 : vector<1x32xf32> to vector<256x32xf32>
    %116 = arith.addf %113, %115 : vector<256x32xf32>
    %117 = vector.shape_cast %116 : vector<256x32xf32> to vector<4x64x32xf32>
    %c0_47 = arith.constant 0 : index
    %c0_48 = arith.constant 0 : index
    %c0_49 = arith.constant 0 : index
    %118 = vector.load %arg7[%c0_47, %c0_48, %c0_49] : memref<4x64x32xf32, #tpu.memory_space<vmem>>, vector<4x64x32xf32>
    tpu.vector_store %arg7[%c0_47, %c0_48, %c0_49], %117 {strides = array<i32>} : memref<4x64x32xf32, #tpu.memory_space<vmem>>, vector<4x64x32xf32>,
    return
  }
  func.func @transform_0(%arg0: i32) -> (i32, i32, i32) {
    %c0_i32 = arith.constant 0 : i32
    %c0_i32_0 = arith.constant 0 : i32
    %c0_i32_1 = arith.constant 0 : i32
    return %arg0, %c0_i32, %c0_i32_0 : i32, i32, i32
  }
  func.func @transform_1(%arg0: i32) -> (i32, i32) {
    %c0_i32 = arith.constant 0 : i32
    %c0_i32_0 = arith.constant 0 : i32
    %c0_i32_1 = arith.constant 0 : i32
    return %c0_i32, %c0_i32_0 : i32, i32
  }
  func.func @transform_2(%arg0: i32) -> (i32, i32) {
    %c0_i32 = arith.constant 0 : i32
    %c0_i32_0 = arith.constant 0 : i32
    %c0_i32_1 = arith.constant 0 : i32
    return %c0_i32, %c0_i32_0 : i32, i32
  }
  func.func @transform_3(%arg0: i32) -> (i32, i32, i32) {
    %c0_i32 = arith.constant 0 : i32
    %c0_i32_0 = arith.constant 0 : i32
    %c0_i32_1 = arith.constant 0 : i32
    %c0_i32_2 = arith.constant 0 : i32
    return %c0_i32, %c0_i32_0, %c0_i32_1 : i32, i32, i32
  }
  func.func @transform_4(%arg0: i32) -> (i32, i32) {
    %c0_i32 = arith.constant 0 : i32
    %c0_i32_0 = arith.constant 0 : i32
    %c0_i32_1 = arith.constant 0 : i32
    return %c0_i32, %c0_i32_0 : i32, i32
  }
  func.func @transform_5(%arg0: i32) -> (i32, i32) {
    %c0_i32 = arith.constant 0 : i32
    %c0_i32_0 = arith.constant 0 : i32
    %c0_i32_1 = arith.constant 0 : i32
    return %c0_i32, %c0_i32_0 : i32, i32
  }
  func.func @transform_6(%arg0: i32) -> (i32, i32, i32) {
    %c0_i32 = arith.constant 0 : i32
    %c0_i32_0 = arith.constant 0 : i32
    %c0_i32_1 = arith.constant 0 : i32
    return %arg0, %c0_i32, %c0_i32_0 : i32, i32, i32
  }
}

</mosaic_0001>

<bundles_post_ra>
// kernel: tpu_custom_call.1
= control target key start
LH: loop header
LB: loop body
LE: loop exit
PB: predicated region body
PF: predicated region fallthrough
CT: control target
= control target key end

     0   :  { %s12195_s21 = smov 0   ;;  %s15959_s0 = inlined_call_operand.vmem [shape: f32[8,64,32], index: 0, kind: input, shape index: {}]   ;;  %s15960_s1 = inlined_call_operand.vmem [shape: f32[32,96], index: 1, kind: input, shape index: {}]   ;;  %s15961_s2 = inlined_call_operand.vmem [shape: f32[1,96], index: 2, kind: input, shape index: {}]   ;;  %s15962_s3 = inlined_call_operand.vmem [shape: f32[4,64,64], index: 3, kind: input, shape index: {}]   ;;  %s15963_s4 = inlined_call_operand.vmem [shape: f32[32,32], index: 4, kind: input, shape index: {}]   ;;  %s15964_s5 = inlined_call_operand.vmem [shape: f32[1,32], index: 5, kind: input, shape index: {}]   ;;  %s15965_s6 = inlined_call_operand.vmem [shape: f32[8,64,32], index: 6, kind: output, shape index: {}]  }
   0x1 LB: > { %s8223_s22 = sadd.s32 4294967295, %s12144_s21   ;;  %p8227_p0 = scmp.ge.s32.totalorder %s12144_s21, 1  ;;  %s12144_s21 = sphi %s12195_s21, %s16_s21  }
   0x2   : > { %p214_p1 = scmp.lt.s32.totalorder %s12144_s21, 3 }
   0x4   : > { %p215_p2 = pnand %p8227_p0, %p214_p1 }
   0x6   : > { %218 = sbr.rel (%p215_p2) target bundleno = 3627 (0xe2b), region = 44 }
   0xd   : > { %v292_v0 = vld [vmem:[%s15960_s1] sm:$0xff]  ;;  %v293_v1 = vld [vmem:[%s15960_s1 + $0x8] sm:$0xff]  ;;  %v294_v2 = vld [vmem:[%s15960_s1 + $0x10] sm:$0xff]  ;;  %s8228_s29 = sshll.u32 %s8223_s22, 2  ;;  %vm303_vm0 = vcmask 261120   ;;  %vm689_vm1 = vcmask 64512  }
   0xe   : > { %v10304_v3 = vpack.c.bf16 %v293_v1, %v292_v0  ;;  %v295_v4 = vld [vmem:[%s15960_s1 + $0x18] sm:$0xff]  ;;  %p247_p3 = scmp.lt.s32.totalorder %s8228_s29, 7  ;;  %v12292_v38 = vld [vmem:[%s15961_s2] ss:$0 sm:$0xff]  ;;  %s12146_s14 = smov 96   ;;  %vm12548_vm2 = vmpackc.low %vm689_vm1, %vm689_vm1  ;;  %vm1342_vm3 = vcmask 523264  }
   0xf   : > { %v10308_v5 = vpack.c.bf16 %v295_v4, %v294_v2  ;;  %s12147_s15 = smov 64   ;;  %s12148_s16 = smov 88   ;;  %vm4116_vm4 = vcmask 130112   ;;  %vm5926_vm5 = vcmask 195712   ;;  %vm7736_vm6 = vcmask 261312  }
  0x10   : > { %10305 = vmatprep.subr.bf16.mxu0 %v10304_v3  ;;  %s16469_s29 = smov (!%p247_p3, %s8228_s29), 7  ;;  %s12149_s17 = smov 120  }
  0x11   : > { %10307 = vmatpush3.bf16.msra.mxu0 %v10304_v3  ;;  %s8710_s8 = sshll.u32 %s16469_s29, 6  ;;  %s12150_s13 = smov 56  }
  0x12   : > { %10309 = vmatprep.subr.bf16.mxu0 %v10308_v5  ;;  %s12223_s11 = scalar_lea.vmem %s15959_s0, %s8710_s8  ;;  %s12154_s12 = smov 72  }
  0x13   : > { %v260_v6 = vld [vmem:[%s12223_s11] sm:$0xff]  ;;  %v261_v7 = vld [vmem:[%s12223_s11 + $0x8] sm:$0xff]  ;;  %v262_v8 = vld [vmem:[%s12223_s11 + $0x10] sm:$0xff]  ;;  %s12155_s7 = smov 104   ;;  %s12156_s9 = smov 40  }
  0x14   : > { %9304 = vmatprep.mubr.msk.f32.mxu0 %vm303_vm0, %v260_v6  ;;  %v263_v9 = vld [vmem:[%s12223_s11 + $0x18] sm:$0xff]  ;;  %v264_v10 = vld [vmem:[%s12223_s11 + $0x20] sm:$0xff]  ;;  %v265_v11 = vld [vmem:[%s12223_s11 + $0x28] sm:$0xff]  ;;  %s12157_s27 = smov 8   ;;  %s12158_s28 = smov 16  }
  0x15   : > { %10311 = vmatpush3.bf16.msra.mxu0 %v10308_v5  ;;  %v266_v12 = vld [vmem:[%s12223_s11 + $0x30] sm:$0xff]  ;;  %v267_v13 = vld [vmem:[%s12223_s11 + $0x38] sm:$0xff]  ;;  %v268_v14 = vld [vmem:[%s12223_s11 + $0x40] sm:$0xff]  ;;  %s15858_s20 = scalar_lea.vmem %s15965_s6, %s8710_s8 }
  0x16   : > { %v269_v15 = vld [vmem:[%s12223_s11 + $0x48] sm:$0xff]  ;;  %v270_v16 = vld [vmem:[%s12223_s11 + $0x50] sm:$0xff]  ;;  %v271_v17 = vld [vmem:[%s12223_s11 + $0x58] sm:$0xff] }
  0x17   : > { %v272_v18 = vld [vmem:[%s12223_s11 + $0x60] sm:$0xff]  ;;  %v273_v19 = vld [vmem:[%s12223_s11 + $0x68] sm:$0xff]  ;;  %v274_v20 = vld [vmem:[%s12223_s11 + $0x70] sm:$0xff] }
  0x18   : > { %9305 = vmatmul.mubr.msk.f32.vlgmr.msra.gmra.mrb[0].mxu0 %vm303_vm0, %v261_v7  ;;  %v275_v21 = vld [vmem:[%s12223_s11 + $0x78] sm:$0xff]  ;;  %v276_v22 = vld [vmem:[%s12223_s11 + $0x80] sm:$0xff]  ;;  %v277_v23 = vld [vmem:[%s12223_s11 + $0x88] sm:$0xff] }
  0x19   : > { %9307 = vmatprep.mubr.msk.f32.mxu0 %vm303_vm0, %v262_v8  ;;  %v278_v24 = vld [vmem:[%s12223_s11 + $0x90] sm:$0xff]  ;;  %v279_v25 = vld [vmem:[%s12223_s11 + $0x98] sm:$0xff]  ;;  %v280_v26 = vld [vmem:[%s12223_s11 + $0xa0] sm:$0xff] }
  0x1a   : > { %v281_v27 = vld [vmem:[%s12223_s11 + $0xa8] sm:$0xff]  ;;  %v282_v28 = vld [vmem:[%s12223_s11 + $0xb0] sm:$0xff]  ;;  %v283_v29 = vld [vmem:[%s12223_s11 + $0xb8] sm:$0xff] }
  0x1b   : > { %v284_v30 = vld [vmem:[%s12223_s11 + $0xc0] sm:$0xff]  ;;  %v285_v31 = vld [vmem:[%s12223_s11 + $0xc8] sm:$0xff]  ;;  %v286_v32 = vld [vmem:[%s12223_s11 + $0xd0] sm:$0xff] }
  0x1c   : > { %9308 = vmatmul.mubr.msk.f32.gmra.mrb[2].mxu0 %vm303_vm0, %v263_v9  ;;  %v287_v33 = vld [vmem:[%s12223_s11 + $0xd8] sm:$0xff]  ;;  %v288_v34 = vld [vmem:[%s12223_s11 + $0xe0] sm:$0xff]  ;;  %v289_v35 = vld [vmem:[%s12223_s11 + $0xe8] sm:$0xff] }
  0x1d   : > { %9310 = vmatprep.mubr.msk.f32.mxu0 %vm303_vm0, %v264_v10  ;;  %v290_v36 = vld [vmem:[%s12223_s11 + $0xf0] sm:$0xff]  ;;  %v291_v37 = vld [vmem:[%s12223_s11 + $0xf8] sm:$0xff]  ;;  %s12153_s11 = smov 48  }
  0x20   : > { %9311 = vmatmul.mubr.msk.f32.gmra.mrb[4].mxu0 %vm303_vm0, %v265_v11 }
  0x21   : > { %9313 = vmatprep.mubr.msk.f32.mxu0 %vm303_vm0, %v266_v12 }
  0x24   : > { %9314 = vmatmul.mubr.msk.f32.gmra.mrb[6].mxu0 %vm303_vm0, %v267_v13 }
  0x25   : > { %9316 = vmatprep.mubr.msk.f32.mxu0 %vm303_vm0, %v268_v14 }
  0x28   : > { %9317 = vmatmul.mubr.msk.f32.gmra.mrb[8].mxu0 %vm303_vm0, %v269_v15 }
  0x29   : > { %9319 = vmatprep.mubr.msk.f32.mxu0 %vm303_vm0, %v270_v16 }
  0x2c   : > { %9320 = vmatmul.mubr.msk.f32.gmra.mrb[10].mxu0 %vm303_vm0, %v271_v17 }
  0x2d   : > { %9322 = vmatprep.mubr.msk.f32.mxu0 %vm303_vm0, %v272_v18 }
  0x30   : > { %9323 = vmatmul.mubr.msk.f32.gmra.mrb[12].mxu0 %vm303_vm0, %v273_v19 }
  0x31   : > { %9325 = vmatprep.mubr.msk.f32.mxu0 %vm303_vm0, %v274_v20 }
  0x34   : > { %9326 = vmatmul.mubr.msk.f32.gmra.mrb[14].mxu0 %vm303_vm0, %v275_v21 }
  0x35   : > { %9328 = vmatprep.mubr.msk.f32.mxu0 %vm303_vm0, %v276_v22 }
  0x38   : > { %9329 = vmatmul.mubr.msk.f32.gmra.mrb[16].mxu0 %vm303_vm0, %v277_v23 }
  0x39   : > { %9331 = vmatprep.mubr.msk.f32.mxu0 %vm303_vm0, %v278_v24 }
  0x3c   : > { %9332 = vmatmul.mubr.msk.f32.gmra.mrb[18].mxu0 %vm303_vm0, %v279_v25 }
  0x3d   : > { %9334 = vmatprep.mubr.msk.f32.mxu0 %vm303_vm0, %v280_v26 }
  0x40   : > { %9335 = vmatmul.mubr.msk.f32.gmra.mrb[20].mxu0 %vm303_vm0, %v281_v27 }
  0x41   : > { %9337 = vmatprep.mubr.msk.f32.mxu0 %vm303_vm0, %v282_v28 }
  0x44   : > { %9338 = vmatmul.mubr.msk.f32.gmra.mrb[22].mxu0 %vm303_vm0, %v283_v29 }
  0x45   : > { %9340 = vmatprep.mubr.msk.f32.mxu0 %vm303_vm0, %v284_v30 }
  0x48   : > { %9341 = vmatmul.mubr.msk.f32.gmra.mrb[24].mxu0 %vm303_vm0, %v285_v31 }
  0x49   : > { %9343 = vmatprep.mubr.msk.f32.mxu0 %vm303_vm0, %v286_v32 }
  0x4c   : > { %9344 = vmatmul.mubr.msk.f32.gmra.mrb[26].mxu0 %vm303_vm0, %v287_v33 }
  0x4d   : > { %9346 = vmatprep.mubr.msk.f32.mxu0 %vm303_vm0, %v288_v34 }
  0x50   : > { %9347 = vmatmul.mubr.msk.f32.gmra.mrb[28].mxu0 %vm303_vm0, %v289_v35 }
  0x51   : > { %9349 = vmatprep.mubr.msk.f32.mxu0 %vm303_vm0, %v290_v36 }
  0x54   : > { %9350 = vmatmul.mubr.msk.f32.gmra.mrb[30].mxu0 %vm303_vm0, %v291_v37 }
  0xeb   : > { %v9306_v39 = vpop.f32.mrb[0].mxu0 }
  0xec   : > { %v12295_v40 = vadd.f32 %v9306_v39, %v12292_v38  ;;  %v466_v41 = vpop.f32.mrb[1].mxu0 }
  0xed   : > { %v467_v42 = vadd.f32 %v12292_v38, %v466_v41 }
  0xef   : > { %v9309_v43 = vpop.f32.mrb[2].mxu0  ;;  %v12299_v44 = vpack.i.bf16 %v12295_v40, %v467_v42  ;;  %v12301_v45 = vmul.f32 0.35355338, %v467_v42 }
  0xf0   : > { %v12304_v46 = vadd.f32 %v9309_v43, %v12292_v38  ;;  %v476_v47 = vpop.f32.mrb[3].mxu0 }
  0xf1   : > { %16111 = vst [vmem:[#allocation3_spill] sm:$0xff] %v12299_v44  ;;  %16112 = vst [vmem:[#allocation4_spill] sm:$0xff] %v12301_v45  ;;  %v12307_v48 = vadd.f32 %v12292_v38, %v476_v47  ;;  %10987 = vrot.lane.b32.xlu0 %v12299_v44, %s12146_s14  ;;  %9368 = vmatprep.mubr.msk.f32.mxu1 %vm689_vm1, %v12301_v45 }
  0xf3   : > { %v9312_v49 = vpop.f32.mrb[4].mxu0  ;;  %v12315_v50 = vpack.i.bf16 %v12304_v46, %v12307_v48 }
  0xf4   : > { %v12318_v51 = vadd.f32 %v9312_v49, %v12292_v38  ;;  %v486_v52 = vpop.f32.mrb[5].mxu0 }
  0xf5   : > { %16113 = vst [vmem:[#allocation5_spill] sm:$0xff] %v12315_v50  ;;  %v12321_v53 = vadd.f32 %v12292_v38, %v486_v52  ;;  %10992 = vrot.lane.b32.xlu0 %v12315_v50, %s12146_s14 }
  0xf7   : > { %v9315_v54 = vpop.f32.mrb[6].mxu0  ;;  %v12327_v55 = vpack.i.bf16 %v12318_v51, %v12321_v53 }
  0xf8   : > { %v12330_v56 = vadd.f32 %v9315_v54, %v12292_v38  ;;  %v496_v57 = vpop.f32.mrb[7].mxu0 }
  0xf9   : > { %16114 = vst [vmem:[#allocation6_spill] sm:$0xff] %v12327_v55  ;;  %v12333_v58 = vadd.f32 %v12292_v38, %v496_v57  ;;  %10997 = vrot.lane.b32.xlu1 %v12327_v55, %s12146_s14 }
  0xfb   : > { %v9318_v59 = vpop.f32.mrb[8].mxu0  ;;  %v12339_v60 = vpack.i.bf16 %v12330_v56, %v12333_v58 }
  0xfc   : > { %v12342_v61 = vadd.f32 %v9318_v59, %v12292_v38  ;;  %v506_v62 = vpop.f32.mrb[9].mxu0 }
  0xfd   : > { %16115 = vst [vmem:[#allocation7_spill] sm:$0xff] %v12339_v60  ;;  %v12345_v63 = vadd.f32 %v12292_v38, %v506_v62  ;;  %11002 = vrot.lane.b32.xlu1 %v12339_v60, %s12146_s14 }
  0xff   : > { %v9321_v0 = vpop.f32.mrb[10].mxu0  ;;  %v12351_v1 = vpack.i.bf16 %v12342_v61, %v12345_v63 }
 0x100   : > { %v12354_v2 = vadd.f32 %v9321_v0, %v12292_v38  ;;  %v516_v3 = vpop.f32.mrb[11].mxu0 }
 0x101   : > { %16116 = vst [vmem:[#allocation8_spill] sm:$0xff] %v12351_v1  ;;  %v12357_v4 = vadd.f32 %v12292_v38, %v516_v3  ;;  %11007 = vrot.lane.b32.xlu0 %v12351_v1, %s12146_s14 }
 0x103   : > { %v9324_v5 = vpop.f32.mrb[12].mxu0  ;;  %v12363_v6 = vpack.i.bf16 %v12354_v2, %v12357_v4 }
 0x104   : > { %v12366_v7 = vadd.f32 %v9324_v5, %v12292_v38  ;;  %v526_v8 = vpop.f32.mrb[13].mxu0 }
 0x105   : > { %16117 = vst [vmem:[#allocation9_spill] sm:$0xff] %v12363_v6  ;;  %v12369_v9 = vadd.f32 %v12292_v38, %v526_v8  ;;  %11012 = vrot.lane.b32.xlu1 %v12363_v6, %s12146_s14 }
 0x107   : > { %v9327_v10 = vpop.f32.mrb[14].mxu0  ;;  %v12375_v11 = vpack.i.bf16 %v12366_v7, %v12369_v9 }
 0x108   : > { %v12378_v12 = vadd.f32 %v9327_v10, %v12292_v38  ;;  %v536_v13 = vpop.f32.mrb[15].mxu0 }
 0x109   : > { %16118 = vst [vmem:[#allocation10_spill] sm:$0xff] %v12375_v11  ;;  %v12381_v14 = vadd.f32 %v12292_v38, %v536_v13  ;;  %11017 = vrot.lane.b32.xlu0 %v12375_v11, %s12146_s14 }
 0x10b   : > { %v9330_v15 = vpop.f32.mrb[16].mxu0  ;;  %v12387_v16 = vpack.i.bf16 %v12378_v12, %v12381_v14 }
 0x10c   : > { %v12390_v17 = vadd.f32 %v9330_v15, %v12292_v38  ;;  %v546_v18 = vpop.f32.mrb[17].mxu0 }
 0x10d   : > { %16119 = vst [vmem:[#allocation11_spill] sm:$0xff] %v12387_v16  ;;  %v547_v19 = vadd.f32 %v12292_v38, %v546_v18  ;;  %11027 = vrot.lane.b32.xlu0 %v12387_v16, %s12146_s14 }
 0x10f   : > { %v12395_v20 = vmul.f32 0.35355338, %v547_v19  ;;  %v12398_v21 = vpack.i.bf16 %v12390_v17, %v547_v19  ;;  %v9333_v22 = vpop.f32.mrb[18].mxu0 }
 0x110   : > { %v12401_v23 = vadd.f32 %v9333_v22, %v12292_v38  ;;  %v556_v24 = vpop.f32.mrb[19].mxu0  ;;  %v12542_v22 = vmul.f32 0.35355338, %v12295_v40 }
 0x111   : > { %16120 = vst [vmem:[#allocation12_spill] sm:$0xff] %v12395_v20  ;;  %16121 = vst [vmem:[#allocation13_spill] sm:$0xff] %v12398_v21  ;;  %9424 = vmatprep.mubr.msk.f32.mxu0 %vm689_vm1, %v12395_v20  ;;  %11022 = vrot.lane.b32.xlu1 %v12398_v21, %s12146_s14  ;;  %v12408_v25 = vadd.f32 %v12292_v38, %v556_v24 }
 0x112   : > { %16129 = vst [vmem:[#allocation21_spill] sm:$0xff] %v12542_v22 }
 0x113   : > { %v12412_v26 = vpack.i.bf16 %v12401_v23, %v12408_v25  ;;  %v9336_v27 = vpop.f32.mrb[20].mxu0 }
 0x114   : > { %v12415_v28 = vadd.f32 %v9336_v27, %v12292_v38  ;;  %v566_v29 = vpop.f32.mrb[21].mxu0 }
 0x115   : > { %16122 = vst [vmem:[#allocation14_spill] sm:$0xff] %v12412_v26  ;;  %11032 = vrot.lane.b32.xlu1 %v12412_v26, %s12146_s14  ;;  %v12420_v30 = vadd.f32 %v12292_v38, %v566_v29 }
 0x117   : > { %v9339_v31 = vpop.f32.mrb[22].mxu0  ;;  %v12424_v32 = vpack.i.bf16 %v12415_v28, %v12420_v30 }
 0x118   : > { %v12427_v33 = vadd.f32 %v9339_v31, %v12292_v38  ;;  %v576_v34 = vpop.f32.mrb[23].mxu0 }
 0x119   : > { %16123 = vst [vmem:[#allocation15_spill] sm:$0xff] %v12424_v32  ;;  %v12430_v35 = vadd.f32 %v12292_v38, %v576_v34  ;;  %11037 = vrot.lane.b32.xlu0 %v12424_v32, %s12146_s14 }
 0x11b   : > { %v9342_v36 = vpop.f32.mrb[24].mxu0  ;;  %v12436_v37 = vpack.i.bf16 %v12427_v33, %v12430_v35 }
 0x11c   : > { %v12439_v39 = vadd.f32 %v9342_v36, %v12292_v38  ;;  %v586_v41 = vpop.f32.mrb[25].mxu0 }
 0x11d   : > { %v12442_v42 = vadd.f32 %v12292_v38, %v586_v41  ;;  %11047 = vrot.lane.b32.xlu0 %v12436_v37, %s12146_s14 }
 0x11f   : > { %v9345_v43 = vpop.f32.mrb[26].mxu0  ;;  %v12448_v47 = vpack.i.bf16 %v12439_v39, %v12442_v42 }
 0x120   : > { %v12451_v49 = vadd.f32 %v9345_v43, %v12292_v38  ;;  %v596_v52 = vpop.f32.mrb[27].mxu0 }
 0x121   : > { %16124 = vst [vmem:[#allocation16_spill] sm:$0xff] %v12448_v47  ;;  %v12454_v54 = vadd.f32 %v12292_v38, %v596_v52  ;;  %11042 = vrot.lane.b32.xlu1 %v12448_v47, %s12146_s14 }
 0x123   : > { %v9348_v57 = vpop.f32.mrb[28].mxu0  ;;  %v12460_v59 = vpack.i.bf16 %v12451_v49, %v12454_v54 }
 0x124   : > { %v12463_v62 = vadd.f32 %v9348_v57, %v12292_v38  ;;  %v606_v0 = vpop.f32.mrb[29].mxu0 }
 0x125   : > { %16125 = vst [vmem:[#allocation17_spill] sm:$0xff] %v12460_v59  ;;  %v12466_v3 = vadd.f32 %v12292_v38, %v606_v0  ;;  %11052 = vrot.lane.b32.xlu1 %v12460_v59, %s12146_s14 }
 0x127   : > { %v9351_v5 = vpop.f32.mrb[30].mxu0  ;;  %v12472_v8 = vpack.i.bf16 %v12463_v62, %v12466_v3 }
 0x128   : > { %v12475_v10 = vadd.f32 %v9351_v5, %v12292_v38  ;;  %v616_v13 = vpop.f32.mrb[31].mxu0 }
 0x129   : > { %16126 = vst [vmem:[#allocation18_spill] sm:$0xff] %v12472_v8  ;;  %v12478_v15 = vadd.f32 %v12292_v38, %v616_v13  ;;  %11057 = vrot.lane.b32.xlu0 %v12472_v8, %s12146_s14  ;;  %v12531_v38 = vmul.f32 0.35355338, %v12345_v63  ;;  %v16130_v63 = vmov 0 }
 0x12a   : > { %v16131_v63 = vsel %vm12548_vm2, 4294967295, %v16130_v63 }
 0x12b   : > { %v12484_v18 = vpack.i.bf16 %v12475_v10, %v12478_v15  ;;  %16128 = vst [vmem:[#allocation20_spill] sm:$0xff] %v12531_v38  ;;  %16132 = vst [vmem:[#allocation22_spill] sm:$0xff] %v16131_v63 }
 0x12d   : > { %16127 = vst [vmem:[#allocation19_spill] sm:$0xff] %v12484_v18  ;;  %11062 = vrot.lane.b32.xlu1 %v12484_v18, %s12146_s14  ;;  %11072 = vrot.lane.b32.xlu0 %v12315_v50, %s12147_s15  ;;  %s12151_s14 = smov 80  }
 0x131   : > { %11067 = vrot.lane.b32.xlu1 %v12299_v44, %s12147_s15  ;;  %11082 = vrot.lane.b32.xlu0 %v12339_v60, %s12147_s15 }
 0x135   : > { %11077 = vrot.lane.b32.xlu1 %v12327_v55, %s12147_s15  ;;  %11092 = vrot.lane.b32.xlu0 %v12398_v21, %s12147_s15 }
 0x139   : > { %11087 = vrot.lane.b32.xlu1 %v12351_v1, %s12147_s15  ;;  %11102 = vrot.lane.b32.xlu0 %v12412_v26, %s12147_s15 }
 0x13d   : > { %11097 = vrot.lane.b32.xlu1 %v12363_v6, %s12147_s15  ;;  %11112 = vrot.lane.b32.xlu0 %v12424_v32, %s12147_s15 }
 0x141   : > { %11107 = vrot.lane.b32.xlu1 %v12375_v11, %s12147_s15  ;;  %11122 = vrot.lane.b32.xlu0 %v12436_v37, %s12147_s15 }
 0x145   : > { %11117 = vrot.lane.b32.xlu1 %v12387_v16, %s12147_s15  ;;  %11132 = vrot.lane.b32.xlu0 %v12460_v59, %s12147_s15 }
 0x149   : > { %11127 = vrot.lane.b32.xlu1 %v12448_v47, %s12147_s15  ;;  %11142 = vrot.lane.b32.xlu0 %v12472_v8, %s12147_s15 }
 0x14d   : > { %11137 = vrot.lane.b32.xlu1 %v12299_v44, %s12148_s16  ;;  %11152 = vrot.lane.b32.xlu0 %v12327_v55, %s12148_s16 }
 0x151   : > { %11147 = vrot.lane.b32.xlu1 %v12315_v50, %s12148_s16  ;;  %11157 = vrot.lane.b32.xlu0 %v12351_v1, %s12148_s16 }
 0x155   : > { %11162 = vrot.lane.b32.xlu1 %v12339_v60, %s12148_s16  ;;  %2348 = vrot.lane.b32.xlu0 %v12301_v45, %s12149_s17 }
 0x159   : > { %11167 = vrot.lane.b32.xlu1 %v12363_v6, %s12148_s16  ;;  %2517 = vrot.lane.b32.xlu0 %v12531_v38, %s12149_s17 }
 0x15d   : > { %11172 = vrot.lane.b32.xlu1 %v12375_v11, %s12148_s16  ;;  %v12846_v11 = vld [vmem:[%s15962_s3 + $0x30] sm:$0xff] }
 0x161   : > { %11177 = vrot.lane.b32.xlu1 %v12398_v21, %s12148_s16 }
 0x163   : > { %v10988_v19 = vpop.permute.xlu0 %10987 }
 0x164   : > { %v10990_v24 = vunpack.i.h.bf16 %v10988_v19  ;;  %v10989_v27 = vunpack.i.l.bf16 %v10988_v19  ;;  %v12571_v19 = vmul.f32 0.35355338, %v12342_v61 }
 0x165   : > { %2350 = vrot.lane.b32.xlu1 %v12542_v22, %s12149_s17 }
 0x166   : > { %v10312_v29 = vpack.c.bf16 %v10990_v24, %v10989_v27  ;;  %16133 = vst [vmem:[#allocation23_spill] sm:$0xff] %v12571_v19 }
 0x167   : > { %v10993_v31 = vpop.permute.xlu0 %10992 }
 0x168   : > { %v10995_v34 = vunpack.i.h.bf16 %v10993_v31  ;;  %v10994_v36 = vunpack.i.l.bf16 %v10993_v31  ;;  %10314 = vmatprep.subr.msk.bf16.mxu1 %vm12548_vm2, %v10312_v29 }
 0x169   : > { %11182 = vrot.lane.b32.xlu1 %v12387_v16, %s12148_s16  ;;  %10317 = vmatpush3.bf16.xpose.msk.msra.mxu1 %vm12548_vm2, %v10312_v29 }
 0x16a   : > { %v10318_v40 = vpack.c.bf16 %v10995_v34, %v10994_v36 }
 0x16b   : > { %v10998_v41 = vpop.permute.xlu1 %10997 }
 0x16c   : > { %v11000_v43 = vunpack.i.h.bf16 %v10998_v41  ;;  %v10999_v52 = vunpack.i.l.bf16 %v10998_v41  ;;  %10320 = vmatprep.subr.msk.bf16.mxu1 %vm12548_vm2, %v10318_v40 }
 0x16d   : > { %11187 = vrot.lane.b32.xlu1 %v12412_v26, %s12148_s16 }
 0x16e   : > { %v10324_v57 = vpack.c.bf16 %v11000_v43, %v10999_v52 }
 0x16f   : > { %v11003_v0 = vpop.permute.xlu1 %11002 }
 0x170   : > { %v11005_v5 = vunpack.i.h.bf16 %v11003_v0  ;;  %v11004_v13 = vunpack.i.l.bf16 %v11003_v0 }
 0x171   : > { %11192 = vrot.lane.b32.xlu1 %v12424_v32, %s12148_s16  ;;  %10323 = vmatpush3.bf16.xpose.msk.msra.mxu1 %vm12548_vm2, %v10318_v40 }
 0x172   : > { %10326 = vmatprep.subr.msk.bf16.mxu1 %vm12548_vm2, %v10324_v57  ;;  %v10330_v24 = vpack.c.bf16 %v11005_v5, %v11004_v13  ;;  %v12586_v13 = vmul.f32 0.35355338, %v12307_v48 }
 0x173   : > { %v11008_v27 = vpop.permute.xlu0 %11007 }
 0x174   : > { %v11010_v29 = vunpack.i.h.bf16 %v11008_v27  ;;  %v11009_v31 = vunpack.i.l.bf16 %v11008_v27  ;;  %16134 = vst [vmem:[#allocation24_spill] sm:$0xff] %v12586_v13 }
 0x175   : > { %11197 = vrot.lane.b32.xlu1 %v12448_v47, %s12148_s16  ;;  %v12838_v47 = vld [vmem:[%s15962_s3 + $0x28] sm:$0xff] }
 0x176   : > { %v10336_v36 = vpack.c.bf16 %v11010_v29, %v11009_v31  ;;  %v12601_v31 = vmul.f32 0.35355338, %v12304_v46  ;;  %v12613_v46 = vmul.f32 0.35355338, %v12318_v51  ;;  %v12629_v51 = vmul.f32 0.35355338, %v12330_v56 }
 0x177   : > { %v11013_v34 = vpop.permute.xlu1 %11012 }
 0x178   : > { %v11015_v41 = vunpack.i.h.bf16 %v11013_v34  ;;  %v11014_v43 = vunpack.i.l.bf16 %v11013_v34  ;;  %16135 = vst [vmem:[#allocation25_spill] sm:$0xff] %v12601_v31  ;;  %v12604_v34 = vmul.f32 0.35355338, %v12321_v53  ;;  %16137 = vst [vmem:[#allocation27_spill] sm:$0xff] %v12613_v46  ;;  %v12616_v53 = vmul.f32 0.35355338, %v12333_v58 }
 0x179   : > { %2519 = vrot.lane.b32.xlu1 %v12571_v19, %s12149_s17  ;;  %10329 = vmatpush3.bf16.xpose.msk.msra.mxu1 %vm12548_vm2, %v10324_v57  ;;  %16139 = vst [vmem:[#allocation29_spill] sm:$0xff] %v12629_v51 }
 0x17a   : > { %10332 = vmatprep.subr.msk.bf16.mxu1 %vm12548_vm2, %v10330_v24  ;;  %v10342_v45 = vpack.c.bf16 %v11015_v41, %v11014_v43  ;;  %16136 = vst [vmem:[#allocation26_spill] sm:$0xff] %v12604_v34  ;;  %16138 = vst [vmem:[#allocation28_spill] sm:$0xff] %v12616_v53 }
 0x17b   : > { %v11018_v61 = vpop.permute.xlu0 %11017 }
 0x17c   : > { %v11020_v41 = vunpack.i.h.bf16 %v11018_v61  ;;  %v11019_v43 = vunpack.i.l.bf16 %v11018_v61 }
 0x17d   : > { %11202 = vrot.lane.b32.xlu1 %v12484_v18, %s12147_s15  ;;  %s12152_s15 = smov 112  }
 0x17f   : > { %v11028_v5 = vpop.permute.xlu0 %11027 }
 0x181   : > { %10335 = vmatpush3.bf16.xpose.msk.msra.mxu1 %vm12548_vm2, %v10330_v24 }
 0x182   : > { %10338 = vmatprep.subr.msk.bf16.mxu1 %vm12548_vm2, %v10336_v36 }
 0x183   : > { %v11023_v40 = vpop.permute.xlu1 %11022 }
 0x184   : > { %v11025_v52 = vunpack.i.h.bf16 %v11023_v40  ;;  %v11024_v57 = vunpack.i.l.bf16 %v11023_v40 }
 0x186   : > { %v10360_v0 = vpack.c.bf16 %v11025_v52, %v11024_v57 }
 0x187   : > { %v11033_v27 = vpop.permute.xlu1 %11032 }
 0x188   : > { %9369 = vmatmul.mubr.msk.f32.vlgmr.msra.gmra.mrb[0].mxu1 %vm689_vm1, %v12542_v22  ;;  %10362 = vmatprep.subr.msk.bf16.mxu0 %vm12548_vm2, %v10360_v0  ;;  %v11035_v24 = vunpack.i.h.bf16 %v11033_v27  ;;  %v11034_v29 = vunpack.i.l.bf16 %v11033_v27  ;;  %v12654_v22 = vmul.f32 0.35355338, %v12390_v17  ;;  %v12673_v17 = vmul.f32 0.35355338, %v12354_v2 }
 0x189   : > { %9371 = vmatprep.mubr.msk.f32.mxu1 %vm689_vm1, %v12586_v13  ;;  %10341 = vmatpush3.bf16.xpose.msk.msra.mxu1 %vm12548_vm2, %v10336_v36  ;;  %v12686_v2 = vmul.f32 0.35355338, %v12420_v30  ;;  %v12698_v30 = vmul.f32 0.35355338, %v12415_v28  ;;  %v12717_v28 = vmul.f32 0.35355338, %v12378_v12 }
 0x18a   : > { %10365 = vmatpush3.bf16.xpose.msk.msra.mxu0 %vm12548_vm2, %v10360_v0  ;;  %10344 = vmatprep.subr.msk.bf16.mxu1 %vm12548_vm2, %v10342_v45  ;;  %v10366_v48 = vpack.c.bf16 %v11035_v24, %v11034_v29  ;;  %v10348_v0 = vpack.c.bf16 %v11020_v41, %v11019_v43  ;;  %v11030_v29 = vunpack.i.h.bf16 %v11028_v5  ;;  %16140 = vst [vmem:[#allocation30_spill] sm:$0xff] %v12654_v22  ;;  %16143 = vst [vmem:[#allocation33_spill] sm:$0xff] %v12673_v17 }
 0x18b   : > { %v11038_v40 = vpop.permute.xlu0 %11037  ;;  %16146 = vst [vmem:[#allocation36_spill] sm:$0xff] %v12686_v2  ;;  %16148 = vst [vmem:[#allocation38_spill] sm:$0xff] %v12698_v30 }
 0x18c   : > { %9372 = vmatmul.mubr.msk.f32.gmra.mrb[2].mxu1 %vm689_vm1, %v12601_v31  ;;  %10368 = vmatprep.subr.msk.bf16.mxu0 %vm12548_vm2, %v10366_v48  ;;  %v11040_v36 = vunpack.i.h.bf16 %v11038_v40  ;;  %v11039_v52 = vunpack.i.l.bf16 %v11038_v40  ;;  %v11029_v40 = vunpack.i.l.bf16 %v11028_v5  ;;  %16151 = vst [vmem:[#allocation41_spill] sm:$0xff] %v12717_v28 }
 0x18d   : > { %9374 = vmatprep.mubr.msk.f32.mxu1 %vm689_vm1, %v12604_v34 }
 0x18e   : > { %v10372_v57 = vpack.c.bf16 %v11040_v36, %v11039_v52 }
 0x18f   : > { %v11048_v58 = vpop.permute.xlu0 %11047 }
 0x190   : > { %9375 = vmatmul.mubr.msk.f32.gmra.mrb[4].mxu1 %vm689_vm1, %v12613_v46  ;;  %v11050_v27 = vunpack.i.h.bf16 %v11048_v58  ;;  %v11049_v24 = vunpack.i.l.bf16 %v11048_v58 }
 0x191   : > { %9377 = vmatprep.mubr.msk.f32.mxu1 %vm689_vm1, %v12616_v53  ;;  %10347 = vmatpush3.bf16.xpose.msk.msra.mxu1 %vm12548_vm2, %v10342_v45 }
 0x192   : > { %10371 = vmatpush3.bf16.xpose.msk.msra.mxu0 %vm12548_vm2, %v10366_v48  ;;  %10350 = vmatprep.subr.msk.bf16.mxu1 %vm12548_vm2, %v10348_v0  ;;  %v10378_v45 = vpack.c.bf16 %v11050_v27, %v11049_v24  ;;  %v10354_v48 = vpack.c.bf16 %v11030_v29, %v11029_v40 }
 0x193   : > { %v11043_v61 = vpop.permute.xlu1 %11042  ;;  %10374 = vmatprep.subr.msk.bf16.mxu0 %vm12548_vm2, %v10372_v57 }
 0x194   : > { %9378 = vmatmul.mubr.msk.f32.gmra.mrb[6].mxu1 %vm689_vm1, %v12629_v51  ;;  %v11045_v41 = vunpack.i.h.bf16 %v11043_v61  ;;  %v11044_v43 = vunpack.i.l.bf16 %v11043_v61 }
 0x195   : > { %9396 = vmatprep.mubr.msk.f32.mxu1 %vm689_vm1, %v12531_v38 }
 0x196   : > { %v10384_v36 = vpack.c.bf16 %v11045_v41, %v11044_v43 }
 0x197   : > { %v11053_v56 = vpop.permute.xlu1 %11052 }
 0x199   : > { %10353 = vmatpush3.bf16.xpose.msk.msra.mxu1 %vm12548_vm2, %v10348_v0  ;;  %v11054_v0 = vunpack.i.l.bf16 %v11053_v56 }
 0x19a   : > { %10377 = vmatpush3.bf16.xpose.msk.msra.mxu0 %vm12548_vm2, %v10372_v57  ;;  %10356 = vmatprep.subr.msk.bf16.mxu1 %vm12548_vm2, %v10354_v48  ;;  %v11055_v57 = vunpack.i.h.bf16 %v11053_v56 }
 0x19b   : > { %10380 = vmatprep.subr.msk.bf16.mxu0 %vm12548_vm2, %v10378_v45  ;;  %v11058_v5 = vpop.permute.xlu0 %11057 }
 0x19c   : > { %v10390_v43 = vpack.c.bf16 %v11055_v57, %v11054_v0  ;;  %v11059_v0 = vunpack.i.l.bf16 %v11058_v5 }
 0x19f   : > { %v12645_v52 = vpop.permute.xlu1 %11062  ;;  %v11073_v58 = vpop.permute.xlu0 %11072 }
 0x1a0   : > { %v11075_v29 = vunpack.i.h.bf16 %v11073_v58  ;;  %v11074_v40 = vunpack.i.l.bf16 %v11073_v58 }
 0x1a1   : > { %10359 = vmatpush3.bf16.xpose.msk.msra.mxu1 %vm12548_vm2, %v10354_v48  ;;  %v12657_v48 = vmul.f32 0.35355338, %v12357_v4 }
 0x1a2   : > { %10383 = vmatpush3.bf16.xpose.msk.msra.mxu0 %vm12548_vm2, %v10378_v45  ;;  %10386 = vmatprep.subr.msk.bf16.mxu1 %vm12548_vm2, %v10384_v36  ;;  %v12662_v45 = vmul.f32 0.35355338, %v12408_v25  ;;  %v10412_v4 = vpack.c.bf16 %v11075_v29, %v11074_v40  ;;  %v11060_v25 = vunpack.i.h.bf16 %v11058_v5  ;;  %v12695_v5 = vmul.f32 0.35355338, %v12366_v7 }
 0x1a3   : > { %v11068_v61 = vpop.permute.xlu1 %11067  ;;  %16141 = vst [vmem:[#allocation31_spill] sm:$0xff] %v12657_v48  ;;  %v11083_v58 = vpop.permute.xlu0 %11082  ;;  %v12701_v29 = vmul.f32 0.35355338, %v12381_v14  ;;  %v12706_v40 = vmul.f32 0.35355338, %v12430_v35  ;;  %v11065_v35 = vunpack.i.h.bf16 %v12645_v52 }
 0x1a4   : > { %v11070_v27 = vunpack.i.h.bf16 %v11068_v61  ;;  %v11069_v24 = vunpack.i.l.bf16 %v11068_v61  ;;  %16142 = vst [vmem:[#allocation32_spill] sm:$0xff] %v12662_v45  ;;  %v12676_v61 = vmul.f32 0.35355338, %v12401_v23  ;;  %v11085_v23 = vunpack.i.h.bf16 %v11083_v58  ;;  %16147 = vst [vmem:[#allocation37_spill] sm:$0xff] %v12695_v5 }
 0x1a5   : > { %16149 = vst [vmem:[#allocation39_spill] sm:$0xff] %v12701_v29  ;;  %16150 = vst [vmem:[#allocation40_spill] sm:$0xff] %v12706_v40 }
 0x1a6   : > { %v10408_v41 = vpack.c.bf16 %v11070_v27, %v11069_v24  ;;  %16144 = vst [vmem:[#allocation34_spill] sm:$0xff] %v12676_v61  ;;  %v12679_v27 = vmul.f32 0.35355338, %v12369_v9 }
 0x1a7   : > { %v11078_v38 = vpop.permute.xlu1 %11077 }
 0x1a8   : > { %9397 = vmatmul.mubr.msk.f32.vlgmr.msra.gmra.mrb[8].mxu1 %vm689_vm1, %v12571_v19  ;;  %10409 = vmatprep.subr.bf16.mxu0 %v10408_v41  ;;  %v11080_v56 = vunpack.i.h.bf16 %v11078_v38  ;;  %v11079_v57 = vunpack.i.l.bf16 %v11078_v38  ;;  %16145 = vst [vmem:[#allocation35_spill] sm:$0xff] %v12679_v27  ;;  %v11084_v38 = vunpack.i.l.bf16 %v11083_v58 }
 0x1a9   : > { %9425 = vmatmul.mubr.msk.f32.vlgmr.msra.gmra.mrb[32].mxu0 %vm689_vm1, %v12654_v22  ;;  %9399 = vmatprep.mubr.msk.f32.mxu1 %vm689_vm1, %v12657_v48 }
 0x1aa   : > { %9427 = vmatprep.mubr.msk.f32.mxu0 %vm689_vm1, %v12662_v45  ;;  %10389 = vmatpush3.bf16.xpose.msk.msra.mxu1 %vm12548_vm2, %v10384_v36  ;;  %v10416_v9 = vpack.c.bf16 %v11080_v56, %v11079_v57  ;;  %v10396_v36 = vpack.c.bf16 %v11060_v25, %v11059_v0  ;;  %v10420_v14 = vpack.c.bf16 %v11085_v23, %v11084_v38  ;;  %v11064_v56 = vunpack.i.l.bf16 %v12645_v52 }
 0x1ab   : > { %10411 = vmatpush3.bf16.msra.mxu0 %v10408_v41  ;;  %10392 = vmatprep.subr.msk.bf16.mxu1 %vm12548_vm2, %v10390_v43  ;;  %v11088_v24 = vpop.permute.xlu1 %11087  ;;  %v12722_v57 = vmul.f32 0.35355338, %v12427_v33 }
 0x1ac   : > { %10413 = vmatprep.subr.bf16.mxu0 %v10412_v4  ;;  %9400 = vmatmul.mubr.msk.f32.gmra.mrb[10].mxu1 %vm689_vm1, %v12673_v17  ;;  %v11090_v7 = vunpack.i.h.bf16 %v11088_v24  ;;  %v11089_v41 = vunpack.i.l.bf16 %v11088_v24  ;;  %v10402_v52 = vpack.c.bf16 %v11065_v35, %v11064_v56 }
 0x1ad   : > { %9428 = vmatmul.mubr.msk.f32.gmra.mrb[34].mxu0 %vm689_vm1, %v12676_v61  ;;  %9402 = vmatprep.mubr.msk.f32.mxu1 %vm689_vm1, %v12679_v27  ;;  %16152 = vst [vmem:[#allocation42_spill] sm:$0xff] %v12722_v57 }
 0x1ae   : > { %9430 = vmatprep.mubr.msk.f32.mxu0 %vm689_vm1, %v12686_v2  ;;  %v12737_v33 = vpack.c.bf16 %v11090_v7, %v11089_v41 }
 0x1af   : > { %10415 = vmatpush3.bf16.msra.mxu0 %v10412_v4  ;;  %v12725_v4 = vmul.f32 0.35355338, %v12442_v42  ;;  %v12735_v12 = vpop.permute.xlu1 %11097  ;;  %v11093_v42 = vpop.permute.xlu0 %11092 }
 0x1b0   : > { %10417 = vmatprep.subr.bf16.mxu0 %v10416_v9  ;;  %9403 = vmatmul.mubr.msk.f32.gmra.mrb[12].mxu1 %vm689_vm1, %v12695_v5  ;;  %v11095_v25 = vunpack.i.h.bf16 %v11093_v42  ;;  %v11094_v0 = vunpack.i.l.bf16 %v11093_v42 }
 0x1b1   : > { %9431 = vmatmul.mubr.msk.f32.gmra.mrb[36].mxu0 %vm689_vm1, %v12698_v30  ;;  %9405 = vmatprep.mubr.msk.f32.mxu1 %vm689_vm1, %v12701_v29  ;;  %16153 = vst [vmem:[#allocation43_spill] sm:$0xff] %v12725_v4 }
 0x1b2   : > { %9433 = vmatprep.mubr.msk.f32.mxu0 %vm689_vm1, %v12706_v40  ;;  %10395 = vmatpush3.bf16.xpose.msk.msra.mxu1 %vm12548_vm2, %v10390_v43  ;;  %v10440_v23 = vpack.c.bf16 %v11095_v25, %v11094_v0 }
 0x1b3   : > { %10419 = vmatpush3.bf16.msra.mxu0 %v10416_v9  ;;  %10398 = vmatprep.subr.msk.bf16.mxu1 %vm12548_vm2, %v10396_v36  ;;  %v12744_v43 = vpop.permute.xlu1 %11107  ;;  %v11103_v58 = vpop.permute.xlu0 %11102 }
 0x1b4   : > { %10421 = vmatprep.subr.bf16.mxu0 %v10420_v14  ;;  %9406 = vmatmul.mubr.msk.f32.gmra.mrb[14].mxu1 %vm689_vm1, %v12717_v28  ;;  %v11105_v24 = vunpack.i.h.bf16 %v11103_v58  ;;  %v11104_v7 = vunpack.i.l.bf16 %v11103_v58 }
 0x1b5   : > { %9434 = vmatmul.mubr.msk.f32.gmra.mrb[38].mxu0 %vm689_vm1, %v12722_v57  ;;  %9452 = vmatprep.mubr.msk.f32.mxu1 %vm689_vm1, %v12725_v4 }
 0x1b6   : > { %v10444_v42 = vpack.c.bf16 %v11105_v24, %v11104_v7 }
 0x1b7   : > { %10423 = vmatpush3.bf16.msra.mxu0 %v10420_v14  ;;  %v12746_v38 = vpop.permute.xlu1 %11117  ;;  %v11113_v9 = vpop.permute.xlu0 %11112  ;;  %v12756_v14 = vmul.f32 0.35355338, %v12454_v54 }
 0x1b8   : > { %10425 = vmatprep.subr.bf16.mxu0 %v12737_v33  ;;  %v11115_v35 = vunpack.i.h.bf16 %v11113_v9  ;;  %v11114_v56 = vunpack.i.l.bf16 %v11113_v9 }
 0x1b9   : > { %16155 = vst [vmem:[#allocation45_spill] sm:$0xff] %v12756_v14 }
 0x1ba   : > { %10401 = vmatpush3.bf16.xpose.msk.msra.mxu1 %vm12548_vm2, %v10396_v36  ;;  %v12751_v36 = vmul.f32 0.35355338, %v12439_v39  ;;  %v12763_v39 = vmul.f32 0.35355338, %v12451_v49  ;;  %v10448_v58 = vpack.c.bf16 %v11115_v35, %v11114_v56  ;;  %v12776_v49 = vmul.f32 0.35355338, %v12478_v15 }
 0x1bb   : > { %10404 = vmatprep.subr.msk.bf16.mxu1 %vm12548_vm2, %v10402_v52  ;;  %v12753_v41 = vpop.permute.xlu1 %11127  ;;  %v11123_v25 = vpop.permute.xlu0 %11122  ;;  %v12783_v35 = vmul.f32 0.35355338, %v12475_v10  ;;  %v12800_v10 = vld [vmem:[%s15962_s3] sm:$0xff] }
 0x1bc   : > { %16154 = vst [vmem:[#allocation44_spill] sm:$0xff] %v12751_v36  ;;  %16156 = vst [vmem:[#allocation46_spill] sm:$0xff] %v12763_v39  ;;  %v11125_v54 = vunpack.i.h.bf16 %v11123_v25  ;;  %v11124_v0 = vunpack.i.l.bf16 %v11123_v25 }
 0x1bd   : > { %16159 = vst [vmem:[#allocation49_spill] sm:$0xff] %v12776_v49  ;;  %16160 = vst [vmem:[#allocation50_spill] sm:$0xff] %v12783_v35 }
 0x1be   : > { %v10452_v7 = vpack.c.bf16 %v11125_v54, %v11124_v0  ;;  %v12811_v0 = vld [vmem:[%s15962_s3 + $0x18] sm:$0xff] }
 0x1bf   : > { %v11138_v9 = vpop.permute.xlu1 %11137 }
 0x1c0   : > { %v11139_v24 = vunpack.i.l.bf16 %v11138_v9 }
 0x1c2   : > { %10407 = vmatpush3.bf16.xpose.msk.msra.mxu1 %vm12548_vm2, %v10402_v52  ;;  %v12766_v52 = vmul.f32 0.35355338, %v12466_v3  ;;  %v11140_v3 = vunpack.i.h.bf16 %v11138_v9 }
 0x1c3   : > { %10441 = vmatprep.subr.bf16.mxu1 %v10440_v23 }
 0x1c4   : > { %16157 = vst [vmem:[#allocation47_spill] sm:$0xff] %v12766_v52  ;;  %v12785_v56 = vpack.c.bf16 %v11140_v3, %v11139_v24 }
 0x1c6   : > { %16161 = vst [vmem:[#allocation51_spill] sm:$0xff] %v12785_v56 }
 0x1c9   : > { %9453 = vmatmul.mubr.msk.f32.vlgmr.msra.gmra.mrb[16].mxu1 %vm689_vm1, %v12751_v36 }
 0x1ca   : > { %9455 = vmatprep.mubr.msk.f32.mxu1 %vm689_vm1, %v12756_v14  ;;  %10443 = vmatpush3.bf16.msra.mxu1 %v10440_v23  ;;  %v12773_v23 = vmul.f32 0.35355338, %v12463_v62  ;;  %v12795_v62 = vld [vmem:[%s15962_s3 + $0x8] sm:$0xff] }
 0x1cb   : > { %10445 = vmatprep.subr.bf16.mxu1 %v10444_v42 }
 0x1cc   : > { %16158 = vst [vmem:[#allocation48_spill] sm:$0xff] %v12773_v23 }
 0x1cd   : > { %9456 = vmatmul.mubr.msk.f32.gmra.mrb[18].mxu1 %vm689_vm1, %v12763_v39 }
 0x1ce   : > { %9458 = vmatprep.mubr.msk.f32.mxu1 %vm689_vm1, %v12766_v52  ;;  %10447 = vmatpush3.bf16.msra.mxu1 %v10444_v42 }
 0x1cf   : > { %10449 = vmatprep.subr.bf16.mxu1 %v10448_v58 }
 0x1d1   : > { %9459 = vmatmul.mubr.msk.f32.gmra.mrb[20].mxu1 %vm689_vm1, %v12773_v23 }
 0x1d2   : > { %9461 = vmatprep.mubr.msk.f32.mxu1 %vm689_vm1, %v12776_v49  ;;  %10451 = vmatpush3.bf16.msra.mxu1 %v10448_v58 }
 0x1d3   : > { %10453 = vmatprep.subr.bf16.mxu1 %v10452_v7 }
 0x1d5   : > { %9462 = vmatmul.mubr.msk.f32.gmra.mrb[22].mxu1 %vm689_vm1, %v12783_v35 }
 0x1d6   : > { %10455 = vmatpush3.bf16.msra.mxu1 %v10452_v7 }
 0x1d7   : > { %10474 = vmatprep.subr.msk.bf16.mxu1 %vm12548_vm2, %v12785_v56 }
 0x25b   : > { %v9370_v15 = vpop.f32.mrb[0].mxu1 }
 0x25c   : > { %v12803_v42 = vadd.f32 %v9370_v15, %v12795_v62  ;;  %v796_v25 = vpop.f32.mrb[1].mxu1  ;;  %v12823_v15 = vld [vmem:[%s15962_s3 + $0x10] sm:$0xff] }
 0x25d   : > { %v12806_v54 = vadd.f32 %v796_v25, %v12800_v10  ;;  %v12828_v25 = vld [vmem:[%s15962_s3 + $0x20] sm:$0xff] }
 0x25e   : > { %v1346_v58 = vsel %vm1342_vm3, %v12803_v42, -inf }
 0x25f   : > { %1347 = vmax.xlane.f32.xlu1 %v1346_v58  ;;  %v9373_v9 = vpop.f32.mrb[2].mxu1  ;;  %v1343_v3 = vsel %vm1342_vm3, %v12806_v54, -inf }
 0x260   : > { %v12818_v24 = vadd.f32 %v9373_v9, %v12811_v0  ;;  %v806_v7 = vpop.f32.mrb[3].mxu1  ;;  %1344 = vmax.xlane.f32.xlu0 %v1343_v3 }
 0x261   : > { %v12833_v19 = vadd.f32 %v806_v7, %v12823_v15 }
 0x262   : > { %v1352_v58 = vsel %vm1342_vm3, %v12818_v24, -inf }
 0x263   : > { %v9376_v9 = vpop.f32.mrb[4].mxu1  ;;  %v1349_v55 = vsel %vm1342_vm3, %v12833_v19, -inf }
 0x264   : > { %v816_v16 = vpop.f32.mrb[5].mxu1  ;;  %1353 = vmax.xlane.f32.xlu0 %v1352_v58  ;;  %v12849_v6 = vadd.f32 %v9376_v9, %v12838_v47 }
 0x265   : > { %v12841_v3 = vadd.f32 %v816_v16, %v12828_v25  ;;  %v12858_v16 = vld [vmem:[%s15962_s3 + $0x38] sm:$0xff] }
 0x266   : > { %v1358_v49 = vsel %vm1342_vm3, %v12849_v6, -inf }
 0x267   : > { %v9379_v7 = vpop.f32.mrb[6].mxu1  ;;  %v1355_v1 = vsel %vm1342_vm3, %v12841_v3, -inf }
 0x268   : > { %v826_v58 = vpop.f32.mrb[7].mxu1  ;;  %1356 = vmax.xlane.f32.xlu1 %v1355_v1  ;;  %1350 = vmax.xlane.f32.xlu0 %v1349_v55  ;;  %v12864_v9 = vadd.f32 %v9379_v7, %v12858_v16 }
 0x269   : > { %v12861_v44 = vadd.f32 %v826_v58, %v12846_v11 }
 0x26a   : > { %v1364_v26 = vsel %vm1342_vm3, %v12864_v9, -inf }
 0x26b   : > { %v1361_v32 = vsel %vm1342_vm3, %v12861_v44, -inf }
 0x26c   : > { %1362 = vmax.xlane.f32.xlu1 %v1361_v32  ;;  %1359 = vmax.xlane.f32.xlu0 %v1358_v49 }
 0x270   : > { %1365 = vmax.xlane.f32.xlu0 %v1364_v26 }
 0x27b   : > { %v9398_v1 = vpop.f32.mrb[8].mxu1 }
 0x27c   : > { %v12873_v55 = vadd.f32 %v9398_v1, %v12795_v62  ;;  %v9426_v58 = vpop.f32.mrb[32].mxu0  ;;  %v965_v52 = vpop.f32.mrb[9].mxu1 }
 0x27d   : > { %v12876_v7 = vadd.f32 %v965_v52, %v12800_v10  ;;  %v1134_v21 = vpop.f32.mrb[33].mxu0  ;;  %v12879_v14 = vadd.f32 %v9426_v58, %v12795_v62 }
 0x27e   : > { %v1370_v32 = vsel %vm1342_vm3, %v12873_v55, -inf  ;;  %v12884_v49 = vadd.f32 %v1134_v21, %v12800_v10 }
 0x27f   : > { %v9401_v26 = vpop.f32.mrb[10].mxu1  ;;  %1371 = vmax.xlane.f32.xlu0 %v1370_v32  ;;  %v1367_v1 = vsel %vm1342_vm3, %v12876_v7, -inf  ;;  %v1394_v58 = vsel %vm1342_vm3, %v12879_v14, -inf }
 0x280   : > { %v9429_v60 = vpop.f32.mrb[34].mxu0  ;;  %v975_v40 = vpop.f32.mrb[11].mxu1  ;;  %1368 = vmax.xlane.f32.xlu1 %v1367_v1  ;;  %v12889_v50 = vadd.f32 %v9401_v26, %v12811_v0  ;;  %v1391_v32 = vsel %vm1342_vm3, %v12884_v49, -inf }
 0x281   : > { %v1144_v52 = vpop.f32.mrb[35].mxu0  ;;  %v12894_v2 = vadd.f32 %v975_v40, %v12823_v15  ;;  %v12899_v1 = vadd.f32 %v9429_v60, %v12811_v0 }
 0x282   : > { %v1376_v26 = vsel %vm1342_vm3, %v12889_v50, -inf  ;;  %v12904_v56 = vadd.f32 %v1144_v52, %v12823_v15 }
 0x283   : > { %v9404_v21 = vpop.f32.mrb[12].mxu1  ;;  %1395 = vmax.xlane.f32.xlu0 %v1394_v58  ;;  %v1373_v58 = vsel %vm1342_vm3, %v12894_v2, -inf  ;;  %v1400_v60 = vsel %vm1342_vm3, %v12899_v1, -inf }
 0x284   : > { %v9432_v35 = vpop.f32.mrb[36].mxu0  ;;  %v985_v45 = vpop.f32.mrb[13].mxu1  ;;  %1392 = vmax.xlane.f32.xlu1 %v1391_v32  ;;  %v12909_v32 = vadd.f32 %v9404_v21, %v12838_v47  ;;  %v1397_v52 = vsel %vm1342_vm3, %v12904_v56, -inf }
 0x285   : > { %v1154_v63 = vpop.f32.mrb[37].mxu0  ;;  %v12914_v29 = vadd.f32 %v985_v45, %v12828_v25 }
 0x286   : > { %v12924_v21 = vadd.f32 %v1154_v63, %v12828_v25 }
 0x287   : > { %v9407_v40 = vpop.f32.mrb[14].mxu1  ;;  %1377 = vmax.xlane.f32.xlu0 %v1376_v26  ;;  %v12919_v26 = vadd.f32 %v9432_v35, %v12838_v47  ;;  %v1379_v57 = vsel %vm1342_vm3, %v12914_v29, -inf }
 0x288   : > { %v9435_v23 = vpop.f32.mrb[38].mxu0  ;;  %v995_v4 = vpop.f32.mrb[15].mxu1  ;;  %1374 = vmax.xlane.f32.xlu1 %v1373_v58  ;;  %v1382_v58 = vsel %vm1342_vm3, %v12909_v32, -inf  ;;  %v12929_v45 = vadd.f32 %v9407_v40, %v12858_v16 }
 0x289   : > { %v1164_v39 = vpop.f32.mrb[39].mxu0  ;;  %v12934_v35 = vadd.f32 %v995_v4, %v12846_v11  ;;  %v12939_v63 = vadd.f32 %v9435_v23, %v12858_v16 }
 0x28a   : > { %v12944_v40 = vadd.f32 %v1164_v39, %v12846_v11 }
 0x28b   : > { %1401 = vmax.xlane.f32.xlu0 %v1400_v60  ;;  %v1406_v60 = vsel %vm1342_vm3, %v12919_v26, -inf  ;;  %v1412_v4 = vsel %vm1342_vm3, %v12939_v63, -inf }
 0x28c   : > { %1398 = vmax.xlane.f32.xlu1 %v1397_v52  ;;  %v1403_v52 = vsel %vm1342_vm3, %v12924_v21, -inf }
 0x28f   : > { %1383 = vmax.xlane.f32.xlu0 %v1382_v58  ;;  %v1385_v58 = vsel %vm1342_vm3, %v12934_v35, -inf }
 0x290   : > { %1380 = vmax.xlane.f32.xlu1 %v1379_v57  ;;  %v1388_v57 = vsel %vm1342_vm3, %v12929_v45, -inf }
 0x293   : > { %1407 = vmax.xlane.f32.xlu0 %v1406_v60  ;;  %v1409_v60 = vsel %vm1342_vm3, %v12944_v40, -inf }
 0x294   : > { %1404 = vmax.xlane.f32.xlu1 %v1403_v52 }
 0x297   : > { %1389 = vmax.xlane.f32.xlu0 %v1388_v57 }
 0x298   : > { %1386 = vmax.xlane.f32.xlu1 %v1385_v58 }
 0x29b   : > { %1413 = vmax.xlane.f32.xlu0 %v1412_v4 }
 0x29c   : > { %v9454_v23 = vpop.f32.mrb[16].mxu1  ;;  %1410 = vmax.xlane.f32.xlu1 %v1409_v60 }
 0x29d   : > { %v12953_v52 = vadd.f32 %v9454_v23, %v12795_v62  ;;  %v1303_v27 = vpop.f32.mrb[17].mxu1 }
 0x29e   : > { %v12956_v39 = vadd.f32 %v1303_v27, %v12800_v10 }
 0x29f   : > { %v1418_v57 = vsel %vm1342_vm3, %v12953_v52, -inf }
 0x2a0   : > { %v9457_v58 = vpop.f32.mrb[18].mxu1  ;;  %1419 = vmax.xlane.f32.xlu0 %v1418_v57  ;;  %v1415_v4 = vsel %vm1342_vm3, %v12956_v39, -inf }
 0x2a1   : > { %v12963_v30 = vadd.f32 %v9457_v58, %v12811_v0  ;;  %v1313_v17 = vpop.f32.mrb[19].mxu1  ;;  %1416 = vmax.xlane.f32.xlu1 %v1415_v4  ;;  %v12975_v0 = vpop.permute.xlu1 %11147 }
 0x2a2   : > { %v12966_v62 = vadd.f32 %v1313_v17, %v12823_v15  ;;  %16162 = vst [vmem:[#allocation52_spill] sm:$0xff] %v12975_v0 }
 0x2a3   : > { %v1424_v27 = vsel %vm1342_vm3, %v12963_v30, -inf }
 0x2a4   : > { %v9460_v10 = vpop.f32.mrb[20].mxu1  ;;  %1425 = vmax.xlane.f32.xlu0 %v1424_v27  ;;  %v1421_v60 = vsel %vm1342_vm3, %v12966_v62, -inf }
 0x2a5   : > { %v12973_v23 = vadd.f32 %v9460_v10, %v12838_v47  ;;  %v1323_v57 = vpop.f32.mrb[21].mxu1  ;;  %1422 = vmax.xlane.f32.xlu1 %v1421_v60  ;;  %v12992_v60 = vpop.permute.xlu1 %11162 }
 0x2a6   : > { %v12978_v58 = vadd.f32 %v1323_v57, %v12828_v25  ;;  %16163 = vst [vmem:[#allocation53_spill] sm:$0xff] %v12992_v60 }
 0x2a7   : > { %v1430_v17 = vsel %vm1342_vm3, %v12973_v23, -inf }
 0x2a8   : > { %v9463_v15 = vpop.f32.mrb[22].mxu1  ;;  %1431 = vmax.xlane.f32.xlu0 %v1430_v17  ;;  %v1427_v4 = vsel %vm1342_vm3, %v12978_v58, -inf }
 0x2a9   : > { %v12985_v27 = vadd.f32 %v9463_v15, %v12858_v16  ;;  %v1333_v47 = vpop.f32.mrb[23].mxu1  ;;  %1428 = vmax.xlane.f32.xlu1 %v1427_v4  ;;  %v12996_v17 = vpop.permute.xlu1 %11167 }
 0x2aa   : > { %v12988_v10 = vadd.f32 %v1333_v47, %v12846_v11  ;;  %16164 = vst [vmem:[#allocation54_spill] sm:$0xff] %v12996_v17  ;;  %v13006_v4 = vpop.permute.xlu0 %11132 }
 0x2ab   : > { %v1436_v25 = vsel %vm1342_vm3, %v12985_v27, -inf  ;;  %16169 = vst [vmem:[#allocation59_spill] sm:$0xff] %v13006_v4 }
 0x2ac   : > { %1437 = vmax.xlane.f32.xlu0 %v1436_v25  ;;  %v1433_v57 = vsel %vm1342_vm3, %v12988_v10, -inf }
 0x2ad   : > { %1434 = vmax.xlane.f32.xlu1 %v1433_v57  ;;  %v12998_v0 = vpop.permute.xlu1 %11172 }
 0x2ae   : > { %16165 = vst [vmem:[#allocation55_spill] sm:$0xff] %v12998_v0  ;;  %v13010_v60 = vpop.permute.xlu0 %11142 }
 0x2af   : > { %16171 = vst [vmem:[#allocation61_spill] sm:$0xff] %v13010_v60 }
 0x2b1   : > { %v13000_v16 = vpop.permute.xlu1 %11177 }
 0x2b2   : > { %16166 = vst [vmem:[#allocation56_spill] sm:$0xff] %v13000_v16  ;;  %v13014_v61 = vpop.permute.xlu0 %11152 }
 0x2b3   : > { %16173 = vst [vmem:[#allocation63_spill] sm:$0xff] %v13014_v61 }
 0x2b5   : > { %v13002_v15 = vpop.permute.xlu1 %2350 }
 0x2b6   : > { %16167 = vst [vmem:[#allocation57_spill] sm:$0xff] %v13002_v15  ;;  %v13018_v17 = vpop.permute.xlu0 %11157 }
 0x2b7   : > { %16175 = vst [vmem:[#allocation65_spill] sm:$0xff] %v13018_v17 }
 0x2b9   : > { %v13004_v11 = vpop.permute.xlu1 %11182 }
 0x2ba   : > { %16168 = vst [vmem:[#allocation58_spill] sm:$0xff] %v13004_v11  ;;  %v13022_v16 = vpop.permute.xlu0 %2348 }
 0x2bb   : > { %16177 = vst [vmem:[#allocation67_spill] sm:$0xff] %v13022_v16 }
 0x2bd   : > { %v13008_v47 = vpop.permute.xlu1 %11187 }
 0x2be   : > { %16170 = vst [vmem:[#allocation60_spill] sm:$0xff] %v13008_v47  ;;  %v13026_v11 = vpop.permute.xlu0 %2517 }
 0x2bf   : > { %16179 = vst [vmem:[#allocation69_spill] sm:$0xff] %v13026_v11 }
 0x2c1   : > { %v13012_v25 = vpop.permute.xlu1 %11192 }
 0x2c2   : > { %16172 = vst [vmem:[#allocation62_spill] sm:$0xff] %v13012_v25 }
 0x2c5   : > { %v13016_v57 = vpop.permute.xlu1 %11197 }
 0x2c6   : > { %16174 = vst [vmem:[#allocation64_spill] sm:$0xff] %v13016_v57 }
 0x2c9   : > { %v13020_v0 = vpop.permute.xlu1 %2519 }
 0x2ca   : > { %16176 = vst [vmem:[#allocation66_spill] sm:$0xff] %v13020_v0 }
 0x2cd   : > { %v13024_v15 = vpop.permute.xlu1 %11202 }
 0x2ce   : > { %16178 = vst [vmem:[#allocation68_spill] sm:$0xff] %v13024_v15 }
 0x2ec   : > { %v1348_v4 = vpop.xlane.xlu1 %1347 }
 0x2ed   : > { %v1440_v47 = vsub.f32 %v12803_v42, %v1348_v4  ;;  %v1345_v60 = vpop.xlane.xlu0 %1344 }
 0x2ee   : > { %v1439_v25 = vsub.f32 %v12806_v54, %v1345_v60 }
 0x2ef   : > { %v1473_v22 = vmul.f32 1.442695, %v1440_v47 }
 0x2f0   : > { %v1471_v61 = vmul.f32 1.442695, %v1439_v25 }
 0x2f1   : > { %11626 = vpow2.f32 %v1473_v22  ;;  %v1354_v57 = vpop.xlane.xlu0 %1353 }
 0x2f2   : > { %11628 = vpow2.f32 %v1471_v61  ;;  %v1442_v17 = vsub.f32 %v12818_v24, %v1354_v57 }
 0x2f4   : > { %v1477_v0 = vmul.f32 1.442695, %v1442_v17 }
 0x2f5   : > { %v1357_v36 = vpop.xlane.xlu1 %1356  ;;  %v1351_v16 = vpop.xlane.xlu0 %1350 }
 0x2f6   : > { %11630 = vpow2.f32 %v1477_v0  ;;  %v1443_v15 = vsub.f32 %v12841_v3, %v1357_v36  ;;  %v1441_v11 = vsub.f32 %v12833_v19, %v1351_v16 }
 0x2f8   : > { %v1475_v8 = vmul.f32 1.442695, %v1441_v11  ;;  %v1479_v42 = vmul.f32 1.442695, %v1443_v15 }
 0x2f9   : > { %v1360_v4 = vpop.xlane.xlu0 %1359  ;;  %v1363_v28 = vpop.xlane.xlu1 %1362 }
 0x2fa   : > { %v1444_v54 = vsub.f32 %v12849_v6, %v1360_v4  ;;  %11632 = vpow2.f32 %v1475_v8  ;;  %v1445_v36 = vsub.f32 %v12861_v44, %v1363_v28 }
 0x2fb   : > { %v13034_v60 = vpop.eup %11626  ;;  %11634 = vpow2.f32 %v1479_v42 }
 0x2fc   : > { %v13036_v22 = vpop.eup %11628  ;;  %v1481_v61 = vmul.f32 1.442695, %v1444_v54  ;;  %v1538_v24 = vsel %vm1342_vm3, %v13034_v60, 0.0  ;;  %v1483_v17 = vmul.f32 1.442695, %v1445_v36 }
 0x2fd   : > { %1539 = vadd.xlane.f32.xlu0 %v1538_v24  ;;  %v1366_v19 = vpop.xlane.xlu0 %1365  ;;  %v1535_v3 = vsel %vm1342_vm3, %v13036_v22, 0.0 }
 0x2fe   : > { %v1446_v0 = vsub.f32 %v12864_v9, %v1366_v19  ;;  %1536 = vadd.xlane.f32.xlu1 %v1535_v3  ;;  %11636 = vpow2.f32 %v1481_v61 }
 0x300   : > { %v13044_v6 = vpop.eup %11630  ;;  %v1485_v8 = vmul.f32 1.442695, %v1446_v0 }
 0x301   : > { %v1544_v16 = vsel %vm1342_vm3, %v13044_v6, 0.0 }
 0x302   : > { %11638 = vpow2.f32 %v1485_v8  ;;  %1545 = vadd.xlane.f32.xlu0 %v1544_v16 }
 0x303   : > { %11640 = vpow2.f32 %v1483_v17 }
 0x304   : > { %v13048_v15 = vpop.eup %11632 }
 0x305   : > { %v1541_v44 = vsel %vm1342_vm3, %v13048_v15, 0.0  ;;  %v13052_v28 = vpop.eup %11634 }
 0x306   : > { %1542 = vadd.xlane.f32.xlu1 %v1541_v44  ;;  %v1547_v11 = vsel %vm1342_vm3, %v13052_v28, 0.0 }
 0x308   : > { %v13054_v9 = vpop.eup %11636 }
 0x309   : > { %v1550_v47 = vsel %vm1342_vm3, %v13054_v9, 0.0 }
 0x30a   : > { %1548 = vadd.xlane.f32.xlu1 %v1547_v11  ;;  %1551 = vadd.xlane.f32.xlu0 %v1550_v47 }
 0x30c   : > { %v13060_v25 = vpop.eup %11638  ;;  %v1372_v57 = vpop.xlane.xlu0 %1371 }
 0x30d   : > { %v1448_v42 = vsub.f32 %v12873_v55, %v1372_v57  ;;  %v1369_v4 = vpop.xlane.xlu1 %1368  ;;  %v1556_v54 = vsel %vm1342_vm3, %v13060_v25, 0.0  ;;  %v13065_v61 = vpop.eup %11640 }
 0x30e   : > { %v1447_v36 = vsub.f32 %v12876_v7, %v1369_v4  ;;  %1557 = vadd.xlane.f32.xlu0 %v1556_v54  ;;  %v1553_v55 = vsel %vm1342_vm3, %v13065_v61, 0.0 }
 0x30f   : > { %v1489_v24 = vmul.f32 1.442695, %v1448_v42 }
 0x310   : > { %v1396_v19 = vpop.xlane.xlu0 %1395  ;;  %v1487_v17 = vmul.f32 1.442695, %v1447_v36 }
 0x311   : > { %11642 = vpow2.f32 %v1489_v24  ;;  %v1456_v3 = vsub.f32 %v12879_v14, %v1396_v19  ;;  %v1393_v0 = vpop.xlane.xlu1 %1392 }
 0x312   : > { %v1455_v8 = vsub.f32 %v12884_v49, %v1393_v0  ;;  %1554 = vadd.xlane.f32.xlu0 %v1553_v55 }
 0x313   : > { %v1505_v16 = vmul.f32 1.442695, %v1456_v3 }
 0x314   : > { %v1503_v44 = vmul.f32 1.442695, %v1455_v8  ;;  %v1378_v11 = vpop.xlane.xlu0 %1377 }
 0x315   : > { %11644 = vpow2.f32 %v1505_v16  ;;  %v1450_v47 = vsub.f32 %v12889_v50, %v1378_v11  ;;  %v1375_v7 = vpop.xlane.xlu1 %1374 }
 0x316   : > { %11646 = vpow2.f32 %v1503_v44  ;;  %v1449_v14 = vsub.f32 %v12894_v2, %v1375_v7 }
 0x317   : > { %11648 = vpow2.f32 %v1487_v17  ;;  %v1493_v57 = vmul.f32 1.442695, %v1450_v47 }
 0x318   : > { %v1402_v42 = vpop.xlane.xlu0 %1401  ;;  %v1491_v24 = vmul.f32 1.442695, %v1449_v14 }
 0x319   : > { %v1458_v49 = vsub.f32 %v12899_v1, %v1402_v42  ;;  %v1399_v4 = vpop.xlane.xlu1 %1398  ;;  %11650 = vpow2.f32 %v1493_v57 }
 0x31a   : > { %v1457_v19 = vsub.f32 %v12904_v56, %v1399_v4 }
 0x31b   : > { %v13075_v54 = vpop.eup %11642  ;;  %v1509_v36 = vmul.f32 1.442695, %v1458_v49 }
 0x31c   : > { %v1384_v3 = vpop.xlane.xlu0 %1383  ;;  %v1562_v50 = vsel %vm1342_vm3, %v13075_v54, 0.0  ;;  %v1507_v1 = vmul.f32 1.442695, %v1457_v19 }
 0x31d   : > { %11652 = vpow2.f32 %v1509_v36  ;;  %v1452_v0 = vsub.f32 %v12909_v32, %v1384_v3  ;;  %v1381_v8 = vpop.xlane.xlu1 %1380  ;;  %1563 = vadd.xlane.f32.xlu0 %v1562_v50 }
 0x31e   : > { %11654 = vpow2.f32 %v1491_v24  ;;  %v1451_v57 = vsub.f32 %v12914_v29, %v1381_v8 }
 0x31f   : > { %v13081_v2 = vpop.eup %11644  ;;  %v1497_v55 = vmul.f32 1.442695, %v1452_v0 }
 0x320   : > { %v13083_v17 = vpop.eup %11646  ;;  %v1408_v16 = vpop.xlane.xlu0 %1407  ;;  %v1586_v56 = vsel %vm1342_vm3, %v13081_v2, 0.0 }
 0x321   : > { %v13087_v44 = vpop.eup %11648  ;;  %11656 = vpow2.f32 %v1497_v55  ;;  %v1460_v11 = vsub.f32 %v12919_v26, %v1408_v16  ;;  %v1405_v47 = vpop.xlane.xlu1 %1404  ;;  %1587 = vadd.xlane.f32.xlu1 %v1586_v56  ;;  %v1583_v32 = vsel %vm1342_vm3, %v13083_v17, 0.0 }
 0x322   : > { %v1459_v7 = vsub.f32 %v12924_v21, %v1405_v47  ;;  %1584 = vadd.xlane.f32.xlu0 %v1583_v32  ;;  %11658 = vpow2.f32 %v1507_v1  ;;  %v1559_v4 = vsel %vm1342_vm3, %v13087_v44, 0.0  ;;  %v1495_v21 = vmul.f32 1.442695, %v1451_v57 }
 0x323   : > { %v1513_v14 = vmul.f32 1.442695, %v1460_v11  ;;  %v13096_v24 = vpop.eup %11650 }
 0x324   : > { %v1511_v42 = vmul.f32 1.442695, %v1459_v7  ;;  %v1390_v49 = vpop.xlane.xlu0 %1389  ;;  %v1568_v29 = vsel %vm1342_vm3, %v13096_v24, 0.0 }
 0x325   : > { %v1454_v26 = vsub.f32 %v12929_v45, %v1390_v49  ;;  %v1387_v36 = vpop.xlane.xlu1 %1386  ;;  %1560 = vadd.xlane.f32.xlu1 %v1559_v4 }
 0x326   : > { %11660 = vpow2.f32 %v1511_v42  ;;  %v1453_v56 = vsub.f32 %v12934_v35, %v1387_v36 }
 0x327   : > { %v13099_v19 = vpop.eup %11652  ;;  %11662 = vpow2.f32 %v1513_v14  ;;  %v1501_v3 = vmul.f32 1.442695, %v1454_v26 }
 0x328   : > { %v1414_v50 = vpop.xlane.xlu0 %1413  ;;  %v1592_v0 = vsel %vm1342_vm3, %v13099_v19, 0.0  ;;  %v13105_v8 = vpop.eup %11654  ;;  %v1499_v42 = vmul.f32 1.442695, %v1453_v56 }
 0x329   : > { %11664 = vpow2.f32 %v1501_v3  ;;  %v1462_v45 = vsub.f32 %v12939_v63, %v1414_v50  ;;  %v1411_v1 = vpop.xlane.xlu1 %1410  ;;  %1569 = vadd.xlane.f32.xlu1 %v1568_v29  ;;  %1593 = vadd.xlane.f32.xlu0 %v1592_v0  ;;  %v1565_v32 = vsel %vm1342_vm3, %v13105_v8, 0.0 }
 0x32a   : > { %v1461_v55 = vsub.f32 %v12944_v40, %v1411_v1  ;;  %11666 = vpow2.f32 %v1495_v21 }
 0x32b   : > { %v13109_v16 = vpop.eup %11656  ;;  %v1517_v11 = vmul.f32 1.442695, %v1462_v45 }
 0x32c   : > { %v1515_v47 = vmul.f32 1.442695, %v1461_v55  ;;  %v1574_v7 = vsel %vm1342_vm3, %v13109_v16, 0.0  ;;  %v13116_v57 = vpop.eup %11658 }
 0x32d   : > { %v1420_v63 = vpop.xlane.xlu0 %1419  ;;  %1566 = vadd.xlane.f32.xlu0 %v1565_v32  ;;  %1575 = vadd.xlane.f32.xlu1 %v1574_v7  ;;  %v1589_v26 = vsel %vm1342_vm3, %v13116_v57, 0.0 }
 0x32e   : > { %11668 = vpow2.f32 %v1515_v47  ;;  %v1464_v40 = vsub.f32 %v12953_v52, %v1420_v63  ;;  %v1417_v14 = vpop.xlane.xlu1 %1416 }
 0x32f   : > { %11670 = vpow2.f32 %v1517_v11  ;;  %v1463_v35 = vsub.f32 %v12956_v39, %v1417_v14 }
 0x330   : > { %v13120_v49 = vpop.eup %11660  ;;  %v1521_v4 = vmul.f32 1.442695, %v1464_v40 }
 0x331   : > { %v13124_v36 = vpop.eup %11662  ;;  %1590 = vadd.xlane.f32.xlu0 %v1589_v26  ;;  %v1595_v21 = vsel %vm1342_vm3, %v13120_v49, 0.0  ;;  %v1519_v3 = vmul.f32 1.442695, %v1463_v35  ;;  %v1426_v14 = vpop.xlane.xlu0 %1425 }
 0x332   : > { %11672 = vpow2.f32 %v1521_v4  ;;  %1596 = vadd.xlane.f32.xlu1 %v1595_v21  ;;  %v1598_v39 = vsel %vm1342_vm3, %v13124_v36, 0.0  ;;  %v1466_v35 = vsub.f32 %v12963_v30, %v1426_v14  ;;  %v1423_v21 = vpop.xlane.xlu1 %1422 }
 0x333   : > { %v13128_v52 = vpop.eup %11664  ;;  %11674 = vpow2.f32 %v1499_v42 }
 0x334   : > { %v1580_v50 = vsel %vm1342_vm3, %v13128_v52, 0.0  ;;  %v13134_v29 = vpop.eup %11666  ;;  %11676 = vpow2.f32 %v1519_v3  ;;  %v1525_v26 = vmul.f32 1.442695, %v1466_v35 }
 0x335   : > { %1599 = vadd.xlane.f32.xlu0 %v1598_v39  ;;  %v1571_v45 = vsel %vm1342_vm3, %v13134_v29, 0.0  ;;  %v1432_v42 = vpop.xlane.xlu0 %1431  ;;  %v1465_v39 = vsub.f32 %v12966_v62, %v1423_v21 }
 0x336   : > { %1581 = vadd.xlane.f32.xlu1 %v1580_v50  ;;  %11678 = vpow2.f32 %v1525_v26 }
 0x338   : > { %v13136_v0 = vpop.eup %11668 }
 0x339   : > { %v13140_v1 = vpop.eup %11670  ;;  %1572 = vadd.xlane.f32.xlu0 %v1571_v45  ;;  %v1601_v55 = vsel %vm1342_vm3, %v13136_v0, 0.0  ;;  %v1438_v4 = vpop.xlane.xlu0 %1437 }
 0x33a   : > { %1602 = vadd.xlane.f32.xlu1 %v1601_v55  ;;  %v1604_v11 = vsel %vm1342_vm3, %v13140_v1, 0.0  ;;  %v1470_v3 = vsub.f32 %v12985_v27, %v1438_v4  ;;  %v1429_v45 = vpop.xlane.xlu1 %1428  ;;  %v1523_v55 = vmul.f32 1.442695, %v1465_v39 }
 0x33c   : > { %v13144_v56 = vpop.eup %11672  ;;  %v1533_v50 = vmul.f32 1.442695, %v1470_v3 }
 0x33d   : > { %v13148_v47 = vpop.eup %11674  ;;  %1605 = vadd.xlane.f32.xlu0 %v1604_v11  ;;  %v1610_v32 = vsel %vm1342_vm3, %v13144_v56, 0.0  ;;  %v1468_v11 = vsub.f32 %v12973_v23, %v1432_v42 }
 0x33e   : > { %1611 = vadd.xlane.f32.xlu1 %v1610_v32  ;;  %v1577_v7 = vsel %vm1342_vm3, %v13148_v47, 0.0  ;;  %v13154_v63 = vpop.eup %11676  ;;  %11680 = vpow2.f32 %v1533_v50 }
 0x33f   : > { %v1607_v40 = vsel %vm1342_vm3, %v13154_v63, 0.0  ;;  %11682 = vpow2.f32 %v1523_v55  ;;  %v1529_v32 = vmul.f32 1.442695, %v1468_v11 }
 0x340   : > { %v13167_v30 = vpop.eup %11678 }
 0x341   : > { %1578 = vadd.xlane.f32.xlu0 %v1577_v7  ;;  %v1467_v7 = vsub.f32 %v12978_v58, %v1429_v45  ;;  %11684 = vpow2.f32 %v1529_v32  ;;  %v1616_v62 = vsel %vm1342_vm3, %v13167_v30, 0.0 }
 0x343   : > { %v1527_v14 = vmul.f32 1.442695, %v1467_v7 }
 0x345   : > { %1608 = vadd.xlane.f32.xlu0 %v1607_v40  ;;  %v1435_v40 = vpop.xlane.xlu1 %1434  ;;  %11686 = vpow2.f32 %v1527_v14  ;;  %v11100_v14 = vunpack.i.h.bf16 %v12735_v12 }
 0x346   : > { %v1469_v27 = vsub.f32 %v12988_v10, %v1435_v40 }
 0x348   : > { %v13172_v35 = vpop.eup %11680  ;;  %v1531_v23 = vmul.f32 1.442695, %v1469_v27  ;;  %v11099_v27 = vunpack.i.l.bf16 %v12735_v12 }
 0x349   : > { %v13174_v42 = vpop.eup %11682  ;;  %v1628_v58 = vsel %vm1342_vm3, %v13172_v35, 0.0 }
 0x34a   : > { %11688 = vpow2.f32 %v1531_v23  ;;  %v1613_v4 = vsel %vm1342_vm3, %v13174_v42, 0.0  ;;  %v10428_v12 = vpack.c.bf16 %v11100_v14, %v11099_v27 }
 0x34b   : > { %v13180_v26 = vpop.eup %11684 }
 0x34c   : > { %v1622_v10 = vsel %vm1342_vm3, %v13180_v26, 0.0 }
 0x34f   : > { %2354 = vrot.lane.b32.xlu1 %v12601_v31, %s12149_s17  ;;  %v13184_v21 = vpop.eup %11686 }
 0x350   : > { %v1619_v3 = vsel %vm1342_vm3, %v13184_v21, 0.0 }
 0x354   : > { %v13188_v39 = vpop.eup %11688 }
 0x355   : > { %v1625_v50 = vsel %vm1342_vm3, %v13188_v39, 0.0 }
 0x35b   : > { %2352 = vrot.lane.b32.xlu0 %v12586_v13, %s12149_s17 }
 0x373   : > { %1617 = vadd.xlane.f32.xlu1 %v1616_v62 }
 0x377   : > { %1629 = vadd.xlane.f32.xlu1 %v1628_v58 }
 0x37a   : > { %1614 = vadd.xlane.f32.xlu0 %v1613_v4 }
 0x37e   : > { %1623 = vadd.xlane.f32.xlu0 %v1622_v10  ;;  %v11110_v10 = vunpack.i.h.bf16 %v12744_v43 }
 0x382   : > { %1620 = vadd.xlane.f32.xlu0 %v1619_v3  ;;  %v11109_v3 = vunpack.i.l.bf16 %v12744_v43  ;;  %v11119_v43 = vunpack.i.l.bf16 %v12746_v38 }
 0x386   : > { %1626 = vadd.xlane.f32.xlu0 %v1625_v50  ;;  %v10432_v50 = vpack.c.bf16 %v11110_v10, %v11109_v3 }
 0x388   : > { %11212 = vrot.lane.b32.xlu1 %v12460_v59, %s12148_s16 }
 0x38a   : > { %v1540_v45 = vpop.xlane.xlu0 %1539 }
 0x38b   : > { %11690 = vrcp.f32 %v1540_v45  ;;  %v1537_v55 = vpop.xlane.xlu1 %1536 }
 0x38c   : > { %11692 = vrcp.f32 %v1537_v55  ;;  %2358 = vrot.lane.b32.xlu1 %v12613_v46, %s12149_s17  ;;  %v11120_v55 = vunpack.i.h.bf16 %v12746_v38  ;;  %v11130_v38 = vunpack.i.h.bf16 %v12753_v41 }
 0x38e   : > { %v10436_v14 = vpack.c.bf16 %v11120_v55, %v11119_v43  ;;  %v16186_v55 = vld [vmem:[#allocation38_spill] sm:$0xff]  ;;  %v16187_v43 = vld [vmem:[#allocation35_spill] sm:$0xff] }
 0x38f   : > { %v1546_v11 = vpop.xlane.xlu0 %1545 }
 0x390   : > { %2362 = vrot.lane.b32.xlu1 %v12629_v51, %s12149_s17  ;;  %11694 = vrcp.f32 %v1546_v11 }
 0x393   : > { %v1543_v32 = vpop.xlane.xlu1 %1542 }
 0x394   : > { %2686 = vrot.lane.b32.xlu1 %v12395_v20, %s12149_s17  ;;  %11696 = vrcp.f32 %v1543_v32 }
 0x395   : > { %v11691_v7 = vpop.eup %11690 }
 0x396   : > { %v11693_v40 = vpop.eup %11692  ;;  %v1634_v23 = vmul.f32 %v11691_v7, %v13034_v60 }
 0x397   : > { %v1632_v62 = vmul.f32 %v11693_v40, %v13036_v22  ;;  %v1549_v58 = vpop.xlane.xlu1 %1548  ;;  %v1552_v4 = vpop.xlane.xlu0 %1551  ;;  %v11129_v40 = vunpack.i.l.bf16 %v12753_v41 }
 0x398   : > { %2521 = vrot.lane.b32.xlu1 %v12657_v48, %s12149_s17  ;;  %11698 = vrcp.f32 %v1549_v58 }
 0x399   : > { %9480 = vmatprep.mubr.msk.f32.mxu0 %vm1342_vm3, %v1632_v62  ;;  %11700 = vrcp.f32 %v1552_v4  ;;  %v13235_v41 = vpack.c.bf16 %v11130_v38, %v11129_v40  ;;  %v16190_v38 = vld [vmem:[#allocation46_spill] sm:$0xff] }
 0x39a   : > { %9481 = vmatmul.mubr.msk.f32.vlgmr.msra.gmra.mrb[40].mxu0 %vm1342_vm3, %v1634_v23  ;;  %v11695_v22 = vpop.eup %11694  ;;  %v16181_v23 = vld [vmem:[#allocation18_spill] sm:$0xff] }
 0x39b   : > { %10427 = vmatpush3.bf16.msra.mxu0 %v12737_v33  ;;  %v1558_v60 = vpop.xlane.xlu0 %1557  ;;  %v1638_v32 = vmul.f32 %v11695_v22, %v13044_v6  ;;  %v16180_v6 = vld [vmem:[#allocation41_spill] sm:$0xff] }
 0x39c   : > { %10429 = vmatprep.subr.bf16.mxu0 %v10428_v12  ;;  %11207 = vrot.lane.b32.xlu0 %v12436_v37, %s12148_s16  ;;  %11702 = vrcp.f32 %v1558_v60 }
 0x39d   : > { %11222 = vrot.lane.b32.xlu1 %v12484_v18, %s12148_s16 }
 0x39e   : > { %v11697_v45 = vpop.eup %11696 }
 0x39f   : > { %10431 = vmatpush3.bf16.msra.mxu0 %v10428_v12  ;;  %v1555_v11 = vpop.xlane.xlu0 %1554  ;;  %v1636_v33 = vmul.f32 %v11697_v45, %v13048_v15  ;;  %v16184_v12 = vld [vmem:[#allocation34_spill] sm:$0xff]  ;;  %v16185_v45 = vld [vmem:[#allocation33_spill] sm:$0xff] }
 0x3a0   : > { %10433 = vmatprep.subr.bf16.mxu0 %v10432_v50  ;;  %2356 = vrot.lane.b32.xlu0 %v12604_v34, %s12149_s17  ;;  %11704 = vrcp.f32 %v1555_v11 }
 0x3a1   : > { %2527 = vrot.lane.b32.xlu1 %v12695_v5, %s12149_s17  ;;  %9483 = vmatprep.mubr.msk.f32.mxu0 %vm1342_vm3, %v1636_v33 }
 0x3a2   : > { %v11699_v7 = vpop.eup %11698  ;;  %9484 = vmatmul.mubr.msk.f32.gmra.mrb[42].mxu0 %vm1342_vm3, %v1638_v32  ;;  %v16189_v32 = vld [vmem:[#allocation39_spill] sm:$0xff] }
 0x3a3   : > { %v11701_v27 = vpop.eup %11700  ;;  %10435 = vmatpush3.bf16.msra.mxu0 %v10432_v50  ;;  %v1640_v15 = vmul.f32 %v11699_v7, %v13052_v28  ;;  %v16182_v28 = vld [vmem:[#allocation44_spill] sm:$0xff] }
 0x3a4   : > { %2360 = vrot.lane.b32.xlu0 %v12616_v53, %s12149_s17  ;;  %10437 = vmatprep.subr.bf16.mxu0 %v10436_v14  ;;  %v1642_v62 = vmul.f32 %v11701_v27, %v13054_v9  ;;  %v16183_v9 = vld [vmem:[#allocation30_spill] sm:$0xff] }
 0x3a5   : > { %2531 = vrot.lane.b32.xlu1 %v16180_v6, %s12149_s17  ;;  %9486 = vmatprep.mubr.msk.f32.mxu0 %vm1342_vm3, %v1640_v15 }
 0x3a6   : > { %9487 = vmatmul.mubr.msk.f32.gmra.mrb[44].mxu0 %vm1342_vm3, %v1642_v62  ;;  %v11703_v58 = vpop.eup %11702 }
 0x3a7   : > { %10439 = vmatpush3.bf16.msra.mxu0 %v10436_v14  ;;  %v1646_v60 = vmul.f32 %v11703_v58, %v13060_v25  ;;  %v16188_v25 = vld [vmem:[#allocation42_spill] sm:$0xff]  ;;  %v16191_v14 = vld [vmem:[#allocation52_spill] sm:$0xff] }
 0x3a8   : > { %11217 = vrot.lane.b32.xlu0 %v16181_v23, %s12148_s16  ;;  %10457 = vmatprep.subr.bf16.mxu0 %v13235_v41  ;;  %v11150_v27 = vunpack.i.h.bf16 %v16191_v14  ;;  %v11149_v15 = vunpack.i.l.bf16 %v16191_v14 }
 0x3a9   : > { %2857 = vrot.lane.b32.xlu1 %v16182_v28, %s12149_s17 }
 0x3aa   : > { %v1564_v4 = vpop.xlane.xlu0 %1563  ;;  %v11705_v10 = vpop.eup %11704 }
 0x3ab   : > { %v1644_v3 = vmul.f32 %v11705_v10, %v13065_v61 }
 0x3ac   : > { %2688 = vrot.lane.b32.xlu0 %v16183_v9, %s12149_s17 }
 0x3ad   : > { %2692 = vrot.lane.b32.xlu1 %v16184_v12, %s12149_s17  ;;  %9489 = vmatprep.mubr.msk.f32.mxu0 %vm1342_vm3, %v1644_v3 }
 0x3ae   : > { %v1588_v22 = vpop.xlane.xlu1 %1587  ;;  %9490 = vmatmul.mubr.msk.f32.gmra.mrb[46].mxu0 %vm1342_vm3, %v1646_v60  ;;  %v16192_v60 = vld [vmem:[#allocation43_spill] sm:$0xff] }
 0x3af   : > { %11706 = vrcp.f32 %v1588_v22  ;;  %v1585_v50 = vpop.xlane.xlu0 %1584 }
 0x3b0   : > { %11708 = vrcp.f32 %v1585_v50  ;;  %2523 = vrot.lane.b32.xlu0 %v16185_v45, %s12149_s17  ;;  %v16193_v50 = vld [vmem:[#allocation59_spill] sm:$0xff] }
 0x3b1   : > { %2696 = vrot.lane.b32.xlu1 %v16186_v55, %s12149_s17  ;;  %11710 = vrcp.f32 %v1564_v4 }
 0x3b2   : > { %v1561_v61 = vpop.xlane.xlu1 %1560 }
 0x3b3   : > { %11712 = vrcp.f32 %v1561_v61  ;;  %v11135_v61 = vunpack.i.h.bf16 %v16193_v50 }
 0x3b4   : > { %2525 = vrot.lane.b32.xlu0 %v16187_v43, %s12149_s17 }
 0x3b5   : > { %2700 = vrot.lane.b32.xlu1 %v16188_v25, %s12149_s17  ;;  %v16194_v25 = vld [vmem:[#allocation48_spill] sm:$0xff] }
 0x3b6   : > { %v1570_v11 = vpop.xlane.xlu1 %1569  ;;  %v1594_v33 = vpop.xlane.xlu0 %1593 }
 0x3b7   : > { %11714 = vrcp.f32 %v1570_v11  ;;  %v10478_v11 = vpack.c.bf16 %v11150_v27, %v11149_v15  ;;  %v16197_v27 = vld [vmem:[#allocation32_spill] sm:$0xff]  ;;  %v16199_v15 = vld [vmem:[#allocation61_spill] sm:$0xff] }
 0x3b8   : > { %2529 = vrot.lane.b32.xlu0 %v16189_v32, %s12149_s17 }
 0x3b9   : > { %v11707_v7 = vpop.eup %11706  ;;  %2861 = vrot.lane.b32.xlu1 %v16190_v38, %s12149_s17  ;;  %v11134_v38 = vunpack.i.l.bf16 %v16193_v50 }
 0x3ba   : > { %v11709_v40 = vpop.eup %11708  ;;  %v1576_v62 = vpop.xlane.xlu1 %1575  ;;  %v1666_v3 = vmul.f32 %v11707_v7, %v13081_v2  ;;  %v16195_v7 = vld [vmem:[#allocation51_spill] sm:$0xff] }
 0x3bb   : > { %v1567_v58 = vpop.xlane.xlu0 %1566  ;;  %v1664_v4 = vmul.f32 %v11709_v40, %v13083_v17  ;;  %v11711_v10 = vpop.eup %11710 }
 0x3bc   : > { %11716 = vrcp.f32 %v1567_v58  ;;  %2855 = vrot.lane.b32.xlu0 %v16192_v60, %s12149_s17  ;;  %v1650_v58 = vmul.f32 %v11711_v10, %v13075_v54 }
 0x3bd   : > { %v11713_v22 = vpop.eup %11712  ;;  %2865 = vrot.lane.b32.xlu1 %v16194_v25, %s12149_s17  ;;  %9536 = vmatprep.mubr.msk.f32.mxu1 %vm1342_vm3, %v1664_v4  ;;  %11718 = vrcp.f32 %v1594_v33  ;;  %v16198_v33 = vld [vmem:[#allocation50_spill] sm:$0xff]  ;;  %v11145_v4 = vunpack.i.h.bf16 %v16199_v15 }
 0x3be   : > { %9537 = vmatmul.mubr.msk.f32.vlgmr.msra.gmra.mrb[24].mxu1 %vm1342_vm3, %v1666_v3  ;;  %v1648_v2 = vmul.f32 %v11713_v22, %v13087_v44  ;;  %v10460_v44 = vpack.c.bf16 %v11135_v61, %v11134_v38  ;;  %v11144_v3 = vunpack.i.l.bf16 %v16199_v15  ;;  %v16200_v22 = vld [vmem:[#allocation63_spill] sm:$0xff]  ;;  %v16202_v61 = vld [vmem:[#allocation5_spill] sm:$0xff] }
 0x3bf   : > { %v1591_v17 = vpop.xlane.xlu0 %1590  ;;  %10477 = vmatpush3.bf16.xpose.msk.msra.mxu1 %vm12548_vm2, %v16195_v7  ;;  %v1597_v14 = vpop.xlane.xlu1 %1596  ;;  %v11155_v50 = vunpack.i.h.bf16 %v16200_v22  ;;  %v11154_v54 = vunpack.i.l.bf16 %v16200_v22  ;;  %v16201_v7 = vld [vmem:[#allocation36_spill] sm:$0xff] }
 0x3c0   : > { %11720 = vrcp.f32 %v1591_v17  ;;  %10480 = vmatprep.subr.msk.bf16.mxu1 %vm12548_vm2, %v10478_v11  ;;  %2690 = vrot.lane.b32.xlu0 %v16197_v27, %s12149_s17  ;;  %v10464_v15 = vpack.c.bf16 %v11145_v4, %v11144_v3  ;;  %v16204_v4 = vld [vmem:[#allocation40_spill] sm:$0xff]  ;;  %v16205_v3 = vld [vmem:[#allocation7_spill] sm:$0xff] }
 0x3c1   : > { %11722 = vrcp.f32 %v1597_v14  ;;  %2869 = vrot.lane.b32.xlu1 %v16198_v33, %s12149_s17  ;;  %9508 = vmatprep.mubr.msk.f32.mxu0 %vm1342_vm3, %v1648_v2  ;;  %v11715_v38 = vpop.eup %11714  ;;  %v10484_v14 = vpack.c.bf16 %v11155_v50, %v11154_v54  ;;  %v16206_v50 = vld [vmem:[#allocation65_spill] sm:$0xff] }
 0x3c2   : > { %9509 = vmatmul.mubr.msk.f32.vlgmr.msra.gmra.mrb[48].mxu0 %vm1342_vm3, %v1650_v58  ;;  %v16203_v58 = vld [vmem:[#allocation68_spill] sm:$0xff]  ;;  %v11160_v54 = vunpack.i.h.bf16 %v16206_v50  ;;  %v11159_v55 = vunpack.i.l.bf16 %v16206_v50 }
 0x3c3   : > { %v1600_v10 = vpop.xlane.xlu0 %1599  ;;  %10459 = vmatpush3.bf16.msra.mxu0 %v13235_v41  ;;  %v1582_v17 = vpop.xlane.xlu1 %1581  ;;  %v11205_v33 = vunpack.i.h.bf16 %v16203_v58  ;;  %v11204_v41 = vunpack.i.l.bf16 %v16203_v58 }
 0x3c4   : > { %11724 = vrcp.f32 %v1600_v10  ;;  %10461 = vmatprep.subr.bf16.mxu0 %v10460_v44  ;;  %2694 = vrot.lane.b32.xlu0 %v16201_v7, %s12149_s17 }
 0x3c5   : > { %11232 = vrot.lane.b32.xlu1 %v16202_v61, %s12150_s13  ;;  %11726 = vrcp.f32 %v1576_v62 }
 0x3c6   : > { %v11717_v2 = vpop.eup %11716 }
 0x3c7   : > { %v1573_v22 = vpop.xlane.xlu0 %1572  ;;  %10463 = vmatpush3.bf16.msra.mxu0 %v10460_v44  ;;  %10483 = vmatpush3.bf16.xpose.msk.msra.mxu1 %vm12548_vm2, %v10478_v11  ;;  %v1603_v10 = vpop.xlane.xlu1 %1602  ;;  %v1652_v25 = vmul.f32 %v11717_v2, %v13105_v8  ;;  %v1654_v44 = vmul.f32 %v11715_v38, %v13096_v24 }
 0x3c8   : > { %11728 = vrcp.f32 %v1573_v22  ;;  %v11719_v7 = vpop.eup %11718  ;;  %10465 = vmatprep.subr.bf16.mxu0 %v10464_v15  ;;  %10486 = vmatprep.subr.msk.bf16.mxu1 %vm12548_vm2, %v10484_v14  ;;  %v16207_v22 = vld [vmem:[#allocation53_spill] sm:$0xff] }
 0x3c9   : > { %11730 = vrcp.f32 %v1603_v10  ;;  %2698 = vrot.lane.b32.xlu0 %v16204_v4, %s12149_s17  ;;  %11242 = vrot.lane.b32.xlu1 %v16205_v3, %s12150_s13  ;;  %v11165_v8 = vunpack.i.h.bf16 %v16207_v22  ;;  %v11164_v2 = vunpack.i.l.bf16 %v16207_v22  ;;  %v10468_v4 = vpack.c.bf16 %v11205_v33, %v11204_v41 }
 0x3ca   : > { %v11721_v62 = vpop.eup %11720  ;;  %9511 = vmatprep.mubr.msk.f32.mxu0 %vm1342_vm3, %v1652_v25  ;;  %v1670_v38 = vmul.f32 %v11719_v7, %v13099_v19  ;;  %v16208_v25 = vld [vmem:[#allocation45_spill] sm:$0xff] }
 0x3cb   : > { %v11723_v11 = vpop.eup %11722  ;;  %v1606_v58 = vpop.xlane.xlu0 %1605  ;;  %v1668_v10 = vmul.f32 %v11721_v62, %v13116_v57  ;;  %9512 = vmatmul.mubr.msk.f32.gmra.mrb[50].mxu0 %vm1342_vm3, %v1654_v44  ;;  %v10490_v22 = vpack.c.bf16 %v11165_v8, %v11164_v2  ;;  %v16209_v57 = vld [vmem:[#allocation13_spill] sm:$0xff] }
 0x3cc   : > { %11732 = vrcp.f32 %v1606_v58  ;;  %v1672_v24 = vmul.f32 %v11723_v11, %v13120_v49  ;;  %10467 = vmatpush3.bf16.msra.mxu0 %v10464_v15  ;;  %v13324_v15 = vpack.c.bf16 %v11160_v54, %v11159_v55  ;;  %v1612_v41 = vpop.xlane.xlu1 %1611  ;;  %v16213_v8 = vld [vmem:[#allocation49_spill] sm:$0xff]  ;;  %v16214_v58 = vld [vmem:[#allocation15_spill] sm:$0xff] }
 0x3cd   : > { %9539 = vmatprep.mubr.msk.f32.mxu1 %vm1342_vm3, %v1668_v10  ;;  %10469 = vmatprep.subr.bf16.mxu0 %v10468_v4  ;;  %11734 = vrcp.f32 %v1582_v17  ;;  %v16215_v10 = vld [vmem:[#allocation3_spill] sm:$0xff] }
 0x3ce   : > { %v11725_v27 = vpop.eup %11724  ;;  %2859 = vrot.lane.b32.xlu0 %v16208_v25, %s12149_s17  ;;  %11252 = vrot.lane.b32.xlu1 %v16209_v57, %s12150_s13 }
 0x3cf   : > { %9540 = vmatmul.mubr.msk.f32.gmra.mrb[26].mxu1 %vm1342_vm3, %v1670_v38  ;;  %v1579_v33 = vpop.xlane.xlu0 %1578  ;;  %v1674_v49 = vmul.f32 %v11725_v27, %v13124_v36  ;;  %v11727_v19 = vpop.eup %11726  ;;  %v16210_v36 = vld [vmem:[#allocation47_spill] sm:$0xff]  ;;  %v16211_v27 = vld [vmem:[#allocation56_spill] sm:$0xff] }
 0x3d0   : > { %9542 = vmatprep.mubr.msk.f32.mxu1 %vm1342_vm3, %v1672_v24  ;;  %10489 = vmatpush3.bf16.xpose.msk.msra.mxu1 %vm12548_vm2, %v10484_v14  ;;  %11736 = vrcp.f32 %v1579_v33  ;;  %v11180_v7 = vunpack.i.h.bf16 %v16211_v27  ;;  %v11179_v62 = vunpack.i.l.bf16 %v16211_v27  ;;  %v16212_v14 = vld [vmem:[#allocation14_spill] sm:$0xff]  ;;  %v1658_v11 = vmul.f32 %v11727_v19, %v13109_v16  ;;  %v16216_v24 = vld [vmem:[#allocation67_spill] sm:$0xff]  ;;  %v16217_v38 = vld [vmem:[#allocation60_spill] sm:$0xff] }
 0x3d1   : > { %10471 = vmatpush3.bf16.msra.mxu0 %v10468_v4  ;;  %10492 = vmatprep.subr.msk.bf16.mxu1 %vm12548_vm2, %v10490_v22  ;;  %11738 = vrcp.f32 %v1612_v41  ;;  %v11190_v33 = vunpack.i.h.bf16 %v16217_v38 }
 0x3d2   : > { %v11729_v17 = vpop.eup %11728  ;;  %10498 = vmatprep.subr.msk.bf16.mxu0 %vm12548_vm2, %v13324_v15  ;;  %2863 = vrot.lane.b32.xlu0 %v16210_v36, %s12149_s17  ;;  %v10520_v2 = vpack.c.bf16 %v11180_v7, %v11179_v62 }
 0x3d3   : > { %v11731_v55 = vpop.eup %11730  ;;  %11262 = vrot.lane.b32.xlu1 %v16212_v14, %s12150_s13  ;;  %9543 = vmatmul.mubr.msk.f32.gmra.mrb[28].mxu1 %vm1342_vm3, %v1674_v49  ;;  %v1609_v4 = vpop.xlane.xlu0 %1608  ;;  %v1656_v44 = vmul.f32 %v11729_v17, %v13134_v29  ;;  %v16218_v17 = vld [vmem:[#allocation6_spill] sm:$0xff] }
 0x3d4   : > { %11740 = vrcp.f32 %v1609_v4  ;;  %v1676_v50 = vmul.f32 %v11731_v55, %v13136_v0  ;;  %v16219_v55 = vld [vmem:[#allocation54_spill] sm:$0xff] }
 0x3d5   : > { %9514 = vmatprep.mubr.msk.f32.mxu0 %vm1342_vm3, %v1656_v44  ;;  %v11170_v27 = vunpack.i.h.bf16 %v16219_v55  ;;  %v11169_v7 = vunpack.i.l.bf16 %v16219_v55 }
 0x3d6   : > { %v11733_v54 = vpop.eup %11732  ;;  %2867 = vrot.lane.b32.xlu0 %v16213_v8, %s12149_s17  ;;  %9515 = vmatmul.mubr.msk.f32.gmra.mrb[52].mxu0 %vm1342_vm3, %v1658_v11  ;;  %v2355_v11 = vpop.permute.xlu1 %2354 }
 0x3d7   : > { %11272 = vrot.lane.b32.xlu1 %v16214_v58, %s12150_s13  ;;  %9545 = vmatprep.mubr.msk.f32.mxu1 %vm1342_vm3, %v1676_v50  ;;  %v1678_v29 = vmul.f32 %v11733_v54, %v13140_v1  ;;  %v11735_v16 = vpop.eup %11734  ;;  %v11189_v1 = vunpack.i.l.bf16 %v16217_v38  ;;  %v2353_v4 = vpop.permute.xlu0 %2352  ;;  %v16221_v50 = vld [vmem:[#allocation8_spill] sm:$0xff]  ;;  %v10502_v54 = vpack.c.bf16 %v11170_v27, %v11169_v7  ;;  %v16229_v27 = vld [vmem:[#allocation21_spill] sm:$0xff] }
 0x3d8   : > { %10495 = vmatpush3.bf16.xpose.msk.msra.mxu1 %vm12548_vm2, %v10490_v22  ;;  %v1662_v49 = vmul.f32 %v11735_v16, %v13128_v52  ;;  %v16224_v16 = vld [vmem:[#allocation55_spill] sm:$0xff]  ;;  %v16230_v7 = vld [vmem:[#allocation64_spill] sm:$0xff] }
 0x3d9   : > { %10522 = vmatprep.subr.msk.bf16.mxu1 %vm12548_vm2, %v10520_v2  ;;  %9546 = vmatmul.mubr.msk.f32.gmra.mrb[30].mxu1 %vm1342_vm3, %v1678_v29  ;;  %v10526_v62 = vpack.c.bf16 %v11190_v33, %v11189_v1  ;;  %v16226_v1 = vld [vmem:[#allocation11_spill] sm:$0xff] }
 0x3da   : > { %v11737_v0 = vpop.eup %11736  ;;  %11227 = vrot.lane.b32.xlu0 %v16215_v10, %s12150_s13  ;;  %9592 = vmatprep.mubr.msk.f32.mxu1 %vm689_vm1, %v16216_v24  ;;  %v11174_v24 = vunpack.i.l.bf16 %v16224_v16 }
 0x3db   : > { %11282 = vrot.lane.b32.xlu1 %v12436_v37, %s12150_s13  ;;  %v1660_v22 = vmul.f32 %v11737_v0, %v13148_v47  ;;  %v11739_v41 = vpop.eup %11738  ;;  %v16220_v47 = vld [vmem:[#allocation57_spill] sm:$0xff]  ;;  %v11175_v0 = vunpack.i.h.bf16 %v16224_v16  ;;  %v16232_v16 = vld [vmem:[#allocation4_spill] sm:$0xff] }
 0x3dc   : > { %v1682_v44 = vmul.f32 %v11739_v41, %v13144_v56 }
 0x3dd   : > { %9517 = vmatprep.mubr.msk.f32.mxu0 %vm1342_vm3, %v1660_v22  ;;  %v10508_v33 = vpack.c.bf16 %v11175_v0, %v11174_v24  ;;  %v16227_v22 = vld [vmem:[#allocation58_spill] sm:$0xff] }
 0x3de   : > { %v11741_v19 = vpop.eup %11740  ;;  %11237 = vrot.lane.b32.xlu0 %v16218_v17, %s12150_s13  ;;  %9518 = vmatmul.mubr.msk.f32.gmra.mrb[54].mxu0 %vm1342_vm3, %v1662_v49  ;;  %v11185_v49 = vunpack.i.h.bf16 %v16227_v22  ;;  %v11184_v41 = vunpack.i.l.bf16 %v16227_v22 }
 0x3df   : > { %11292 = vrot.lane.b32.xlu1 %v12460_v59, %s12150_s13  ;;  %9593 = vmatmul.mubr.msk.f32.vlgmr.msra.gmra.mrb[32].mxu1 %vm689_vm1, %v16220_v47  ;;  %v1680_v52 = vmul.f32 %v11741_v19, %v13154_v63  ;;  %v16222_v63 = vld [vmem:[#allocation62_spill] sm:$0xff]  ;;  %v16228_v19 = vld [vmem:[#allocation16_spill] sm:$0xff] }
 0x3e0   : > { %9595 = vmatprep.mubr.msk.f32.mxu1 %vm689_vm1, %v2353_v4  ;;  %10525 = vmatpush3.bf16.xpose.msk.msra.mxu1 %vm12548_vm2, %v10520_v2  ;;  %v11195_v29 = vunpack.i.h.bf16 %v16222_v63  ;;  %v11194_v56 = vunpack.i.l.bf16 %v16222_v63  ;;  %v16223_v2 = vld [vmem:[#allocation9_spill] sm:$0xff]  ;;  %v10514_v55 = vpack.c.bf16 %v11185_v49, %v11184_v41  ;;  %v11199_v4 = vunpack.i.l.bf16 %v16230_v7 }
 0x3e1   : > { %10528 = vmatprep.subr.msk.bf16.mxu1 %vm12548_vm2, %v10526_v62  ;;  %9564 = vmatprep.mubr.msk.f32.mxu0 %vm1342_vm3, %v1680_v52  ;;  %v16231_v52 = vld [vmem:[#allocation23_spill] sm:$0xff] }
 0x3e2   : > { %11247 = vrot.lane.b32.xlu0 %v16221_v50, %s12150_s13  ;;  %9565 = vmatmul.mubr.msk.f32.vlgmr.msra.gmra.mrb[56].mxu0 %vm1342_vm3, %v1682_v44  ;;  %v10532_v38 = vpack.c.bf16 %v11195_v29, %v11194_v56 }
 0x3e3   : > { %11297 = vrot.lane.b32.xlu1 %v16215_v10, %s12151_s14  ;;  %9596 = vmatmul.mubr.msk.f32.gmra.mrb[34].mxu1 %vm689_vm1, %v2355_v11 }
 0x3e4   : > { %10501 = vmatpush3.bf16.xpose.msk.msra.mxu0 %vm12548_vm2, %v13324_v15  ;;  %v16225_v15 = vld [vmem:[#allocation10_spill] sm:$0xff] }
 0x3e5   : > { %10504 = vmatprep.subr.msk.bf16.mxu0 %vm12548_vm2, %v10502_v54 }
 0x3e6   : > { %11257 = vrot.lane.b32.xlu0 %v16223_v2, %s12150_s13 }
 0x3e7   : > { %11312 = vrot.lane.b32.xlu1 %v16202_v61, %s12151_s14 }
 0x3e8   : > { %10531 = vmatpush3.bf16.xpose.msk.msra.mxu1 %vm12548_vm2, %v10526_v62  ;;  %v11200_v62 = vunpack.i.h.bf16 %v16230_v7 }
 0x3e9   : > { %10534 = vmatprep.subr.msk.bf16.mxu1 %vm12548_vm2, %v10532_v38 }
 0x3ea   : > { %11267 = vrot.lane.b32.xlu0 %v16225_v15, %s12150_s13  ;;  %v13440_v47 = vpack.c.bf16 %v11200_v62, %v11199_v4 }
 0x3eb   : > { %11322 = vrot.lane.b32.xlu1 %v16221_v50, %s12151_s14 }
 0x3ec   : > { %10507 = vmatpush3.bf16.xpose.msk.msra.mxu0 %vm12548_vm2, %v10502_v54 }
 0x3ed   : > { %10510 = vmatprep.subr.msk.bf16.mxu0 %vm12548_vm2, %v10508_v33 }
 0x3ee   : > { %11277 = vrot.lane.b32.xlu0 %v16226_v1, %s12150_s13 }
 0x3ef   : > { %11332 = vrot.lane.b32.xlu1 %v16223_v2, %s12151_s14 }
 0x3f0   : > { %10537 = vmatpush3.bf16.xpose.msk.msra.mxu1 %vm12548_vm2, %v10532_v38 }
 0x3f2   : > { %11287 = vrot.lane.b32.xlu0 %v16228_v19, %s12150_s13 }
 0x3f3   : > { %4160 = vrot.lane.b32.xlu1 %v16229_v27, %s12152_s15 }
 0x3f4   : > { %10513 = vmatpush3.bf16.xpose.msk.msra.mxu0 %vm12548_vm2, %v10508_v33 }
 0x3f5   : > { %10516 = vmatprep.subr.msk.bf16.mxu0 %vm12548_vm2, %v10514_v55 }
 0x3f6   : > { %11302 = vrot.lane.b32.xlu0 %v16181_v23, %s12150_s13 }
 0x3f7   : > { %11352 = vrot.lane.b32.xlu1 %v16212_v14, %s12151_s14 }
 0x3fa   : > { %11307 = vrot.lane.b32.xlu0 %v12484_v18, %s12150_s13 }
 0x3fb   : > { %11362 = vrot.lane.b32.xlu1 %v16228_v19, %s12151_s14 }
 0x3fc   : > { %10519 = vmatpush3.bf16.xpose.msk.msra.mxu0 %vm12548_vm2, %v10514_v55 }
 0x3fd   : > { %10546 = vmatprep.subr.msk.bf16.mxu0 %vm12548_vm2, %v13440_v47 }
 0x3fe   : > { %11317 = vrot.lane.b32.xlu0 %v16218_v17, %s12151_s14 }
 0x3ff   : > { %4329 = vrot.lane.b32.xlu1 %v16231_v52, %s12152_s15 }
 0x400   : > { %v1618_v44 = vpop.xlane.xlu1 %1617 }
 0x401   : > { %11742 = vrcp.f32 %v1618_v44 }
 0x402   : > { %11327 = vrot.lane.b32.xlu0 %v16205_v3, %s12151_s14 }
 0x404   : > { %v1630_v11 = vpop.xlane.xlu1 %1629 }
 0x406   : > { %11337 = vrot.lane.b32.xlu0 %v16225_v15, %s12151_s14 }
 0x407   : > { %v1615_v54 = vpop.xlane.xlu0 %1614 }
 0x408   : > { %11744 = vrcp.f32 %v1615_v54  ;;  %v11213_v63 = vpop.permute.xlu1 %11212 }
 0x40a   : > { %11342 = vrot.lane.b32.xlu0 %v16209_v57, %s12151_s14 }
 0x40b   : > { %v1624_v29 = vpop.xlane.xlu0 %1623  ;;  %v11743_v38 = vpop.eup %11742 }
 0x40c   : > { %v2359_v56 = vpop.permute.xlu1 %2358  ;;  %11746 = vrcp.f32 %v1624_v29  ;;  %v1686_v55 = vmul.f32 %v11743_v38, %v13167_v30 }
 0x40e   : > { %4158 = vrot.lane.b32.xlu0 %v16232_v16, %s12152_s15 }
 0x40f   : > { %v1621_v0 = vpop.xlane.xlu0 %1620 }
 0x410   : > { %11748 = vrcp.f32 %v1621_v0  ;;  %v2363_v24 = vpop.permute.xlu1 %2362 }
 0x411   : > { %11750 = vrcp.f32 %v1630_v11  ;;  %v16233_v11 = vld [vmem:[#allocation20_spill] sm:$0xff] }
 0x412   : > { %11347 = vrot.lane.b32.xlu0 %v16226_v1, %s12151_s14  ;;  %v11745_v33 = vpop.eup %11744 }
 0x413   : > { %v1627_v22 = vpop.xlane.xlu0 %1626  ;;  %v1684_v49 = vmul.f32 %v11745_v33, %v13174_v42 }
 0x414   : > { %11752 = vrcp.f32 %v1627_v22  ;;  %v2687_v41 = vpop.permute.xlu1 %2686 }
 0x415   : > { %9567 = vmatprep.mubr.msk.f32.mxu0 %vm1342_vm3, %v1684_v49 }
 0x416   : > { %11357 = vrot.lane.b32.xlu0 %v16214_v58, %s12151_s14  ;;  %9568 = vmatmul.mubr.msk.f32.gmra.mrb[58].mxu0 %vm1342_vm3, %v1686_v55  ;;  %v11747_v54 = vpop.eup %11746 }
 0x417   : > { %v11208_v7 = vpop.permute.xlu0 %11207  ;;  %v1690_v33 = vmul.f32 %v11747_v54, %v13180_v26  ;;  %v11215_v26 = vunpack.i.h.bf16 %v11213_v63 }
 0x418   : > { %v11210_v62 = vunpack.i.h.bf16 %v11208_v7  ;;  %v11209_v4 = vunpack.i.l.bf16 %v11208_v7  ;;  %v2522_v44 = vpop.permute.xlu1 %2521 }
 0x41a   : > { %4327 = vrot.lane.b32.xlu0 %v16233_v11, %s12152_s15  ;;  %v11749_v42 = vpop.eup %11748  ;;  %v10538_v29 = vpack.c.bf16 %v11210_v62, %v11209_v4  ;;  %v16234_v4 = vld [vmem:[#allocation69_spill] sm:$0xff] }
 0x41b   : > { %v2357_v0 = vpop.permute.xlu0 %2356  ;;  %v1688_v30 = vmul.f32 %v11749_v42, %v13184_v21  ;;  %v11751_v22 = vpop.eup %11750 }
 0x41c   : > { %v11223_v38 = vpop.permute.xlu1 %11222  ;;  %9598 = vmatprep.mubr.msk.f32.mxu1 %vm689_vm1, %v2357_v0  ;;  %10540 = vmatprep.subr.msk.bf16.mxu1 %vm12548_vm2, %v10538_v29  ;;  %v1694_v62 = vmul.f32 %v11751_v22, %v13172_v35 }
 0x41d   : > { %9570 = vmatprep.mubr.msk.f32.mxu0 %vm1342_vm3, %v1688_v30  ;;  %9599 = vmatmul.mubr.msk.f32.gmra.mrb[36].mxu1 %vm689_vm1, %v2359_v56  ;;  %v11214_v56 = vunpack.i.l.bf16 %v11213_v63  ;;  %v11224_v22 = vunpack.i.l.bf16 %v11223_v38 }
 0x41e   : > { %v11753_v49 = vpop.eup %11752  ;;  %10543 = vmatpush3.bf16.xpose.msk.msra.mxu1 %vm12548_vm2, %v10538_v29  ;;  %9571 = vmatmul.mubr.msk.f32.gmra.mrb[60].mxu0 %vm1342_vm3, %v1690_v33  ;;  %v16235_v29 = vld [vmem:[#allocation66_spill] sm:$0xff] }
 0x41f   : > { %v2361_v21 = vpop.permute.xlu0 %2360  ;;  %v1692_v55 = vmul.f32 %v11753_v49, %v13188_v39  ;;  %v10550_v42 = vpack.c.bf16 %v11215_v26, %v11214_v56 }
 0x420   : > { %v2528_v7 = vpop.permute.xlu1 %2527  ;;  %9601 = vmatprep.mubr.msk.f32.mxu1 %vm689_vm1, %v2361_v21 }
 0x421   : > { %9573 = vmatprep.mubr.msk.f32.mxu0 %vm1342_vm3, %v1692_v55  ;;  %9602 = vmatmul.mubr.msk.f32.gmra.mrb[38].mxu1 %vm689_vm1, %v2363_v24 }
 0x422   : > { %9574 = vmatmul.mubr.msk.f32.gmra.mrb[62].mxu0 %vm1342_vm3, %v1694_v62  ;;  %9648 = vmatprep.mubr.msk.f32.mxu1 %vm689_vm1, %v2687_v41 }
 0x423   : > { %9620 = vmatprep.mubr.msk.f32.mxu0 %vm689_vm1, %v16234_v4  ;;  %v11218_v54 = vpop.permute.xlu0 %11217 }
 0x424   : > { %v2532_v39 = vpop.permute.xlu1 %2531  ;;  %v11220_v24 = vunpack.i.h.bf16 %v11218_v54  ;;  %v11219_v41 = vunpack.i.l.bf16 %v11218_v54 }
 0x426   : > { %9621 = vmatmul.mubr.msk.f32.vlgmr.msra.gmra.mrb[64].mxu0 %vm689_vm1, %v16235_v29  ;;  %v10556_v33 = vpack.c.bf16 %v11220_v24, %v11219_v41 }
 0x427   : > { %10549 = vmatpush3.bf16.xpose.msk.msra.mxu0 %vm12548_vm2, %v13440_v47  ;;  %9623 = vmatprep.mubr.msk.f32.mxu0 %vm689_vm1, %v2522_v44  ;;  %v2689_v35 = vpop.permute.xlu0 %2688  ;;  %v11225_v44 = vunpack.i.h.bf16 %v11223_v38 }
 0x428   : > { %10552 = vmatprep.subr.msk.bf16.mxu0 %vm12548_vm2, %v10550_v42  ;;  %v2858_v63 = vpop.permute.xlu1 %2857  ;;  %9649 = vmatmul.mubr.msk.f32.vlgmr.msra.gmra.mrb[40].mxu1 %vm689_vm1, %v2689_v35 }
 0x429   : > { %v10562_v55 = vpack.c.bf16 %v11225_v44, %v11224_v22 }
 0x42b   : > { %v2524_v0 = vpop.permute.xlu0 %2523 }
 0x42c   : > { %9624 = vmatmul.mubr.msk.f32.gmra.mrb[66].mxu0 %vm689_vm1, %v2524_v0  ;;  %v2693_v30 = vpop.permute.xlu1 %2692 }
 0x42f   : > { %10555 = vmatpush3.bf16.xpose.msk.msra.mxu0 %vm12548_vm2, %v10550_v42  ;;  %v2526_v47 = vpop.permute.xlu0 %2525 }
 0x430   : > { %10558 = vmatprep.subr.msk.bf16.mxu0 %vm12548_vm2, %v10556_v33  ;;  %9626 = vmatprep.mubr.msk.f32.mxu0 %vm689_vm1, %v2526_v47  ;;  %v2697_v49 = vpop.permute.xlu1 %2696 }
 0x431   : > { %9627 = vmatmul.mubr.msk.f32.gmra.mrb[68].mxu0 %vm689_vm1, %v2528_v7 }
 0x433   : > { %v2530_v21 = vpop.permute.xlu0 %2529 }
 0x434   : > { %9629 = vmatprep.mubr.msk.f32.mxu0 %vm689_vm1, %v2530_v21  ;;  %v2701_v26 = vpop.permute.xlu1 %2700 }
 0x435   : > { %9630 = vmatmul.mubr.msk.f32.gmra.mrb[70].mxu0 %vm689_vm1, %v2532_v39 }
 0x437   : > { %10561 = vmatpush3.bf16.xpose.msk.msra.mxu0 %vm12548_vm2, %v10556_v33  ;;  %v2856_v62 = vpop.permute.xlu0 %2855 }
 0x438   : > { %10564 = vmatprep.subr.msk.bf16.mxu0 %vm12548_vm2, %v10562_v55  ;;  %9676 = vmatprep.mubr.msk.f32.mxu0 %vm689_vm1, %v2856_v62  ;;  %v2862_v38 = vpop.permute.xlu1 %2861 }
 0x43b   : > { %v2691_v7 = vpop.permute.xlu0 %2690 }
 0x43c   : > { %9651 = vmatprep.mubr.msk.f32.mxu1 %vm689_vm1, %v2691_v7  ;;  %v2866_v54 = vpop.permute.xlu1 %2865 }
 0x43d   : > { %9652 = vmatmul.mubr.msk.f32.gmra.mrb[42].mxu1 %vm689_vm1, %v2693_v30 }
 0x43f   : > { %10567 = vmatpush3.bf16.xpose.msk.msra.mxu0 %vm12548_vm2, %v10562_v55  ;;  %v2695_v56 = vpop.permute.xlu0 %2694 }
 0x440   : > { %9654 = vmatprep.mubr.msk.f32.mxu1 %vm689_vm1, %v2695_v56  ;;  %v2870_v42 = vpop.permute.xlu1 %2869 }
 0x441   : > { %9655 = vmatmul.mubr.msk.f32.gmra.mrb[44].mxu1 %vm689_vm1, %v2697_v49 }
 0x443   : > { %v2699_v4 = vpop.permute.xlu0 %2698 }
 0x444   : > { %9657 = vmatprep.mubr.msk.f32.mxu1 %vm689_vm1, %v2699_v4  ;;  %v11233_v24 = vpop.permute.xlu1 %11232 }
 0x445   : > { %9658 = vmatmul.mubr.msk.f32.gmra.mrb[46].mxu1 %vm689_vm1, %v2701_v26  ;;  %v11235_v0 = vunpack.i.h.bf16 %v11233_v24 }
 0x446   : > { %9677 = vmatmul.mubr.msk.f32.vlgmr.msra.gmra.mrb[72].mxu0 %vm689_vm1, %v2858_v63  ;;  %v11234_v63 = vunpack.i.l.bf16 %v11233_v24 }
 0x447   : > { %v2860_v39 = vpop.permute.xlu0 %2859 }
 0x448   : > { %9679 = vmatprep.mubr.msk.f32.mxu0 %vm689_vm1, %v2860_v39  ;;  %v11243_v44 = vpop.permute.xlu1 %11242  ;;  %v10572_v55 = vpack.c.bf16 %v11235_v0, %v11234_v63 }
 0x449   : > { %v11245_v62 = vunpack.i.h.bf16 %v11243_v44  ;;  %v11244_v26 = vunpack.i.l.bf16 %v11243_v44 }
 0x44a   : > { %9680 = vmatmul.mubr.msk.f32.gmra.mrb[74].mxu0 %vm689_vm1, %v2862_v38 }
 0x44b   : > { %v2864_v29 = vpop.permute.xlu0 %2863 }
 0x44c   : > { %9682 = vmatprep.mubr.msk.f32.mxu0 %vm689_vm1, %v2864_v29  ;;  %v10580_v29 = vpack.c.bf16 %v11245_v62, %v11244_v26 }
 0x44e   : > { %9683 = vmatmul.mubr.msk.f32.gmra.mrb[76].mxu0 %vm689_vm1, %v2866_v54  ;;  %v11253_v54 = vpop.permute.xlu1 %11252 }
 0x44f   : > { %v2868_v35 = vpop.permute.xlu0 %2867  ;;  %v11254_v24 = vunpack.i.l.bf16 %v11253_v54 }
 0x450   : > { %9685 = vmatprep.mubr.msk.f32.mxu0 %vm689_vm1, %v2868_v35  ;;  %v11255_v35 = vunpack.i.h.bf16 %v11253_v54 }
 0x452   : > { %9686 = vmatmul.mubr.msk.f32.gmra.mrb[78].mxu0 %vm689_vm1, %v2870_v42  ;;  %v13528_v44 = vpack.c.bf16 %v11255_v35, %v11254_v24 }
 0x453   : > { %v11228_v41 = vpop.permute.xlu0 %11227 }
 0x454   : > { %v11230_v30 = vunpack.i.h.bf16 %v11228_v41  ;;  %v11229_v33 = vunpack.i.l.bf16 %v11228_v41 }
 0x456   : > { %v10568_v47 = vpack.c.bf16 %v11230_v30, %v11229_v33 }
 0x457   : > { %v11238_v22 = vpop.permute.xlu0 %11237 }
 0x458   : > { %v11240_v49 = vunpack.i.h.bf16 %v11238_v22  ;;  %v11239_v21 = vunpack.i.l.bf16 %v11238_v22  ;;  %10569 = vmatprep.subr.bf16.mxu1 %v10568_v47 }
 0x459   : > { %10571 = vmatpush3.bf16.msra.mxu1 %v10568_v47 }
 0x45a   : > { %10573 = vmatprep.subr.bf16.mxu1 %v10572_v55  ;;  %v10576_v4 = vpack.c.bf16 %v11240_v49, %v11239_v21 }
 0x45b   : > { %v11248_v7 = vpop.permute.xlu0 %11247 }
 0x45c   : > { %v11250_v38 = vunpack.i.h.bf16 %v11248_v7  ;;  %v11249_v56 = vunpack.i.l.bf16 %v11248_v7 }
 0x45d   : > { %10575 = vmatpush3.bf16.msra.mxu1 %v10572_v55 }
 0x45e   : > { %10577 = vmatprep.subr.bf16.mxu1 %v10576_v4  ;;  %v10584_v39 = vpack.c.bf16 %v11250_v38, %v11249_v56 }
 0x45f   : > { %v11258_v42 = vpop.permute.xlu0 %11257 }
 0x460   : > { %v11260_v41 = vunpack.i.h.bf16 %v11258_v42  ;;  %v11259_v30 = vunpack.i.l.bf16 %v11258_v42  ;;  %10585 = vmatprep.subr.bf16.mxu0 %v10584_v39 }
 0x461   : > { %10579 = vmatpush3.bf16.msra.mxu1 %v10576_v4  ;;  %10587 = vmatpush3.bf16.msra.mxu0 %v10584_v39 }
 0x462   : > { %10581 = vmatprep.subr.bf16.mxu1 %v10580_v29  ;;  %v10588_v0 = vpack.c.bf16 %v11260_v41, %v11259_v30 }
 0x463   : > { %v11268_v63 = vpop.permute.xlu0 %11267 }
 0x464   : > { %v11270_v33 = vunpack.i.h.bf16 %v11268_v63  ;;  %v11269_v47 = vunpack.i.l.bf16 %v11268_v63  ;;  %10589 = vmatprep.subr.bf16.mxu0 %v10588_v0 }
 0x465   : > { %10583 = vmatpush3.bf16.msra.mxu1 %v10580_v29  ;;  %10591 = vmatpush3.bf16.msra.mxu0 %v10588_v0 }
 0x466   : > { %10601 = vmatprep.subr.bf16.mxu1 %v13528_v44  ;;  %v10592_v22 = vpack.c.bf16 %v11270_v33, %v11269_v47 }
 0x467   : > { %v11278_v49 = vpop.permute.xlu0 %11277 }
 0x468   : > { %v11280_v21 = vunpack.i.h.bf16 %v11278_v49  ;;  %v11279_v55 = vunpack.i.l.bf16 %v11278_v49  ;;  %10593 = vmatprep.subr.bf16.mxu0 %v10592_v22 }
 0x469   : > { %10595 = vmatpush3.bf16.msra.mxu0 %v10592_v22 }
 0x46a   : > { %v10596_v62 = vpack.c.bf16 %v11280_v21, %v11279_v55 }
 0x46b   : > { %v11288_v26 = vpop.permute.xlu0 %11287 }
 0x46c   : > { %v11290_v7 = vunpack.i.h.bf16 %v11288_v26  ;;  %v11289_v38 = vunpack.i.l.bf16 %v11288_v26  ;;  %10597 = vmatprep.subr.bf16.mxu0 %v10596_v62 }
 0x46d   : > { %v9482_v56 = vpop.f32.mrb[40].mxu0  ;;  %10599 = vmatpush3.bf16.msra.mxu0 %v10596_v62 }
 0x46e   : > { %2308 = vst.msk [vmem:[#allocation2 + $0x8] sm:$0xff] %vm689_vm1, %v9482_v56  ;;  %v1809_v4 = vpop.f32.mrb[41].mxu0  ;;  %v13532_v54 = vpack.c.bf16 %v11290_v7, %v11289_v38 }
 0x46f   : > { %2307 = vst.msk [vmem:[#allocation2] sm:$0xff] %vm689_vm1, %v1809_v4  ;;  %v13559_v4 = vld [vmem:[%s15962_s3 + $0x48] sm:$0xff]  ;;  %v13682_v57 = vpop.permute.xlu0 %11302 }
 0x470   : > { %16236 = vst [vmem:[#allocation52_spill] sm:$0xff] %v13532_v54  ;;  %10617 = vmatprep.subr.bf16.mxu0 %v13532_v54  ;;  %16237 = vst [vmem:[#allocation59_spill] sm:$0xff] %v13682_v57 }
 0x475   : > { %v9485_v39 = vpop.f32.mrb[42].mxu0 }
 0x476   : > { %2310 = vst.msk [vmem:[#allocation2 + $0x18] sm:$0xff] %vm689_vm1, %v9485_v39  ;;  %v1819_v42 = vpop.f32.mrb[43].mxu0 }
 0x477   : > { %2309 = vst.msk [vmem:[#allocation2 + $0x10] sm:$0xff] %vm689_vm1, %v1819_v42  ;;  %v13564_v42 = vld [vmem:[%s15962_s3 + $0x40] sm:$0xff] }
 0x479   : > { %v9488_v29 = vpop.f32.mrb[44].mxu0 }
 0x47a   : > { %2312 = vst.msk [vmem:[#allocation2 + $0x28] sm:$0xff] %vm689_vm1, %v9488_v29  ;;  %v1829_v35 = vpop.f32.mrb[45].mxu0 }
 0x47b   : > { %2311 = vst.msk [vmem:[#allocation2 + $0x20] sm:$0xff] %vm689_vm1, %v1829_v35 }
 0x481   : > { %v9491_v24 = vpop.f32.mrb[46].mxu0 }
 0x482   : > { %2314 = vst.msk [vmem:[#allocation2 + $0x38] sm:$0xff] %vm689_vm1, %v9491_v24  ;;  %v1839_v41 = vpop.f32.mrb[47].mxu0 }
 0x483   : > { %2313 = vst.msk [vmem:[#allocation2 + $0x30] sm:$0xff] %vm689_vm1, %v1839_v41 }
 0x491   : > { %v9538_v30 = vpop.f32.mrb[24].mxu1 }
 0x492   : > { %2324 = vst.msk [vmem:[#allocation2 + $0x88] sm:$0xff] %vm689_vm1, %v9538_v30  ;;  %v2115_v0 = vpop.f32.mrb[25].mxu1 }
 0x493   : > { %2323 = vst.msk [vmem:[#allocation2 + $0x80] sm:$0xff] %vm689_vm1, %v2115_v0  ;;  %v13577_v0 = vld [vmem:[%s15962_s3 + $0x58] sm:$0xff] }
 0x495   : > { %v9510_v63 = vpop.f32.mrb[48].mxu0 }
 0x496   : > { %2316 = vst.msk [vmem:[#allocation2 + $0x48] sm:$0xff] %vm689_vm1, %v9510_v63  ;;  %v1962_v33 = vpop.f32.mrb[49].mxu0 }
 0x497   : > { %2315 = vst.msk [vmem:[#allocation2 + $0x40] sm:$0xff] %vm689_vm1, %v1962_v33 }
 0x49e   : > { %v9513_v47 = vpop.f32.mrb[50].mxu0 }
 0x49f   : > { %2318 = vst.msk [vmem:[#allocation2 + $0x58] sm:$0xff] %vm689_vm1, %v9513_v47  ;;  %v1972_v22 = vpop.f32.mrb[51].mxu0 }
 0x4a0   : > { %2317 = vst.msk [vmem:[#allocation2 + $0x50] sm:$0xff] %vm689_vm1, %v1972_v22 }
 0x4a2   : > { %v9541_v49 = vpop.f32.mrb[26].mxu1 }
 0x4a3   : > { %2326 = vst.msk [vmem:[#allocation2 + $0x98] sm:$0xff] %vm689_vm1, %v9541_v49  ;;  %v2125_v21 = vpop.f32.mrb[27].mxu1 }
 0x4a4   : > { %2325 = vst.msk [vmem:[#allocation2 + $0x90] sm:$0xff] %vm689_vm1, %v2125_v21 }
 0x4a6   : > { %v9544_v55 = vpop.f32.mrb[28].mxu1 }
 0x4a7   : > { %2328 = vst.msk [vmem:[#allocation2 + $0xa8] sm:$0xff] %vm689_vm1, %v9544_v55  ;;  %v2135_v62 = vpop.f32.mrb[29].mxu1 }
 0x4a8   : > { %2327 = vst.msk [vmem:[#allocation2 + $0xa0] sm:$0xff] %vm689_vm1, %v2135_v62  ;;  %v13591_v62 = vld [vmem:[%s15962_s3 + $0x50] sm:$0xff] }
 0x4a9   : > { %v9516_v26 = vpop.f32.mrb[52].mxu0 }
 0x4aa   : > { %2320 = vst.msk [vmem:[#allocation2 + $0x68] sm:$0xff] %vm689_vm1, %v9516_v26  ;;  %v1982_v7 = vpop.f32.mrb[53].mxu0 }
 0x4ab   : > { %2319 = vst.msk [vmem:[#allocation2 + $0x60] sm:$0xff] %vm689_vm1, %v1982_v7 }
 0x4ac   : > { %v9547_v38 = vpop.f32.mrb[30].mxu1 }
 0x4ad   : > { %2330 = vst.msk [vmem:[#allocation2 + $0xb8] sm:$0xff] %vm689_vm1, %v9547_v38  ;;  %v2145_v56 = vpop.f32.mrb[31].mxu1 }
 0x4ae   : > { %2329 = vst.msk [vmem:[#allocation2 + $0xb0] sm:$0xff] %vm689_vm1, %v2145_v56 }
 0x4b1   : > { %v9519_v39 = vpop.f32.mrb[54].mxu0 }
 0x4b2   : > { %2322 = vst.msk [vmem:[#allocation2 + $0x78] sm:$0xff] %vm689_vm1, %v9519_v39  ;;  %v9594_v29 = vpop.f32.mrb[32].mxu1  ;;  %v1992_v35 = vpop.f32.mrb[55].mxu0 }
 0x4b3   : > { %v13568_v24 = vadd.f32 %v9594_v29, %v13559_v4  ;;  %2321 = vst.msk [vmem:[#allocation2 + $0x70] sm:$0xff] %vm689_vm1, %v1992_v35  ;;  %v2478_v41 = vpop.f32.mrb[33].mxu1  ;;  %v13605_v29 = vld [vmem:[%s15962_s3 + $0x68] sm:$0xff]  ;;  %v13610_v35 = vld [vmem:[%s15962_s3 + $0x60] sm:$0xff] }
 0x4b4   : > { %v13572_v30 = vadd.f32 %v13564_v42, %v2478_v41 }
 0x4b5   : > { %v3027_v63 = vsel %vm1342_vm3, %v13568_v24, -inf  ;;  %v9566_v33 = vpop.f32.mrb[56].mxu0 }
 0x4b6   : > { %3028 = vmax.xlane.f32.xlu1 %v3027_v63  ;;  %2332 = vst.msk [vmem:[#allocation2 + $0xc8] sm:$0xff] %vm689_vm1, %v9566_v33  ;;  %v9597_v47 = vpop.f32.mrb[34].mxu1  ;;  %v3024_v22 = vsel %vm1342_vm3, %v13572_v30, -inf  ;;  %v2268_v49 = vpop.f32.mrb[57].mxu0 }
 0x4b7   : > { %v13585_v21 = vadd.f32 %v9597_v47, %v13577_v0  ;;  %3025 = vmax.xlane.f32.xlu0 %v3024_v22  ;;  %2331 = vst.msk [vmem:[#allocation2 + $0xc0] sm:$0xff] %vm689_vm1, %v2268_v49  ;;  %v2488_v55 = vpop.f32.mrb[35].mxu1 }
 0x4b8   : > { %v13596_v7 = vadd.f32 %v13591_v62, %v2488_v55  ;;  %v13622_v55 = vld [vmem:[%s15962_s3 + $0x78] sm:$0xff] }
 0x4b9   : > { %v3033_v26 = vsel %vm1342_vm3, %v13585_v21, -inf }
 0x4ba   : > { %v3030_v38 = vsel %vm1342_vm3, %v13596_v7, -inf }
 0x4bb   : > { %3034 = vmax.xlane.f32.xlu0 %v3033_v26 }
 0x4bf   : > { %3031 = vmax.xlane.f32.xlu0 %v3030_v38 }
 0x4e9   : > { %v9569_v56 = vpop.f32.mrb[58].mxu0 }
 0x4ea   : > { %2334 = vst.msk [vmem:[#allocation2 + $0xd8] sm:$0xff] %vm689_vm1, %v9569_v56  ;;  %v2278_v39 = vpop.f32.mrb[59].mxu0 }
 0x4eb   : > { %2333 = vst.msk [vmem:[#allocation2 + $0xd0] sm:$0xff] %vm689_vm1, %v2278_v39  ;;  %v13632_v39 = vld [vmem:[%s15962_s3 + $0x70] sm:$0xff] }
 0x4f0   : > { %v9600_v41 = vpop.f32.mrb[36].mxu1 }
 0x4f1   : > { %v13613_v63 = vadd.f32 %v9600_v41, %v13605_v29  ;;  %v9572_v33 = vpop.f32.mrb[60].mxu0  ;;  %v2498_v47 = vpop.f32.mrb[37].mxu1 }
 0x4f2   : > { %2336 = vst.msk [vmem:[#allocation2 + $0xe8] sm:$0xff] %vm689_vm1, %v9572_v33  ;;  %v13617_v22 = vadd.f32 %v13610_v35, %v2498_v47  ;;  %v2288_v49 = vpop.f32.mrb[61].mxu0 }
 0x4f3   : > { %2335 = vst.msk [vmem:[#allocation2 + $0xe0] sm:$0xff] %vm689_vm1, %v2288_v49  ;;  %v3039_v26 = vsel %vm1342_vm3, %v13613_v63, -inf }
 0x4f4   : > { %3040 = vmax.xlane.f32.xlu0 %v3039_v26  ;;  %v9603_v38 = vpop.f32.mrb[38].mxu1  ;;  %v3036_v56 = vsel %vm1342_vm3, %v13617_v22, -inf }
 0x4f5   : > { %v13635_v41 = vadd.f32 %v9603_v38, %v13622_v55  ;;  %v9575_v33 = vpop.f32.mrb[62].mxu0  ;;  %3037 = vmax.xlane.f32.xlu1 %v3036_v56  ;;  %v2508_v47 = vpop.f32.mrb[39].mxu1 }
 0x4f6   : > { %2338 = vst.msk [vmem:[#allocation2 + $0xf8] sm:$0xff] %vm689_vm1, %v9575_v33  ;;  %v2298_v49 = vpop.f32.mrb[63].mxu0  ;;  %v13639_v26 = vadd.f32 %v13632_v39, %v2508_v47  ;;  %v13649_v33 = vpop.permute.xlu1 %11262 }
 0x4f7   : > { %2337 = vst.msk [vmem:[#allocation2 + $0xf0] sm:$0xff] %vm689_vm1, %v2298_v49  ;;  %v3045_v52 = vsel %vm1342_vm3, %v13635_v41, -inf }
 0x4f8   : > { %3046 = vmax.xlane.f32.xlu0 %v3045_v52  ;;  %v3042_v56 = vsel %vm1342_vm3, %v13639_v26, -inf }
 0x4f9   : > { %v9622_v27 = vpop.f32.mrb[64].mxu0 }
 0x4fa   : > { %v13645_v11 = vadd.f32 %v9622_v27, %v13559_v4  ;;  %v2647_v38 = vpop.f32.mrb[65].mxu0 }
 0x4fb   : > { %v9650_v16 = vpop.f32.mrb[40].mxu1  ;;  %v13652_v47 = vadd.f32 %v13564_v42, %v2647_v38 }
 0x4fc   : > { %v13655_v49 = vadd.f32 %v9650_v16, %v13559_v4  ;;  %3043 = vmax.xlane.f32.xlu0 %v3042_v56  ;;  %v2816_v19 = vpop.f32.mrb[41].mxu1  ;;  %v3051_v52 = vsel %vm1342_vm3, %v13645_v11, -inf  ;;  %v13669_v56 = vpop.permute.xlu1 %11272 }
 0x4fd   : > { %3052 = vmax.xlane.f32.xlu1 %v3051_v52  ;;  %v13662_v15 = vadd.f32 %v13564_v42, %v2816_v19  ;;  %v3048_v16 = vsel %vm1342_vm3, %v13652_v47, -inf }
 0x4fe   : > { %v3075_v27 = vsel %vm1342_vm3, %v13655_v49, -inf }
 0x4ff   : > { %v9625_v1 = vpop.f32.mrb[66].mxu0 }
 0x500   : > { %v13665_v58 = vadd.f32 %v9625_v1, %v13577_v0  ;;  %v2657_v38 = vpop.f32.mrb[67].mxu0  ;;  %3076 = vmax.xlane.f32.xlu0 %v3075_v27  ;;  %v3072_v1 = vsel %vm1342_vm3, %v13662_v15, -inf  ;;  %v13678_v27 = vpop.permute.xlu1 %11282 }
 0x501   : > { %3049 = vmax.xlane.f32.xlu1 %v3048_v16  ;;  %v13674_v2 = vadd.f32 %v13591_v62, %v2657_v38  ;;  %v13686_v38 = vpop.permute.xlu0 %11307 }
 0x502   : > { %v3057_v52 = vsel %vm1342_vm3, %v13665_v58, -inf  ;;  %16239 = vst [vmem:[#allocation22_spill] sm:$0xff] %v13686_v38 }
 0x503   : > { %v3054_v16 = vsel %vm1342_vm3, %v13674_v2, -inf }
 0x504   : > { %v9628_v14 = vpop.f32.mrb[68].mxu0  ;;  %3058 = vmax.xlane.f32.xlu0 %v3057_v52  ;;  %v13684_v3 = vpop.permute.xlu1 %11292 }
 0x505   : > { %v2667_v19 = vpop.f32.mrb[69].mxu0  ;;  %3073 = vmax.xlane.f32.xlu1 %v3072_v1  ;;  %16238 = vst [vmem:[#allocation51_spill] sm:$0xff] %v13684_v3  ;;  %v13695_v8 = vadd.f32 %v9628_v14, %v13605_v29  ;;  %v13706_v38 = vpop.permute.xlu0 %11317 }
 0x506   : > { %16240 = vst [vmem:[#allocation61_spill] sm:$0xff] %v13706_v38 }
 0x507   : > { %v3063_v60 = vsel %vm1342_vm3, %v13695_v8, -inf }
 0x508   : > { %v9631_v50 = vpop.f32.mrb[70].mxu0  ;;  %v13699_v25 = vpop.permute.xlu1 %11297 }
 0x509   : > { %v2677_v17 = vpop.f32.mrb[71].mxu0  ;;  %3055 = vmax.xlane.f32.xlu1 %v3054_v16  ;;  %v13702_v16 = vadd.f32 %v13610_v35, %v2667_v19  ;;  %v13720_v32 = vpop.permute.xlu0 %11327 }
 0x50a   : > { %16242 = vst [vmem:[#allocation68_spill] sm:$0xff] %v13720_v32 }
 0x50c   : > { %v13718_v38 = vpop.permute.xlu1 %11312 }
 0x50d   : > { %16241 = vst [vmem:[#allocation63_spill] sm:$0xff] %v13718_v38 }
 0x510   : > { %v9653_v52 = vpop.f32.mrb[42].mxu1  ;;  %v13737_v32 = vpop.permute.xlu1 %11322 }
 0x511   : > { %v13689_v10 = vadd.f32 %v9653_v52, %v13577_v0  ;;  %v2826_v61 = vpop.f32.mrb[43].mxu1  ;;  %16243 = vst [vmem:[#allocation65_spill] sm:$0xff] %v13737_v32 }
 0x512   : > { %v13692_v1 = vadd.f32 %v13591_v62, %v2826_v61 }
 0x513   : > { %v3081_v36 = vsel %vm1342_vm3, %v13689_v10, -inf }
 0x514   : > { %3082 = vmax.xlane.f32.xlu0 %v3081_v36  ;;  %v9656_v12 = vpop.f32.mrb[44].mxu1  ;;  %v3078_v52 = vsel %vm1342_vm3, %v13692_v1, -inf  ;;  %v3060_v36 = vsel %vm1342_vm3, %v13702_v16, -inf  ;;  %v13756_v18 = vpop.permute.xlu1 %11332 }
 0x515   : > { %v2836_v61 = vpop.f32.mrb[45].mxu1  ;;  %3079 = vmax.xlane.f32.xlu1 %v3078_v52  ;;  %v13709_v14 = vadd.f32 %v9656_v12, %v13605_v29  ;;  %v13723_v12 = vadd.f32 %v9631_v50, %v13622_v55  ;;  %16245 = vst [vmem:[#allocation56_spill] sm:$0xff] %v13756_v18 }
 0x516   : > { %v13714_v28 = vadd.f32 %v13610_v35, %v2836_v61 }
 0x517   : > { %v3087_v61 = vsel %vm1342_vm3, %v13709_v14, -inf  ;;  %v3069_v50 = vsel %vm1342_vm3, %v13723_v12, -inf }
 0x518   : > { %3064 = vmax.xlane.f32.xlu0 %v3063_v60  ;;  %v9659_v19 = vpop.f32.mrb[46].mxu1  ;;  %v13728_v60 = vadd.f32 %v13632_v39, %v2677_v17  ;;  %v3084_v6 = vsel %vm1342_vm3, %v13714_v28, -inf  ;;  %v13775_v18 = vpop.permute.xlu1 %4160 }
 0x519   : > { %v9678_v54 = vpop.f32.mrb[72].mxu0  ;;  %v2846_v57 = vpop.f32.mrb[47].mxu1  ;;  %3061 = vmax.xlane.f32.xlu1 %v3060_v36  ;;  %v13733_v38 = vadd.f32 %v9659_v19, %v13622_v55  ;;  %16247 = vst [vmem:[#allocation60_spill] sm:$0xff] %v13775_v18 }
 0x51a   : > { %v2985_v52 = vpop.f32.mrb[73].mxu0  ;;  %v13740_v43 = vadd.f32 %v13632_v39, %v2846_v57  ;;  %v3066_v17 = vsel %vm1342_vm3, %v13728_v60, -inf  ;;  %v13747_v19 = vadd.f32 %v9678_v54, %v13559_v4 }
 0x51b   : > { %v3093_v45 = vsel %vm1342_vm3, %v13733_v38, -inf  ;;  %v13752_v32 = vadd.f32 %v13564_v42, %v2985_v52 }
 0x51c   : > { %3088 = vmax.xlane.f32.xlu0 %v3087_v61  ;;  %v13744_v61 = vpop.permute.xlu0 %11337  ;;  %v3090_v57 = vsel %vm1342_vm3, %v13740_v43, -inf  ;;  %v3099_v4 = vsel %vm1342_vm3, %v13747_v19, -inf }
 0x51d   : > { %v9681_v3 = vpop.f32.mrb[74].mxu0  ;;  %3085 = vmax.xlane.f32.xlu1 %v3084_v6  ;;  %16244 = vst [vmem:[#allocation53_spill] sm:$0xff] %v13744_v61 }
 0x51e   : > { %v2995_v36 = vpop.f32.mrb[75].mxu0  ;;  %v13761_v54 = vadd.f32 %v9681_v3, %v13577_v0 }
 0x51f   : > { %v13766_v42 = vadd.f32 %v13591_v62, %v2995_v36 }
 0x520   : > { %3070 = vmax.xlane.f32.xlu0 %v3069_v50 }
 0x521   : > { %v9684_v5 = vpop.f32.mrb[76].mxu0  ;;  %3067 = vmax.xlane.f32.xlu1 %v3066_v17  ;;  %v13758_v17 = vpop.permute.xlu0 %11342  ;;  %v3102_v0 = vsel %vm1342_vm3, %v13766_v42, -inf }
 0x522   : > { %v3005_v6 = vpop.f32.mrb[77].mxu0  ;;  %16246 = vst [vmem:[#allocation67_spill] sm:$0xff] %v13758_v17  ;;  %v13771_v52 = vadd.f32 %v9684_v5, %v13605_v29 }
 0x523   : > { %v13778_v3 = vadd.f32 %v13610_v35, %v3005_v6  ;;  %v13794_v6 = vpop.permute.xlu1 %11352 }
 0x524   : > { %3094 = vmax.xlane.f32.xlu0 %v3093_v45  ;;  %v3096_v45 = vsel %vm1342_vm3, %v13752_v32, -inf  ;;  %v3111_v5 = vsel %vm1342_vm3, %v13771_v52, -inf  ;;  %16249 = vst [vmem:[#allocation57_spill] sm:$0xff] %v13794_v6 }
 0x525   : > { %v9687_v50 = vpop.f32.mrb[78].mxu0  ;;  %3091 = vmax.xlane.f32.xlu1 %v3090_v57  ;;  %v3105_v57 = vsel %vm1342_vm3, %v13761_v54, -inf  ;;  %v13782_v62 = vpop.permute.xlu0 %4158  ;;  %v3108_v35 = vsel %vm1342_vm3, %v13778_v3, -inf }
 0x526   : > { %v3015_v61 = vpop.f32.mrb[79].mxu0  ;;  %16248 = vst [vmem:[#allocation54_spill] sm:$0xff] %v13782_v62  ;;  %v13785_v36 = vadd.f32 %v9687_v50, %v13622_v55 }
 0x527   : > { %v13790_v29 = vadd.f32 %v13632_v39, %v3015_v61  ;;  %v13802_v50 = vpop.permute.xlu1 %11362 }
 0x528   : > { %3100 = vmax.xlane.f32.xlu0 %v3099_v4  ;;  %16251 = vst [vmem:[#allocation55_spill] sm:$0xff] %v13802_v50 }
 0x529   : > { %3097 = vmax.xlane.f32.xlu1 %v3096_v45  ;;  %v13796_v4 = vpop.permute.xlu0 %11347  ;;  %v3117_v45 = vsel %vm1342_vm3, %v13785_v36, -inf  ;;  %v3114_v55 = vsel %vm1342_vm3, %v13790_v29, -inf }
 0x52a   : > { %16250 = vst [vmem:[#allocation62_spill] sm:$0xff] %v13796_v4 }
 0x52b   : > { %v13806_v61 = vpop.permute.xlu1 %4329 }
 0x52c   : > { %3106 = vmax.xlane.f32.xlu0 %v3105_v57  ;;  %16253 = vst [vmem:[#allocation64_spill] sm:$0xff] %v13806_v61 }
 0x52d   : > { %3103 = vmax.xlane.f32.xlu1 %v3102_v0  ;;  %v13804_v39 = vpop.permute.xlu0 %11357 }
 0x52e   : > { %16252 = vst [vmem:[#allocation58_spill] sm:$0xff] %v13804_v39 }
 0x530   : > { %3112 = vmax.xlane.f32.xlu0 %v3111_v5 }
 0x531   : > { %3109 = vmax.xlane.f32.xlu1 %v3108_v35  ;;  %v13808_v57 = vpop.permute.xlu0 %4327 }
 0x532   : > { %16254 = vst [vmem:[#allocation69_spill] sm:$0xff] %v13808_v57 }
 0x534   : > { %3118 = vmax.xlane.f32.xlu0 %v3117_v45 }
 0x535   : > { %3115 = vmax.xlane.f32.xlu1 %v3114_v55 }
 0x543   : > { %v3029_v0 = vpop.xlane.xlu1 %3028 }
 0x544   : > { %v3121_v5 = vsub.f32 %v13568_v24, %v3029_v0  ;;  %v3026_v35 = vpop.xlane.xlu0 %3025 }
 0x545   : > { %v3120_v4 = vsub.f32 %v13572_v30, %v3026_v35 }
 0x546   : > { %v3154_v18 = vmul.f32 1.442695, %v3121_v5 }
 0x547   : > { %v3152_v45 = vmul.f32 1.442695, %v3120_v4 }
 0x548   : > { %11754 = vpow2.f32 %v3154_v18  ;;  %v3035_v62 = vpop.xlane.xlu0 %3034 }
 0x549   : > { %11756 = vpow2.f32 %v3152_v45  ;;  %v3123_v55 = vsub.f32 %v13585_v21, %v3035_v62 }
 0x54b   : > { %v3158_v50 = vmul.f32 1.442695, %v3123_v55 }
 0x54c   : > { %v3032_v6 = vpop.xlane.xlu0 %3031 }
 0x54d   : > { %11758 = vpow2.f32 %v3158_v50  ;;  %v3122_v61 = vsub.f32 %v13596_v7, %v3032_v6 }
 0x54f   : > { %v3156_v39 = vmul.f32 1.442695, %v3122_v61 }
 0x551   : > { %11760 = vpow2.f32 %v3156_v39 }
 0x552   : > { %v13814_v57 = vpop.eup %11754 }
 0x553   : > { %v13816_v24 = vpop.eup %11756  ;;  %v3219_v30 = vsel %vm1342_vm3, %v13814_v57, 0.0 }
 0x554   : > { %3220 = vadd.xlane.f32.xlu0 %v3219_v30  ;;  %v3216_v18 = vsel %vm1342_vm3, %v13816_v24, 0.0 }
 0x555   : > { %3217 = vadd.xlane.f32.xlu1 %v3216_v18 }
 0x557   : > { %v13822_v21 = vpop.eup %11758 }
 0x558   : > { %v3225_v62 = vsel %vm1342_vm3, %v13822_v21, 0.0 }
 0x559   : > { %3226 = vadd.xlane.f32.xlu1 %v3225_v62 }
 0x55b   : > { %v13826_v7 = vpop.eup %11760 }
 0x55c   : > { %v3222_v6 = vsel %vm1342_vm3, %v13826_v7, 0.0 }
 0x55d   : > { %3223 = vadd.xlane.f32.xlu1 %v3222_v6 }
 0x581   : > { %v3041_v4 = vpop.xlane.xlu0 %3040 }
 0x582   : > { %v3125_v50 = vsub.f32 %v13613_v63, %v3041_v4  ;;  %v3038_v39 = vpop.xlane.xlu1 %3037 }
 0x583   : > { %v3124_v61 = vsub.f32 %v13617_v22, %v3038_v39 }
 0x584   : > { %v3162_v0 = vmul.f32 1.442695, %v3125_v50 }
 0x585   : > { %v3160_v5 = vmul.f32 1.442695, %v3124_v61  ;;  %v3047_v35 = vpop.xlane.xlu0 %3046 }
 0x586   : > { %11762 = vpow2.f32 %v3162_v0  ;;  %v3127_v45 = vsub.f32 %v13635_v41, %v3047_v35 }
 0x587   : > { %11764 = vpow2.f32 %v3160_v5 }
 0x588   : > { %v3166_v55 = vmul.f32 1.442695, %v3127_v45 }
 0x589   : > { %v3044_v30 = vpop.xlane.xlu0 %3043 }
 0x58a   : > { %11766 = vpow2.f32 %v3166_v55  ;;  %v3126_v18 = vsub.f32 %v13639_v26, %v3044_v30  ;;  %v3053_v62 = vpop.xlane.xlu1 %3052 }
 0x58b   : > { %v3129_v6 = vsub.f32 %v13645_v11, %v3053_v62 }
 0x58c   : > { %v3164_v17 = vmul.f32 1.442695, %v3126_v18 }
 0x58d   : > { %v3170_v63 = vmul.f32 1.442695, %v3129_v6  ;;  %v3077_v4 = vpop.xlane.xlu0 %3076 }
 0x58e   : > { %11768 = vpow2.f32 %v3164_v17  ;;  %v3137_v22 = vsub.f32 %v13655_v49, %v3077_v4  ;;  %v3050_v50 = vpop.xlane.xlu1 %3049 }
 0x58f   : > { %v3128_v39 = vsub.f32 %v13652_v47, %v3050_v50  ;;  %11770 = vpow2.f32 %v3170_v63 }
 0x590   : > { %v13837_v61 = vpop.eup %11762  ;;  %v3186_v41 = vmul.f32 1.442695, %v3137_v22 }
 0x591   : > { %v13839_v0 = vpop.eup %11764  ;;  %v3168_v5 = vmul.f32 1.442695, %v3128_v39  ;;  %v3059_v26 = vpop.xlane.xlu0 %3058  ;;  %v3231_v11 = vsel %vm1342_vm3, %v13837_v61, 0.0 }
 0x592   : > { %v3131_v35 = vsub.f32 %v13665_v58, %v3059_v26  ;;  %3232 = vadd.xlane.f32.xlu0 %v3231_v11  ;;  %v3074_v17 = vpop.xlane.xlu1 %3073  ;;  %v3228_v49 = vsel %vm1342_vm3, %v13839_v0, 0.0 }
 0x593   : > { %11772 = vpow2.f32 %v3168_v5  ;;  %v3136_v47 = vsub.f32 %v13662_v15, %v3074_v17  ;;  %3229 = vadd.xlane.f32.xlu1 %v3228_v49 }
 0x594   : > { %v13847_v45 = vpop.eup %11766  ;;  %11774 = vpow2.f32 %v3186_v41  ;;  %v3174_v55 = vmul.f32 1.442695, %v3131_v35 }
 0x595   : > { %v3184_v30 = vmul.f32 1.442695, %v3136_v47  ;;  %v3237_v18 = vsel %vm1342_vm3, %v13847_v45, 0.0 }
 0x596   : > { %v3056_v63 = vpop.xlane.xlu1 %3055 }
 0x597   : > { %11776 = vpow2.f32 %v3184_v30  ;;  %3238 = vadd.xlane.f32.xlu1 %v3237_v18  ;;  %v3130_v39 = vsub.f32 %v13674_v2, %v3056_v63 }
 0x598   : > { %v13851_v58 = vpop.eup %11768  ;;  %11778 = vpow2.f32 %v3174_v55 }
 0x599   : > { %v3234_v62 = vsel %vm1342_vm3, %v13851_v58, 0.0  ;;  %v13855_v6 = vpop.eup %11770  ;;  %v3172_v47 = vmul.f32 1.442695, %v3130_v39 }
 0x59a   : > { %3235 = vadd.xlane.f32.xlu0 %v3234_v62  ;;  %v3243_v4 = vsel %vm1342_vm3, %v13855_v6, 0.0 }
 0x59d   : > { %v13857_v15 = vpop.eup %11772 }
 0x59e   : > { %v13861_v22 = vpop.eup %11774  ;;  %3244 = vadd.xlane.f32.xlu0 %v3243_v4  ;;  %v3240_v50 = vsel %vm1342_vm3, %v13857_v15, 0.0 }
 0x59f   : > { %3241 = vadd.xlane.f32.xlu1 %v3240_v50  ;;  %v3267_v26 = vsel %vm1342_vm3, %v13861_v22, 0.0 }
 0x5a1   : > { %v13866_v41 = vpop.eup %11776  ;;  %v3083_v5 = vpop.xlane.xlu0 %3082 }
 0x5a2   : > { %v13870_v11 = vpop.eup %11778  ;;  %v3139_v35 = vsub.f32 %v13689_v10, %v3083_v5  ;;  %3268 = vadd.xlane.f32.xlu0 %v3267_v26  ;;  %v3080_v17 = vpop.xlane.xlu1 %3079  ;;  %v3264_v49 = vsel %vm1342_vm3, %v13866_v41, 0.0 }
 0x5a3   : > { %3265 = vadd.xlane.f32.xlu1 %v3264_v49  ;;  %v3138_v2 = vsub.f32 %v13692_v1, %v3080_v17  ;;  %v3249_v18 = vsel %vm1342_vm3, %v13870_v11, 0.0 }
 0x5a4   : > { %v3190_v55 = vmul.f32 1.442695, %v3139_v35 }
 0x5a5   : > { %v3065_v30 = vpop.xlane.xlu0 %3064  ;;  %v3188_v10 = vmul.f32 1.442695, %v3138_v2 }
 0x5a6   : > { %11780 = vpow2.f32 %v3190_v55  ;;  %v3133_v62 = vsub.f32 %v13695_v8, %v3065_v30  ;;  %3250 = vadd.xlane.f32.xlu0 %v3249_v18  ;;  %v3062_v63 = vpop.xlane.xlu1 %3061 }
 0x5a7   : > { %11782 = vpow2.f32 %v3172_v47  ;;  %v3132_v50 = vsub.f32 %v13702_v16, %v3062_v63 }
 0x5a8   : > { %v3178_v4 = vmul.f32 1.442695, %v3133_v62 }
 0x5a9   : > { %v3089_v5 = vpop.xlane.xlu0 %3088  ;;  %v3176_v1 = vmul.f32 1.442695, %v3132_v50 }
 0x5aa   : > { %11784 = vpow2.f32 %v3178_v4  ;;  %v3141_v39 = vsub.f32 %v13709_v14, %v3089_v5  ;;  %v3086_v26 = vpop.xlane.xlu1 %3085 }
 0x5ab   : > { %11786 = vpow2.f32 %v3188_v10  ;;  %v3140_v17 = vsub.f32 %v13714_v28, %v3086_v26 }
 0x5ac   : > { %v3194_v35 = vmul.f32 1.442695, %v3141_v39 }
 0x5ad   : > { %v3071_v49 = vpop.xlane.xlu0 %3070  ;;  %v3192_v2 = vmul.f32 1.442695, %v3140_v17 }
 0x5ae   : > { %11788 = vpow2.f32 %v3194_v35  ;;  %v3135_v8 = vsub.f32 %v13723_v12, %v3071_v49  ;;  %v3068_v55 = vpop.xlane.xlu1 %3067 }
 0x5af   : > { %11790 = vpow2.f32 %v3176_v1  ;;  %v3134_v12 = vsub.f32 %v13728_v60, %v3068_v55 }
 0x5b0   : > { %v13883_v47 = vpop.eup %11780  ;;  %v3182_v16 = vmul.f32 1.442695, %v3135_v8 }
 0x5b1   : > { %v3095_v30 = vpop.xlane.xlu0 %3094  ;;  %v3273_v14 = vsel %vm1342_vm3, %v13883_v47, 0.0  ;;  %v13887_v18 = vpop.eup %11782  ;;  %v3180_v1 = vmul.f32 1.442695, %v3134_v12 }
 0x5b2   : > { %11792 = vpow2.f32 %v3182_v16  ;;  %v3143_v62 = vsub.f32 %v13733_v38, %v3095_v30  ;;  %3274 = vadd.xlane.f32.xlu1 %v3273_v14  ;;  %v3092_v28 = vpop.xlane.xlu1 %3091  ;;  %v3246_v5 = vsel %vm1342_vm3, %v13887_v18, 0.0 }
 0x5b3   : > { %11794 = vpow2.f32 %v3192_v2  ;;  %v3142_v60 = vsub.f32 %v13740_v43, %v3092_v28 }
 0x5b4   : > { %v13890_v63 = vpop.eup %11784  ;;  %v3198_v10 = vmul.f32 1.442695, %v3143_v62 }
 0x5b5   : > { %v3101_v4 = vpop.xlane.xlu0 %3100  ;;  %v3255_v50 = vsel %vm1342_vm3, %v13890_v63, 0.0  ;;  %v13897_v39 = vpop.eup %11786  ;;  %v3196_v2 = vmul.f32 1.442695, %v3142_v60 }
 0x5b6   : > { %v3145_v26 = vsub.f32 %v13747_v19, %v3101_v4  ;;  %3256 = vadd.xlane.f32.xlu0 %v3255_v50  ;;  %3247 = vadd.xlane.f32.xlu1 %v3246_v5  ;;  %11796 = vpow2.f32 %v3198_v10  ;;  %v3098_v17 = vpop.xlane.xlu1 %3097  ;;  %v3270_v8 = vsel %vm1342_vm3, %v13897_v39, 0.0 }
 0x5b7   : > { %v3144_v16 = vsub.f32 %v13752_v32, %v3098_v17 }
 0x5b8   : > { %v13900_v38 = vpop.eup %11788  ;;  %v3202_v35 = vmul.f32 1.442695, %v3145_v26 }
 0x5b9   : > { %v3279_v49 = vsel %vm1342_vm3, %v13900_v38, 0.0  ;;  %v13907_v55 = vpop.eup %11790  ;;  %v3200_v62 = vmul.f32 1.442695, %v3144_v16 }
 0x5ba   : > { %11798 = vpow2.f32 %v3202_v35  ;;  %3280 = vadd.xlane.f32.xlu0 %v3279_v49  ;;  %3271 = vadd.xlane.f32.xlu1 %v3270_v8  ;;  %v3252_v30 = vsel %vm1342_vm3, %v13907_v55, 0.0  ;;  %v3107_v35 = vpop.xlane.xlu0 %3106  ;;  %v3104_v17 = vpop.xlane.xlu1 %3103 }
 0x5bb   : > { %11800 = vpow2.f32 %v3180_v1 }
 0x5bc   : > { %v13909_v19 = vpop.eup %11792  ;;  %11802 = vpow2.f32 %v3196_v2 }
 0x5bd   : > { %v3261_v43 = vsel %vm1342_vm3, %v13909_v19, 0.0  ;;  %v13916_v14 = vpop.eup %11794  ;;  %11804 = vpow2.f32 %v3200_v62 }
 0x5be   : > { %3262 = vadd.xlane.f32.xlu0 %v3261_v43  ;;  %3253 = vadd.xlane.f32.xlu1 %v3252_v30  ;;  %v3276_v28 = vsel %vm1342_vm3, %v13916_v14, 0.0  ;;  %v3113_v8 = vpop.xlane.xlu0 %3112  ;;  %v3110_v2 = vpop.xlane.xlu1 %3109 }
 0x5c0   : > { %v13920_v12 = vpop.eup %11796 }
 0x5c1   : > { %v3285_v4 = vsel %vm1342_vm3, %v13920_v12, 0.0 }
 0x5c2   : > { %3277 = vadd.xlane.f32.xlu1 %v3276_v28  ;;  %v3119_v16 = vpop.xlane.xlu0 %3118  ;;  %v3116_v43 = vpop.xlane.xlu1 %3115  ;;  %v3146_v28 = vsub.f32 %v13766_v42, %v3104_v17  ;;  %v11274_v17 = vunpack.i.l.bf16 %v13669_v56 }
 0x5c4   : > { %v13922_v10 = vpop.eup %11798 }
 0x5c5   : > { %16255 = vst [vmem:[#allocation66_spill] sm:$0xff] %v13922_v10  ;;  %v3291_v32 = vsel %vm1342_vm3, %v13922_v10, 0.0  ;;  %v13928_v50 = vpop.eup %11800 }
 0x5c6   : > { %3292 = vadd.xlane.f32.xlu0 %v3291_v32  ;;  %3286 = vadd.xlane.f32.xlu1 %v3285_v4  ;;  %v3258_v5 = vsel %vm1342_vm3, %v13928_v50, 0.0  ;;  %v13932_v26 = vpop.eup %11802  ;;  %v3204_v4 = vmul.f32 1.442695, %v3146_v28 }
 0x5c7   : > { %v3282_v1 = vsel %vm1342_vm3, %v13932_v26, 0.0  ;;  %v13936_v60 = vpop.eup %11804 }
 0x5c8   : > { %16256 = vst [vmem:[#allocation70_spill] sm:$0xff] %v13936_v60  ;;  %v3288_v49 = vsel %vm1342_vm3, %v13936_v60, 0.0  ;;  %v3148_v60 = vsub.f32 %v13778_v3, %v3110_v2 }
 0x5ca   : > { %3259 = vadd.xlane.f32.xlu1 %v3258_v5  ;;  %v3149_v5 = vsub.f32 %v13771_v52, %v3113_v8  ;;  %v11275_v52 = vunpack.i.h.bf16 %v13669_v56  ;;  %v3147_v8 = vsub.f32 %v13761_v54, %v3107_v35  ;;  %v3151_v54 = vsub.f32 %v13785_v36, %v3119_v16 }
 0x5cc   : > { %v10608_v56 = vpack.c.bf16 %v11275_v52, %v11274_v17  ;;  %v3214_v36 = vmul.f32 1.442695, %v3151_v54 }
 0x5ce   : > { %3283 = vadd.xlane.f32.xlu1 %v3282_v1 }
 0x5d2   : > { %3289 = vadd.xlane.f32.xlu1 %v3288_v49 }
 0x5dc   : > { %4162 = vrot.lane.b32.xlu0 %v12586_v13, %s12152_s15  ;;  %v11265_v13 = vunpack.i.h.bf16 %v13649_v33 }
 0x5e1   : > { %v3221_v30 = vpop.xlane.xlu0 %3220 }
 0x5e2   : > { %11806 = vrcp.f32 %v3221_v30  ;;  %v3218_v62 = vpop.xlane.xlu1 %3217  ;;  %v11264_v30 = vunpack.i.l.bf16 %v13649_v33  ;;  %v3208_v33 = vmul.f32 1.442695, %v3148_v60  ;;  %v11300_v60 = vunpack.i.h.bf16 %v13699_v25 }
 0x5e3   : > { %11808 = vrcp.f32 %v3218_v62  ;;  %4164 = vrot.lane.b32.xlu1 %v12601_v31, %s12152_s15  ;;  %v3210_v62 = vmul.f32 1.442695, %v3149_v5 }
 0x5e4   : > { %v10604_v28 = vpack.c.bf16 %v11265_v13, %v11264_v30 }
 0x5e6   : > { %v3227_v32 = vpop.xlane.xlu1 %3226 }
 0x5e7   : > { %11810 = vrcp.f32 %v3227_v32  ;;  %v3150_v32 = vsub.f32 %v13790_v29, %v3116_v43 }
 0x5e9   : > { %v3212_v35 = vmul.f32 1.442695, %v3150_v32 }
 0x5ea   : > { %v3224_v1 = vpop.xlane.xlu1 %3223 }
 0x5eb   : > { %11812 = vrcp.f32 %v3224_v1 }
 0x5ec   : > { %v11807_v49 = vpop.eup %11806  ;;  %11814 = vpow2.f32 %v3204_v4 }
 0x5ed   : > { %v11809_v10 = vpop.eup %11808  ;;  %v3315_v42 = vmul.f32 %v11807_v49, %v13814_v57  ;;  %11816 = vpow2.f32 %v3210_v62 }
 0x5ee   : > { %v3313_v31 = vmul.f32 %v11809_v10, %v13816_v24  ;;  %v11284_v24 = vunpack.i.l.bf16 %v13678_v27  ;;  %v3206_v10 = vmul.f32 1.442695, %v3147_v8  ;;  %11818 = vpow2.f32 %v3208_v33 }
 0x5f0   : > { %9704 = vmatprep.mubr.msk.f32.mxu1 %vm1342_vm3, %v3313_v31  ;;  %v11285_v31 = vunpack.i.h.bf16 %v13678_v27  ;;  %v11299_v27 = vunpack.i.l.bf16 %v13699_v25  ;;  %11820 = vpow2.f32 %v3206_v10 }
 0x5f1   : > { %9705 = vmatmul.mubr.msk.f32.vlgmr.msra.gmra.mrb[48].mxu1 %vm1342_vm3, %v3315_v42  ;;  %v11811_v3 = vpop.eup %11810  ;;  %11822 = vpow2.f32 %v3212_v35 }
 0x5f2   : > { %10603 = vmatpush3.bf16.msra.mxu1 %v13528_v44  ;;  %v3319_v29 = vmul.f32 %v11811_v3, %v13822_v21  ;;  %v10612_v2 = vpack.c.bf16 %v11285_v31, %v11284_v24  ;;  %v13973_v16 = vpack.c.bf16 %v11300_v60, %v11299_v27  ;;  %11824 = vpow2.f32 %v3214_v36  ;;  %v16260_v27 = vld [vmem:[#allocation35_spill] sm:$0xff] }
 0x5f3   : > { %10605 = vmatprep.subr.bf16.mxu1 %v10604_v28 }
 0x5f5   : > { %v11813_v57 = vpop.eup %11812 }
 0x5f6   : > { %10607 = vmatpush3.bf16.msra.mxu1 %v10604_v28  ;;  %v3317_v13 = vmul.f32 %v11813_v57, %v13826_v7  ;;  %v13963_v44 = vpop.eup %11814 }
 0x5f7   : > { %10609 = vmatprep.subr.bf16.mxu1 %v10608_v56  ;;  %v3294_v7 = vsel %vm1342_vm3, %v13963_v44, 0.0  ;;  %v13971_v21 = vpop.eup %11816 }
 0x5f8   : > { %9707 = vmatprep.mubr.msk.f32.mxu1 %vm1342_vm3, %v3317_v13  ;;  %v3303_v25 = vsel %vm1342_vm3, %v13971_v21, 0.0  ;;  %v13980_v43 = vpop.eup %11818 }
 0x5f9   : > { %9708 = vmatmul.mubr.msk.f32.gmra.mrb[50].mxu1 %vm1342_vm3, %v3319_v29  ;;  %v3300_v5 = vsel %vm1342_vm3, %v13980_v43, 0.0 }
 0x5fa   : > { %10611 = vmatpush3.bf16.msra.mxu1 %v10608_v56  ;;  %v13982_v4 = vpop.eup %11820  ;;  %v16257_v56 = vld [vmem:[#allocation19_spill] sm:$0xff] }
 0x5fb   : > { %10613 = vmatprep.subr.bf16.mxu1 %v10612_v2  ;;  %3295 = vadd.xlane.f32.xlu0 %v3294_v7  ;;  %v13986_v1 = vpop.eup %11822  ;;  %v3297_v49 = vsel %vm1342_vm3, %v13982_v4, 0.0  ;;  %v16261_v7 = vld [vmem:[#allocation51_spill] sm:$0xff] }
 0x5fc   : > { %v3306_v30 = vsel %vm1342_vm3, %v13986_v1, 0.0  ;;  %v13992_v62 = vpop.eup %11824 }
 0x5fd   : > { %v3309_v42 = vsel %vm1342_vm3, %v13992_v62, 0.0 }
 0x5fe   : > { %10615 = vmatpush3.bf16.msra.mxu1 %v10612_v2 }
 0x5ff   : > { %10634 = vmatprep.subr.msk.bf16.mxu1 %vm12548_vm2, %v13973_v16  ;;  %3304 = vadd.xlane.f32.xlu0 %v3303_v25  ;;  %v11295_v25 = vunpack.i.h.bf16 %v16261_v7 }
 0x603   : > { %3301 = vadd.xlane.f32.xlu0 %v3300_v5  ;;  %v11294_v5 = vunpack.i.l.bf16 %v16261_v7  ;;  %v16272_v7 = vld [vmem:[#allocation61_spill] sm:$0xff] }
 0x607   : > { %3298 = vadd.xlane.f32.xlu1 %v3297_v49  ;;  %3307 = vadd.xlane.f32.xlu0 %v3306_v30  ;;  %v16263_v30 = vld [vmem:[#allocation39_spill] sm:$0xff] }
 0x60b   : > { %3310 = vadd.xlane.f32.xlu1 %v3309_v42 }
 0x61c   : > { %11372 = vrot.lane.b32.xlu1 %v12460_v59, %s12151_s14 }
 0x61d   : > { %11367 = vrot.lane.b32.xlu0 %v12436_v37, %s12151_s14 }
 0x61f   : > { %v3233_v52 = vpop.xlane.xlu0 %3232 }
 0x620   : > { %11826 = vrcp.f32 %v3233_v52  ;;  %4168 = vrot.lane.b32.xlu1 %v12613_v46, %s12152_s15  ;;  %v3230_v17 = vpop.xlane.xlu1 %3229 }
 0x621   : > { %11828 = vrcp.f32 %v3230_v17  ;;  %4166 = vrot.lane.b32.xlu0 %v12604_v34, %s12152_s15  ;;  %v16264_v17 = vld [vmem:[#allocation59_spill] sm:$0xff] }
 0x624   : > { %4172 = vrot.lane.b32.xlu1 %v12629_v51, %s12152_s15  ;;  %v3239_v8 = vpop.xlane.xlu1 %3238 }
 0x625   : > { %4170 = vrot.lane.b32.xlu0 %v12616_v53, %s12152_s15  ;;  %11830 = vrcp.f32 %v3239_v8  ;;  %v11305_v8 = vunpack.i.h.bf16 %v16264_v17 }
 0x627   : > { %v3236_v28 = vpop.xlane.xlu0 %3235 }
 0x628   : > { %11832 = vrcp.f32 %v3236_v28  ;;  %4496 = vrot.lane.b32.xlu1 %v12395_v20, %s12152_s15  ;;  %v11304_v28 = vunpack.i.l.bf16 %v16264_v17  ;;  %v16274_v17 = vld [vmem:[#allocation38_spill] sm:$0xff] }
 0x629   : > { %11377 = vrot.lane.b32.xlu0 %v16181_v23, %s12151_s14 }
 0x62a   : > { %v11827_v33 = vpop.eup %11826 }
 0x62b   : > { %v11829_v32 = vpop.eup %11828  ;;  %v3245_v3 = vpop.xlane.xlu0 %3244  ;;  %v3323_v24 = vmul.f32 %v11827_v33, %v13837_v61  ;;  %v16259_v61 = vld [vmem:[#allocation37_spill] sm:$0xff]  ;;  %v10620_v33 = vpack.c.bf16 %v11295_v25, %v11294_v5  ;;  %v11320_v25 = vunpack.i.h.bf16 %v16272_v7  ;;  %v11319_v5 = vunpack.i.l.bf16 %v16272_v7 }
 0x62c   : > { %11834 = vrcp.f32 %v3245_v3  ;;  %4331 = vrot.lane.b32.xlu1 %v12657_v48, %s12152_s15  ;;  %v3242_v57 = vpop.xlane.xlu1 %3241  ;;  %v3321_v31 = vmul.f32 %v11829_v32, %v13839_v0  ;;  %v16258_v0 = vld [vmem:[#allocation33_spill] sm:$0xff]  ;;  %v16265_v32 = vld [vmem:[#allocation63_spill] sm:$0xff] }
 0x62d   : > { %11836 = vrcp.f32 %v3242_v57  ;;  %4498 = vrot.lane.b32.xlu0 %v16183_v9, %s12152_s15  ;;  %v11315_v3 = vunpack.i.h.bf16 %v16265_v32  ;;  %v16266_v57 = vld [vmem:[#allocation52_spill] sm:$0xff] }
 0x62e   : > { %9710 = vmatprep.mubr.msk.f32.mxu1 %vm1342_vm3, %v3321_v31 }
 0x62f   : > { %v3269_v10 = vpop.xlane.xlu0 %3268  ;;  %9711 = vmatmul.mubr.msk.f32.gmra.mrb[52].mxu1 %vm1342_vm3, %v3323_v24  ;;  %v11831_v35 = vpop.eup %11830 }
 0x630   : > { %11838 = vrcp.f32 %v3269_v10  ;;  %11382 = vrot.lane.b32.xlu1 %v16257_v56, %s12151_s14  ;;  %v3266_v54 = vpop.xlane.xlu1 %3265  ;;  %v3327_v60 = vmul.f32 %v11831_v35, %v13847_v45  ;;  %v16268_v10 = vld [vmem:[#allocation43_spill] sm:$0xff] }
 0x631   : > { %11840 = vrcp.f32 %v3266_v54  ;;  %4333 = vrot.lane.b32.xlu0 %v16258_v0, %s12152_s15  ;;  %v16269_v54 = vld [vmem:[#allocation22_spill] sm:$0xff] }
 0x632   : > { %v11833_v13 = vpop.eup %11832  ;;  %v11310_v35 = vunpack.i.h.bf16 %v16269_v54 }
 0x633   : > { %v3325_v29 = vmul.f32 %v11833_v13, %v13851_v58  ;;  %v16262_v58 = vld [vmem:[#allocation41_spill] sm:$0xff]  ;;  %v11309_v13 = vunpack.i.l.bf16 %v16269_v54 }
 0x634   : > { %4337 = vrot.lane.b32.xlu1 %v16259_v61, %s12152_s15 }
 0x635   : > { %4335 = vrot.lane.b32.xlu0 %v16260_v27, %s12152_s15  ;;  %9713 = vmatprep.mubr.msk.f32.mxu1 %vm1342_vm3, %v3325_v29 }
 0x636   : > { %v11835_v2 = vpop.eup %11834  ;;  %9714 = vmatmul.mubr.msk.f32.gmra.mrb[54].mxu1 %vm1342_vm3, %v3327_v60  ;;  %v10624_v60 = vpack.c.bf16 %v11305_v8, %v11304_v28  ;;  %v16275_v28 = vld [vmem:[#allocation36_spill] sm:$0xff] }
 0x637   : > { %v11837_v36 = vpop.eup %11836  ;;  %v3331_v45 = vmul.f32 %v11835_v2, %v13855_v6  ;;  %v16267_v6 = vld [vmem:[#allocation44_spill] sm:$0xff] }
 0x638   : > { %4341 = vrot.lane.b32.xlu1 %v16262_v58, %s12152_s15  ;;  %v3329_v49 = vmul.f32 %v11837_v36, %v13857_v15  ;;  %v11314_v15 = vunpack.i.l.bf16 %v16265_v32  ;;  %v16271_v36 = vld [vmem:[#allocation32_spill] sm:$0xff] }
 0x639   : > { %4339 = vrot.lane.b32.xlu0 %v16263_v30, %s12152_s15 }
 0x63a   : > { %v11839_v42 = vpop.eup %11838  ;;  %9732 = vmatprep.mubr.msk.f32.mxu0 %vm1342_vm3, %v3329_v49  ;;  %v10638_v2 = vpack.c.bf16 %v11315_v3, %v11314_v15  ;;  %v16276_v15 = vld [vmem:[#allocation42_spill] sm:$0xff] }
 0x63b   : > { %v11841_v52 = vpop.eup %11840  ;;  %9733 = vmatmul.mubr.msk.f32.vlgmr.msra.gmra.mrb[80].mxu0 %vm1342_vm3, %v3331_v45  ;;  %v3347_v24 = vmul.f32 %v11839_v42, %v13861_v22  ;;  %v3251_v22 = vpop.xlane.xlu0 %3250  ;;  %v10628_v45 = vpack.c.bf16 %v11310_v35, %v11309_v13  ;;  %v16273_v42 = vld [vmem:[#allocation65_spill] sm:$0xff] }
 0x63c   : > { %10619 = vmatpush3.bf16.msra.mxu0 %v16266_v57  ;;  %4667 = vrot.lane.b32.xlu1 %v16267_v6, %s12152_s15  ;;  %v3345_v31 = vmul.f32 %v11841_v52, %v13866_v41  ;;  %v16270_v41 = vld [vmem:[#allocation34_spill] sm:$0xff]  ;;  %v11325_v52 = vunpack.i.h.bf16 %v16273_v42  ;;  %11842 = vrcp.f32 %v3251_v22  ;;  %v16277_v57 = vld [vmem:[#allocation40_spill] sm:$0xff] }
 0x63d   : > { %10621 = vmatprep.subr.bf16.mxu0 %v10620_v33  ;;  %4665 = vrot.lane.b32.xlu0 %v16268_v10, %s12152_s15 }
 0x63e   : > { %9760 = vmatprep.mubr.msk.f32.mxu1 %vm1342_vm3, %v3345_v31  ;;  %v16278_v31 = vld [vmem:[#allocation68_spill] sm:$0xff] }
 0x63f   : > { %9761 = vmatmul.mubr.msk.f32.vlgmr.msra.gmra.mrb[56].mxu1 %vm1342_vm3, %v3347_v24  ;;  %v3275_v29 = vpop.xlane.xlu1 %3274  ;;  %v11330_v24 = vunpack.i.h.bf16 %v16278_v31  ;;  %v11329_v54 = vunpack.i.l.bf16 %v16278_v31 }
 0x640   : > { %10623 = vmatpush3.bf16.msra.mxu0 %v10620_v33  ;;  %10637 = vmatpush3.bf16.xpose.msk.msra.mxu1 %vm12548_vm2, %v13973_v16  ;;  %v11324_v16 = vunpack.i.l.bf16 %v16273_v42  ;;  %v10644_v33 = vpack.c.bf16 %v11320_v25, %v11319_v5 }
 0x641   : > { %4502 = vrot.lane.b32.xlu1 %v16270_v41, %s12152_s15  ;;  %10625 = vmatprep.subr.bf16.mxu0 %v10624_v60  ;;  %v10650_v7 = vpack.c.bf16 %v11330_v24, %v11329_v54  ;;  %v16284_v54 = vld [vmem:[#allocation50_spill] sm:$0xff] }
 0x642   : > { %10640 = vmatprep.subr.msk.bf16.mxu1 %vm12548_vm2, %v10638_v2  ;;  %4500 = vrot.lane.b32.xlu0 %v16271_v36, %s12152_s15  ;;  %v14074_v3 = vpack.c.bf16 %v11325_v52, %v11324_v16  ;;  %v16282_v52 = vld [vmem:[#allocation47_spill] sm:$0xff] }
 0x643   : > { %v3248_v49 = vpop.xlane.xlu1 %3247  ;;  %v3257_v8 = vpop.xlane.xlu0 %3256 }
 0x644   : > { %10627 = vmatpush3.bf16.msra.mxu0 %v10624_v60  ;;  %11844 = vrcp.f32 %v3248_v49  ;;  %v16281_v49 = vld [vmem:[#allocation48_spill] sm:$0xff] }
 0x645   : > { %4506 = vrot.lane.b32.xlu1 %v16274_v17, %s12152_s15  ;;  %10629 = vmatprep.subr.bf16.mxu0 %v10628_v45  ;;  %11846 = vrcp.f32 %v3275_v29  ;;  %v16279_v29 = vld [vmem:[#allocation46_spill] sm:$0xff] }
 0x646   : > { %4504 = vrot.lane.b32.xlu0 %v16275_v28, %s12152_s15  ;;  %v11843_v60 = vpop.eup %11842 }
 0x647   : > { %v3272_v32 = vpop.xlane.xlu1 %3271  ;;  %v3281_v13 = vpop.xlane.xlu0 %3280 }
 0x648   : > { %10631 = vmatpush3.bf16.msra.mxu0 %v10628_v45  ;;  %10643 = vmatpush3.bf16.xpose.msk.msra.mxu1 %vm12548_vm2, %v10638_v2  ;;  %11848 = vrcp.f32 %v3272_v32  ;;  %v16280_v2 = vld [vmem:[#allocation45_spill] sm:$0xff]  ;;  %v3335_v45 = vmul.f32 %v11843_v60, %v13870_v11 }
 0x649   : > { %4510 = vrot.lane.b32.xlu1 %v16276_v15, %s12152_s15  ;;  %10646 = vmatprep.subr.msk.bf16.mxu1 %vm12548_vm2, %v10644_v33  ;;  %11850 = vrcp.f32 %v3257_v8  ;;  %v16283_v8 = vld [vmem:[#allocation67_spill] sm:$0xff] }
 0x64a   : > { %10658 = vmatprep.subr.msk.bf16.mxu0 %vm12548_vm2, %v14074_v3  ;;  %4508 = vrot.lane.b32.xlu0 %v16277_v57, %s12152_s15  ;;  %v11344_v32 = vunpack.i.l.bf16 %v16283_v8 }
 0x64b   : > { %v3254_v35 = vpop.xlane.xlu1 %3253  ;;  %v3263_v31 = vpop.xlane.xlu0 %3262 }
 0x64c   : > { %11852 = vrcp.f32 %v3254_v35 }
 0x64d   : > { %4671 = vrot.lane.b32.xlu1 %v16279_v29, %s12152_s15  ;;  %11854 = vrcp.f32 %v3281_v13  ;;  %v16285_v13 = vld [vmem:[#allocation49_spill] sm:$0xff] }
 0x64e   : > { %4669 = vrot.lane.b32.xlu0 %v16280_v2, %s12152_s15  ;;  %v11845_v22 = vpop.eup %11844 }
 0x64f   : > { %v3278_v25 = vpop.xlane.xlu1 %3277  ;;  %v3333_v5 = vmul.f32 %v11845_v22, %v13887_v18  ;;  %v11847_v42 = vpop.eup %11846 }
 0x650   : > { %10649 = vmatpush3.bf16.xpose.msk.msra.mxu1 %vm12548_vm2, %v10644_v33  ;;  %11856 = vrcp.f32 %v3278_v25  ;;  %v11345_v33 = vunpack.i.h.bf16 %v16283_v8  ;;  %v3351_v11 = vmul.f32 %v11847_v42, %v13883_v47 }
 0x651   : > { %4675 = vrot.lane.b32.xlu1 %v16281_v49, %s12152_s15  ;;  %10652 = vmatprep.subr.msk.bf16.mxu1 %vm12548_vm2, %v10650_v7  ;;  %11858 = vrcp.f32 %v3263_v31 }
 0x652   : > { %4673 = vrot.lane.b32.xlu0 %v16282_v52, %s12152_s15  ;;  %9735 = vmatprep.mubr.msk.f32.mxu0 %vm1342_vm3, %v3333_v5  ;;  %v11849_v16 = vpop.eup %11848  ;;  %v14114_v22 = vpack.c.bf16 %v11345_v33, %v11344_v32  ;;  %v16286_v5 = vld [vmem:[#allocation5_spill] sm:$0xff]  ;;  %v16288_v32 = vld [vmem:[#allocation7_spill] sm:$0xff] }
 0x653   : > { %9736 = vmatmul.mubr.msk.f32.gmra.mrb[82].mxu0 %vm1342_vm3, %v3335_v45  ;;  %v3287_v18 = vpop.xlane.xlu1 %3286  ;;  %v3349_v24 = vmul.f32 %v11849_v16, %v13897_v39  ;;  %v11851_v35 = vpop.eup %11850  ;;  %v16287_v16 = vld [vmem:[#allocation3_spill] sm:$0xff] }
 0x654   : > { %v3339_v45 = vmul.f32 %v11851_v35, %v13890_v63  ;;  %v3293_v8 = vpop.xlane.xlu0 %3292  ;;  %v16289_v63 = vld [vmem:[#allocation6_spill] sm:$0xff] }
 0x655   : > { %4679 = vrot.lane.b32.xlu1 %v16284_v54, %s12152_s15  ;;  %9763 = vmatprep.mubr.msk.f32.mxu1 %vm1342_vm3, %v3349_v24  ;;  %v16302_v54 = vld [vmem:[#allocation60_spill] sm:$0xff] }
 0x656   : > { %4677 = vrot.lane.b32.xlu0 %v16285_v13, %s12152_s15  ;;  %v11853_v60 = vpop.eup %11852  ;;  %9764 = vmatmul.mubr.msk.f32.gmra.mrb[58].mxu1 %vm1342_vm3, %v3351_v11  ;;  %s12159_s15 = smov 24  }
 0x657   : > { %v3260_v25 = vpop.xlane.xlu1 %3259  ;;  %v3337_v39 = vmul.f32 %v11853_v60, %v13907_v55  ;;  %v11855_v47 = vpop.eup %11854 }
 0x658   : > { %10655 = vmatpush3.bf16.xpose.msk.msra.mxu1 %vm12548_vm2, %v10650_v7  ;;  %11860 = vrcp.f32 %v3260_v25  ;;  %v3355_v33 = vmul.f32 %v11855_v47, %v13900_v38  ;;  %v16291_v38 = vld [vmem:[#allocation8_spill] sm:$0xff]  ;;  %v16292_v25 = vld [vmem:[#allocation14_spill] sm:$0xff]  ;;  %v16293_v47 = vld [vmem:[#allocation9_spill] sm:$0xff] }
 0x659   : > { %11392 = vrot.lane.b32.xlu1 %v16286_v5, %s12153_s11  ;;  %10682 = vmatprep.subr.msk.bf16.mxu1 %vm12548_vm2, %v14114_v22  ;;  %11862 = vrcp.f32 %v3287_v18 }
 0x65a   : > { %v11857_v42 = vpop.eup %11856  ;;  %11387 = vrot.lane.b32.xlu0 %v16287_v16, %s12153_s11  ;;  %9738 = vmatprep.mubr.msk.f32.mxu0 %vm1342_vm3, %v3337_v39 }
 0x65b   : > { %9739 = vmatmul.mubr.msk.f32.gmra.mrb[84].mxu0 %vm1342_vm3, %v3339_v45  ;;  %v3284_v55 = vpop.xlane.xlu1 %3283  ;;  %v3353_v7 = vmul.f32 %v11857_v42, %v13916_v14  ;;  %v11859_v31 = vpop.eup %11858  ;;  %v16290_v14 = vld [vmem:[#allocation13_spill] sm:$0xff] }
 0x65c   : > { %11864 = vrcp.f32 %v3284_v55  ;;  %v3343_v35 = vmul.f32 %v11859_v31, %v13909_v19  ;;  %v16297_v31 = vld [vmem:[#allocation57_spill] sm:$0xff] }
 0x65d   : > { %11402 = vrot.lane.b32.xlu1 %v16288_v32, %s12153_s11  ;;  %9766 = vmatprep.mubr.msk.f32.mxu1 %vm1342_vm3, %v3353_v7  ;;  %11866 = vrcp.f32 %v3293_v8  ;;  %v16295_v7 = vld [vmem:[#allocation56_spill] sm:$0xff] }
 0x65e   : > { %11397 = vrot.lane.b32.xlu0 %v16289_v63, %s12153_s11  ;;  %9767 = vmatmul.mubr.msk.f32.gmra.mrb[60].mxu1 %vm1342_vm3, %v3355_v33  ;;  %v11335_v8 = vunpack.i.h.bf16 %v16295_v7  ;;  %v16296_v33 = vld [vmem:[#allocation10_spill] sm:$0xff] }
 0x65f   : > { %v3290_v18 = vpop.xlane.xlu1 %3289 }
 0x660   : > { %11868 = vrcp.f32 %v3290_v18  ;;  %v11334_v18 = vunpack.i.l.bf16 %v16295_v7 }
 0x661   : > { %11412 = vrot.lane.b32.xlu1 %v16290_v14, %s12153_s11 }
 0x662   : > { %v11861_v24 = vpop.eup %11860  ;;  %11407 = vrot.lane.b32.xlu0 %v16291_v38, %s12153_s11 }
 0x663   : > { %v3341_v11 = vmul.f32 %v11861_v24, %v13928_v50  ;;  %v11863_v60 = vpop.eup %11862  ;;  %v16294_v50 = vld [vmem:[#allocation15_spill] sm:$0xff]  ;;  %v16298_v24 = vld [vmem:[#allocation54_spill] sm:$0xff] }
 0x664   : > { %v3359_v42 = vmul.f32 %v11863_v60, %v13920_v12  ;;  %v11354_v12 = vunpack.i.l.bf16 %v16297_v31  ;;  %v16300_v60 = vld [vmem:[#allocation66_spill] sm:$0xff] }
 0x665   : > { %11422 = vrot.lane.b32.xlu1 %v16292_v25, %s12153_s11  ;;  %9741 = vmatprep.mubr.msk.f32.mxu0 %vm1342_vm3, %v3341_v11  ;;  %v16299_v11 = vld [vmem:[#allocation70_spill] sm:$0xff] }
 0x666   : > { %v11865_v39 = vpop.eup %11864  ;;  %11417 = vrot.lane.b32.xlu0 %v16293_v47, %s12153_s11  ;;  %9742 = vmatmul.mubr.msk.f32.gmra.mrb[86].mxu0 %vm1342_vm3, %v3343_v35 }
 0x667   : > { %v3357_v45 = vmul.f32 %v11865_v39, %v13932_v26  ;;  %v11867_v55 = vpop.eup %11866  ;;  %v11355_v26 = vunpack.i.h.bf16 %v16297_v31  ;;  %v4163_v31 = vpop.permute.xlu0 %4162 }
 0x668   : > { %v3363_v39 = vmul.f32 %v11867_v55, %v16300_v60  ;;  %v16303_v55 = vld [vmem:[#allocation53_spill] sm:$0xff] }
 0x669   : > { %11432 = vrot.lane.b32.xlu1 %v16294_v50, %s12153_s11  ;;  %9769 = vmatprep.mubr.msk.f32.mxu1 %vm1342_vm3, %v3357_v45  ;;  %v16301_v45 = vld [vmem:[#allocation11_spill] sm:$0xff]  ;;  %v10686_v7 = vpack.c.bf16 %v11355_v26, %v11354_v12 }
 0x66a   : > { %v11869_v19 = vpop.eup %11868  ;;  %11427 = vrot.lane.b32.xlu0 %v16296_v33, %s12153_s11  ;;  %9770 = vmatmul.mubr.msk.f32.gmra.mrb[62].mxu1 %vm1342_vm3, %v3359_v42  ;;  %v10662_v42 = vpack.c.bf16 %v11335_v8, %v11334_v18  ;;  %v4165_v8 = vpop.permute.xlu1 %4164 }
 0x66b   : > { %9816 = vmatprep.mubr.msk.f32.mxu1 %vm689_vm1, %v16298_v24  ;;  %v3361_v35 = vmul.f32 %v11869_v19, %v16299_v11  ;;  %v11340_v19 = vunpack.i.h.bf16 %v16303_v55  ;;  %v16306_v11 = vld [vmem:[#allocation62_spill] sm:$0xff] }
 0x66c   : > { %v11349_v60 = vunpack.i.l.bf16 %v16306_v11 }
 0x66d   : > { %11442 = vrot.lane.b32.xlu1 %v12436_v37, %s12153_s11  ;;  %9788 = vmatprep.mubr.msk.f32.mxu0 %vm1342_vm3, %v3361_v35  ;;  %v11350_v35 = vunpack.i.h.bf16 %v16306_v11 }
 0x66e   : > { %11437 = vrot.lane.b32.xlu0 %v16301_v45, %s12153_s11  ;;  %9789 = vmatmul.mubr.msk.f32.vlgmr.msra.gmra.mrb[88].mxu0 %vm1342_vm3, %v3363_v39 }
 0x66f   : > { %9817 = vmatmul.mubr.msk.f32.vlgmr.msra.gmra.mrb[64].mxu1 %vm689_vm1, %v16302_v54  ;;  %10661 = vmatpush3.bf16.xpose.msk.msra.mxu0 %vm12548_vm2, %v14074_v3  ;;  %v11339_v54 = vunpack.i.l.bf16 %v16303_v55  ;;  %v16304_v3 = vld [vmem:[#allocation16_spill] sm:$0xff]  ;;  %v10674_v39 = vpack.c.bf16 %v11350_v35, %v11349_v60 }
 0x670   : > { %10685 = vmatpush3.bf16.xpose.msk.msra.mxu1 %vm12548_vm2, %v14114_v22  ;;  %9819 = vmatprep.mubr.msk.f32.mxu1 %vm689_vm1, %v4163_v31  ;;  %v16305_v22 = vld [vmem:[#allocation58_spill] sm:$0xff] }
 0x671   : > { %10664 = vmatprep.subr.msk.bf16.mxu0 %vm12548_vm2, %v10662_v42  ;;  %10688 = vmatprep.subr.msk.bf16.mxu1 %vm12548_vm2, %v10686_v7  ;;  %v11360_v18 = vunpack.i.h.bf16 %v16305_v22  ;;  %v11359_v26 = vunpack.i.l.bf16 %v16305_v22  ;;  %v10668_v12 = vpack.c.bf16 %v11340_v19, %v11339_v54 }
 0x672   : > { %11452 = vrot.lane.b32.xlu1 %v12460_v59, %s12153_s11  ;;  %11447 = vrot.lane.b32.xlu0 %v16304_v3, %s12153_s11 }
 0x673   : > { %9820 = vmatmul.mubr.msk.f32.gmra.mrb[66].mxu1 %vm689_vm1, %v4165_v8  ;;  %v10692_v24 = vpack.c.bf16 %v11360_v18, %v11359_v26 }
 0x676   : > { %11457 = vrot.lane.b32.xlu1 %v16287_v16, %s12154_s12  ;;  %11462 = vrot.lane.b32.xlu0 %v16181_v23, %s12153_s11 }
 0x677   : > { %10667 = vmatpush3.bf16.xpose.msk.msra.mxu0 %vm12548_vm2, %v10662_v42  ;;  %v16307_v42 = vld [vmem:[#allocation55_spill] sm:$0xff] }
 0x678   : > { %10691 = vmatpush3.bf16.xpose.msk.msra.mxu1 %vm12548_vm2, %v10686_v7  ;;  %10670 = vmatprep.subr.msk.bf16.mxu0 %vm12548_vm2, %v10668_v12  ;;  %v11365_v7 = vunpack.i.h.bf16 %v16307_v42  ;;  %v11364_v31 = vunpack.i.l.bf16 %v16307_v42 }
 0x679   : > { %10694 = vmatprep.subr.msk.bf16.mxu1 %vm12548_vm2, %v10692_v24 }
 0x67a   : > { %11472 = vrot.lane.b32.xlu1 %v16286_v5, %s12154_s12  ;;  %11467 = vrot.lane.b32.xlu0 %v16257_v56, %s12153_s11  ;;  %v10704_v55 = vpack.c.bf16 %v11365_v7, %v11364_v31 }
 0x67f   : > { %10673 = vmatpush3.bf16.xpose.msk.msra.mxu0 %vm12548_vm2, %v10668_v12 }
 0x680   : > { %10697 = vmatpush3.bf16.xpose.msk.msra.mxu1 %vm12548_vm2, %v10692_v24  ;;  %10676 = vmatprep.subr.msk.bf16.mxu0 %vm12548_vm2, %v10674_v39 }
 0x687   : > { %10679 = vmatpush3.bf16.xpose.msk.msra.mxu0 %vm12548_vm2, %v10674_v39 }
 0x688   : > { %10706 = vmatprep.subr.msk.bf16.mxu0 %vm12548_vm2, %v10704_v55  ;;  %v3296_v19 = vpop.xlane.xlu0 %3295 }
 0x689   : > { %11870 = vrcp.f32 %v3296_v19 }
 0x68c   : > { %v3305_v54 = vpop.xlane.xlu0 %3304 }
 0x690   : > { %v3302_v8 = vpop.xlane.xlu0 %3301 }
 0x691   : > { %11872 = vrcp.f32 %v3302_v8 }
 0x693   : > { %v11871_v22 = vpop.eup %11870 }
 0x694   : > { %v3308_v18 = vpop.xlane.xlu0 %3307  ;;  %v3299_v26 = vpop.xlane.xlu1 %3298  ;;  %v3365_v12 = vmul.f32 %v11871_v22, %v13963_v44 }
 0x695   : > { %11874 = vrcp.f32 %v3299_v26 }
 0x696   : > { %9791 = vmatprep.mubr.msk.f32.mxu0 %vm1342_vm3, %v3365_v12  ;;  %11876 = vrcp.f32 %v3305_v54 }
 0x697   : > { %11878 = vrcp.f32 %v3308_v18 }
 0x698   : > { %v11368_v24 = vpop.permute.xlu0 %11367  ;;  %v3311_v11 = vpop.xlane.xlu1 %3310 }
 0x699   : > { %v11370_v35 = vunpack.i.h.bf16 %v11368_v24  ;;  %v11369_v60 = vunpack.i.l.bf16 %v11368_v24  ;;  %11880 = vrcp.f32 %v3311_v11 }
 0x69b   : > { %v10698_v39 = vpack.c.bf16 %v11370_v35, %v11369_v60  ;;  %v11873_v44 = vpop.eup %11872 }
 0x69c   : > { %v4167_v42 = vpop.permute.xlu0 %4166  ;;  %v11373_v7 = vpop.permute.xlu1 %11372  ;;  %v3369_v18 = vmul.f32 %v11873_v44, %v13980_v43 }
 0x69d   : > { %9822 = vmatprep.mubr.msk.f32.mxu1 %vm689_vm1, %v4167_v42  ;;  %10700 = vmatprep.subr.msk.bf16.mxu1 %vm12548_vm2, %v10698_v39  ;;  %v11375_v42 = vunpack.i.h.bf16 %v11373_v7  ;;  %v11374_v44 = vunpack.i.l.bf16 %v11373_v7 }
 0x69e   : > { %10703 = vmatpush3.bf16.xpose.msk.msra.mxu1 %vm12548_vm2, %v10698_v39 }
 0x69f   : > { %v11875_v31 = vpop.eup %11874 }
 0x6a0   : > { %v4171_v19 = vpop.permute.xlu0 %4170  ;;  %v4169_v54 = vpop.permute.xlu1 %4168  ;;  %v3367_v8 = vmul.f32 %v11875_v31, %v13982_v4 }
 0x6a1   : > { %9823 = vmatmul.mubr.msk.f32.gmra.mrb[68].mxu1 %vm689_vm1, %v4169_v54  ;;  %v11877_v22 = vpop.eup %11876  ;;  %v16309_v54 = vld [vmem:[#allocation64_spill] sm:$0xff] }
 0x6a2   : > { %9825 = vmatprep.mubr.msk.f32.mxu1 %vm689_vm1, %v4171_v19  ;;  %v11879_v26 = vpop.eup %11878  ;;  %9792 = vmatmul.mubr.msk.f32.gmra.mrb[90].mxu0 %vm1342_vm3, %v3367_v8  ;;  %v3371_v11 = vmul.f32 %v11877_v22, %v13971_v21  ;;  %v16308_v21 = vld [vmem:[#allocation69_spill] sm:$0xff]  ;;  %v10710_v19 = vpack.c.bf16 %v11375_v42, %v11374_v44 }
 0x6a3   : > { %9794 = vmatprep.mubr.msk.f32.mxu0 %vm1342_vm3, %v3369_v18  ;;  %v11881_v35 = vpop.eup %11880  ;;  %v3373_v60 = vmul.f32 %v11879_v26, %v13986_v1 }
 0x6a4   : > { %v11378_v12 = vpop.permute.xlu0 %11377  ;;  %v4173_v24 = vpop.permute.xlu1 %4172  ;;  %v3375_v39 = vmul.f32 %v11881_v35, %v13992_v62 }
 0x6a5   : > { %9826 = vmatmul.mubr.msk.f32.gmra.mrb[70].mxu1 %vm689_vm1, %v4173_v24  ;;  %v11380_v7 = vunpack.i.h.bf16 %v11378_v12  ;;  %v11379_v22 = vunpack.i.l.bf16 %v11378_v12 }
 0x6a6   : > { %9795 = vmatmul.mubr.msk.f32.gmra.mrb[92].mxu0 %vm1342_vm3, %v3371_v11 }
 0x6a7   : > { %9797 = vmatprep.mubr.msk.f32.mxu0 %vm1342_vm3, %v3373_v60  ;;  %v10716_v24 = vpack.c.bf16 %v11380_v7, %v11379_v22 }
 0x6a8   : > { %v4499_v4 = vpop.permute.xlu0 %4498  ;;  %v4497_v43 = vpop.permute.xlu1 %4496 }
 0x6a9   : > { %9872 = vmatprep.mubr.msk.f32.mxu1 %vm689_vm1, %v4497_v43 }
 0x6aa   : > { %9873 = vmatmul.mubr.msk.f32.vlgmr.msra.gmra.mrb[72].mxu1 %vm689_vm1, %v4499_v4  ;;  %9798 = vmatmul.mubr.msk.f32.gmra.mrb[94].mxu0 %vm1342_vm3, %v3375_v39 }
 0x6ab   : > { %9844 = vmatprep.mubr.msk.f32.mxu0 %vm689_vm1, %v16308_v21 }
 0x6ac   : > { %v4334_v1 = vpop.permute.xlu0 %4333  ;;  %v4332_v31 = vpop.permute.xlu1 %4331 }
 0x6ae   : > { %9845 = vmatmul.mubr.msk.f32.vlgmr.msra.gmra.mrb[96].mxu0 %vm689_vm1, %v16309_v54 }
 0x6af   : > { %10709 = vmatpush3.bf16.xpose.msk.msra.mxu0 %vm12548_vm2, %v10704_v55  ;;  %9847 = vmatprep.mubr.msk.f32.mxu0 %vm689_vm1, %v4332_v31 }
 0x6b0   : > { %v4336_v62 = vpop.permute.xlu0 %4335  ;;  %v11383_v8 = vpop.permute.xlu1 %11382  ;;  %10712 = vmatprep.subr.msk.bf16.mxu0 %vm12548_vm2, %v10710_v19 }
 0x6b1   : > { %v11385_v12 = vunpack.i.h.bf16 %v11383_v8  ;;  %v11384_v35 = vunpack.i.l.bf16 %v11383_v8 }
 0x6b2   : > { %9848 = vmatmul.mubr.msk.f32.gmra.mrb[98].mxu0 %vm689_vm1, %v4334_v1 }
 0x6b3   : > { %9850 = vmatprep.mubr.msk.f32.mxu0 %vm689_vm1, %v4336_v62  ;;  %v10722_v43 = vpack.c.bf16 %v11385_v12, %v11384_v35 }
 0x6b4   : > { %v4340_v18 = vpop.permute.xlu0 %4339  ;;  %v4338_v26 = vpop.permute.xlu1 %4337 }
 0x6b6   : > { %9851 = vmatmul.mubr.msk.f32.gmra.mrb[100].mxu0 %vm689_vm1, %v4338_v26 }
 0x6b7   : > { %10715 = vmatpush3.bf16.xpose.msk.msra.mxu0 %vm12548_vm2, %v10710_v19  ;;  %9853 = vmatprep.mubr.msk.f32.mxu0 %vm689_vm1, %v4340_v18 }
 0x6b8   : > { %v4666_v55 = vpop.permute.xlu0 %4665  ;;  %v4342_v11 = vpop.permute.xlu1 %4341  ;;  %10718 = vmatprep.subr.msk.bf16.mxu0 %vm12548_vm2, %v10716_v24 }
 0x6ba   : > { %9854 = vmatmul.mubr.msk.f32.gmra.mrb[102].mxu0 %vm689_vm1, %v4342_v11 }
 0x6bb   : > { %9900 = vmatprep.mubr.msk.f32.mxu0 %vm689_vm1, %v4666_v55 }
 0x6bc   : > { %v4501_v60 = vpop.permute.xlu0 %4500  ;;  %v4668_v4 = vpop.permute.xlu1 %4667 }
 0x6bd   : > { %9875 = vmatprep.mubr.msk.f32.mxu1 %vm689_vm1, %v4501_v60 }
 0x6bf   : > { %10721 = vmatpush3.bf16.xpose.msk.msra.mxu0 %vm12548_vm2, %v10716_v24 }
 0x6c0   : > { %v4505_v39 = vpop.permute.xlu0 %4504  ;;  %v4503_v42 = vpop.permute.xlu1 %4502  ;;  %10724 = vmatprep.subr.msk.bf16.mxu0 %vm12548_vm2, %v10722_v43 }
 0x6c1   : > { %9876 = vmatmul.mubr.msk.f32.gmra.mrb[74].mxu1 %vm689_vm1, %v4503_v42 }
 0x6c2   : > { %9878 = vmatprep.mubr.msk.f32.mxu1 %vm689_vm1, %v4505_v39 }
 0x6c4   : > { %v14272_v44 = vpop.f32.mrb[48].mxu1  ;;  %v4509_v1 = vpop.permute.xlu0 %4508 }
 0x6c5   : > { %16310 = vst [vmem:[#allocation51_spill] sm:$0xff] %v14272_v44  ;;  %v14274_v21 = vpop.f32.mrb[49].mxu1  ;;  %v4507_v31 = vpop.permute.xlu1 %4506 }
 0x6c6   : > { %16311 = vst [vmem:[#allocation59_spill] sm:$0xff] %v14274_v21  ;;  %9879 = vmatmul.mubr.msk.f32.gmra.mrb[76].mxu1 %vm689_vm1, %v4507_v31 }
 0x6c7   : > { %9881 = vmatprep.mubr.msk.f32.mxu1 %vm689_vm1, %v4509_v1  ;;  %10727 = vmatpush3.bf16.xpose.msk.msra.mxu0 %vm12548_vm2, %v10722_v43 }
 0x6c8   : > { %v4670_v19 = vpop.permute.xlu0 %4669 }
 0x6c9   : > { %v4511_v54 = vpop.permute.xlu1 %4510 }
 0x6ca   : > { %9882 = vmatmul.mubr.msk.f32.gmra.mrb[78].mxu1 %vm689_vm1, %v4511_v54 }
 0x6cc   : > { %v14281_v62 = vpop.f32.mrb[50].mxu1  ;;  %v4674_v7 = vpop.permute.xlu0 %4673 }
 0x6cd   : > { %16312 = vst [vmem:[#allocation63_spill] sm:$0xff] %v14281_v62  ;;  %v14283_v8 = vpop.f32.mrb[51].mxu1  ;;  %v4672_v22 = vpop.permute.xlu1 %4671 }
 0x6ce   : > { %16313 = vst [vmem:[#allocation52_spill] sm:$0xff] %v14283_v8  ;;  %9901 = vmatmul.mubr.msk.f32.vlgmr.msra.gmra.mrb[104].mxu0 %vm689_vm1, %v4668_v4 }
 0x6cf   : > { %9903 = vmatprep.mubr.msk.f32.mxu0 %vm689_vm1, %v4670_v19 }
 0x6d0   : > { %v4678_v18 = vpop.permute.xlu0 %4677 }
 0x6d1   : > { %v4676_v26 = vpop.permute.xlu1 %4675 }
 0x6d2   : > { %9904 = vmatmul.mubr.msk.f32.gmra.mrb[106].mxu0 %vm689_vm1, %v4672_v22 }
 0x6d3   : > { %9906 = vmatprep.mubr.msk.f32.mxu0 %vm689_vm1, %v4674_v7 }
 0x6d4   : > { %v11388_v24 = vpop.permute.xlu0 %11387 }
 0x6d5   : > { %v11390_v55 = vunpack.i.h.bf16 %v11388_v24  ;;  %v11389_v11 = vunpack.i.l.bf16 %v11388_v24  ;;  %v4680_v12 = vpop.permute.xlu1 %4679 }
 0x6d6   : > { %9907 = vmatmul.mubr.msk.f32.gmra.mrb[108].mxu0 %vm689_vm1, %v4676_v26 }
 0x6d7   : > { %v10728_v35 = vpack.c.bf16 %v11390_v55, %v11389_v11  ;;  %9909 = vmatprep.mubr.msk.f32.mxu0 %vm689_vm1, %v4678_v18 }
 0x6d8   : > { %v11398_v60 = vpop.permute.xlu0 %11397 }
 0x6d9   : > { %v11393_v43 = vpop.permute.xlu1 %11392  ;;  %10729 = vmatprep.subr.bf16.mxu1 %v10728_v35  ;;  %v11400_v4 = vunpack.i.h.bf16 %v11398_v60  ;;  %v11399_v39 = vunpack.i.l.bf16 %v11398_v60 }
 0x6da   : > { %v11395_v42 = vunpack.i.h.bf16 %v11393_v43  ;;  %v11394_v1 = vunpack.i.l.bf16 %v11393_v43  ;;  %10731 = vmatpush3.bf16.msra.mxu1 %v10728_v35  ;;  %9910 = vmatmul.mubr.msk.f32.gmra.mrb[110].mxu0 %vm689_vm1, %v4680_v12 }
 0x6db   : > { %v10736_v55 = vpack.c.bf16 %v11400_v4, %v11399_v39 }
 0x6dc   : > { %v11408_v31 = vpop.permute.xlu0 %11407  ;;  %v10732_v19 = vpack.c.bf16 %v11395_v42, %v11394_v1 }
 0x6dd   : > { %v11410_v54 = vunpack.i.h.bf16 %v11408_v31  ;;  %v11409_v7 = vunpack.i.l.bf16 %v11408_v31  ;;  %v11403_v22 = vpop.permute.xlu1 %11402 }
 0x6de   : > { %v11405_v24 = vunpack.i.h.bf16 %v11403_v22  ;;  %v11404_v26 = vunpack.i.l.bf16 %v11403_v22  ;;  %10733 = vmatprep.subr.bf16.mxu1 %v10732_v19 }
 0x6df   : > { %10735 = vmatpush3.bf16.msra.mxu1 %v10732_v19  ;;  %v10744_v18 = vpack.c.bf16 %v11410_v54, %v11409_v7 }
 0x6e0   : > { %10737 = vmatprep.subr.bf16.mxu1 %v10736_v55  ;;  %v11418_v11 = vpop.permute.xlu0 %11417  ;;  %v10740_v12 = vpack.c.bf16 %v11405_v24, %v11404_v26 }
 0x6e1   : > { %v11420_v8 = vunpack.i.h.bf16 %v11418_v11  ;;  %v11419_v60 = vunpack.i.l.bf16 %v11418_v11  ;;  %v11413_v62 = vpop.permute.xlu1 %11412  ;;  %10745 = vmatprep.subr.bf16.mxu0 %v10744_v18 }
 0x6e2   : > { %v11415_v35 = vunpack.i.h.bf16 %v11413_v62  ;;  %v11414_v43 = vunpack.i.l.bf16 %v11413_v62  ;;  %10747 = vmatpush3.bf16.msra.mxu0 %v10744_v18 }
 0x6e3   : > { %10739 = vmatpush3.bf16.msra.mxu1 %v10736_v55  ;;  %v10748_v42 = vpack.c.bf16 %v11420_v8, %v11419_v60 }
 0x6e4   : > { %10741 = vmatprep.subr.bf16.mxu1 %v10740_v12  ;;  %v11428_v1 = vpop.permute.xlu0 %11427  ;;  %v14292_v4 = vpack.c.bf16 %v11415_v35, %v11414_v43 }
 0x6e5   : > { %v11430_v31 = vunpack.i.h.bf16 %v11428_v1  ;;  %v11429_v22 = vunpack.i.l.bf16 %v11428_v1  ;;  %10749 = vmatprep.subr.bf16.mxu0 %v10748_v42  ;;  %v14538_v0 = vpop.permute.xlu1 %11422 }
 0x6e6   : > { %10751 = vmatpush3.bf16.msra.mxu0 %v10748_v42 }
 0x6e7   : > { %10743 = vmatpush3.bf16.msra.mxu1 %v10740_v12  ;;  %v10752_v39 = vpack.c.bf16 %v11430_v31, %v11429_v22 }
 0x6e8   : > { %10761 = vmatprep.subr.bf16.mxu1 %v14292_v4  ;;  %v11438_v19 = vpop.permute.xlu0 %11437 }
 0x6e9   : > { %v11440_v54 = vunpack.i.h.bf16 %v11438_v19  ;;  %v11439_v7 = vunpack.i.l.bf16 %v11438_v19  ;;  %10753 = vmatprep.subr.bf16.mxu0 %v10752_v39 }
 0x6ea   : > { %10755 = vmatpush3.bf16.msra.mxu0 %v10752_v39 }
 0x6eb   : > { %v10756_v62 = vpack.c.bf16 %v11440_v54, %v11439_v7 }
 0x6ec   : > { %v11448_v24 = vpop.permute.xlu0 %11447 }
 0x6ed   : > { %v11450_v8 = vunpack.i.h.bf16 %v11448_v24  ;;  %v11449_v26 = vunpack.i.l.bf16 %v11448_v24  ;;  %10757 = vmatprep.subr.bf16.mxu0 %v10756_v62 }
 0x6ee   : > { %10759 = vmatpush3.bf16.msra.mxu0 %v10756_v62 }
 0x6ef   : > { %v14295_v55 = vpack.c.bf16 %v11450_v8, %v11449_v26 }
 0x6f1   : > { %10777 = vmatprep.subr.bf16.mxu0 %v14295_v55 }
 0x702   : > { %v14298_v18 = vpop.f32.mrb[52].mxu1 }
 0x703   : > { %16314 = vst [vmem:[#allocation22_spill] sm:$0xff] %v14298_v18  ;;  %v14300_v11 = vpop.f32.mrb[53].mxu1 }
 0x704   : > { %16315 = vst [vmem:[#allocation61_spill] sm:$0xff] %v14300_v11  ;;  %v14361_v11 = vld [vmem:[%s15962_s3 + $0x98] sm:$0xff] }
 0x709   : > { %v14302_v60 = vpop.f32.mrb[54].mxu1 }
 0x70a   : > { %16316 = vst [vmem:[#allocation65_spill] sm:$0xff] %v14302_v60  ;;  %v14304_v35 = vpop.f32.mrb[55].mxu1 }
 0x70b   : > { %16317 = vst [vmem:[#allocation68_spill] sm:$0xff] %v14304_v35 }
 0x70e   : > { %v14306_v43 = vpop.f32.mrb[80].mxu0 }
 0x70f   : > { %16318 = vst [vmem:[#allocation67_spill] sm:$0xff] %v14306_v43  ;;  %v14308_v12 = vpop.f32.mrb[81].mxu0 }
 0x710   : > { %16319 = vst [vmem:[#allocation7_spill] sm:$0xff] %v14308_v12 }
 0x712   : > { %v14310_v42 = vpop.f32.mrb[56].mxu1 }
 0x713   : > { %16320 = vst [vmem:[#allocation13_spill] sm:$0xff] %v14310_v42  ;;  %v14312_v1 = vpop.f32.mrb[57].mxu1 }
 0x714   : > { %16321 = vst [vmem:[#allocation8_spill] sm:$0xff] %v14312_v1 }
 0x726   : > { %v14314_v31 = vpop.f32.mrb[82].mxu0 }
 0x727   : > { %16322 = vst [vmem:[#allocation9_spill] sm:$0xff] %v14314_v31  ;;  %v14316_v22 = vpop.f32.mrb[83].mxu0 }
 0x728   : > { %16323 = vst [vmem:[#allocation15_spill] sm:$0xff] %v14316_v22  ;;  %v14341_v22 = vld [vmem:[%s15962_s3 + $0x88] sm:$0xff] }
 0x729   : > { %v14318_v39 = vpop.f32.mrb[58].mxu1 }
 0x72a   : > { %16324 = vst [vmem:[#allocation56_spill] sm:$0xff] %v14318_v39  ;;  %v14320_v19 = vpop.f32.mrb[59].mxu1 }
 0x72b   : > { %16325 = vst [vmem:[#allocation10_spill] sm:$0xff] %v14320_v19 }
 0x72e   : > { %v14322_v54 = vpop.f32.mrb[84].mxu0 }
 0x72f   : > { %16326 = vst [vmem:[#allocation57_spill] sm:$0xff] %v14322_v54  ;;  %v14324_v7 = vpop.f32.mrb[85].mxu0 }
 0x730   : > { %16327 = vst [vmem:[#allocation54_spill] sm:$0xff] %v14324_v7  ;;  %v14348_v7 = vld [vmem:[%s15962_s3 + $0x80] sm:$0xff] }
 0x731   : > { %v14326_v62 = vpop.f32.mrb[60].mxu1 }
 0x732   : > { %16328 = vst [vmem:[#allocation70_spill] sm:$0xff] %v14326_v62  ;;  %v14328_v24 = vpop.f32.mrb[61].mxu1 }
 0x733   : > { %16329 = vst [vmem:[#allocation66_spill] sm:$0xff] %v14328_v24 }
 0x739   : > { %v14330_v8 = vpop.f32.mrb[86].mxu0 }
 0x73a   : > { %16330 = vst [vmem:[#allocation11_spill] sm:$0xff] %v14330_v8  ;;  %v14332_v26 = vpop.f32.mrb[87].mxu0 }
 0x73b   : > { %16331 = vst [vmem:[#allocation60_spill] sm:$0xff] %v14332_v26 }
 0x73d   : > { %v14334_v12 = vpop.f32.mrb[62].mxu1 }
 0x73e   : > { %16332 = vst [vmem:[#allocation53_spill] sm:$0xff] %v14334_v12  ;;  %v14336_v31 = vpop.f32.mrb[63].mxu1 }
 0x73f   : > { %16333 = vst [vmem:[#allocation58_spill] sm:$0xff] %v14336_v31 }
 0x741   : > { %v14343_v54 = vpop.f32.mrb[88].mxu0 }
 0x742   : > { %16334 = vst [vmem:[#allocation62_spill] sm:$0xff] %v14343_v54  ;;  %v9818_v43 = vpop.f32.mrb[64].mxu1  ;;  %v14350_v35 = vpop.f32.mrb[89].mxu0 }
 0x743   : > { %16335 = vst [vmem:[#allocation55_spill] sm:$0xff] %v14350_v35  ;;  %v14353_v60 = vadd.f32 %v9818_v43, %v14341_v22  ;;  %v4288_v12 = vpop.f32.mrb[65].mxu1 }
 0x744   : > { %v14356_v31 = vadd.f32 %v14348_v7, %v4288_v12  ;;  %v14373_v12 = vld [vmem:[%s15962_s3 + $0x90] sm:$0xff] }
 0x745   : > { %v4837_v54 = vsel %vm1342_vm3, %v14353_v60, -inf }
 0x746   : > { %4838 = vmax.xlane.f32.xlu1 %v4837_v54  ;;  %v9821_v18 = vpop.f32.mrb[66].mxu1  ;;  %v4834_v35 = vsel %vm1342_vm3, %v14356_v31, -inf }
 0x747   : > { %v14368_v43 = vadd.f32 %v9821_v18, %v14361_v11  ;;  %4835 = vmax.xlane.f32.xlu0 %v4834_v35  ;;  %v4298_v24 = vpop.f32.mrb[67].mxu1  ;;  %v14385_v18 = vld [vmem:[%s15962_s3 + $0xa8] sm:$0xff]  ;;  %v14390_v35 = vld [vmem:[%s15962_s3 + $0xa0] sm:$0xff] }
 0x748   : > { %v14378_v19 = vadd.f32 %v14373_v12, %v4298_v24 }
 0x749   : > { %v4843_v62 = vsel %vm1342_vm3, %v14368_v43, -inf }
 0x74a   : > { %v4840_v54 = vsel %vm1342_vm3, %v14378_v19, -inf }
 0x74b   : > { %4844 = vmax.xlane.f32.xlu0 %v4843_v62 }
 0x74f   : > { %4841 = vmax.xlane.f32.xlu0 %v4840_v54  ;;  %v14403_v54 = vld [vmem:[%s15962_s3 + $0xb8] sm:$0xff] }
 0x774   : > { %v9824_v39 = vpop.f32.mrb[68].mxu1 }
 0x775   : > { %v14393_v21 = vadd.f32 %v9824_v39, %v14385_v18  ;;  %v4308_v24 = vpop.f32.mrb[69].mxu1  ;;  %v14395_v62 = vpop.f32.mrb[90].mxu0 }
 0x776   : > { %16336 = vst [vmem:[#allocation69_spill] sm:$0xff] %v14395_v62  ;;  %v14398_v44 = vadd.f32 %v14390_v35, %v4308_v24  ;;  %v14405_v42 = vpop.f32.mrb[91].mxu0  ;;  %v14414_v24 = vld [vmem:[%s15962_s3 + $0xb0] sm:$0xff] }
 0x777   : > { %16337 = vst [vmem:[#allocation64_spill] sm:$0xff] %v14405_v42  ;;  %v4849_v1 = vsel %vm1342_vm3, %v14393_v21, -inf }
 0x778   : > { %4850 = vmax.xlane.f32.xlu0 %v4849_v1  ;;  %v9827_v8 = vpop.f32.mrb[70].mxu1  ;;  %v4846_v39 = vsel %vm1342_vm3, %v14398_v44, -inf }
 0x779   : > { %v14417_v62 = vadd.f32 %v9827_v8, %v14403_v54  ;;  %4847 = vmax.xlane.f32.xlu1 %v4846_v39  ;;  %v4318_v26 = vpop.f32.mrb[71].mxu1  ;;  %v14419_v5 = vpop.f32.mrb[92].mxu0 }
 0x77a   : > { %16338 = vst [vmem:[#allocation71_spill] sm:$0xff] %v14419_v5  ;;  %v14422_v42 = vadd.f32 %v14414_v24, %v4318_v26  ;;  %v14424_v1 = vpop.f32.mrb[93].mxu0 }
 0x77b   : > { %16339 = vst [vmem:[#allocation72_spill] sm:$0xff] %v14424_v1  ;;  %v4855_v16 = vsel %vm1342_vm3, %v14417_v62, -inf }
 0x77c   : > { %4856 = vmax.xlane.f32.xlu0 %v4855_v16  ;;  %v4852_v5 = vsel %vm1342_vm3, %v14422_v42, -inf }
 0x77d   : > { %v9874_v49 = vpop.f32.mrb[72].mxu1  ;;  %v14428_v29 = vpop.f32.mrb[94].mxu0 }
 0x77e   : > { %16340 = vst [vmem:[#allocation73_spill] sm:$0xff] %v14428_v29  ;;  %v4626_v6 = vpop.f32.mrb[73].mxu1  ;;  %v14431_v8 = vadd.f32 %v9874_v49, %v14341_v22  ;;  %v14433_v39 = vpop.f32.mrb[95].mxu0 }
 0x77f   : > { %16341 = vst [vmem:[#allocation74_spill] sm:$0xff] %v14433_v39 }
 0x780   : > { %4853 = vmax.xlane.f32.xlu0 %v4852_v5  ;;  %v4885_v16 = vsel %vm1342_vm3, %v14431_v8, -inf }
 0x781   : > { %v9846_v26 = vpop.f32.mrb[96].mxu0 }
 0x782   : > { %v14438_v1 = vadd.f32 %v9846_v26, %v14341_v22  ;;  %v4457_v15 = vpop.f32.mrb[97].mxu0  ;;  %v14451_v26 = vadd.f32 %v14348_v7, %v4626_v6 }
 0x783   : > { %v14443_v29 = vadd.f32 %v14348_v7, %v4457_v15 }
 0x784   : > { %4886 = vmax.xlane.f32.xlu0 %v4885_v16  ;;  %v4861_v49 = vsel %vm1342_vm3, %v14438_v1, -inf }
 0x785   : > { %4862 = vmax.xlane.f32.xlu1 %v4861_v49  ;;  %v9849_v39 = vpop.f32.mrb[98].mxu0  ;;  %v4858_v56 = vsel %vm1342_vm3, %v14443_v29, -inf }
 0x786   : > { %v14448_v17 = vadd.f32 %v9849_v39, %v14361_v11  ;;  %v4467_v5 = vpop.f32.mrb[99].mxu0  ;;  %v4882_v39 = vsel %vm1342_vm3, %v14451_v26, -inf }
 0x787   : > { %v14458_v49 = vadd.f32 %v14373_v12, %v4467_v5 }
 0x788   : > { %v4867_v16 = vsel %vm1342_vm3, %v14448_v17, -inf }
 0x789   : > { %4859 = vmax.xlane.f32.xlu1 %v4858_v56  ;;  %4868 = vmax.xlane.f32.xlu0 %v4867_v16  ;;  %v9852_v15 = vpop.f32.mrb[100].mxu0  ;;  %v4864_v52 = vsel %vm1342_vm3, %v14458_v49, -inf }
 0x78a   : > { %v4477_v13 = vpop.f32.mrb[101].mxu0  ;;  %v14471_v5 = vadd.f32 %v9852_v15, %v14385_v18 }
 0x78b   : > { %v14476_v58 = vadd.f32 %v14390_v35, %v4477_v13 }
 0x78c   : > { %v4873_v15 = vsel %vm1342_vm3, %v14471_v5, -inf }
 0x78d   : > { %4883 = vmax.xlane.f32.xlu1 %v4882_v39  ;;  %v9855_v36 = vpop.f32.mrb[102].mxu0  ;;  %v4870_v13 = vsel %vm1342_vm3, %v14476_v58, -inf }
 0x78e   : > { %v4487_v6 = vpop.f32.mrb[103].mxu0  ;;  %v14491_v61 = vadd.f32 %v9855_v36, %v14403_v54 }
 0x790   : > { %v4879_v36 = vsel %vm1342_vm3, %v14491_v61, -inf }
 0x791   : > { %4865 = vmax.xlane.f32.xlu1 %v4864_v52 }
 0x794   : > { %v9877_v20 = vpop.f32.mrb[74].mxu1 }
 0x795   : > { %v14465_v2 = vadd.f32 %v9877_v20, %v14361_v11  ;;  %v4636_v56 = vpop.f32.mrb[75].mxu1 }
 0x796   : > { %v14468_v16 = vadd.f32 %v14373_v12, %v4636_v56 }
 0x797   : > { %v4891_v39 = vsel %vm1342_vm3, %v14465_v2, -inf }
 0x798   : > { %4892 = vmax.xlane.f32.xlu0 %v4891_v39  ;;  %v4888_v52 = vsel %vm1342_vm3, %v14468_v16, -inf }
 0x799   : > { %v9880_v10 = vpop.f32.mrb[76].mxu1  ;;  %4889 = vmax.xlane.f32.xlu1 %v4888_v52  ;;  %v14496_v52 = vadd.f32 %v14414_v24, %v4487_v6 }
 0x79a   : > { %v4646_v20 = vpop.f32.mrb[77].mxu1  ;;  %v14481_v30 = vadd.f32 %v9880_v10, %v14385_v18 }
 0x79b   : > { %v14486_v56 = vadd.f32 %v14390_v35, %v4646_v20  ;;  %v4876_v6 = vsel %vm1342_vm3, %v14496_v52, -inf }
 0x79c   : > { %4874 = vmax.xlane.f32.xlu0 %v4873_v15  ;;  %v4897_v10 = vsel %vm1342_vm3, %v14481_v30, -inf }
 0x79d   : > { %v9883_v39 = vpop.f32.mrb[78].mxu1  ;;  %4871 = vmax.xlane.f32.xlu1 %v4870_v13  ;;  %v4894_v20 = vsel %vm1342_vm3, %v14486_v56, -inf }
 0x79e   : > { %v4656_v57 = vpop.f32.mrb[79].mxu1  ;;  %v14501_v28 = vadd.f32 %v9883_v39, %v14403_v54 }
 0x79f   : > { %v14506_v27 = vadd.f32 %v14414_v24, %v4656_v57 }
 0x7a0   : > { %4898 = vmax.xlane.f32.xlu0 %v4897_v10  ;;  %v4903_v39 = vsel %vm1342_vm3, %v14501_v28, -inf }
 0x7a1   : > { %4895 = vmax.xlane.f32.xlu1 %v4894_v20  ;;  %v9902_v15 = vpop.f32.mrb[104].mxu0  ;;  %v4900_v57 = vsel %vm1342_vm3, %v14506_v27, -inf }
 0x7a2   : > { %v4795_v13 = vpop.f32.mrb[105].mxu0  ;;  %v14511_v41 = vadd.f32 %v9902_v15, %v14341_v22 }
 0x7a3   : > { %v14516_v59 = vadd.f32 %v14348_v7, %v4795_v13 }
 0x7a4   : > { %4880 = vmax.xlane.f32.xlu0 %v4879_v36  ;;  %v4909_v22 = vsel %vm1342_vm3, %v14511_v41, -inf }
 0x7a5   : > { %4877 = vmax.xlane.f32.xlu1 %v4876_v6  ;;  %v9905_v10 = vpop.f32.mrb[106].mxu0  ;;  %v4906_v7 = vsel %vm1342_vm3, %v14516_v59, -inf }
 0x7a6   : > { %v4805_v20 = vpop.f32.mrb[107].mxu0  ;;  %v14567_v46 = vadd.f32 %v9905_v10, %v14361_v11 }
 0x7a7   : > { %v14526_v15 = vadd.f32 %v14373_v12, %v4805_v20 }
 0x7a8   : > { %4904 = vmax.xlane.f32.xlu0 %v4903_v39 }
 0x7a9   : > { %4901 = vmax.xlane.f32.xlu1 %v4900_v57  ;;  %v9908_v36 = vpop.f32.mrb[108].mxu0 }
 0x7aa   : > { %v14521_v9 = vadd.f32 %v9908_v36, %v14385_v18  ;;  %v4815_v6 = vpop.f32.mrb[109].mxu0  ;;  %v4912_v36 = vsel %vm1342_vm3, %v14526_v15, -inf }
 0x7ab   : > { %v14534_v18 = vadd.f32 %v14390_v35, %v4815_v6 }
 0x7ac   : > { %4910 = vmax.xlane.f32.xlu0 %v4909_v22  ;;  %v14545_v22 = vpop.permute.xlu1 %11432 }
 0x7ad   : > { %4907 = vmax.xlane.f32.xlu1 %v4906_v7  ;;  %v9911_v13 = vpop.f32.mrb[110].mxu0  ;;  %v4918_v20 = vsel %vm1342_vm3, %v14534_v18, -inf  ;;  %v14555_v7 = vpop.permute.xlu0 %11462 }
 0x7ae   : > { %v14531_v39 = vadd.f32 %v9911_v13, %v14403_v54  ;;  %v4825_v57 = vpop.f32.mrb[111].mxu0 }
 0x7af   : > { %v14541_v12 = vadd.f32 %v14414_v24, %v4825_v57 }
 0x7b0   : > { %v14549_v35 = vpop.permute.xlu1 %11442 }
 0x7b1   : > { %4913 = vmax.xlane.f32.xlu1 %v4912_v36  ;;  %v4924_v54 = vsel %vm1342_vm3, %v14541_v12, -inf  ;;  %v14559_v13 = vpop.permute.xlu0 %11467 }
 0x7b2   : > { %16342 = vst [vmem:[#allocation75_spill] sm:$0xff] %v14559_v13 }
 0x7b4   : > { %v14553_v6 = vpop.permute.xlu1 %11452 }
 0x7b5   : > { %4919 = vmax.xlane.f32.xlu1 %v4918_v20 }
 0x7b8   : > { %v14557_v24 = vpop.permute.xlu1 %11457 }
 0x7b9   : > { %4925 = vmax.xlane.f32.xlu1 %v4924_v54 }
 0x7bc   : > { %v14561_v57 = vpop.permute.xlu1 %11472 }
 0x7c2   : > { %11477 = vrot.lane.b32.xlu0 %v16289_v63, %s12154_s12 }
 0x7d3   : > { %v4839_v36 = vpop.xlane.xlu1 %4838 }
 0x7d4   : > { %v4836_v20 = vpop.xlane.xlu0 %4835  ;;  %v4931_v54 = vsub.f32 %v14353_v60, %v4839_v36 }
 0x7d5   : > { %v4930_v23 = vsub.f32 %v14356_v31, %v4836_v20  ;;  %v4915_v31 = vsel %vm1342_vm3, %v14567_v46, -inf }
 0x7d6   : > { %v4964_v53 = vmul.f32 1.442695, %v4931_v54 }
 0x7d7   : > { %v4962_v48 = vmul.f32 1.442695, %v4930_v23 }
 0x7d8   : > { %v4845_v51 = vpop.xlane.xlu0 %4844 }
 0x7d9   : > { %11882 = vpow2.f32 %v4962_v48  ;;  %v4933_v63 = vsub.f32 %v14368_v43, %v4845_v51  ;;  %v4921_v48 = vsel %vm1342_vm3, %v14521_v9, -inf }
 0x7db   : > { %v4968_v3 = vmul.f32 1.442695, %v4933_v63 }
 0x7dc   : > { %v4842_v25 = vpop.xlane.xlu0 %4841 }
 0x7dd   : > { %11884 = vpow2.f32 %v4968_v3  ;;  %v4932_v34 = vsub.f32 %v14378_v19, %v4842_v25 }
 0x7de   : > { %11886 = vpow2.f32 %v4964_v53  ;;  %v4927_v53 = vsel %vm1342_vm3, %v14531_v39, -inf }
 0x7df   : > { %v4966_v13 = vmul.f32 1.442695, %v4932_v34 }
 0x7e1   : > { %11888 = vpow2.f32 %v4966_v13  ;;  %4916 = vmax.xlane.f32.xlu0 %v4915_v31 }
 0x7e3   : > { %v14572_v23 = vpop.eup %11882 }
 0x7e4   : > { %v5026_v51 = vsel %vm1342_vm3, %v14572_v23, 0.0 }
 0x7e5   : > { %5027 = vadd.xlane.f32.xlu1 %v5026_v51  ;;  %4922 = vmax.xlane.f32.xlu0 %v4921_v48 }
 0x7e7   : > { %v14578_v63 = vpop.eup %11884 }
 0x7e8   : > { %v5035_v34 = vsel %vm1342_vm3, %v14578_v63, 0.0  ;;  %v14584_v25 = vpop.eup %11886 }
 0x7e9   : > { %5036 = vadd.xlane.f32.xlu1 %v5035_v34  ;;  %4928 = vmax.xlane.f32.xlu0 %v4927_v53  ;;  %v5029_v60 = vsel %vm1342_vm3, %v14584_v25, 0.0 }
 0x7eb   : > { %v14586_v3 = vpop.eup %11888 }
 0x7ec   : > { %v5032_v11 = vsel %vm1342_vm3, %v14586_v3, 0.0 }
 0x7ed   : > { %5033 = vadd.xlane.f32.xlu1 %v5032_v11  ;;  %5030 = vadd.xlane.f32.xlu0 %v5029_v60 }
 0x805   : > { %v4851_v19 = vpop.xlane.xlu0 %4850 }
 0x806   : > { %v4935_v43 = vsub.f32 %v14393_v21, %v4851_v19  ;;  %v4848_v10 = vpop.xlane.xlu1 %4847 }
 0x807   : > { %v4934_v13 = vsub.f32 %v14398_v44, %v4848_v10 }
 0x808   : > { %v4972_v36 = vmul.f32 1.442695, %v4935_v43 }
 0x809   : > { %v4970_v20 = vmul.f32 1.442695, %v4934_v13  ;;  %v4857_v54 = vpop.xlane.xlu0 %4856 }
 0x80a   : > { %11890 = vpow2.f32 %v4972_v36  ;;  %v4937_v31 = vsub.f32 %v14417_v62, %v4857_v54 }
 0x80b   : > { %11892 = vpow2.f32 %v4970_v20 }
 0x80c   : > { %v4976_v51 = vmul.f32 1.442695, %v4937_v31 }
 0x80d   : > { %v4854_v48 = vpop.xlane.xlu0 %4853 }
 0x80e   : > { %11894 = vpow2.f32 %v4976_v51  ;;  %v4936_v34 = vsub.f32 %v14422_v42, %v4854_v48 }
 0x810   : > { %v4974_v53 = vmul.f32 1.442695, %v4936_v34 }
 0x811   : > { %v4887_v11 = vpop.xlane.xlu0 %4886 }
 0x812   : > { %11896 = vpow2.f32 %v4974_v53  ;;  %v4947_v21 = vsub.f32 %v14431_v8, %v4887_v11  ;;  %v4863_v60 = vpop.xlane.xlu1 %4862 }
 0x813   : > { %v4939_v44 = vsub.f32 %v14438_v1, %v4863_v60 }
 0x814   : > { %v14597_v19 = vpop.eup %11890  ;;  %v4996_v10 = vmul.f32 1.442695, %v4947_v21 }
 0x815   : > { %v14600_v43 = vpop.eup %11892  ;;  %v5041_v62 = vsel %vm1342_vm3, %v14597_v19, 0.0  ;;  %v4980_v13 = vmul.f32 1.442695, %v4939_v44 }
 0x816   : > { %5042 = vadd.xlane.f32.xlu0 %v5041_v62  ;;  %v5038_v42 = vsel %vm1342_vm3, %v14600_v43, 0.0  ;;  %v4869_v36 = vpop.xlane.xlu0 %4868  ;;  %v4860_v20 = vpop.xlane.xlu1 %4859 }
 0x817   : > { %5039 = vadd.xlane.f32.xlu1 %v5038_v42  ;;  %11898 = vpow2.f32 %v4980_v13  ;;  %v4941_v54 = vsub.f32 %v14448_v17, %v4869_v36  ;;  %v4938_v1 = vsub.f32 %v14443_v29, %v4860_v20 }
 0x818   : > { %v14606_v8 = vpop.eup %11894  ;;  %11900 = vpow2.f32 %v4996_v10 }
 0x819   : > { %v5047_v31 = vsel %vm1342_vm3, %v14606_v8, 0.0  ;;  %v4984_v51 = vmul.f32 1.442695, %v4941_v54  ;;  %v4978_v48 = vmul.f32 1.442695, %v4938_v1 }
 0x81a   : > { %v4884_v34 = vpop.xlane.xlu1 %4883 }
 0x81b   : > { %5048 = vadd.xlane.f32.xlu1 %v5047_v31  ;;  %v4946_v11 = vsub.f32 %v14451_v26, %v4884_v34  ;;  %11902 = vpow2.f32 %v4978_v48 }
 0x81c   : > { %v14612_v53 = vpop.eup %11896  ;;  %11904 = vpow2.f32 %v4984_v51 }
 0x81d   : > { %v5044_v21 = vsel %vm1342_vm3, %v14612_v53, 0.0  ;;  %v4994_v17 = vmul.f32 1.442695, %v4946_v11 }
 0x81e   : > { %5045 = vadd.xlane.f32.xlu0 %v5044_v21  ;;  %v4866_v29 = vpop.xlane.xlu1 %4865 }
 0x81f   : > { %11906 = vpow2.f32 %v4994_v17  ;;  %v4940_v10 = vsub.f32 %v14458_v49, %v4866_v29 }
 0x821   : > { %v14617_v60 = vpop.eup %11898  ;;  %v4982_v1 = vmul.f32 1.442695, %v4940_v10 }
 0x822   : > { %v5053_v44 = vsel %vm1342_vm3, %v14617_v60, 0.0  ;;  %v14621_v62 = vpop.eup %11900 }
 0x823   : > { %5054 = vadd.xlane.f32.xlu0 %v5053_v44  ;;  %v5077_v20 = vsel %vm1342_vm3, %v14621_v62, 0.0 }
 0x825   : > { %v4893_v26 = vpop.xlane.xlu0 %4892  ;;  %v14625_v36 = vpop.eup %11902 }
 0x826   : > { %v4949_v13 = vsub.f32 %v14465_v2, %v4893_v26  ;;  %v4890_v42 = vpop.xlane.xlu1 %4889  ;;  %v14629_v54 = vpop.eup %11904  ;;  %v5050_v49 = vsel %vm1342_vm3, %v14625_v36, 0.0 }
 0x827   : > { %v4948_v51 = vsub.f32 %v14468_v16, %v4890_v42  ;;  %5078 = vadd.xlane.f32.xlu0 %v5077_v20  ;;  %5051 = vadd.xlane.f32.xlu1 %v5050_v49  ;;  %v5059_v21 = vsel %vm1342_vm3, %v14629_v54, 0.0 }
 0x828   : > { %v5000_v31 = vmul.f32 1.442695, %v4949_v13 }
 0x829   : > { %v4875_v48 = vpop.xlane.xlu0 %4874  ;;  %v14634_v34 = vpop.eup %11906  ;;  %v4998_v16 = vmul.f32 1.442695, %v4948_v51 }
 0x82a   : > { %11908 = vpow2.f32 %v5000_v31  ;;  %v4943_v2 = vsub.f32 %v14471_v5, %v4875_v48  ;;  %v4872_v11 = vpop.xlane.xlu1 %4871  ;;  %v5074_v17 = vsel %vm1342_vm3, %v14634_v34, 0.0 }
 0x82b   : > { %11910 = vpow2.f32 %v4982_v1  ;;  %v4942_v44 = vsub.f32 %v14476_v58, %v4872_v11  ;;  %5060 = vadd.xlane.f32.xlu0 %v5059_v21  ;;  %5075 = vadd.xlane.f32.xlu1 %v5074_v17 }
 0x82c   : > { %v4988_v29 = vmul.f32 1.442695, %v4943_v2 }
 0x82d   : > { %v4899_v10 = vpop.xlane.xlu0 %4898  ;;  %v4986_v5 = vmul.f32 1.442695, %v4942_v44 }
 0x82e   : > { %11912 = vpow2.f32 %v4988_v29  ;;  %v4951_v26 = vsub.f32 %v14481_v30, %v4899_v10  ;;  %v4896_v13 = vpop.xlane.xlu1 %4895 }
 0x82f   : > { %11914 = vpow2.f32 %v4998_v16  ;;  %v4950_v20 = vsub.f32 %v14486_v56, %v4896_v13 }
 0x830   : > { %v5004_v42 = vmul.f32 1.442695, %v4951_v26 }
 0x831   : > { %v4881_v31 = vpop.xlane.xlu0 %4880  ;;  %v5002_v58 = vmul.f32 1.442695, %v4950_v20 }
 0x832   : > { %11916 = vpow2.f32 %v5004_v42  ;;  %v4945_v1 = vsub.f32 %v14491_v61, %v4881_v31  ;;  %v4878_v51 = vpop.xlane.xlu1 %4877 }
 0x833   : > { %11918 = vpow2.f32 %v4986_v5  ;;  %v4944_v61 = vsub.f32 %v14496_v52, %v4878_v51 }
 0x834   : > { %v14645_v49 = vpop.eup %11908  ;;  %v4992_v48 = vmul.f32 1.442695, %v4945_v1 }
 0x835   : > { %v4905_v2 = vpop.xlane.xlu0 %4904  ;;  %v5083_v30 = vsel %vm1342_vm3, %v14645_v49, 0.0  ;;  %v14649_v11 = vpop.eup %11910  ;;  %v4990_v42 = vmul.f32 1.442695, %v4944_v61 }
 0x836   : > { %11920 = vpow2.f32 %v4992_v48  ;;  %v4953_v21 = vsub.f32 %v14501_v28, %v4905_v2  ;;  %v4902_v56 = vpop.xlane.xlu1 %4901  ;;  %5084 = vadd.xlane.f32.xlu1 %v5083_v30  ;;  %v5056_v10 = vsel %vm1342_vm3, %v14649_v11, 0.0 }
 0x837   : > { %11922 = vpow2.f32 %v5002_v58  ;;  %v4952_v52 = vsub.f32 %v14506_v27, %v4902_v56 }
 0x838   : > { %v14652_v17 = vpop.eup %11912  ;;  %v5008_v16 = vmul.f32 1.442695, %v4953_v21 }
 0x839   : > { %v4911_v29 = vpop.xlane.xlu0 %4910  ;;  %v5065_v44 = vsel %vm1342_vm3, %v14652_v17, 0.0  ;;  %v14659_v26 = vpop.eup %11914  ;;  %v5006_v2 = vmul.f32 1.442695, %v4952_v52 }
 0x83a   : > { %v4955_v13 = vsub.f32 %v14511_v41, %v4911_v29  ;;  %5066 = vadd.xlane.f32.xlu0 %v5065_v44  ;;  %5057 = vadd.xlane.f32.xlu1 %v5056_v10  ;;  %v4908_v28 = vpop.xlane.xlu1 %4907  ;;  %11924 = vpow2.f32 %v5008_v16  ;;  %v5080_v1 = vsel %vm1342_vm3, %v14659_v26, 0.0 }
 0x83b   : > { %v4954_v27 = vsub.f32 %v14516_v59, %v4908_v28 }
 0x83c   : > { %v14662_v5 = vpop.eup %11916  ;;  %v5012_v20 = vmul.f32 1.442695, %v4955_v13 }
 0x83d   : > { %v5089_v31 = vsel %vm1342_vm3, %v14662_v5, 0.0  ;;  %v14669_v51 = vpop.eup %11918 }
 0x83e   : > { %11926 = vpow2.f32 %v5012_v20  ;;  %5090 = vadd.xlane.f32.xlu0 %v5089_v31  ;;  %5081 = vadd.xlane.f32.xlu1 %v5080_v1  ;;  %v4914_v41 = vpop.xlane.xlu1 %4913  ;;  %v5062_v56 = vsel %vm1342_vm3, %v14669_v51, 0.0 }
 0x83f   : > { %v4956_v58 = vsub.f32 %v14526_v15, %v4914_v41  ;;  %11928 = vpow2.f32 %v4990_v42  ;;  %v5010_v15 = vmul.f32 1.442695, %v4954_v27 }
 0x840   : > { %v14672_v48 = vpop.eup %11920 }
 0x841   : > { %v5014_v30 = vmul.f32 1.442695, %v4956_v58  ;;  %v5071_v21 = vsel %vm1342_vm3, %v14672_v48, 0.0  ;;  %v14679_v61 = vpop.eup %11922 }
 0x842   : > { %5072 = vadd.xlane.f32.xlu0 %v5071_v21  ;;  %5063 = vadd.xlane.f32.xlu1 %v5062_v56  ;;  %v5086_v16 = vsel %vm1342_vm3, %v14679_v61, 0.0  ;;  %v4920_v58 = vpop.xlane.xlu1 %4919 }
 0x843   : > { %11930 = vpow2.f32 %v5014_v30  ;;  %v4958_v56 = vsub.f32 %v14534_v18, %v4920_v58 }
 0x844   : > { %11932 = vpow2.f32 %v5006_v2  ;;  %v14683_v29 = vpop.eup %11924  ;;  %v14707_v2 = vpop.permute.xlu0 %11477 }
 0x845   : > { %11934 = vpow2.f32 %v5010_v15  ;;  %v5095_v10 = vsel %vm1342_vm3, %v14683_v29, 0.0 }
 0x846   : > { %5087 = vadd.xlane.f32.xlu1 %v5086_v16  ;;  %v4926_v27 = vpop.xlane.xlu1 %4925 }
 0x848   : > { %v14685_v59 = vpop.eup %11926 }
 0x849   : > { %16343 = vst [vmem:[#allocation76_spill] sm:$0xff] %v14685_v59  ;;  %v5101_v44 = vsel %vm1342_vm3, %v14685_v59, 0.0  ;;  %v14691_v13 = vpop.eup %11928 }
 0x84a   : > { %5102 = vadd.xlane.f32.xlu0 %v5101_v44  ;;  %5096 = vadd.xlane.f32.xlu1 %v5095_v10  ;;  %v5068_v42 = vsel %vm1342_vm3, %v14691_v13, 0.0 }
 0x84d   : > { %v14693_v28 = vpop.eup %11930 }
 0x84e   : > { %16344 = vst [vmem:[#allocation77_spill] sm:$0xff] %v14693_v28  ;;  %v14697_v52 = vpop.eup %11932  ;;  %5069 = vadd.xlane.f32.xlu1 %v5068_v42  ;;  %v5104_v20 = vsel %vm1342_vm3, %v14693_v28, 0.0  ;;  %v5018_v42 = vmul.f32 1.442695, %v4958_v56  ;;  %v11424_v56 = vunpack.i.l.bf16 %v14538_v0 }
 0x84f   : > { %5105 = vadd.xlane.f32.xlu0 %v5104_v20  ;;  %v5092_v31 = vsel %vm1342_vm3, %v14697_v52, 0.0  ;;  %v14703_v1 = vpop.eup %11934 }
 0x850   : > { %16345 = vst [vmem:[#allocation78_spill] sm:$0xff] %v14703_v1  ;;  %v5098_v41 = vsel %vm1342_vm3, %v14703_v1, 0.0 }
 0x852   : > { %5093 = vadd.xlane.f32.xlu1 %v5092_v31  ;;  %v4960_v31 = vsub.f32 %v14541_v12, %v4926_v27 }
 0x854   : > { %v5022_v59 = vmul.f32 1.442695, %v4960_v31  ;;  %v11434_v31 = vunpack.i.l.bf16 %v14545_v22 }
 0x856   : > { %5099 = vadd.xlane.f32.xlu1 %v5098_v41 }
 0x86e   : > { %v4917_v30 = vpop.xlane.xlu0 %4916 }
 0x86f   : > { %v4957_v21 = vsub.f32 %v14567_v46, %v4917_v30 }
 0x871   : > { %v5016_v15 = vmul.f32 1.442695, %v4957_v21 }
 0x872   : > { %v5028_v16 = vpop.xlane.xlu1 %5027  ;;  %v4923_v44 = vpop.xlane.xlu0 %4922 }
 0x873   : > { %11936 = vpow2.f32 %v5016_v15  ;;  %v4959_v10 = vsub.f32 %v14521_v9, %v4923_v44 }
 0x874   : > { %11938 = vrcp.f32 %v5028_v16 }
 0x875   : > { %v5020_v20 = vmul.f32 1.442695, %v4959_v10 }
 0x876   : > { %v5037_v41 = vpop.xlane.xlu1 %5036  ;;  %v4929_v28 = vpop.xlane.xlu0 %4928 }
 0x877   : > { %11940 = vpow2.f32 %v5020_v20  ;;  %v11435_v20 = vunpack.i.h.bf16 %v14545_v22 }
 0x878   : > { %11942 = vpow2.f32 %v5018_v42 }
 0x879   : > { %v10768_v22 = vpack.c.bf16 %v11435_v20, %v11434_v31 }
 0x87a   : > { %v5034_v1 = vpop.xlane.xlu1 %5033  ;;  %v5031_v46 = vpop.xlane.xlu0 %5030 }
 0x87b   : > { %11944 = vrcp.f32 %v5034_v1 }
 0x87c   : > { %11946 = vrcp.f32 %v5031_v46  ;;  %v11444_v46 = vunpack.i.l.bf16 %v14549_v35 }
 0x87d   : > { %v14713_v18 = vpop.eup %11936  ;;  %11948 = vpow2.f32 %v5022_v59  ;;  %v11425_v59 = vunpack.i.h.bf16 %v14538_v0 }
 0x87e   : > { %v11939_v58 = vpop.eup %11938  ;;  %v5107_v9 = vsel %vm1342_vm3, %v14713_v18, 0.0  ;;  %11950 = vrcp.f32 %v5037_v41 }
 0x87f   : > { %5108 = vadd.xlane.f32.xlu1 %v5107_v9  ;;  %v5123_v12 = vmul.f32 %v11939_v58, %v14572_v23  ;;  %v10764_v41 = vpack.c.bf16 %v11425_v59, %v11424_v56  ;;  %v11459_v58 = vunpack.i.l.bf16 %v14557_v24 }
 0x881   : > { %v14718_v27 = vpop.eup %11940  ;;  %9928 = vmatprep.mubr.msk.f32.mxu1 %vm1342_vm3, %v5123_v12 }
 0x882   : > { %v5113_v30 = vsel %vm1342_vm3, %v14718_v27, 0.0  ;;  %v14723_v1 = vpop.eup %11942 }
 0x883   : > { %5114 = vadd.xlane.f32.xlu0 %v5113_v30  ;;  %v5110_v15 = vsel %vm1342_vm3, %v14723_v1, 0.0 }
 0x885   : > { %v11945_v21 = vpop.eup %11944 }
 0x886   : > { %v11947_v16 = vpop.eup %11946  ;;  %v5127_v42 = vmul.f32 %v11945_v21, %v14586_v3  ;;  %v11445_v3 = vunpack.i.h.bf16 %v14549_v35  ;;  %v4961_v35 = vsub.f32 %v14531_v39, %v4929_v28  ;;  %v16346_v28 = vld [vmem:[#allocation4_spill] sm:$0xff] }
 0x887   : > { %5111 = vadd.xlane.f32.xlu0 %v5110_v15  ;;  %v14729_v23 = vpop.eup %11948  ;;  %v5125_v44 = vmul.f32 %v11947_v16, %v14584_v25 }
 0x888   : > { %v11951_v10 = vpop.eup %11950  ;;  %v5116_v0 = vsel %vm1342_vm3, %v14729_v23, 0.0  ;;  %v10772_v9 = vpack.c.bf16 %v11445_v3, %v11444_v46  ;;  %v5024_v12 = vmul.f32 1.442695, %v4961_v35  ;;  %v16347_v3 = vld [vmem:[#allocation20_spill] sm:$0xff] }
 0x889   : > { %9929 = vmatmul.mubr.msk.f32.vlgmr.msra.gmra.mrb[80].mxu1 %vm1342_vm3, %v5125_v44  ;;  %v5129_v25 = vmul.f32 %v11951_v10, %v14578_v63  ;;  %v16348_v46 = vld [vmem:[#allocation24_spill] sm:$0xff] }
 0x88a   : > { %10763 = vmatpush3.bf16.msra.mxu1 %v14292_v4  ;;  %9931 = vmatprep.mubr.msk.f32.mxu1 %vm1342_vm3, %v5127_v42  ;;  %v11460_v4 = vunpack.i.h.bf16 %v14557_v24 }
 0x88b   : > { %10765 = vmatprep.subr.bf16.mxu1 %v10764_v41  ;;  %5117 = vadd.xlane.f32.xlu0 %v5116_v0 }
 0x88c   : > { %v14748_v63 = vpack.c.bf16 %v11460_v4, %v11459_v58  ;;  %v11455_v58 = vunpack.i.h.bf16 %v14553_v6 }
 0x88d   : > { %9932 = vmatmul.mubr.msk.f32.gmra.mrb[82].mxu1 %vm1342_vm3, %v5129_v25 }
 0x88e   : > { %10767 = vmatpush3.bf16.msra.mxu1 %v10764_v41 }
 0x88f   : > { %10769 = vmatprep.subr.bf16.mxu1 %v10768_v22 }
 0x890   : > { %11482 = vrot.lane.b32.xlu1 %v16291_v38, %s12154_s12 }
 0x892   : > { %10771 = vmatpush3.bf16.msra.mxu1 %v10768_v22 }
 0x893   : > { %10773 = vmatprep.subr.bf16.mxu1 %v10772_v9 }
 0x896   : > { %10775 = vmatpush3.bf16.msra.mxu1 %v10772_v9 }
 0x897   : > { %10794 = vmatprep.subr.msk.bf16.mxu1 %vm12548_vm2, %v14748_v63 }
 0x8a1   : > { %11487 = vrot.lane.b32.xlu0 %v16288_v32, %s12154_s12 }
 0x8a3   : > { %v5043_v30 = vpop.xlane.xlu0 %5042 }
 0x8a4   : > { %11952 = vrcp.f32 %v5043_v30  ;;  %v5040_v21 = vpop.xlane.xlu1 %5039 }
 0x8a5   : > { %11954 = vrcp.f32 %v5040_v21  ;;  %11497 = vrot.lane.b32.xlu0 %v16296_v33, %s12154_s12  ;;  %v11465_v21 = vunpack.i.h.bf16 %v14555_v7 }
 0x8a6   : > { %11956 = vpow2.f32 %v5024_v12 }
 0x8a8   : > { %v5049_v24 = vpop.xlane.xlu1 %5048 }
 0x8a9   : > { %11502 = vrot.lane.b32.xlu0 %v16290_v14, %s12154_s12  ;;  %11958 = vrcp.f32 %v5049_v24  ;;  %v11464_v24 = vunpack.i.l.bf16 %v14555_v7 }
 0x8ab   : > { %v5046_v59 = vpop.xlane.xlu0 %5045 }
 0x8ac   : > { %11960 = vrcp.f32 %v5046_v59 }
 0x8ad   : > { %5968 = vrot.lane.b32.xlu0 %v16346_v28, %s12155_s7 }
 0x8ae   : > { %v11953_v39 = vpop.eup %11952 }
 0x8af   : > { %v11955_v56 = vpop.eup %11954  ;;  %v5133_v10 = vmul.f32 %v11953_v39, %v14597_v19  ;;  %v11475_v39 = vunpack.i.h.bf16 %v14561_v57 }
 0x8b0   : > { %v14762_v15 = vpop.eup %11956  ;;  %v5131_v16 = vmul.f32 %v11955_v56, %v14600_v43  ;;  %v5055_v44 = vpop.xlane.xlu0 %5054 }
 0x8b1   : > { %11507 = vrot.lane.b32.xlu0 %v16301_v45, %s12154_s12  ;;  %v5119_v42 = vsel %vm1342_vm3, %v14762_v15, 0.0  ;;  %11962 = vrcp.f32 %v5055_v44 }
 0x8b2   : > { %9934 = vmatprep.mubr.msk.f32.mxu1 %vm1342_vm3, %v5131_v16  ;;  %v16350_v16 = vld [vmem:[#allocation75_spill] sm:$0xff] }
 0x8b3   : > { %9935 = vmatmul.mubr.msk.f32.gmra.mrb[84].mxu1 %vm1342_vm3, %v5133_v10  ;;  %v11959_v20 = vpop.eup %11958  ;;  %v11470_v44 = vunpack.i.h.bf16 %v16350_v16  ;;  %v11469_v10 = vunpack.i.l.bf16 %v16350_v16 }
 0x8b4   : > { %5120 = vadd.xlane.f32.xlu1 %v5119_v42  ;;  %v5052_v41 = vpop.xlane.xlu1 %5051  ;;  %v5079_v43 = vpop.xlane.xlu0 %5078  ;;  %v5137_v0 = vmul.f32 %v11959_v20, %v14606_v8  ;;  %v16349_v8 = vld [vmem:[#allocation25_spill] sm:$0xff]  ;;  %v16352_v20 = vld [vmem:[#allocation26_spill] sm:$0xff] }
 0x8b5   : > { %11517 = vrot.lane.b32.xlu0 %v16294_v50, %s12154_s12  ;;  %11964 = vrcp.f32 %v5052_v41  ;;  %v11479_v41 = vunpack.i.l.bf16 %v14707_v2 }
 0x8b6   : > { %v11961_v31 = vpop.eup %11960  ;;  %11966 = vrcp.f32 %v5079_v43  ;;  %v10788_v43 = vpack.c.bf16 %v11470_v44, %v11469_v10 }
 0x8b7   : > { %v5135_v19 = vmul.f32 %v11961_v31, %v14612_v53  ;;  %v11454_v53 = vunpack.i.l.bf16 %v14553_v6  ;;  %v11474_v6 = vunpack.i.l.bf16 %v14561_v57  ;;  %v10784_v57 = vpack.c.bf16 %v11465_v21, %v11464_v24  ;;  %v16358_v24 = vld [vmem:[#allocation29_spill] sm:$0xff] }
 0x8b8   : > { %v5076_v25 = vpop.xlane.xlu1 %5075  ;;  %v5061_v28 = vpop.xlane.xlu0 %5060  ;;  %v11480_v31 = vunpack.i.h.bf16 %v14707_v2 }
 0x8b9   : > { %9937 = vmatprep.mubr.msk.f32.mxu1 %vm1342_vm3, %v5135_v19  ;;  %6137 = vrot.lane.b32.xlu0 %v16347_v3, %s12155_s7  ;;  %11968 = vrcp.f32 %v5076_v25  ;;  %v10780_v56 = vpack.c.bf16 %v11455_v58, %v11454_v53  ;;  %v10798_v42 = vpack.c.bf16 %v11475_v39, %v11474_v6  ;;  %v16353_v19 = vld [vmem:[#allocation14_spill] sm:$0xff]  ;;  %v16354_v25 = vld [vmem:[#allocation27_spill] sm:$0xff]  ;;  %v16356_v58 = vld [vmem:[#allocation28_spill] sm:$0xff] }
 0x8ba   : > { %9938 = vmatmul.mubr.msk.f32.gmra.mrb[86].mxu1 %vm1342_vm3, %v5137_v0  ;;  %11970 = vrcp.f32 %v5061_v28  ;;  %v10804_v3 = vpack.c.bf16 %v11480_v31, %v11479_v41  ;;  %v16366_v31 = vld [vmem:[#allocation36_spill] sm:$0xff] }
 0x8bb   : > { %v11963_v22 = vpop.eup %11962 }
 0x8bc   : > { %v5141_v35 = vmul.f32 %v11963_v22, %v14617_v60 }
 0x8bd   : > { %5972 = vrot.lane.b32.xlu0 %v16348_v46, %s12155_s7  ;;  %v16355_v46 = vld [vmem:[#allocation16_spill] sm:$0xff] }
 0x8bf   : > { %v11965_v4 = vpop.eup %11964 }
 0x8c0   : > { %v5139_v9 = vmul.f32 %v11965_v4, %v14625_v36  ;;  %v11967_v30 = vpop.eup %11966 }
 0x8c1   : > { %5974 = vrot.lane.b32.xlu0 %v16349_v8, %s12155_s7  ;;  %v5157_v60 = vmul.f32 %v11967_v30, %v14621_v62  ;;  %v16357_v8 = vld [vmem:[#allocation23_spill] sm:$0xff] }
 0x8c2   : > { %9956 = vmatprep.mubr.msk.f32.mxu0 %vm1342_vm3, %v5139_v9 }
 0x8c3   : > { %v5085_v12 = vpop.xlane.xlu1 %5084  ;;  %v11969_v59 = vpop.eup %11968  ;;  %9957 = vmatmul.mubr.msk.f32.vlgmr.msra.gmra.mrb[112].mxu0 %vm1342_vm3, %v5141_v35 }
 0x8c4   : > { %10779 = vmatpush3.bf16.msra.mxu0 %v14295_v55  ;;  %v5155_v7 = vmul.f32 %v11969_v59, %v14634_v34  ;;  %v16351_v55 = vld [vmem:[#allocation21_spill] sm:$0xff]  ;;  %v11971_v22 = vpop.eup %11970 }
 0x8c5   : > { %11492 = vrot.lane.b32.xlu1 %v16293_v47, %s12154_s12  ;;  %11527 = vrot.lane.b32.xlu0 %v12436_v37, %s12154_s12  ;;  %v5145_v9 = vmul.f32 %v11971_v22, %v14629_v54  ;;  %v16368_v22 = vld [vmem:[#allocation40_spill] sm:$0xff] }
 0x8c6   : > { %10781 = vmatprep.subr.bf16.mxu0 %v10780_v56  ;;  %9984 = vmatprep.mubr.msk.f32.mxu1 %vm1342_vm3, %v5155_v7  ;;  %v16360_v7 = vld [vmem:[#allocation18_spill] sm:$0xff] }
 0x8c7   : > { %v5058_v36 = vpop.xlane.xlu1 %5057  ;;  %9985 = vmatmul.mubr.msk.f32.vlgmr.msra.gmra.mrb[88].mxu1 %vm1342_vm3, %v5157_v60  ;;  %v5067_v34 = vpop.xlane.xlu0 %5066 }
 0x8c8   : > { %11972 = vrcp.f32 %v5058_v36  ;;  %10783 = vmatpush3.bf16.msra.mxu0 %v10780_v56  ;;  %10797 = vmatpush3.bf16.xpose.msk.msra.mxu1 %vm12548_vm2, %v14748_v63 }
 0x8c9   : > { %5970 = vrot.lane.b32.xlu1 %v16351_v55, %s12155_s7  ;;  %10785 = vmatprep.subr.bf16.mxu0 %v10784_v57  ;;  %11974 = vrcp.f32 %v5085_v12  ;;  %v16363_v55 = vld [vmem:[#allocation17_spill] sm:$0xff] }
 0x8ca   : > { %10800 = vmatprep.subr.msk.bf16.mxu1 %vm12548_vm2, %v10798_v42  ;;  %5976 = vrot.lane.b32.xlu0 %v16352_v20, %s12155_s7 }
 0x8cb   : > { %v5082_v62 = vpop.xlane.xlu1 %5081  ;;  %v5091_v0 = vpop.xlane.xlu0 %5090 }
 0x8cc   : > { %11976 = vrcp.f32 %v5082_v62  ;;  %10787 = vmatpush3.bf16.msra.mxu0 %v10784_v57  ;;  %v16365_v62 = vld [vmem:[#allocation35_spill] sm:$0xff] }
 0x8cd   : > { %11512 = vrot.lane.b32.xlu1 %v16353_v19, %s12154_s12  ;;  %10789 = vmatprep.subr.bf16.mxu0 %v10788_v43  ;;  %11978 = vrcp.f32 %v5067_v34  ;;  %v16364_v34 = vld [vmem:[#allocation34_spill] sm:$0xff] }
 0x8ce   : > { %5978 = vrot.lane.b32.xlu0 %v16354_v25, %s12155_s7 }
 0x8cf   : > { %v5064_v63 = vpop.xlane.xlu1 %5063  ;;  %v5073_v12 = vpop.xlane.xlu0 %5072 }
 0x8d0   : > { %11980 = vrcp.f32 %v5064_v63  ;;  %10791 = vmatpush3.bf16.msra.mxu0 %v10788_v43  ;;  %10803 = vmatpush3.bf16.xpose.msk.msra.mxu1 %vm12548_vm2, %v10798_v42  ;;  %v16362_v42 = vld [vmem:[#allocation30_spill] sm:$0xff]  ;;  %v16367_v63 = vld [vmem:[#allocation37_spill] sm:$0xff] }
 0x8d1   : > { %11522 = vrot.lane.b32.xlu1 %v16355_v46, %s12154_s12  ;;  %11982 = vrcp.f32 %v5091_v0  ;;  %10806 = vmatprep.subr.msk.bf16.mxu1 %vm12548_vm2, %v10804_v3 }
 0x8d2   : > { %v11973_v2 = vpop.eup %11972  ;;  %5980 = vrot.lane.b32.xlu0 %v16356_v58, %s12155_s7  ;;  %v16370_v58 = vld [vmem:[#allocation78_spill] sm:$0xff] }
 0x8d3   : > { %v5088_v4 = vpop.xlane.xlu1 %5087  ;;  %v5143_v53 = vmul.f32 %v11973_v2, %v14649_v11  ;;  %v11975_v35 = vpop.eup %11974  ;;  %v16359_v11 = vld [vmem:[#allocation31_spill] sm:$0xff] }
 0x8d4   : > { %11984 = vrcp.f32 %v5088_v4  ;;  %v5161_v39 = vmul.f32 %v11975_v35, %v14645_v49  ;;  %v16361_v49 = vld [vmem:[#allocation33_spill] sm:$0xff] }
 0x8d5   : > { %6139 = vrot.lane.b32.xlu1 %v16357_v8, %s12155_s7  ;;  %9959 = vmatprep.mubr.msk.f32.mxu0 %vm1342_vm3, %v5143_v53  ;;  %11986 = vrcp.f32 %v5073_v12  ;;  %v16371_v8 = vld [vmem:[#allocation76_spill] sm:$0xff]  ;;  %v16373_v35 = vld [vmem:[#allocation41_spill] sm:$0xff] }
 0x8d6   : > { %v11977_v30 = vpop.eup %11976  ;;  %9960 = vmatmul.mubr.msk.f32.gmra.mrb[114].mxu0 %vm1342_vm3, %v5145_v9  ;;  %5982 = vrot.lane.b32.xlu0 %v16358_v24, %s12155_s7  ;;  %v16377_v24 = vld [vmem:[#allocation47_spill] sm:$0xff] }
 0x8d7   : > { %v5097_v21 = vpop.xlane.xlu1 %5096  ;;  %v5159_v59 = vmul.f32 %v11977_v30, %v14659_v26  ;;  %v11979_v6 = vpop.eup %11978  ;;  %v16375_v30 = vld [vmem:[#allocation45_spill] sm:$0xff] }
 0x8d8   : > { %v5103_v54 = vpop.xlane.xlu0 %5102  ;;  %10809 = vmatpush3.bf16.xpose.msk.msra.mxu1 %vm12548_vm2, %v10804_v3  ;;  %v5149_v36 = vmul.f32 %v11979_v6, %v14652_v17  ;;  %v16381_v6 = vld [vmem:[#allocation38_spill] sm:$0xff] }
 0x8d9   : > { %6141 = vrot.lane.b32.xlu1 %v16359_v11, %s12155_s7  ;;  %9987 = vmatprep.mubr.msk.f32.mxu1 %vm1342_vm3, %v5159_v59  ;;  %v16378_v59 = vld [vmem:[#allocation32_spill] sm:$0xff]  ;;  %v16379_v11 = vld [vmem:[#allocation49_spill] sm:$0xff] }
 0x8da   : > { %v11981_v28 = vpop.eup %11980  ;;  %9988 = vmatmul.mubr.msk.f32.gmra.mrb[90].mxu1 %vm1342_vm3, %v5161_v39  ;;  %11537 = vrot.lane.b32.xlu0 %v16360_v7, %s12154_s12  ;;  %v16380_v39 = vld [vmem:[#allocation19_spill] sm:$0xff] }
 0x8db   : > { %v5070_v56 = vpop.xlane.xlu1 %5069  ;;  %v5147_v26 = vmul.f32 %v11981_v28, %v14669_v51  ;;  %v11983_v60 = vpop.eup %11982  ;;  %v16383_v28 = vld [vmem:[#allocation44_spill] sm:$0xff] }
 0x8dc   : > { %11988 = vrcp.f32 %v5070_v56  ;;  %v5106_v10 = vpop.xlane.xlu0 %5105  ;;  %v5165_v51 = vmul.f32 %v11983_v60, %v14662_v5 }
 0x8dd   : > { %6143 = vrot.lane.b32.xlu1 %v16361_v49, %s12155_s7  ;;  %9962 = vmatprep.mubr.msk.f32.mxu0 %vm1342_vm3, %v5147_v26  ;;  %11990 = vrcp.f32 %v5097_v21  ;;  %v16376_v21 = vld [vmem:[#allocation12_spill] sm:$0xff] }
 0x8de   : > { %v11985_v57 = vpop.eup %11984  ;;  %9963 = vmatmul.mubr.msk.f32.gmra.mrb[116].mxu0 %vm1342_vm3, %v5149_v36  ;;  %6308 = vrot.lane.b32.xlu0 %v16362_v42, %s12155_s7 }
 0x8df   : > { %v5094_v16 = vpop.xlane.xlu1 %5093  ;;  %v5163_v44 = vmul.f32 %v11985_v57, %v14679_v61  ;;  %v11987_v61 = vpop.eup %11986 }
 0x8e0   : > { %11992 = vrcp.f32 %v5094_v16  ;;  %v5153_v41 = vmul.f32 %v11987_v61, %v14672_v48  ;;  %v16369_v48 = vld [vmem:[#allocation39_spill] sm:$0xff] }
 0x8e1   : > { %11532 = vrot.lane.b32.xlu1 %v16363_v55, %s12154_s12  ;;  %9990 = vmatprep.mubr.msk.f32.mxu1 %vm1342_vm3, %v5163_v44  ;;  %11994 = vrcp.f32 %v5103_v54  ;;  %v16382_v54 = vld [vmem:[#allocation42_spill] sm:$0xff] }
 0x8e2   : > { %9991 = vmatmul.mubr.msk.f32.gmra.mrb[92].mxu1 %vm1342_vm3, %v5165_v51  ;;  %11996 = vrcp.f32 %v5106_v10  ;;  %6312 = vrot.lane.b32.xlu0 %v16364_v34, %s12155_s7  ;;  %v16387_v10 = vld [vmem:[#allocation3_spill] sm:$0xff]  ;;  %v16388_v51 = vld [vmem:[#allocation5_spill] sm:$0xff] }
 0x8e3   : > { %v5100_v17 = vpop.xlane.xlu1 %5099 }
 0x8e4   : > { %11998 = vrcp.f32 %v5100_v17 }
 0x8e5   : > { %6145 = vrot.lane.b32.xlu1 %v16365_v62, %s12155_s7 }
 0x8e6   : > { %v11989_v20 = vpop.eup %11988  ;;  %6314 = vrot.lane.b32.xlu0 %v16366_v31, %s12155_s7 }
 0x8e7   : > { %v5151_v5 = vmul.f32 %v11989_v20, %v14691_v13  ;;  %v11991_v43 = vpop.eup %11990 }
 0x8e8   : > { %v5169_v13 = vmul.f32 %v11991_v43, %v14683_v29  ;;  %v16374_v29 = vld [vmem:[#allocation77_spill] sm:$0xff] }
 0x8e9   : > { %6147 = vrot.lane.b32.xlu1 %v16367_v63, %s12155_s7  ;;  %9965 = vmatprep.mubr.msk.f32.mxu0 %vm1342_vm3, %v5151_v5 }
 0x8ea   : > { %v11993_v0 = vpop.eup %11992  ;;  %9966 = vmatmul.mubr.msk.f32.gmra.mrb[118].mxu0 %vm1342_vm3, %v5153_v41  ;;  %6318 = vrot.lane.b32.xlu0 %v16368_v22, %s12155_s7 }
 0x8eb   : > { %v5167_v25 = vmul.f32 %v11993_v0, %v14697_v52  ;;  %v11995_v3 = vpop.eup %11994  ;;  %v16372_v52 = vld [vmem:[#allocation43_spill] sm:$0xff] }
 0x8ec   : > { %v11997_v2 = vpop.eup %11996  ;;  %v5173_v9 = vmul.f32 %v11995_v3, %v16371_v8 }
 0x8ed   : > { %6149 = vrot.lane.b32.xlu1 %v16369_v48, %s12155_s7  ;;  %9993 = vmatprep.mubr.msk.f32.mxu1 %vm1342_vm3, %v5167_v25  ;;  %v5175_v12 = vmul.f32 %v11997_v2, %v16374_v29 }
 0x8ee   : > { %v11999_v4 = vpop.eup %11998  ;;  %9994 = vmatmul.mubr.msk.f32.gmra.mrb[94].mxu1 %vm1342_vm3, %v5169_v13  ;;  %6475 = vrot.lane.b32.xlu0 %v16372_v52, %s12155_s7 }
 0x8ef   : > { %v5171_v53 = vmul.f32 %v11999_v4, %v16370_v58 }
 0x8f1   : > { %6151 = vrot.lane.b32.xlu1 %v16373_v35, %s12155_s7  ;;  %10012 = vmatprep.mubr.msk.f32.mxu0 %vm1342_vm3, %v5171_v53 }
 0x8f2   : > { %10013 = vmatmul.mubr.msk.f32.vlgmr.msra.gmra.mrb[120].mxu0 %vm1342_vm3, %v5173_v9  ;;  %6479 = vrot.lane.b32.xlu0 %v16375_v30, %s12155_s7 }
 0x8f3   : > { %10015 = vmatprep.mubr.msk.f32.mxu0 %vm1342_vm3, %v5175_v12 }
 0x8f5   : > { %6306 = vrot.lane.b32.xlu1 %v16376_v21, %s12155_s7 }
 0x8f6   : > { %6483 = vrot.lane.b32.xlu0 %v16377_v24, %s12155_s7 }
 0x8f9   : > { %6310 = vrot.lane.b32.xlu1 %v16378_v59, %s12155_s7 }
 0x8fa   : > { %6487 = vrot.lane.b32.xlu0 %v16379_v11, %s12155_s7 }
 0x8fd   : > { %11542 = vrot.lane.b32.xlu1 %v16380_v39, %s12154_s12 }
 0x8fe   : > { %11552 = vrot.lane.b32.xlu0 %v16291_v38, %s12156_s9  ;;  %v16384_v38 = vld [vmem:[#allocation46_spill] sm:$0xff] }
 0x901   : > { %6316 = vrot.lane.b32.xlu1 %v16381_v6, %s12155_s7 }
 0x902   : > { %11562 = vrot.lane.b32.xlu0 %v16293_v47, %s12156_s9 }
 0x905   : > { %6320 = vrot.lane.b32.xlu1 %v16382_v54, %s12155_s7 }
 0x906   : > { %11572 = vrot.lane.b32.xlu0 %v16296_v33, %s12156_s9  ;;  %v16385_v33 = vld [vmem:[#allocation48_spill] sm:$0xff] }
 0x909   : > { %6477 = vrot.lane.b32.xlu1 %v16383_v28, %s12155_s7 }
 0x90a   : > { %11582 = vrot.lane.b32.xlu0 %v16301_v45, %s12156_s9  ;;  %v16386_v45 = vld [vmem:[#allocation50_spill] sm:$0xff] }
 0x90c   : > { %v5109_v56 = vpop.xlane.xlu1 %5108 }
 0x90d   : > { %12000 = vrcp.f32 %v5109_v56  ;;  %6481 = vrot.lane.b32.xlu1 %v16384_v38, %s12155_s7 }
 0x90e   : > { %11592 = vrot.lane.b32.xlu0 %v16353_v19, %s12156_s9 }
 0x910   : > { %v5115_v47 = vpop.xlane.xlu0 %5114  ;;  %v11483_v26 = vpop.permute.xlu1 %11482 }
 0x911   : > { %v11485_v60 = vunpack.i.h.bf16 %v11483_v26  ;;  %v11484_v49 = vunpack.i.l.bf16 %v11483_v26  ;;  %6485 = vrot.lane.b32.xlu1 %v16385_v33, %s12155_s7  ;;  %12002 = vrcp.f32 %v5115_v47 }
 0x913   : > { %v10816_v36 = vpack.c.bf16 %v11485_v60, %v11484_v49 }
 0x914   : > { %v5112_v57 = vpop.xlane.xlu0 %5111 }
 0x915   : > { %12004 = vrcp.f32 %v5112_v57  ;;  %6489 = vrot.lane.b32.xlu1 %v16386_v45, %s12155_s7  ;;  %10818 = vmatprep.subr.msk.bf16.mxu0 %vm12548_vm2, %v10816_v36 }
 0x916   : > { %10821 = vmatpush3.bf16.xpose.msk.msra.mxu0 %vm12548_vm2, %v10816_v36 }
 0x917   : > { %v12001_v19 = vpop.eup %12000 }
 0x918   : > { %v5177_v16 = vmul.f32 %v12001_v19, %v14713_v18  ;;  %v5118_v44 = vpop.xlane.xlu0 %5117  ;;  %v16389_v18 = vld [vmem:[#allocation6_spill] sm:$0xff] }
 0x919   : > { %11547 = vrot.lane.b32.xlu1 %v16387_v10, %s12156_s9  ;;  %12006 = vrcp.f32 %v5118_v44 }
 0x91a   : > { %10016 = vmatmul.mubr.msk.f32.gmra.mrb[122].mxu0 %vm1342_vm3, %v5177_v16 }
 0x91b   : > { %v12003_v17 = vpop.eup %12002 }
 0x91c   : > { %v11488_v42 = vpop.permute.xlu0 %11487  ;;  %v5181_v41 = vmul.f32 %v12003_v17, %v14718_v27 }
 0x91d   : > { %11557 = vrot.lane.b32.xlu1 %v16388_v51, %s12156_s9  ;;  %v11490_v34 = vunpack.i.h.bf16 %v11488_v42  ;;  %v11489_v61 = vunpack.i.l.bf16 %v11488_v42 }
 0x91f   : > { %v12005_v62 = vpop.eup %12004  ;;  %v10810_v20 = vpack.c.bf16 %v11490_v34, %v11489_v61 }
 0x920   : > { %v5179_v5 = vmul.f32 %v12005_v62, %v14723_v1  ;;  %v11498_v31 = vpop.permute.xlu0 %11497 }
 0x921   : > { %11567 = vrot.lane.b32.xlu1 %v16389_v18, %s12156_s9  ;;  %10812 = vmatprep.subr.msk.bf16.mxu1 %vm12548_vm2, %v10810_v20  ;;  %v11500_v9 = vunpack.i.h.bf16 %v11498_v31  ;;  %v11499_v52 = vunpack.i.l.bf16 %v11498_v31 }
 0x922   : > { %10018 = vmatprep.mubr.msk.f32.mxu0 %vm1342_vm3, %v5179_v5  ;;  %10815 = vmatpush3.bf16.xpose.msk.msra.mxu1 %vm12548_vm2, %v10810_v20 }
 0x923   : > { %10019 = vmatmul.mubr.msk.f32.gmra.mrb[124].mxu0 %vm1342_vm3, %v5181_v41  ;;  %v12007_v43 = vpop.eup %12006 }
 0x924   : > { %v11503_v63 = vpop.permute.xlu0 %11502  ;;  %v5183_v1 = vmul.f32 %v12007_v43, %v14729_v23 }
 0x925   : > { %11577 = vrot.lane.b32.xlu1 %v16288_v32, %s12156_s9  ;;  %v11505_v0 = vunpack.i.h.bf16 %v11503_v63  ;;  %v11504_v25 = vunpack.i.l.bf16 %v11503_v63 }
 0x926   : > { %10021 = vmatprep.mubr.msk.f32.mxu0 %vm1342_vm3, %v5183_v1 }
 0x927   : > { %v10840_v27 = vpack.c.bf16 %v11505_v0, %v11504_v25 }
 0x928   : > { %v5969_v3 = vpop.permute.xlu0 %5968 }
 0x929   : > { %11587 = vrot.lane.b32.xlu1 %v16290_v14, %s12156_s9  ;;  %10040 = vmatprep.mubr.msk.f32.mxu1 %vm689_vm1, %v5969_v3 }
 0x92a   : > { %10842 = vmatprep.subr.msk.bf16.mxu1 %vm12548_vm2, %v10840_v27 }
 0x92c   : > { %v11508_v22 = vpop.permute.xlu0 %11507 }
 0x92d   : > { %11597 = vrot.lane.b32.xlu1 %v16294_v50, %s12156_s9  ;;  %v10828_v50 = vpack.c.bf16 %v11500_v9, %v11499_v52  ;;  %v11510_v56 = vunpack.i.h.bf16 %v11508_v22  ;;  %v11509_v38 = vunpack.i.l.bf16 %v11508_v22 }
 0x930   : > { %v11518_v32 = vpop.permute.xlu0 %11517 }
 0x931   : > { %v11520_v11 = vunpack.i.h.bf16 %v11518_v32  ;;  %v11519_v6 = vunpack.i.l.bf16 %v11518_v32 }
 0x933   : > { %v10852_v49 = vpack.c.bf16 %v11520_v11, %v11519_v6 }
 0x934   : > { %v6138_v23 = vpop.permute.xlu0 %6137 }
 0x938   : > { %v5973_v13 = vpop.permute.xlu0 %5972 }
 0x93c   : > { %v5975_v2 = vpop.permute.xlu0 %5974 }
 0x940   : > { %v11528_v48 = vpop.permute.xlu0 %11527 }
 0x941   : > { %v5121_v4 = vpop.xlane.xlu1 %5120  ;;  %v11530_v57 = vunpack.i.h.bf16 %v11528_v48  ;;  %v11529_v45 = vunpack.i.l.bf16 %v11528_v48 }
 0x942   : > { %12008 = vrcp.f32 %v5121_v4 }
 0x943   : > { %v10858_v42 = vpack.c.bf16 %v11530_v57, %v11529_v45 }
 0x944   : > { %v5977_v58 = vpop.permute.xlu0 %5976 }
 0x945   : > { %v11493_v53 = vpop.permute.xlu1 %11492 }
 0x946   : > { %v11495_v8 = vunpack.i.h.bf16 %v11493_v53  ;;  %v11494_v14 = vunpack.i.l.bf16 %v11493_v53 }
 0x948   : > { %v10822_v35 = vpack.c.bf16 %v11495_v8, %v11494_v14  ;;  %v5979_v29 = vpop.permute.xlu0 %5978 }
 0x949   : > { %v5971_v12 = vpop.permute.xlu1 %5970 }
 0x94a   : > { %10041 = vmatmul.mubr.msk.f32.vlgmr.msra.gmra.mrb[96].mxu1 %vm689_vm1, %v5971_v12  ;;  %10824 = vmatprep.subr.msk.bf16.mxu0 %vm12548_vm2, %v10822_v35 }
 0x94b   : > { %10845 = vmatpush3.bf16.xpose.msk.msra.mxu1 %vm12548_vm2, %v10840_v27  ;;  %10043 = vmatprep.mubr.msk.f32.mxu1 %vm689_vm1, %v5973_v13 }
 0x94c   : > { %v12009_v30 = vpop.eup %12008  ;;  %10827 = vmatpush3.bf16.xpose.msk.msra.mxu0 %vm12548_vm2, %v10822_v35  ;;  %v5981_v21 = vpop.permute.xlu0 %5980 }
 0x94d   : > { %10830 = vmatprep.subr.msk.bf16.mxu0 %vm12548_vm2, %v10828_v50  ;;  %v11513_v24 = vpop.permute.xlu1 %11512  ;;  %v5185_v59 = vmul.f32 %v12009_v30, %v14762_v15  ;;  %v10834_v15 = vpack.c.bf16 %v11510_v56, %v11509_v38 }
 0x94e   : > { %v11515_v54 = vunpack.i.h.bf16 %v11513_v24  ;;  %v11514_v28 = vunpack.i.l.bf16 %v11513_v24  ;;  %10044 = vmatmul.mubr.msk.f32.gmra.mrb[98].mxu1 %vm689_vm1, %v5975_v2 }
 0x94f   : > { %10022 = vmatmul.mubr.msk.f32.gmra.mrb[126].mxu0 %vm1342_vm3, %v5185_v59  ;;  %10046 = vmatprep.mubr.msk.f32.mxu1 %vm689_vm1, %v5977_v58 }
 0x950   : > { %v10846_v47 = vpack.c.bf16 %v11515_v54, %v11514_v28  ;;  %10068 = vmatprep.mubr.msk.f32.mxu0 %vm689_vm1, %v6138_v23  ;;  %v5983_v26 = vpop.permute.xlu0 %5982 }
 0x951   : > { %v11523_v60 = vpop.permute.xlu1 %11522 }
 0x952   : > { %10047 = vmatmul.mubr.msk.f32.gmra.mrb[100].mxu1 %vm689_vm1, %v5979_v29  ;;  %10848 = vmatprep.subr.msk.bf16.mxu1 %vm12548_vm2, %v10846_v47  ;;  %v11525_v19 = vunpack.i.h.bf16 %v11523_v60  ;;  %v11524_v16 = vunpack.i.l.bf16 %v11523_v60 }
 0x953   : > { %10049 = vmatprep.mubr.msk.f32.mxu1 %vm689_vm1, %v5981_v21  ;;  %10851 = vmatpush3.bf16.xpose.msk.msra.mxu1 %vm12548_vm2, %v10846_v47 }
 0x954   : > { %10833 = vmatpush3.bf16.xpose.msk.msra.mxu0 %vm12548_vm2, %v10828_v50  ;;  %10854 = vmatprep.subr.msk.bf16.mxu1 %vm12548_vm2, %v10852_v49  ;;  %v11538_v33 = vpop.permute.xlu0 %11537  ;;  %v10864_v51 = vpack.c.bf16 %v11525_v19, %v11524_v16 }
 0x955   : > { %10836 = vmatprep.subr.msk.bf16.mxu0 %vm12548_vm2, %v10834_v15  ;;  %v6140_v36 = vpop.permute.xlu1 %6139  ;;  %v11540_v25 = vunpack.i.h.bf16 %v11538_v33  ;;  %v11539_v27 = vunpack.i.l.bf16 %v11538_v33 }
 0x956   : > { %10050 = vmatmul.mubr.msk.f32.gmra.mrb[102].mxu1 %vm689_vm1, %v5983_v26 }
 0x957   : > { %v10876_v32 = vpack.c.bf16 %v11540_v25, %v11539_v27 }
 0x958   : > { %v6309_v44 = vpop.permute.xlu0 %6308 }
 0x959   : > { %v6142_v10 = vpop.permute.xlu1 %6141 }
 0x95b   : > { %10857 = vmatpush3.bf16.xpose.msk.msra.mxu1 %vm12548_vm2, %v10852_v49 }
 0x95c   : > { %10839 = vmatpush3.bf16.xpose.msk.msra.mxu0 %vm12548_vm2, %v10834_v15  ;;  %10860 = vmatprep.subr.msk.bf16.mxu1 %vm12548_vm2, %v10858_v42  ;;  %v14989_v17 = vpop.f32.mrb[80].mxu1  ;;  %v6313_v34 = vpop.permute.xlu0 %6312 }
 0x95d   : > { %10866 = vmatprep.subr.msk.bf16.mxu0 %vm12548_vm2, %v10864_v51  ;;  %v14993_v61 = vpop.f32.mrb[81].mxu1  ;;  %v6144_v62 = vpop.permute.xlu1 %6143 }
 0x960   : > { %v14995_v20 = vpop.f32.mrb[82].mxu1  ;;  %v6315_v5 = vpop.permute.xlu0 %6314 }
 0x961   : > { %v14997_v31 = vpop.f32.mrb[83].mxu1  ;;  %v11533_v18 = vpop.permute.xlu1 %11532 }
 0x962   : > { %v11535_v41 = vunpack.i.h.bf16 %v11533_v18  ;;  %v11534_v43 = vunpack.i.l.bf16 %v11533_v18 }
 0x963   : > { %10069 = vmatmul.mubr.msk.f32.vlgmr.msra.gmra.mrb[128].mxu0 %vm689_vm1, %v6140_v36  ;;  %10863 = vmatpush3.bf16.xpose.msk.msra.mxu1 %vm12548_vm2, %v10858_v42 }
 0x964   : > { %10071 = vmatprep.mubr.msk.f32.mxu0 %vm689_vm1, %v6142_v10  ;;  %10869 = vmatpush3.bf16.xpose.msk.msra.mxu0 %vm12548_vm2, %v10864_v51  ;;  %v10870_v63 = vpack.c.bf16 %v11535_v41, %v11534_v43  ;;  %v6319_v1 = vpop.permute.xlu0 %6318 }
 0x965   : > { %v6146_v0 = vpop.permute.xlu1 %6145 }
 0x966   : > { %10872 = vmatprep.subr.msk.bf16.mxu0 %vm12548_vm2, %v10870_v63 }
 0x967   : > { %10072 = vmatmul.mubr.msk.f32.gmra.mrb[130].mxu0 %vm689_vm1, %v6144_v62 }
 0x968   : > { %10074 = vmatprep.mubr.msk.f32.mxu0 %vm689_vm1, %v6146_v0  ;;  %v6476_v3 = vpop.permute.xlu0 %6475 }
 0x969   : > { %v6148_v22 = vpop.permute.xlu1 %6147 }
 0x96b   : > { %10075 = vmatmul.mubr.msk.f32.gmra.mrb[132].mxu0 %vm689_vm1, %v6148_v22 }
 0x96c   : > { %10875 = vmatpush3.bf16.xpose.msk.msra.mxu0 %vm12548_vm2, %v10870_v63  ;;  %v6480_v23 = vpop.permute.xlu0 %6479 }
 0x96d   : > { %10878 = vmatprep.subr.msk.bf16.mxu0 %vm12548_vm2, %v10876_v32  ;;  %v6150_v13 = vpop.permute.xlu1 %6149 }
 0x96e   : > { %10077 = vmatprep.mubr.msk.f32.mxu0 %vm689_vm1, %v6150_v13 }
 0x970   : > { %v6484_v2 = vpop.permute.xlu0 %6483 }
 0x971   : > { %v6152_v48 = vpop.permute.xlu1 %6151 }
 0x972   : > { %10078 = vmatmul.mubr.msk.f32.gmra.mrb[134].mxu0 %vm689_vm1, %v6152_v48 }
 0x973   : > { %10124 = vmatprep.mubr.msk.f32.mxu0 %vm689_vm1, %v6476_v3 }
 0x974   : > { %10881 = vmatpush3.bf16.xpose.msk.msra.mxu0 %vm12548_vm2, %v10876_v32  ;;  %v6488_v4 = vpop.permute.xlu0 %6487 }
 0x975   : > { %v6307_v58 = vpop.permute.xlu1 %6306 }
 0x976   : > { %10096 = vmatprep.mubr.msk.f32.mxu1 %vm689_vm1, %v6307_v58 }
 0x977   : > { %10097 = vmatmul.mubr.msk.f32.vlgmr.msra.gmra.mrb[104].mxu1 %vm689_vm1, %v6309_v44 }
 0x978   : > { %v11553_v53 = vpop.permute.xlu0 %11552 }
 0x979   : > { %v6311_v8 = vpop.permute.xlu1 %6310  ;;  %v11555_v9 = vunpack.i.h.bf16 %v11553_v53  ;;  %v11554_v52 = vunpack.i.l.bf16 %v11553_v53 }
 0x97a   : > { %10099 = vmatprep.mubr.msk.f32.mxu1 %vm689_vm1, %v6311_v8 }
 0x97b   : > { %10100 = vmatmul.mubr.msk.f32.gmra.mrb[106].mxu1 %vm689_vm1, %v6313_v34  ;;  %v10904_v21 = vpack.c.bf16 %v11555_v9, %v11554_v52 }
 0x97c   : > { %10102 = vmatprep.mubr.msk.f32.mxu1 %vm689_vm1, %v6315_v5  ;;  %v11563_v35 = vpop.permute.xlu0 %11562 }
 0x97d   : > { %v11543_v14 = vpop.permute.xlu1 %11542  ;;  %v11565_v6 = vunpack.i.h.bf16 %v11563_v35  ;;  %v11564_v54 = vunpack.i.l.bf16 %v11563_v35 }
 0x97e   : > { %v11545_v29 = vunpack.i.h.bf16 %v11543_v14  ;;  %v11544_v12 = vunpack.i.l.bf16 %v11543_v14 }
 0x97f   : > { %v10908_v26 = vpack.c.bf16 %v11565_v6, %v11564_v54 }
 0x980   : > { %v10882_v50 = vpack.c.bf16 %v11545_v29, %v11544_v12  ;;  %v11573_v24 = vpop.permute.xlu0 %11572 }
 0x981   : > { %v6317_v30 = vpop.permute.xlu1 %6316  ;;  %v11575_v38 = vunpack.i.h.bf16 %v11573_v24  ;;  %v11574_v47 = vunpack.i.l.bf16 %v11573_v24 }
 0x982   : > { %10103 = vmatmul.mubr.msk.f32.gmra.mrb[108].mxu1 %vm689_vm1, %v6317_v30  ;;  %10884 = vmatprep.subr.msk.bf16.mxu0 %vm12548_vm2, %v10882_v50 }
 0x983   : > { %10105 = vmatprep.mubr.msk.f32.mxu1 %vm689_vm1, %v6319_v1  ;;  %10887 = vmatpush3.bf16.xpose.msk.msra.mxu0 %vm12548_vm2, %v10882_v50  ;;  %v10912_v57 = vpack.c.bf16 %v11575_v38, %v11574_v47 }
 0x984   : > { %10905 = vmatprep.subr.bf16.mxu0 %v10904_v21  ;;  %v11583_v60 = vpop.permute.xlu0 %11582 }
 0x985   : > { %v6321_v59 = vpop.permute.xlu1 %6320  ;;  %v11585_v33 = vunpack.i.h.bf16 %v11583_v60  ;;  %v11584_v36 = vunpack.i.l.bf16 %v11583_v60 }
 0x986   : > { %v15030_v11 = vpop.f32.mrb[84].mxu1  ;;  %10106 = vmatmul.mubr.msk.f32.gmra.mrb[110].mxu1 %vm689_vm1, %v6321_v59 }
 0x987   : > { %16390 = vst [vmem:[#allocation4_spill] sm:$0xff] %v15030_v11  ;;  %v15033_v28 = vpop.f32.mrb[85].mxu1  ;;  %v10916_v19 = vpack.c.bf16 %v11585_v33, %v11584_v36 }
 0x988   : > { %16391 = vst [vmem:[#allocation20_spill] sm:$0xff] %v15033_v28 }
 0x989   : > { %v6478_v56 = vpop.permute.xlu1 %6477 }
 0x98a   : > { %10125 = vmatmul.mubr.msk.f32.vlgmr.msra.gmra.mrb[136].mxu0 %vm689_vm1, %v6478_v56 }
 0x98b   : > { %10127 = vmatprep.mubr.msk.f32.mxu0 %vm689_vm1, %v6480_v23  ;;  %10907 = vmatpush3.bf16.msra.mxu0 %v10904_v21 }
 0x98c   : > { %10909 = vmatprep.subr.bf16.mxu0 %v10908_v26 }
 0x98d   : > { %v15037_v40 = vpop.f32.mrb[86].mxu1  ;;  %v6482_v49 = vpop.permute.xlu1 %6481 }
 0x98e   : > { %16392 = vst [vmem:[#allocation24_spill] sm:$0xff] %v15037_v40  ;;  %v15039_v15 = vpop.f32.mrb[87].mxu1  ;;  %10128 = vmatmul.mubr.msk.f32.gmra.mrb[138].mxu0 %vm689_vm1, %v6482_v49  ;;  %v15101_v49 = vld [vmem:[%s15962_s3 + $0xc0] sm:$0xff] }
 0x98f   : > { %16393 = vst [vmem:[#allocation25_spill] sm:$0xff] %v15039_v15  ;;  %10130 = vmatprep.mubr.msk.f32.mxu0 %vm689_vm1, %v6484_v2  ;;  %10911 = vmatpush3.bf16.msra.mxu0 %v10908_v26  ;;  %v15096_v26 = vld [vmem:[%s15962_s3 + $0xc8] sm:$0xff] }
 0x990   : > { %10913 = vmatprep.subr.bf16.mxu0 %v10912_v57 }
 0x991   : > { %v6486_v45 = vpop.permute.xlu1 %6485 }
 0x992   : > { %10131 = vmatmul.mubr.msk.f32.gmra.mrb[140].mxu0 %vm689_vm1, %v6486_v45 }
 0x993   : > { %10133 = vmatprep.mubr.msk.f32.mxu0 %vm689_vm1, %v6488_v4  ;;  %10915 = vmatpush3.bf16.msra.mxu0 %v10912_v57  ;;  %v15109_v57 = vld [vmem:[%s15962_s3 + $0xd8] sm:$0xff] }
 0x994   : > { %10917 = vmatprep.subr.bf16.mxu0 %v10916_v19 }
 0x995   : > { %v6490_v16 = vpop.permute.xlu1 %6489 }
 0x996   : > { %10134 = vmatmul.mubr.msk.f32.gmra.mrb[142].mxu0 %vm689_vm1, %v6490_v16  ;;  %v15046_v44 = vpop.f32.mrb[112].mxu0 }
 0x997   : > { %16394 = vst [vmem:[#allocation75_spill] sm:$0xff] %v15046_v44  ;;  %10919 = vmatpush3.bf16.msra.mxu0 %v10916_v19  ;;  %v15048_v10 = vpop.f32.mrb[113].mxu0 }
 0x998   : > { %16395 = vst [vmem:[#allocation21_spill] sm:$0xff] %v15048_v10 }
 0x999   : > { %v11548_v42 = vpop.permute.xlu1 %11547 }
 0x99a   : > { %v11550_v51 = vunpack.i.h.bf16 %v11548_v42  ;;  %v11549_v34 = vunpack.i.l.bf16 %v11548_v42  ;;  %v15050_v62 = vpop.f32.mrb[88].mxu1  ;;  %v15119_v42 = vld [vmem:[%s15962_s3 + $0xd0] sm:$0xff] }
 0x99b   : > { %v15052_v5 = vpop.f32.mrb[89].mxu1 }
 0x99c   : > { %v10888_v18 = vpack.c.bf16 %v11550_v51, %v11549_v34 }
 0x99d   : > { %v11558_v41 = vpop.permute.xlu1 %11557 }
 0x99e   : > { %v11560_v43 = vunpack.i.h.bf16 %v11558_v41  ;;  %v11559_v63 = vunpack.i.l.bf16 %v11558_v41  ;;  %10889 = vmatprep.subr.bf16.mxu1 %v10888_v18 }
 0x99f   : > { %10891 = vmatpush3.bf16.msra.mxu1 %v10888_v18 }
 0x9a0   : > { %v10892_v1 = vpack.c.bf16 %v11560_v43, %v11559_v63 }
 0x9a1   : > { %v11568_v0 = vpop.permute.xlu1 %11567 }
 0x9a2   : > { %v11570_v25 = vunpack.i.h.bf16 %v11568_v0  ;;  %v11569_v27 = vunpack.i.l.bf16 %v11568_v0  ;;  %10893 = vmatprep.subr.bf16.mxu1 %v10892_v1  ;;  %v15138_v0 = vld [vmem:[%s15962_s3 + $0xe8] sm:$0xff] }
 0x9a3   : > { %10895 = vmatpush3.bf16.msra.mxu1 %v10892_v1 }
 0x9a4   : > { %v10896_v3 = vpack.c.bf16 %v11570_v25, %v11569_v27 }
 0x9a5   : > { %v11578_v22 = vpop.permute.xlu1 %11577 }
 0x9a6   : > { %v11580_v32 = vunpack.i.h.bf16 %v11578_v22  ;;  %v11579_v23 = vunpack.i.l.bf16 %v11578_v22  ;;  %10897 = vmatprep.subr.bf16.mxu1 %v10896_v3 }
 0x9a7   : > { %10899 = vmatpush3.bf16.msra.mxu1 %v10896_v3 }
 0x9a8   : > { %v10900_v13 = vpack.c.bf16 %v11580_v32, %v11579_v23  ;;  %v15148_v32 = vld [vmem:[%s15962_s3 + $0xe0] sm:$0xff] }
 0x9a9   : > { %v15054_v2 = vpop.f32.mrb[114].mxu0  ;;  %v11588_v48 = vpop.permute.xlu1 %11587 }
 0x9aa   : > { %16396 = vst [vmem:[#allocation26_spill] sm:$0xff] %v15054_v2  ;;  %v11590_v4 = vunpack.i.h.bf16 %v11588_v48  ;;  %v11589_v58 = vunpack.i.l.bf16 %v11588_v48  ;;  %v15056_v53 = vpop.f32.mrb[115].mxu0  ;;  %10901 = vmatprep.subr.bf16.mxu1 %v10900_v13 }
 0x9ab   : > { %16397 = vst [vmem:[#allocation14_spill] sm:$0xff] %v15056_v53  ;;  %10903 = vmatpush3.bf16.msra.mxu1 %v10900_v13 }
 0x9ac   : > { %v15058_v8 = vpack.c.bf16 %v11590_v4, %v11589_v58  ;;  %v15158_v58 = vld [vmem:[%s15962_s3 + $0xf8] sm:$0xff] }
 0x9ad   : > { %v15060_v14 = vpop.f32.mrb[90].mxu1 }
 0x9ae   : > { %v15062_v9 = vpop.f32.mrb[91].mxu1  ;;  %10921 = vmatprep.subr.bf16.mxu1 %v15058_v8 }
 0x9b1   : > { %v15065_v52 = vpop.f32.mrb[116].mxu0 }
 0x9b2   : > { %16398 = vst [vmem:[#allocation27_spill] sm:$0xff] %v15065_v52  ;;  %v15067_v35 = vpop.f32.mrb[117].mxu0 }
 0x9b3   : > { %16399 = vst [vmem:[#allocation16_spill] sm:$0xff] %v15067_v35 }
 0x9b5   : > { %v15069_v29 = vpop.f32.mrb[92].mxu1 }
 0x9b6   : > { %v15071_v12 = vpop.f32.mrb[93].mxu1 }
 0x9bd   : > { %v15073_v50 = vpop.f32.mrb[118].mxu0 }
 0x9be   : > { %v15075_v30 = vpop.f32.mrb[119].mxu0 }
 0x9c1   : > { %v15077_v21 = vpop.f32.mrb[94].mxu1 }
 0x9c2   : > { %16400 = vst [vmem:[#allocation28_spill] sm:$0xff] %v15077_v21  ;;  %v15079_v24 = vpop.f32.mrb[95].mxu1 }
 0x9c3   : > { %16401 = vst [vmem:[#allocation23_spill] sm:$0xff] %v15079_v24 }
 0x9c5   : > { %v15081_v59 = vpop.f32.mrb[120].mxu0 }
 0x9c6   : > { %16402 = vst [vmem:[#allocation29_spill] sm:$0xff] %v15081_v59  ;;  %v15083_v6 = vpop.f32.mrb[121].mxu0 }
 0x9c7   : > { %16403 = vst [vmem:[#allocation31_spill] sm:$0xff] %v15083_v6 }
 0x9ed   : > { %v15085_v54 = vpop.f32.mrb[122].mxu0 }
 0x9ee   : > { %16404 = vst [vmem:[#allocation18_spill] sm:$0xff] %v15085_v54  ;;  %v15087_v56 = vpop.f32.mrb[123].mxu0 }
 0x9ef   : > { %16405 = vst [vmem:[#allocation33_spill] sm:$0xff] %v15087_v56 }
 0x9f6   : > { %v15089_v38 = vpop.f32.mrb[124].mxu0 }
 0x9f7   : > { %16406 = vst [vmem:[#allocation30_spill] sm:$0xff] %v15089_v38  ;;  %v15091_v47 = vpop.f32.mrb[125].mxu0 }
 0x9f8   : > { %16407 = vst [vmem:[#allocation17_spill] sm:$0xff] %v15091_v47 }
 0xa1d   : > { %v10042_v60 = vpop.f32.mrb[96].mxu1 }
 0xa1e   : > { %v15104_v33 = vadd.f32 %v10042_v60, %v15096_v26  ;;  %v6098_v36 = vpop.f32.mrb[97].mxu1 }
 0xa1f   : > { %v15112_v45 = vadd.f32 %v15101_v49, %v6098_v36 }
 0xa20   : > { %v6647_v19 = vsel %vm1342_vm3, %v15104_v33, -inf }
 0xa21   : > { %6648 = vmax.xlane.f32.xlu0 %v6647_v19  ;;  %v10045_v16 = vpop.f32.mrb[98].mxu1  ;;  %v6644_v1 = vsel %vm1342_vm3, %v15112_v45, -inf  ;;  %v15168_v19 = vld [vmem:[%s15962_s3 + $0xf0] sm:$0xff] }
 0xa22   : > { %v15122_v51 = vadd.f32 %v10045_v16, %v15109_v57  ;;  %v15124_v34 = vpop.f32.mrb[126].mxu0  ;;  %v6108_v18 = vpop.f32.mrb[99].mxu1 }
 0xa23   : > { %16408 = vst [vmem:[#allocation34_spill] sm:$0xff] %v15124_v34  ;;  %v15126_v41 = vpop.f32.mrb[127].mxu0  ;;  %v15129_v43 = vadd.f32 %v15119_v42, %v6108_v18 }
 0xa24   : > { %16409 = vst [vmem:[#allocation35_spill] sm:$0xff] %v15126_v41  ;;  %v6653_v63 = vsel %vm1342_vm3, %v15122_v51, -inf }
 0xa25   : > { %6654 = vmax.xlane.f32.xlu1 %v6653_v63  ;;  %v10048_v25 = vpop.f32.mrb[100].mxu1  ;;  %6645 = vmax.xlane.f32.xlu0 %v6644_v1  ;;  %v6650_v22 = vsel %vm1342_vm3, %v15129_v43, -inf }
 0xa26   : > { %v6118_v27 = vpop.f32.mrb[101].mxu1  ;;  %v15141_v3 = vadd.f32 %v10048_v25, %v15138_v0 }
 0xa27   : > { %v15151_v48 = vadd.f32 %v15148_v32, %v6118_v27 }
 0xa28   : > { %v6659_v4 = vsel %vm1342_vm3, %v15141_v3, -inf }
 0xa29   : > { %v10051_v23 = vpop.f32.mrb[102].mxu1  ;;  %6651 = vmax.xlane.f32.xlu1 %v6650_v22  ;;  %v6656_v36 = vsel %vm1342_vm3, %v15151_v48, -inf }
 0xa2a   : > { %v6128_v13 = vpop.f32.mrb[103].mxu1  ;;  %v15161_v60 = vadd.f32 %v10051_v23, %v15158_v58 }
 0xa2b   : > { %v15171_v16 = vadd.f32 %v15168_v19, %v6128_v13 }
 0xa2c   : > { %v6665_v18 = vsel %vm1342_vm3, %v15161_v60, -inf }
 0xa2d   : > { %6660 = vmax.xlane.f32.xlu1 %v6659_v4  ;;  %v6662_v22 = vsel %vm1342_vm3, %v15171_v16, -inf }
 0xa31   : > { %6657 = vmax.xlane.f32.xlu1 %v6656_v36 }
 0xa35   : > { %6666 = vmax.xlane.f32.xlu1 %v6665_v18 }
 0xa36   : > { %v10070_v63 = vpop.f32.mrb[128].mxu0 }
 0xa37   : > { %v15176_v1 = vadd.f32 %v10070_v63, %v15096_v26  ;;  %v6267_v25 = vpop.f32.mrb[129].mxu0 }
 0xa38   : > { %v15179_v27 = vadd.f32 %v15101_v49, %v6267_v25 }
 0xa39   : > { %6663 = vmax.xlane.f32.xlu1 %v6662_v22  ;;  %v6671_v23 = vsel %vm1342_vm3, %v15176_v1, -inf }
 0xa3a   : > { %6672 = vmax.xlane.f32.xlu0 %v6671_v23  ;;  %v10073_v13 = vpop.f32.mrb[130].mxu0  ;;  %v6668_v36 = vsel %vm1342_vm3, %v15179_v27, -inf }
 0xa3b   : > { %v6277_v4 = vpop.f32.mrb[131].mxu0  ;;  %v15191_v22 = vadd.f32 %v10073_v13, %v15109_v57 }
 0xa3c   : > { %v15203_v53 = vadd.f32 %v15119_v42, %v6277_v4 }
 0xa3d   : > { %6669 = vmax.xlane.f32.xlu1 %v6668_v36 }
 0xa3e   : > { %v10076_v18 = vpop.f32.mrb[132].mxu0 }
 0xa3f   : > { %v6287_v63 = vpop.f32.mrb[133].mxu0 }
 0xa45   : > { %v10079_v34 = vpop.f32.mrb[134].mxu0 }
 0xa46   : > { %v6297_v41 = vpop.f32.mrb[135].mxu0 }
 0xa4a   : > { %v10098_v25 = vpop.f32.mrb[104].mxu1 }
 0xa4b   : > { %v15188_v52 = vadd.f32 %v10098_v25, %v15096_v26  ;;  %v6436_v35 = vpop.f32.mrb[105].mxu1  ;;  %v6677_v25 = vsel %vm1342_vm3, %v15191_v22, -inf }
 0xa4d   : > { %v6695_v23 = vsel %vm1342_vm3, %v15188_v52, -inf }
 0xa4e   : > { %11602 = vrot.lane.b32.xlu1 %v12436_v37, %s12156_s9  ;;  %v10101_v47 = vpop.f32.mrb[106].mxu1  ;;  %6696 = vmax.xlane.f32.xlu0 %v6695_v23  ;;  %v15208_v37 = vadd.f32 %v10076_v18, %v15138_v0 }
 0xa4f   : > { %v6446_v36 = vpop.f32.mrb[107].mxu1  ;;  %v15198_v38 = vadd.f32 %v10101_v47, %v15109_v57  ;;  %v6674_v47 = vsel %vm1342_vm3, %v15203_v53, -inf }
 0xa50   : > { %v6683_v10 = vsel %vm1342_vm3, %v15208_v37, -inf }
 0xa51   : > { %v6701_v2 = vsel %vm1342_vm3, %v15198_v38, -inf }
 0xa52   : > { %6678 = vmax.xlane.f32.xlu0 %v6677_v25 }
 0xa55   : > { %v10104_v13 = vpop.f32.mrb[108].mxu1 }
 0xa56   : > { %v6456_v56 = vpop.f32.mrb[109].mxu1  ;;  %6702 = vmax.xlane.f32.xlu0 %v6701_v2  ;;  %v15213_v25 = vadd.f32 %v10104_v13, %v15138_v0  ;;  %v15218_v2 = vadd.f32 %v15148_v32, %v6287_v63 }
 0xa58   : > { %v6707_v6 = vsel %vm1342_vm3, %v15213_v25, -inf  ;;  %v6680_v15 = vsel %vm1342_vm3, %v15218_v2, -inf }
 0xa59   : > { %v10107_v23 = vpop.f32.mrb[110].mxu1 }
 0xa5a   : > { %v6466_v54 = vpop.f32.mrb[111].mxu1  ;;  %6675 = vmax.xlane.f32.xlu0 %v6674_v47  ;;  %v15223_v47 = vadd.f32 %v10079_v34, %v15158_v58  ;;  %v15236_v34 = vadd.f32 %v15168_v19, %v6297_v41 }
 0xa5c   : > { %v6689_v24 = vsel %vm1342_vm3, %v15223_v47, -inf  ;;  %v6686_v11 = vsel %vm1342_vm3, %v15236_v34, -inf }
 0xa5d   : > { %v10126_v4 = vpop.f32.mrb[136].mxu0 }
 0xa5e   : > { %v6605_v44 = vpop.f32.mrb[137].mxu0  ;;  %6684 = vmax.xlane.f32.xlu0 %v6683_v10  ;;  %v15228_v10 = vadd.f32 %v10107_v23, %v15158_v58 }
 0xa60   : > { %v6713_v28 = vsel %vm1342_vm3, %v15228_v10, -inf }
 0xa61   : > { %v10129_v18 = vpop.f32.mrb[138].mxu0 }
 0xa62   : > { %v6615_v59 = vpop.f32.mrb[139].mxu0  ;;  %6708 = vmax.xlane.f32.xlu0 %v6707_v6  ;;  %v15233_v6 = vadd.f32 %v15101_v49, %v6436_v35  ;;  %v15248_v35 = vadd.f32 %v15148_v32, %v6456_v56 }
 0xa63   : > { %v15263_v56 = vadd.f32 %v15119_v42, %v6615_v59 }
 0xa64   : > { %v6692_v23 = vsel %vm1342_vm3, %v15233_v6, -inf  ;;  %v6704_v41 = vsel %vm1342_vm3, %v15248_v35, -inf }
 0xa65   : > { %v10132_v13 = vpop.f32.mrb[140].mxu0 }
 0xa66   : > { %v6625_v40 = vpop.f32.mrb[141].mxu0  ;;  %6681 = vmax.xlane.f32.xlu0 %v6680_v15  ;;  %v15241_v15 = vadd.f32 %v15119_v42, %v6446_v36  ;;  %v15258_v36 = vadd.f32 %v15101_v49, %v6605_v44  ;;  %v15285_v42 = vadd.f32 %v10129_v18, %v15109_v57 }
 0xa69   : > { %v10135_v63 = vpop.f32.mrb[142].mxu0 }
 0xa6a   : > { %v6635_v21 = vpop.f32.mrb[143].mxu0  ;;  %6690 = vmax.xlane.f32.xlu0 %v6689_v24  ;;  %v6698_v24 = vsel %vm1342_vm3, %v15241_v15, -inf }
 0xa6b   : > { %v15273_v44 = vadd.f32 %v15168_v19, %v6635_v21 }
 0xa6d   : > { %v6734_v49 = vsel %vm1342_vm3, %v15273_v44, -inf }
 0xa6e   : > { %6714 = vmax.xlane.f32.xlu0 %v6713_v28  ;;  %v15253_v28 = vadd.f32 %v15168_v19, %v6466_v54  ;;  %v15268_v54 = vadd.f32 %v15148_v32, %v6625_v40  ;;  %v15282_v40 = vadd.f32 %v10126_v4, %v15096_v26  ;;  %v15289_v32 = vpop.permute.xlu0 %11592  ;;  %v6725_v19 = vsel %vm1342_vm3, %v15285_v42, -inf }
 0xa6f   : > { %v15299_v4 = vadd.f32 %v10135_v63, %v15158_v58 }
 0xa70   : > { %v6728_v59 = vsel %vm1342_vm3, %v15268_v54, -inf  ;;  %v6719_v21 = vsel %vm1342_vm3, %v15282_v40, -inf }
 0xa72   : > { %6693 = vmax.xlane.f32.xlu1 %v6692_v23  ;;  %6687 = vmax.xlane.f32.xlu0 %v6686_v11  ;;  %v6710_v11 = vsel %vm1342_vm3, %v15253_v28, -inf  ;;  %v6716_v23 = vsel %vm1342_vm3, %v15258_v36, -inf }
 0xa76   : > { %6699 = vmax.xlane.f32.xlu1 %v6698_v24  ;;  %v6722_v24 = vsel %vm1342_vm3, %v15263_v56, -inf }
 0xa7a   : > { %6705 = vmax.xlane.f32.xlu1 %v6704_v41  ;;  %v15296_v41 = vpop.permute.xlu1 %11597 }
 0xa7e   : > { %6711 = vmax.xlane.f32.xlu1 %v6710_v11 }
 0xa82   : > { %6717 = vmax.xlane.f32.xlu1 %v6716_v23 }
 0xa86   : > { %6723 = vmax.xlane.f32.xlu1 %v6722_v24 }
 0xa88   : > { %11607 = vrot.lane.b32.xlu0 %v16355_v46, %s12156_s9  ;;  %v15292_v46 = vadd.f32 %v10132_v13, %v15138_v0 }
 0xa8a   : > { %6729 = vmax.xlane.f32.xlu1 %v6728_v59  ;;  %v6731_v18 = vsel %vm1342_vm3, %v15292_v46, -inf  ;;  %v6737_v59 = vsel %vm1342_vm3, %v15299_v4, -inf }
 0xa8e   : > { %6735 = vmax.xlane.f32.xlu1 %v6734_v49 }
 0xaa7   : > { %6720 = vmax.xlane.f32.xlu0 %v6719_v21 }
 0xaab   : > { %6726 = vmax.xlane.f32.xlu0 %v6725_v19 }
 0xaae   : > { %v6649_v26 = vpop.xlane.xlu0 %6648 }
 0xaaf   : > { %v6741_v57 = vsub.f32 %v15104_v33, %v6649_v26  ;;  %6732 = vmax.xlane.f32.xlu0 %v6731_v18 }
 0xab1   : > { %v6774_v11 = vmul.f32 1.442695, %v6741_v57 }
 0xab2   : > { %v6646_v23 = vpop.xlane.xlu0 %6645  ;;  %v6655_v0 = vpop.xlane.xlu1 %6654 }
 0xab3   : > { %12010 = vpow2.f32 %v6774_v11  ;;  %v6740_v13 = vsub.f32 %v15112_v45, %v6646_v23  ;;  %v6743_v24 = vsub.f32 %v15122_v51, %v6655_v0  ;;  %6738 = vmax.xlane.f32.xlu0 %v6737_v59 }
 0xab5   : > { %v6772_v58 = vmul.f32 1.442695, %v6740_v13  ;;  %v6778_v63 = vmul.f32 1.442695, %v6743_v24 }
 0xab6   : > { %v6652_v49 = vpop.xlane.xlu1 %6651 }
 0xab7   : > { %12012 = vpow2.f32 %v6772_v58  ;;  %v6742_v33 = vsub.f32 %v15129_v43, %v6652_v49 }
 0xab8   : > { %12014 = vpow2.f32 %v6778_v63 }
 0xab9   : > { %v6776_v21 = vmul.f32 1.442695, %v6742_v33 }
 0xaba   : > { %v6661_v19 = vpop.xlane.xlu1 %6660 }
 0xabb   : > { %v6745_v26 = vsub.f32 %v15141_v3, %v6661_v19  ;;  %12016 = vpow2.f32 %v6776_v21 }
 0xabd   : > { %v15310_v57 = vpop.eup %12010  ;;  %v6782_v45 = vmul.f32 1.442695, %v6745_v26 }
 0xabe   : > { %v6658_v51 = vpop.xlane.xlu1 %6657  ;;  %v6839_v18 = vsel %vm1342_vm3, %v15310_v57, 0.0 }
 0xabf   : > { %v6744_v11 = vsub.f32 %v15151_v48, %v6658_v51  ;;  %6840 = vadd.xlane.f32.xlu1 %v6839_v18  ;;  %12018 = vpow2.f32 %v6782_v45 }
 0xac1   : > { %v15315_v23 = vpop.eup %12012  ;;  %v6780_v43 = vmul.f32 1.442695, %v6744_v11 }
 0xac2   : > { %v6667_v0 = vpop.xlane.xlu1 %6666  ;;  %v6836_v13 = vsel %vm1342_vm3, %v15315_v23, 0.0  ;;  %v15319_v3 = vpop.eup %12014 }
 0xac3   : > { %v6747_v24 = vsub.f32 %v15161_v60, %v6667_v0  ;;  %6837 = vadd.xlane.f32.xlu1 %v6836_v13  ;;  %12020 = vpow2.f32 %v6780_v43  ;;  %v6845_v48 = vsel %vm1342_vm3, %v15319_v3, 0.0 }
 0xac5   : > { %v6786_v59 = vmul.f32 1.442695, %v6747_v24  ;;  %v15324_v63 = vpop.eup %12016 }
 0xac6   : > { %v6664_v58 = vpop.xlane.xlu1 %6663  ;;  %v6842_v60 = vsel %vm1342_vm3, %v15324_v63, 0.0 }
 0xac7   : > { %v6746_v49 = vsub.f32 %v15171_v16, %v6664_v58  ;;  %v6673_v33 = vpop.xlane.xlu0 %6672  ;;  %6846 = vadd.xlane.f32.xlu1 %v6845_v48  ;;  %12022 = vpow2.f32 %v6786_v59 }
 0xac8   : > { %v6749_v21 = vsub.f32 %v15176_v1, %v6673_v33 }
 0xac9   : > { %v6784_v19 = vmul.f32 1.442695, %v6746_v49  ;;  %v15330_v45 = vpop.eup %12018 }
 0xaca   : > { %v6790_v26 = vmul.f32 1.442695, %v6749_v21  ;;  %v6851_v51 = vsel %vm1342_vm3, %v15330_v45, 0.0  ;;  %v6670_v24 = vpop.xlane.xlu1 %6669 }
 0xacb   : > { %6843 = vadd.xlane.f32.xlu1 %v6842_v60  ;;  %v6748_v58 = vsub.f32 %v15179_v27, %v6670_v24 }
 0xacc   : > { %12024 = vpow2.f32 %v6790_v26 }
 0xacd   : > { %12026 = vpow2.f32 %v6784_v19  ;;  %v15334_v18 = vpop.eup %12020  ;;  %v6788_v33 = vmul.f32 1.442695, %v6748_v58 }
 0xace   : > { %v6848_v16 = vsel %vm1342_vm3, %v15334_v18, 0.0 }
 0xacf   : > { %6852 = vadd.xlane.f32.xlu1 %v6851_v51 }
 0xad1   : > { %v15338_v1 = vpop.eup %12022 }
 0xad2   : > { %v6857_v43 = vsel %vm1342_vm3, %v15338_v1, 0.0 }
 0xad3   : > { %6849 = vadd.xlane.f32.xlu1 %v6848_v16 }
 0xad6   : > { %v15340_v11 = vpop.eup %12024 }
 0xad7   : > { %v15344_v0 = vpop.eup %12026  ;;  %v6863_v13 = vsel %vm1342_vm3, %v15340_v11, 0.0  ;;  %6858 = vadd.xlane.f32.xlu1 %v6857_v43 }
 0xad8   : > { %6864 = vadd.xlane.f32.xlu0 %v6863_v13  ;;  %v6854_v59 = vsel %vm1342_vm3, %v15344_v0, 0.0 }
 0xadb   : > { %6855 = vadd.xlane.f32.xlu1 %v6854_v59  ;;  %v6697_v48 = vpop.xlane.xlu0 %6696 }
 0xadc   : > { %v6757_v49 = vsub.f32 %v15188_v52, %v6697_v48 }
 0xade   : > { %v6806_v21 = vmul.f32 1.442695, %v6757_v49 }
 0xadf   : > { %v6679_v19 = vpop.xlane.xlu0 %6678 }
 0xae0   : > { %12028 = vpow2.f32 %v6806_v21  ;;  %v6751_v26 = vsub.f32 %v15191_v22, %v6679_v19 }
 0xae1   : > { %12030 = vpow2.f32 %v6788_v33 }
 0xae2   : > { %v6794_v60 = vmul.f32 1.442695, %v6751_v26 }
 0xae3   : > { %v6703_v51 = vpop.xlane.xlu0 %6702 }
 0xae4   : > { %v6759_v16 = vsub.f32 %v15198_v38, %v6703_v51  ;;  %12032 = vpow2.f32 %v6794_v60 }
 0xae6   : > { %v6810_v43 = vmul.f32 1.442695, %v6759_v16 }
 0xae7   : > { %v6676_v13 = vpop.xlane.xlu0 %6675 }
 0xae8   : > { %v6750_v27 = vsub.f32 %v15203_v53, %v6676_v13  ;;  %12034 = vpow2.f32 %v6810_v43 }
 0xaea   : > { %v15355_v24 = vpop.eup %12028  ;;  %v6792_v52 = vmul.f32 1.442695, %v6750_v27 }
 0xaeb   : > { %v6685_v59 = vpop.xlane.xlu0 %6684  ;;  %v6887_v58 = vsel %vm1342_vm3, %v15355_v24, 0.0  ;;  %v15359_v48 = vpop.eup %12030 }
 0xaec   : > { %v6753_v22 = vsub.f32 %v15208_v37, %v6685_v59  ;;  %6888 = vadd.xlane.f32.xlu0 %v6887_v58  ;;  %12036 = vpow2.f32 %v6792_v52  ;;  %v6860_v33 = vsel %vm1342_vm3, %v15359_v48, 0.0  ;;  %v15377_v52 = vpop.permute.xlu1 %11602 }
 0xaee   : > { %v6798_v38 = vmul.f32 1.442695, %v6753_v22  ;;  %v15364_v53 = vpop.eup %12032 }
 0xaef   : > { %v6709_v49 = vpop.xlane.xlu0 %6708  ;;  %v6869_v60 = vsel %vm1342_vm3, %v15364_v53, 0.0 }
 0xaf0   : > { %v6761_v21 = vsub.f32 %v15213_v25, %v6709_v49  ;;  %6861 = vadd.xlane.f32.xlu0 %v6860_v33  ;;  %12038 = vpow2.f32 %v6798_v38 }
 0xaf2   : > { %v6814_v19 = vmul.f32 1.442695, %v6761_v21  ;;  %v15369_v51 = vpop.eup %12034 }
 0xaf3   : > { %v6682_v26 = vpop.xlane.xlu0 %6681  ;;  %v6893_v13 = vsel %vm1342_vm3, %v15369_v51, 0.0 }
 0xaf4   : > { %v6752_v37 = vsub.f32 %v15218_v2, %v6682_v26  ;;  %6870 = vadd.xlane.f32.xlu0 %v6869_v60  ;;  %12040 = vpow2.f32 %v6814_v19 }
 0xaf6   : > { %v6796_v16 = vmul.f32 1.442695, %v6752_v37  ;;  %v15374_v27 = vpop.eup %12036 }
 0xaf7   : > { %v6691_v43 = vpop.xlane.xlu0 %6690  ;;  %v6866_v2 = vsel %vm1342_vm3, %v15374_v27, 0.0 }
 0xaf8   : > { %v6755_v25 = vsub.f32 %v15223_v47, %v6691_v43  ;;  %6894 = vadd.xlane.f32.xlu0 %v6893_v13  ;;  %12042 = vpow2.f32 %v6796_v16 }
 0xafa   : > { %v6802_v59 = vmul.f32 1.442695, %v6755_v25  ;;  %v15381_v22 = vpop.eup %12038 }
 0xafb   : > { %v6715_v58 = vpop.xlane.xlu0 %6714  ;;  %v6875_v19 = vsel %vm1342_vm3, %v15381_v22, 0.0 }
 0xafc   : > { %v6763_v38 = vsub.f32 %v15228_v10, %v6715_v58  ;;  %6867 = vadd.xlane.f32.xlu0 %v6866_v2  ;;  %12044 = vpow2.f32 %v6802_v59 }
 0xafe   : > { %v6818_v49 = vmul.f32 1.442695, %v6763_v38  ;;  %v15387_v26 = vpop.eup %12040 }
 0xaff   : > { %v6694_v33 = vpop.xlane.xlu1 %6693  ;;  %v6688_v21 = vpop.xlane.xlu0 %6687  ;;  %v6899_v25 = vsel %vm1342_vm3, %v15387_v26, 0.0 }
 0xb00   : > { %v6756_v47 = vsub.f32 %v15233_v6, %v6694_v33  ;;  %v6754_v60 = vsub.f32 %v15236_v34, %v6688_v21  ;;  %6876 = vadd.xlane.f32.xlu0 %v6875_v19  ;;  %12046 = vpow2.f32 %v6818_v49 }
 0xb02   : > { %v6804_v37 = vmul.f32 1.442695, %v6756_v47  ;;  %v6800_v16 = vmul.f32 1.442695, %v6754_v60  ;;  %v15393_v6 = vpop.eup %12042 }
 0xb03   : > { %v6700_v43 = vpop.xlane.xlu1 %6699  ;;  %v11608_v10 = vpop.permute.xlu0 %11607  ;;  %v6872_v33 = vsel %vm1342_vm3, %v15393_v6, 0.0 }
 0xb04   : > { %12048 = vpow2.f32 %v6804_v37  ;;  %v6758_v13 = vsub.f32 %v15241_v15, %v6700_v43  ;;  %v11610_v59 = vunpack.i.h.bf16 %v11608_v10  ;;  %v11609_v58 = vunpack.i.l.bf16 %v11608_v10  ;;  %6900 = vadd.xlane.f32.xlu0 %v6899_v25 }
 0xb05   : > { %12050 = vpow2.f32 %v6800_v16 }
 0xb06   : > { %v6808_v2 = vmul.f32 1.442695, %v6758_v13  ;;  %v15395_v38 = vpack.c.bf16 %v11610_v59, %v11609_v58  ;;  %v15400_v15 = vpop.eup %12044 }
 0xb07   : > { %v6706_v34 = vpop.xlane.xlu1 %6705  ;;  %v6881_v60 = vsel %vm1342_vm3, %v15400_v15, 0.0 }
 0xb08   : > { %12052 = vpow2.f32 %v6808_v2  ;;  %v6760_v49 = vsub.f32 %v15248_v35, %v6706_v34  ;;  %10937 = vmatprep.subr.bf16.mxu0 %v15395_v38  ;;  %6873 = vadd.xlane.f32.xlu0 %v6872_v33 }
 0xb0a   : > { %v6812_v21 = vmul.f32 1.442695, %v6760_v49  ;;  %v15406_v37 = vpop.eup %12046 }
 0xb0b   : > { %v6712_v47 = vpop.xlane.xlu1 %6711  ;;  %16410 = vst [vmem:[#allocation36_spill] sm:$0xff] %v15406_v37  ;;  %v6905_v25 = vsel %vm1342_vm3, %v15406_v37, 0.0 }
 0xb0c   : > { %12054 = vpow2.f32 %v6812_v21  ;;  %v6762_v19 = vsub.f32 %v15253_v28, %v6712_v47  ;;  %6882 = vadd.xlane.f32.xlu0 %v6881_v60 }
 0xb0e   : > { %v15408_v35 = vpop.eup %12048  ;;  %v6816_v16 = vmul.f32 1.442695, %v6762_v19 }
 0xb0f   : > { %v6718_v43 = vpop.xlane.xlu1 %6717  ;;  %v6884_v10 = vsel %vm1342_vm3, %v15408_v35, 0.0  ;;  %v15415_v28 = vpop.eup %12050 }
 0xb10   : > { %12056 = vpow2.f32 %v6816_v16  ;;  %v6764_v13 = vsub.f32 %v15258_v36, %v6718_v43  ;;  %6885 = vadd.xlane.f32.xlu1 %v6884_v10  ;;  %6906 = vadd.xlane.f32.xlu0 %v6905_v25  ;;  %v6878_v34 = vsel %vm1342_vm3, %v15415_v28, 0.0 }
 0xb12   : > { %v15417_v59 = vpop.eup %12052  ;;  %v6820_v58 = vmul.f32 1.442695, %v6764_v13 }
 0xb13   : > { %v6890_v2 = vsel %vm1342_vm3, %v15417_v59, 0.0  ;;  %v6724_v60 = vpop.xlane.xlu1 %6723 }
 0xb14   : > { %12058 = vpow2.f32 %v6820_v58  ;;  %6891 = vadd.xlane.f32.xlu1 %v6890_v2  ;;  %6879 = vadd.xlane.f32.xlu0 %v6878_v34  ;;  %v6766_v13 = vsub.f32 %v15263_v56, %v6724_v60 }
 0xb16   : > { %v15423_v36 = vpop.eup %12054  ;;  %v6824_v34 = vmul.f32 1.442695, %v6766_v13 }
 0xb17   : > { %v6896_v49 = vsel %vm1342_vm3, %v15423_v36, 0.0  ;;  %v6730_v10 = vpop.xlane.xlu1 %6729 }
 0xb18   : > { %6897 = vadd.xlane.f32.xlu1 %v6896_v49  ;;  %v6768_v49 = vsub.f32 %v15268_v54, %v6730_v10 }
 0xb1a   : > { %v15427_v33 = vpop.eup %12056 }
 0xb1b   : > { %16411 = vst [vmem:[#allocation37_spill] sm:$0xff] %v15427_v33  ;;  %v6902_v21 = vsel %vm1342_vm3, %v15427_v33, 0.0  ;;  %v6736_v37 = vpop.xlane.xlu1 %6735 }
 0xb1c   : > { %6903 = vadd.xlane.f32.xlu0 %v6902_v21 }
 0xb1e   : > { %v15431_v47 = vpop.eup %12058 }
 0xb1f   : > { %16412 = vst [vmem:[#allocation40_spill] sm:$0xff] %v15431_v47  ;;  %v6908_v19 = vsel %vm1342_vm3, %v15431_v47, 0.0  ;;  %v6828_v47 = vmul.f32 1.442695, %v6768_v49 }
 0xb20   : > { %6909 = vadd.xlane.f32.xlu1 %v6908_v19 }
 0xb34   : > { %v6721_v16 = vpop.xlane.xlu0 %6720 }
 0xb35   : > { %v6765_v43 = vsub.f32 %v15282_v40, %v6721_v16  ;;  %v6770_v40 = vsub.f32 %v15273_v44, %v6736_v37 }
 0xb37   : > { %v6822_v25 = vmul.f32 1.442695, %v6765_v43 }
 0xb38   : > { %v6727_v58 = vpop.xlane.xlu0 %6726 }
 0xb39   : > { %12060 = vpow2.f32 %v6822_v25  ;;  %v6767_v2 = vsub.f32 %v15285_v42, %v6727_v58  ;;  %v6832_v42 = vmul.f32 1.442695, %v6770_v40 }
 0xb3b   : > { %v6826_v21 = vmul.f32 1.442695, %v6767_v2 }
 0xb3c   : > { %v6733_v33 = vpop.xlane.xlu0 %6732 }
 0xb3d   : > { %12062 = vpow2.f32 %v6826_v21  ;;  %v6769_v19 = vsub.f32 %v15292_v46, %v6733_v33 }
 0xb3e   : > { %12064 = vpow2.f32 %v6824_v34 }
 0xb3f   : > { %v6830_v16 = vmul.f32 1.442695, %v6769_v19 }
 0xb40   : > { %v6739_v56 = vpop.xlane.xlu0 %6738 }
 0xb41   : > { %12066 = vpow2.f32 %v6830_v16  ;;  %v6771_v60 = vsub.f32 %v15299_v4, %v6739_v56 }
 0xb42   : > { %12068 = vpow2.f32 %v6828_v47 }
 0xb43   : > { %v15442_v43 = vpop.eup %12060  ;;  %v6834_v54 = vmul.f32 1.442695, %v6771_v60 }
 0xb44   : > { %v6911_v10 = vsel %vm1342_vm3, %v15442_v43, 0.0 }
 0xb45   : > { %12070 = vpow2.f32 %v6834_v54  ;;  %6912 = vadd.xlane.f32.xlu0 %v6911_v10  ;;  %v11594_v54 = vunpack.i.l.bf16 %v15289_v32 }
 0xb46   : > { %12072 = vpow2.f32 %v6832_v42  ;;  %v11595_v42 = vunpack.i.h.bf16 %v15289_v32 }
 0xb47   : > { %v15446_v46 = vpop.eup %12062 }
 0xb48   : > { %v6917_v44 = vsel %vm1342_vm3, %v15446_v46, 0.0  ;;  %v15450_v37 = vpop.eup %12064 }
 0xb49   : > { %6918 = vadd.xlane.f32.xlu0 %v6917_v44  ;;  %v6914_v13 = vsel %vm1342_vm3, %v15450_v37, 0.0 }
 0xb4b   : > { %v15452_v4 = vpop.eup %12066 }
 0xb4c   : > { %v6841_v33 = vpop.xlane.xlu1 %6840  ;;  %v6923_v47 = vsel %vm1342_vm3, %v15452_v4, 0.0  ;;  %v15458_v25 = vpop.eup %12068 }
 0xb4d   : > { %6924 = vadd.xlane.f32.xlu1 %v6923_v47  ;;  %6915 = vadd.xlane.f32.xlu0 %v6914_v13  ;;  %12074 = vrcp.f32 %v6841_v33  ;;  %v6920_v49 = vsel %vm1342_vm3, %v15458_v25, 0.0  ;;  %v11600_v47 = vunpack.i.h.bf16 %v15296_v41  ;;  %v11599_v13 = vunpack.i.l.bf16 %v15296_v41 }
 0xb4f   : > { %v15460_v58 = vpop.eup %12070 }
 0xb50   : > { %v6838_v2 = vpop.xlane.xlu1 %6837  ;;  %v6929_v34 = vsel %vm1342_vm3, %v15460_v58, 0.0  ;;  %v15466_v21 = vpop.eup %12072 }
 0xb51   : > { %12076 = vrcp.f32 %v6838_v2  ;;  %6930 = vadd.xlane.f32.xlu1 %v6929_v34  ;;  %6921 = vadd.xlane.f32.xlu0 %v6920_v49  ;;  %v6926_v40 = vsel %vm1342_vm3, %v15466_v21, 0.0  ;;  %v10924_v2 = vpack.c.bf16 %v11595_v42, %v11594_v54  ;;  %v16415_v42 = vld [vmem:[#allocation8_spill] sm:$0xff] }
 0xb54   : > { %v6847_v19 = vpop.xlane.xlu1 %6846 }
 0xb55   : > { %6927 = vadd.xlane.f32.xlu0 %v6926_v40  ;;  %12078 = vrcp.f32 %v6847_v19  ;;  %v10928_v19 = vpack.c.bf16 %v11600_v47, %v11599_v13  ;;  %v16420_v47 = vld [vmem:[#allocation10_spill] sm:$0xff] }
 0xb57   : > { %v12075_v56 = vpop.eup %12074 }
 0xb58   : > { %v6844_v16 = vpop.xlane.xlu1 %6843  ;;  %v6935_v33 = vmul.f32 %v12075_v56, %v15310_v57  ;;  %v11604_v57 = vunpack.i.l.bf16 %v15377_v52 }
 0xb59   : > { %12080 = vrcp.f32 %v6844_v16 }
 0xb5b   : > { %v12077_v60 = vpop.eup %12076 }
 0xb5c   : > { %v6853_v10 = vpop.xlane.xlu1 %6852  ;;  %v6933_v44 = vmul.f32 %v12077_v60, %v15315_v23  ;;  %v11605_v23 = vunpack.i.h.bf16 %v15377_v52  ;;  %v16414_v60 = vld [vmem:[#allocation11_spill] sm:$0xff] }
 0xb5d   : > { %12082 = vrcp.f32 %v6853_v10 }
 0xb5e   : > { %10152 = vmatprep.mubr.msk.f32.mxu1 %vm1342_vm3, %v6933_v44  ;;  %v10932_v16 = vpack.c.bf16 %v11605_v23, %v11604_v57 }
 0xb5f   : > { %10153 = vmatmul.mubr.msk.f32.vlgmr.msra.gmra.mrb[112].mxu1 %vm1342_vm3, %v6935_v33  ;;  %v12079_v32 = vpop.eup %12078 }
 0xb60   : > { %10923 = vmatpush3.bf16.msra.mxu1 %v15058_v8  ;;  %v6850_v34 = vpop.xlane.xlu1 %6849  ;;  %v6939_v8 = vmul.f32 %v12079_v32, %v15319_v3 }
 0xb61   : > { %10925 = vmatprep.subr.bf16.mxu1 %v10924_v2  ;;  %12084 = vrcp.f32 %v6850_v34 }
 0xb62   : > { %11612 = vrot.lane.b32.xlu1 %v16363_v55, %s12156_s9 }
 0xb63   : > { %v12081_v49 = vpop.eup %12080 }
 0xb64   : > { %10927 = vmatpush3.bf16.msra.mxu1 %v10924_v2  ;;  %v6859_v41 = vpop.xlane.xlu1 %6858  ;;  %v6937_v40 = vmul.f32 %v12081_v49, %v15324_v63  ;;  %v16413_v63 = vld [vmem:[#allocation60_spill] sm:$0xff] }
 0xb65   : > { %10929 = vmatprep.subr.bf16.mxu1 %v10928_v19  ;;  %12086 = vrcp.f32 %v6859_v41  ;;  %v16422_v49 = vld [vmem:[#allocation52_spill] sm:$0xff] }
 0xb66   : > { %10155 = vmatprep.mubr.msk.f32.mxu1 %vm1342_vm3, %v6937_v40  ;;  %11622 = vrot.lane.b32.xlu1 %v16380_v39, %s12156_s9 }
 0xb67   : > { %10156 = vmatmul.mubr.msk.f32.gmra.mrb[114].mxu1 %vm1342_vm3, %v6939_v8  ;;  %v12083_v55 = vpop.eup %12082 }
 0xb68   : > { %10931 = vmatpush3.bf16.msra.mxu1 %v10928_v19  ;;  %v6856_v52 = vpop.xlane.xlu1 %6855  ;;  %v6943_v3 = vmul.f32 %v12083_v55, %v15330_v45  ;;  %v16424_v19 = vld [vmem:[#allocation66_spill] sm:$0xff] }
 0xb69   : > { %12088 = vrcp.f32 %v6856_v52  ;;  %10933 = vmatprep.subr.bf16.mxu1 %v10932_v16 }
 0xb6a   : > { %4048 = vrot.lane.b32.xlu1 %v16413_v63, %s12157_s27 }
 0xb6b   : > { %v12085_v56 = vpop.eup %12084  ;;  %11617 = vrot.lane.b32.xlu0 %v16360_v7, %s12156_s9 }
 0xb6c   : > { %10935 = vmatpush3.bf16.msra.mxu1 %v10932_v16  ;;  %v6941_v39 = vmul.f32 %v12085_v56, %v15334_v18  ;;  %v6865_v18 = vpop.xlane.xlu0 %6864  ;;  %v16428_v56 = vld [vmem:[#allocation20_spill] sm:$0xff] }
 0xb6d   : > { %12090 = vrcp.f32 %v6865_v18 }
 0xb6e   : > { %10158 = vmatprep.mubr.msk.f32.mxu1 %vm1342_vm3, %v6941_v39  ;;  %4050 = vrot.lane.b32.xlu1 %v16414_v60, %s12157_s27  ;;  %v16429_v39 = vld [vmem:[#allocation53_spill] sm:$0xff] }
 0xb6f   : > { %10159 = vmatmul.mubr.msk.f32.gmra.mrb[116].mxu1 %vm1342_vm3, %v6943_v3  ;;  %4052 = vrot.lane.b32.xlu0 %v16415_v42, %s12157_s27  ;;  %v12087_v54 = vpop.eup %12086  ;;  %v16430_v42 = vld [vmem:[#allocation58_spill] sm:$0xff] }
 0xb70   : > { %v6947_v45 = vmul.f32 %v12087_v54, %v15338_v1  ;;  %v16431_v54 = vld [vmem:[#allocation28_spill] sm:$0xff] }
 0xb72   : > { %5858 = vrot.lane.b32.xlu1 %v15075_v30, %s12158_s28  ;;  %v16416_v30 = vld [vmem:[#allocation13_spill] sm:$0xff] }
 0xb73   : > { %v12089_v10 = vpop.eup %12088  ;;  %5862 = vrot.lane.b32.xlu0 %v15052_v5, %s12158_s28  ;;  %v16417_v5 = vld [vmem:[#allocation51_spill] sm:$0xff] }
 0xb74   : > { %v6945_v7 = vmul.f32 %v12089_v10, %v15344_v0  ;;  %v16418_v0 = vld [vmem:[#allocation59_spill] sm:$0xff] }
 0xb76   : > { %10161 = vmatprep.mubr.msk.f32.mxu1 %vm1342_vm3, %v6945_v7  ;;  %5860 = vrot.lane.b32.xlu1 %v15073_v50, %s12158_s28 }
 0xb77   : > { %10162 = vmatmul.mubr.msk.f32.gmra.mrb[118].mxu1 %vm1342_vm3, %v6947_v45  ;;  %5864 = vrot.lane.b32.xlu0 %v15050_v62, %s12158_s28  ;;  %v16419_v62 = vld [vmem:[#allocation56_spill] sm:$0xff]  ;;  %v12091_v13 = vpop.eup %12090 }
 0xb78   : > { %v6951_v32 = vmul.f32 %v12091_v13, %v15340_v11 }
 0xb79   : > { %v6889_v44 = vpop.xlane.xlu0 %6888 }
 0xb7a   : > { %4054 = vrot.lane.b32.xlu1 %v16416_v30, %s12157_s27 }
 0xb7b   : > { %4022 = vrot.lane.b32.xlu0 %v16417_v5, %s12157_s27  ;;  %v16433_v5 = vld [vmem:[#allocation65_spill] sm:$0xff] }
 0xb7d   : > { %v6862_v1 = vpop.xlane.xlu0 %6861 }
 0xb7e   : > { %12092 = vrcp.f32 %v6862_v1  ;;  %4020 = vrot.lane.b32.xlu1 %v16418_v0, %s12157_s27 }
 0xb7f   : > { %5832 = vrot.lane.b32.xlu0 %v14989_v17, %s12158_s28 }
 0xb81   : > { %v6871_v50 = vpop.xlane.xlu0 %6870 }
 0xb82   : > { %5830 = vrot.lane.b32.xlu1 %v14993_v61, %s12158_s28  ;;  %12094 = vrcp.f32 %v6871_v50  ;;  %v16421_v61 = vld [vmem:[#allocation63_spill] sm:$0xff] }
 0xb83   : > { %4058 = vrot.lane.b32.xlu0 %v16419_v62, %s12157_s27  ;;  %v16434_v62 = vld [vmem:[#allocation68_spill] sm:$0xff] }
 0xb85   : > { %v6895_v33 = vpop.xlane.xlu0 %6894 }
 0xb86   : > { %4056 = vrot.lane.b32.xlu1 %v16420_v47, %s12157_s27 }
 0xb87   : > { %5868 = vrot.lane.b32.xlu0 %v15060_v14, %s12158_s28 }
 0xb88   : > { %v12093_v2 = vpop.eup %12092 }
 0xb89   : > { %v6868_v34 = vpop.xlane.xlu0 %6867  ;;  %v6949_v17 = vmul.f32 %v12093_v2, %v15359_v48  ;;  %v16423_v48 = vld [vmem:[#allocation70_spill] sm:$0xff]  ;;  %v16435_v2 = vld [vmem:[#allocation24_spill] sm:$0xff] }
 0xb8a   : > { %12096 = vrcp.f32 %v6868_v34  ;;  %5866 = vrot.lane.b32.xlu1 %v15062_v9, %s12158_s28  ;;  %v16436_v34 = vld [vmem:[#allocation25_spill] sm:$0xff] }
 0xb8b   : > { %10180 = vmatprep.mubr.msk.f32.mxu0 %vm1342_vm3, %v6949_v17  ;;  %4026 = vrot.lane.b32.xlu0 %v16421_v61, %s12157_s27  ;;  %v16437_v17 = vld [vmem:[#allocation62_spill] sm:$0xff] }
 0xb8c   : > { %10181 = vmatmul.mubr.msk.f32.vlgmr.msra.gmra.mrb[144].mxu0 %vm1342_vm3, %v6951_v32  ;;  %v12095_v9 = vpop.eup %12094  ;;  %v16438_v32 = vld [vmem:[#allocation37_spill] sm:$0xff] }
 0xb8d   : > { %10939 = vmatpush3.bf16.msra.mxu0 %v15395_v38  ;;  %v6877_v14 = vpop.xlane.xlu0 %6876  ;;  %v6955_v41 = vmul.f32 %v12095_v9, %v15364_v53  ;;  %v16426_v53 = vld [vmem:[#allocation61_spill] sm:$0xff] }
 0xb8e   : > { %4024 = vrot.lane.b32.xlu1 %v16422_v49, %s12157_s27  ;;  %12098 = vrcp.f32 %v6877_v14  ;;  %v16439_v14 = vld [vmem:[#allocation55_spill] sm:$0xff]  ;;  %v16441_v9 = vld [vmem:[#allocation29_spill] sm:$0xff] }
 0xb8f   : > { %5836 = vrot.lane.b32.xlu0 %v14995_v20, %s12158_s28 }
 0xb91   : > { %v6901_v11 = vpop.xlane.xlu0 %6900 }
 0xb92   : > { %5834 = vrot.lane.b32.xlu1 %v14997_v31, %s12158_s28  ;;  %v16425_v31 = vld [vmem:[#allocation22_spill] sm:$0xff] }
 0xb93   : > { %4062 = vrot.lane.b32.xlu0 %v16423_v48, %s12157_s27 }
 0xb94   : > { %v12097_v23 = vpop.eup %12096 }
 0xb95   : > { %v6874_v57 = vpop.xlane.xlu0 %6873  ;;  %v6953_v38 = vmul.f32 %v12097_v23, %v15374_v27  ;;  %v16443_v23 = vld [vmem:[#allocation31_spill] sm:$0xff] }
 0xb96   : > { %12100 = vrcp.f32 %v6874_v57  ;;  %4060 = vrot.lane.b32.xlu1 %v16424_v19, %s12157_s27  ;;  %v16444_v57 = vld [vmem:[#allocation67_spill] sm:$0xff] }
 0xb97   : > { %10183 = vmatprep.mubr.msk.f32.mxu0 %vm1342_vm3, %v6953_v38  ;;  %5872 = vrot.lane.b32.xlu0 %v15069_v29, %s12158_s28  ;;  %12102 = vrcp.f32 %v6889_v44  ;;  %v16427_v29 = vld [vmem:[#allocation4_spill] sm:$0xff]  ;;  %v16432_v44 = vld [vmem:[#allocation23_spill] sm:$0xff] }
 0xb98   : > { %10184 = vmatmul.mubr.msk.f32.gmra.mrb[146].mxu0 %vm1342_vm3, %v6955_v41  ;;  %v12099_v8 = vpop.eup %12098  ;;  %v16445_v38 = vld [vmem:[#allocation7_spill] sm:$0xff]  ;;  %v16447_v41 = vld [vmem:[#allocation21_spill] sm:$0xff] }
 0xb99   : > { %v6883_v20 = vpop.xlane.xlu0 %6882  ;;  %v6959_v63 = vmul.f32 %v12099_v8, %v15381_v22  ;;  %v16446_v19 = vld [vmem:[#allocation75_spill] sm:$0xff] }
 0xb9a   : > { %5870 = vrot.lane.b32.xlu1 %v15071_v12, %s12158_s28  ;;  %v16453_v8 = vld [vmem:[#allocation15_spill] sm:$0xff] }
 0xb9b   : > { %4030 = vrot.lane.b32.xlu0 %v16425_v31, %s12157_s27  ;;  %v16449_v31 = vld [vmem:[#allocation64_spill] sm:$0xff] }
 0xb9d   : > { %v6886_v27 = vpop.xlane.xlu1 %6885  ;;  %v6907_v40 = vpop.xlane.xlu0 %6906 }
 0xb9e   : > { %12104 = vrcp.f32 %v6886_v27  ;;  %4028 = vrot.lane.b32.xlu1 %v16426_v53, %s12157_s27  ;;  %v16450_v27 = vld [vmem:[#allocation18_spill] sm:$0xff]  ;;  %v16452_v53 = vld [vmem:[#allocation9_spill] sm:$0xff] }
 0xb9f   : > { %12106 = vrcp.f32 %v6895_v33  ;;  %5840 = vrot.lane.b32.xlu0 %v16427_v29, %s12158_s28  ;;  %v16454_v29 = vld [vmem:[#allocation26_spill] sm:$0xff] }
 0xba0   : > { %v12101_v16 = vpop.eup %12100  ;;  %12108 = vrcp.f32 %v6883_v20  ;;  %v16448_v20 = vld [vmem:[#allocation69_spill] sm:$0xff] }
 0xba1   : > { %v6892_v52 = vpop.xlane.xlu1 %6891  ;;  %v6880_v55 = vpop.xlane.xlu0 %6879  ;;  %v6957_v12 = vmul.f32 %v12101_v16, %v15393_v6 }
 0xba2   : > { %12110 = vrcp.f32 %v6892_v52  ;;  %5838 = vrot.lane.b32.xlu1 %v16428_v56, %s12158_s28  ;;  %v12103_v60 = vpop.eup %12102  ;;  %v16455_v52 = vld [vmem:[#allocation14_spill] sm:$0xff]  ;;  %v16457_v56 = vld [vmem:[#allocation72_spill] sm:$0xff] }
 0xba3   : > { %12112 = vrcp.f32 %v6880_v55  ;;  %10186 = vmatprep.mubr.msk.f32.mxu0 %vm1342_vm3, %v6957_v12  ;;  %4066 = vrot.lane.b32.xlu0 %v16429_v39, %s12157_s27  ;;  %v6967_v45 = vmul.f32 %v12103_v60, %v15355_v24  ;;  %v16456_v55 = vld [vmem:[#allocation71_spill] sm:$0xff]  ;;  %v16459_v39 = vld [vmem:[#allocation17_spill] sm:$0xff] }
 0xba4   : > { %12114 = vrcp.f32 %v6901_v11  ;;  %10187 = vmatmul.mubr.msk.f32.gmra.mrb[148].mxu0 %vm1342_vm3, %v6959_v63  ;;  %v16458_v63 = vld [vmem:[#allocation30_spill] sm:$0xff] }
 0xba5   : > { %v6898_v3 = vpop.xlane.xlu1 %6897 }
 0xba6   : > { %12116 = vrcp.f32 %v6898_v3  ;;  %4064 = vrot.lane.b32.xlu1 %v16430_v42, %s12157_s27  ;;  %v16460_v42 = vld [vmem:[#allocation54_spill] sm:$0xff] }
 0xba7   : > { %5876 = vrot.lane.b32.xlu0 %v16431_v54, %s12158_s28  ;;  %12118 = vrcp.f32 %v6907_v40  ;;  %v16451_v40 = vld [vmem:[#allocation33_spill] sm:$0xff] }
 0xba8   : > { %v12105_v6 = vpop.eup %12104 }
 0xba9   : > { %v6904_v22 = vpop.xlane.xlu0 %6903  ;;  %v6965_v10 = vmul.f32 %v12105_v6, %v15408_v35  ;;  %v12107_v7 = vpop.eup %12106 }
 0xbaa   : > { %12120 = vrcp.f32 %v6904_v22  ;;  %v12109_v18 = vpop.eup %12108  ;;  %5874 = vrot.lane.b32.xlu1 %v16432_v44, %s12158_s28  ;;  %v6971_v47 = vmul.f32 %v12107_v7, %v15369_v51 }
 0xbab   : > { %10208 = vmatprep.mubr.msk.f32.mxu1 %vm1342_vm3, %v6965_v10  ;;  %4034 = vrot.lane.b32.xlu0 %v16433_v5, %s12157_s27  ;;  %v6963_v33 = vmul.f32 %v12109_v18, %v15400_v15 }
 0xbac   : > { %v12111_v30 = vpop.eup %12110  ;;  %10209 = vmatmul.mubr.msk.f32.vlgmr.msra.gmra.mrb[120].mxu1 %vm1342_vm3, %v6967_v45 }
 0xbad   : > { %v12113_v1 = vpop.eup %12112  ;;  %v6910_v0 = vpop.xlane.xlu1 %6909  ;;  %v6969_v35 = vmul.f32 %v12111_v30, %v15417_v59 }
 0xbae   : > { %12122 = vrcp.f32 %v6910_v0  ;;  %v6961_v24 = vmul.f32 %v12113_v1, %v15415_v28  ;;  %v12115_v50 = vpop.eup %12114  ;;  %4032 = vrot.lane.b32.xlu1 %v16434_v62, %s12157_s27 }
 0xbaf   : > { %10211 = vmatprep.mubr.msk.f32.mxu1 %vm1342_vm3, %v6969_v35  ;;  %5844 = vrot.lane.b32.xlu0 %v16435_v2, %s12158_s28  ;;  %v6975_v51 = vmul.f32 %v12115_v50, %v15387_v26  ;;  %v16442_v26 = vld [vmem:[#allocation40_spill] sm:$0xff] }
 0xbb0   : > { %v12117_v13 = vpop.eup %12116  ;;  %10189 = vmatprep.mubr.msk.f32.mxu0 %vm1342_vm3, %v6961_v24  ;;  %10212 = vmatmul.mubr.msk.f32.gmra.mrb[122].mxu1 %vm1342_vm3, %v6971_v47 }
 0xbb1   : > { %10190 = vmatmul.mubr.msk.f32.gmra.mrb[150].mxu0 %vm1342_vm3, %v6963_v33  ;;  %v6973_v28 = vmul.f32 %v12117_v13, %v15423_v36  ;;  %v12119_v59 = vpop.eup %12118  ;;  %v16440_v36 = vld [vmem:[#allocation36_spill] sm:$0xff] }
 0xbb2   : > { %5842 = vrot.lane.b32.xlu1 %v16436_v34, %s12158_s28  ;;  %v6979_v49 = vmul.f32 %v12119_v59, %v16440_v36 }
 0xbb3   : > { %10214 = vmatprep.mubr.msk.f32.mxu1 %vm1342_vm3, %v6973_v28  ;;  %4070 = vrot.lane.b32.xlu0 %v16437_v17, %s12157_s27 }
 0xbb4   : > { %v12121_v15 = vpop.eup %12120  ;;  %10215 = vmatmul.mubr.msk.f32.gmra.mrb[124].mxu1 %vm1342_vm3, %v6975_v51 }
 0xbb5   : > { %v6977_v61 = vmul.f32 %v12121_v15, %v16438_v32 }
 0xbb6   : > { %4068 = vrot.lane.b32.xlu1 %v16439_v14, %s12157_s27 }
 0xbb7   : > { %10217 = vmatprep.mubr.msk.f32.mxu1 %vm1342_vm3, %v6977_v61  ;;  %5880 = vrot.lane.b32.xlu0 %v16441_v9, %s12158_s28 }
 0xbb8   : > { %v12123_v11 = vpop.eup %12122  ;;  %10218 = vmatmul.mubr.msk.f32.gmra.mrb[126].mxu1 %vm1342_vm3, %v6979_v49 }
 0xbb9   : > { %v6981_v48 = vmul.f32 %v12123_v11, %v16442_v26 }
 0xbba   : > { %5878 = vrot.lane.b32.xlu1 %v16443_v23, %s12158_s28 }
 0xbbb   : > { %10236 = vmatprep.mubr.msk.f32.mxu0 %vm1342_vm3, %v6981_v48  ;;  %4038 = vrot.lane.b32.xlu0 %v16444_v57, %s12157_s27 }
 0xbbe   : > { %4036 = vrot.lane.b32.xlu1 %v16445_v38, %s12157_s27 }
 0xbbf   : > { %5848 = vrot.lane.b32.xlu0 %v16446_v19, %s12158_s28 }
 0xbc2   : > { %5846 = vrot.lane.b32.xlu1 %v16447_v41, %s12158_s28 }
 0xbc3   : > { %4074 = vrot.lane.b32.xlu0 %v16448_v20, %s12157_s27 }
 0xbc6   : > { %4072 = vrot.lane.b32.xlu1 %v16449_v31, %s12157_s27 }
 0xbc7   : > { %5884 = vrot.lane.b32.xlu0 %v16450_v27, %s12158_s28 }
 0xbca   : > { %5882 = vrot.lane.b32.xlu1 %v16451_v40, %s12158_s28 }
 0xbcb   : > { %4042 = vrot.lane.b32.xlu0 %v16452_v53, %s12157_s27 }
 0xbce   : > { %4040 = vrot.lane.b32.xlu1 %v16453_v8, %s12157_s27 }
 0xbcf   : > { %5852 = vrot.lane.b32.xlu0 %v16454_v29, %s12158_s28 }
 0xbd2   : > { %v6913_v16 = vpop.xlane.xlu0 %6912  ;;  %5850 = vrot.lane.b32.xlu1 %v16455_v52, %s12158_s28 }
 0xbd3   : > { %4078 = vrot.lane.b32.xlu0 %v16456_v55, %s12157_s27  ;;  %12124 = vrcp.f32 %v6913_v16 }
 0xbd6   : > { %v6919_v12 = vpop.xlane.xlu0 %6918  ;;  %4076 = vrot.lane.b32.xlu1 %v16457_v56, %s12157_s27 }
 0xbd7   : > { %5888 = vrot.lane.b32.xlu0 %v16458_v63, %s12158_s28 }
 0xbda   : > { %5886 = vrot.lane.b32.xlu1 %v16459_v39, %s12158_s28  ;;  %v6916_v3 = vpop.xlane.xlu0 %6915  ;;  %v6925_v60 = vpop.xlane.xlu1 %6924 }
 0xbdb   : > { %12126 = vrcp.f32 %v6916_v3  ;;  %v7801_v3 = vld [vmem:[%s15963_s4] sm:$0xff] }
 0xbdc   : > { %12128 = vrcp.f32 %v6919_v12 }
 0xbdd   : > { %v12125_v47 = vpop.eup %12124 }
 0xbde   : > { %4044 = vrot.lane.b32.xlu1 %v16460_v42, %s12157_s27  ;;  %v6922_v6 = vpop.xlane.xlu0 %6921  ;;  %v6931_v54 = vpop.xlane.xlu1 %6930  ;;  %v6983_v59 = vmul.f32 %v12125_v47, %v15442_v43 }
 0xbdf   : > { %12130 = vrcp.f32 %v6922_v6  ;;  %v7803_v6 = vld [vmem:[%s15963_s4 + $0x10] sm:$0xff] }
 0xbe0   : > { %12132 = vrcp.f32 %v6925_v60  ;;  %v7802_v60 = vld [vmem:[%s15963_s4 + $0x8] sm:$0xff] }
 0xbe1   : > { %v10952_v42 = vpack.c.bf16 %v7802_v60, %v7801_v3 }
 0xbe2   : > { %v6928_v22 = vpop.xlane.xlu0 %6927  ;;  %v11613_v10 = vpop.permute.xlu1 %11612 }
 0xbe3   : > { %v11615_v7 = vunpack.i.h.bf16 %v11613_v10  ;;  %v11614_v45 = vunpack.i.l.bf16 %v11613_v10  ;;  %12134 = vrcp.f32 %v6928_v22  ;;  %10960 = vmatprep.subr.bf16.mxu1 %v10952_v42 }
 0xbe4   : > { %12136 = vrcp.f32 %v6931_v54  ;;  %v7804_v54 = vld [vmem:[%s15963_s4 + $0x18] sm:$0xff]  ;;  %10962 = vmatpush3.bf16.msra.mxu1 %v10952_v42 }
 0xbe5   : > { %v10940_v18 = vpack.c.bf16 %v11615_v7, %v11614_v45  ;;  %v12127_v28 = vpop.eup %12126  ;;  %v10956_v22 = vpack.c.bf16 %v7804_v54, %v7803_v6 }
 0xbe6   : > { %v11618_v44 = vpop.permute.xlu0 %11617  ;;  %v11623_v30 = vpop.permute.xlu1 %11622  ;;  %v6985_v17 = vmul.f32 %v12127_v28, %v15450_v37 }
 0xbe7   : > { %v11620_v5 = vunpack.i.h.bf16 %v11618_v44  ;;  %v11619_v1 = vunpack.i.l.bf16 %v11618_v44  ;;  %v11625_v0 = vunpack.i.h.bf16 %v11623_v30  ;;  %v11624_v35 = vunpack.i.l.bf16 %v11623_v30  ;;  %10941 = vmatprep.subr.bf16.mxu0 %v10940_v18  ;;  %v12129_v34 = vpop.eup %12128  ;;  %10961 = vmatprep.subr.bf16.mxu1 %v10956_v22 }
 0xbe8   : > { %10943 = vmatpush3.bf16.msra.mxu0 %v10940_v18  ;;  %v6987_v61 = vmul.f32 %v12129_v34, %v15446_v46  ;;  %10963 = vmatpush3.bf16.msra.mxu1 %v10956_v22 }
 0xbe9   : > { %v10944_v24 = vpack.c.bf16 %v11620_v5, %v11619_v1  ;;  %v10948_v33 = vpack.c.bf16 %v11625_v0, %v11624_v35  ;;  %v12131_v32 = vpop.eup %12130 }
 0xbea   : > { %v4053_v50 = vpop.permute.xlu0 %4052  ;;  %v4049_v62 = vpop.permute.xlu1 %4048  ;;  %v6989_v11 = vmul.f32 %v12131_v32, %v15458_v25 }
 0xbeb   : > { %4133 = vst.msk [vmem:[#allocation2 + $0x80] sm:$0xff] %vm4116_vm4, %v4053_v50  ;;  %4131 = vst.msk [vmem:[#allocation2 + $0x70] sm:$0xff] %vm4116_vm4, %v4049_v62  ;;  %10945 = vmatprep.subr.bf16.mxu0 %v10944_v24  ;;  %v12133_v14 = vpop.eup %12132 }
 0xbec   : > { %10947 = vmatpush3.bf16.msra.mxu0 %v10944_v24  ;;  %v6991_v37 = vmul.f32 %v12133_v14, %v15452_v4 }
 0xbed   : > { %10949 = vmatprep.subr.bf16.mxu0 %v10948_v33  ;;  %v12135_v43 = vpop.eup %12134 }
 0xbee   : > { %v5863_v13 = vpop.permute.xlu0 %5862  ;;  %v4051_v2 = vpop.permute.xlu1 %4050  ;;  %v6993_v46 = vmul.f32 %v12135_v43, %v15466_v21 }
 0xbef   : > { %5943 = vst.msk [vmem:[#allocation2 + $0x80] sm:$0xff] %vm5926_vm5, %v5863_v13  ;;  %v12137_v9 = vpop.eup %12136 }
 0xbf0   : > { %4132 = vst.msk [vmem:[#allocation2 + $0x78] sm:$0xff] %vm4116_vm4, %v4051_v2  ;;  %10951 = vmatpush3.bf16.msra.mxu0 %v10948_v33  ;;  %v6995_v25 = vmul.f32 %v12137_v9, %v15460_v58 }
 0xbf1   : > { %10953 = vmatprep.subr.bf16.mxu0 %v10952_v42 }
 0xbf2   : > { %v5865_v51 = vpop.permute.xlu0 %5864  ;;  %v5859_v15 = vpop.permute.xlu1 %5858 }
 0xbf3   : > { %5941 = vst.msk [vmem:[#allocation2 + $0x70] sm:$0xff] %vm5926_vm5, %v5859_v15  ;;  %10237 = vmatmul.mubr.msk.f32.vlgmr.msra.gmra.mrb[152].mxu0 %vm1342_vm3, %v6983_v59 }
 0xbf4   : > { %10239 = vmatprep.mubr.msk.f32.mxu0 %vm1342_vm3, %v6985_v17  ;;  %10955 = vmatpush3.bf16.msra.mxu0 %v10952_v42 }
 0xbf5   : > { %10957 = vmatprep.subr.bf16.mxu0 %v10956_v22 }
 0xbf6   : > { %v4023_v36 = vpop.permute.xlu0 %4022  ;;  %v5861_v49 = vpop.permute.xlu1 %5860 }
 0xbf7   : > { %4118 = vst.msk [vmem:[#allocation2 + $0x8] sm:$0xff] %vm4116_vm4, %v4023_v36  ;;  %10240 = vmatmul.mubr.msk.f32.gmra.mrb[154].mxu0 %vm1342_vm3, %v6987_v61 }
 0xbf8   : > { %5942 = vst.msk [vmem:[#allocation2 + $0x78] sm:$0xff] %vm5926_vm5, %v5861_v49  ;;  %10242 = vmatprep.mubr.msk.f32.mxu0 %vm1342_vm3, %v6989_v11  ;;  %10959 = vmatpush3.bf16.msra.mxu0 %v10956_v22 }
 0xbfa   : > { %v5833_v26 = vpop.permute.xlu0 %5832  ;;  %v4055_v48 = vpop.permute.xlu1 %4054 }
 0xbfb   : > { %5928 = vst.msk [vmem:[#allocation2 + $0x8] sm:$0xff] %vm5926_vm5, %v5833_v26  ;;  %10243 = vmatmul.mubr.msk.f32.gmra.mrb[156].mxu0 %vm1342_vm3, %v6991_v37 }
 0xbfc   : > { %4134 = vst.msk [vmem:[#allocation2 + $0x88] sm:$0xff] %vm4116_vm4, %v4055_v48  ;;  %10245 = vmatprep.mubr.msk.f32.mxu0 %vm1342_vm3, %v6993_v46 }
 0xbfd   : > { %5944 = vst.msk [vmem:[#allocation2 + $0x88] sm:$0xff] %vm5926_vm5, %v5865_v51 }
 0xbfe   : > { %v4059_v23 = vpop.permute.xlu0 %4058  ;;  %v4021_v57 = vpop.permute.xlu1 %4020 }
 0xbff   : > { %4136 = vst.msk [vmem:[#allocation2 + $0x98] sm:$0xff] %vm4116_vm4, %v4059_v23  ;;  %4117 = vst.msk [vmem:[#allocation2] sm:$0xff] %vm4116_vm4, %v4021_v57  ;;  %10246 = vmatmul.mubr.msk.f32.gmra.mrb[158].mxu0 %vm1342_vm3, %v6995_v25 }
 0xc02   : > { %v5869_v4 = vpop.permute.xlu0 %5868  ;;  %v5831_v21 = vpop.permute.xlu1 %5830 }
 0xc03   : > { %5946 = vst.msk [vmem:[#allocation2 + $0x98] sm:$0xff] %vm5926_vm5, %v5869_v4  ;;  %5927 = vst.msk [vmem:[#allocation2] sm:$0xff] %vm5926_vm5, %v5831_v21 }
 0xc06   : > { %v4027_v38 = vpop.permute.xlu0 %4026  ;;  %v4057_v19 = vpop.permute.xlu1 %4056 }
 0xc07   : > { %4120 = vst.msk [vmem:[#allocation2 + $0x18] sm:$0xff] %vm4116_vm4, %v4027_v38  ;;  %4135 = vst.msk [vmem:[#allocation2 + $0x90] sm:$0xff] %vm4116_vm4, %v4057_v19 }
 0xc0a   : > { %v5837_v58 = vpop.permute.xlu0 %5836  ;;  %v5867_v41 = vpop.permute.xlu1 %5866 }
 0xc0b   : > { %5930 = vst.msk [vmem:[#allocation2 + $0x18] sm:$0xff] %vm5926_vm5, %v5837_v58  ;;  %5945 = vst.msk [vmem:[#allocation2 + $0x90] sm:$0xff] %vm5926_vm5, %v5867_v41 }
 0xc0e   : > { %v4063_v20 = vpop.permute.xlu0 %4062  ;;  %v4025_v31 = vpop.permute.xlu1 %4024 }
 0xc0f   : > { %4138 = vst.msk [vmem:[#allocation2 + $0xa8] sm:$0xff] %vm4116_vm4, %v4063_v20  ;;  %4119 = vst.msk [vmem:[#allocation2 + $0x10] sm:$0xff] %vm4116_vm4, %v4025_v31 }
 0xc12   : > { %v5873_v27 = vpop.permute.xlu0 %5872  ;;  %v5835_v40 = vpop.permute.xlu1 %5834 }
 0xc13   : > { %5948 = vst.msk [vmem:[#allocation2 + $0xa8] sm:$0xff] %vm5926_vm5, %v5873_v27  ;;  %5929 = vst.msk [vmem:[#allocation2 + $0x10] sm:$0xff] %vm5926_vm5, %v5835_v40 }
 0xc16   : > { %v4031_v53 = vpop.permute.xlu0 %4030  ;;  %v4061_v8 = vpop.permute.xlu1 %4060 }
 0xc17   : > { %4122 = vst.msk [vmem:[#allocation2 + $0x28] sm:$0xff] %vm4116_vm4, %v4031_v53  ;;  %4137 = vst.msk [vmem:[#allocation2 + $0xa0] sm:$0xff] %vm4116_vm4, %v4061_v8  ;;  %v16461_v8 = vld [vmem:[#allocation16_spill] sm:$0xff] }
 0xc1a   : > { %v5841_v29 = vpop.permute.xlu0 %5840  ;;  %v5871_v16 = vpop.permute.xlu1 %5870 }
 0xc1b   : > { %5932 = vst.msk [vmem:[#allocation2 + $0x28] sm:$0xff] %vm5926_vm5, %v5841_v29  ;;  %5947 = vst.msk [vmem:[#allocation2 + $0xa0] sm:$0xff] %vm5926_vm5, %v5871_v16  ;;  %v16462_v29 = vld [vmem:[#allocation57_spill] sm:$0xff]  ;;  %v16463_v16 = vld [vmem:[#allocation74_spill] sm:$0xff] }
 0xc1e   : > { %v4067_v52 = vpop.permute.xlu0 %4066  ;;  %v4029_v55 = vpop.permute.xlu1 %4028 }
 0xc1f   : > { %4140 = vst.msk [vmem:[#allocation2 + $0xb8] sm:$0xff] %vm4116_vm4, %v4067_v52  ;;  %4121 = vst.msk [vmem:[#allocation2 + $0x20] sm:$0xff] %vm4116_vm4, %v4029_v55  ;;  %v16464_v52 = vld [vmem:[#allocation27_spill] sm:$0xff]  ;;  %v16465_v55 = vld [vmem:[#allocation73_spill] sm:$0xff] }
 0xc22   : > { %v5877_v12 = vpop.permute.xlu0 %5876  ;;  %v5839_v56 = vpop.permute.xlu1 %5838 }
 0xc23   : > { %5950 = vst.msk [vmem:[#allocation2 + $0xb8] sm:$0xff] %vm5926_vm5, %v5877_v12  ;;  %5931 = vst.msk [vmem:[#allocation2 + $0x20] sm:$0xff] %vm5926_vm5, %v5839_v56  ;;  %v16466_v56 = vld [vmem:[#allocation35_spill] sm:$0xff] }
 0xc26   : > { %v4035_v63 = vpop.permute.xlu0 %4034  ;;  %v4065_v39 = vpop.permute.xlu1 %4064 }
 0xc27   : > { %4124 = vst.msk [vmem:[#allocation2 + $0x38] sm:$0xff] %vm4116_vm4, %v4035_v63  ;;  %4139 = vst.msk [vmem:[#allocation2 + $0xb0] sm:$0xff] %vm4116_vm4, %v4065_v39 }
 0xc2a   : > { %v5845_v10 = vpop.permute.xlu0 %5844  ;;  %v5875_v7 = vpop.permute.xlu1 %5874 }
 0xc2b   : > { %5934 = vst.msk [vmem:[#allocation2 + $0x38] sm:$0xff] %vm5926_vm5, %v5845_v10  ;;  %5949 = vst.msk [vmem:[#allocation2 + $0xb0] sm:$0xff] %vm5926_vm5, %v5875_v7 }
 0xc2e   : > { %v4071_v45 = vpop.permute.xlu0 %4070  ;;  %v4033_v18 = vpop.permute.xlu1 %4032 }
 0xc2f   : > { %4142 = vst.msk [vmem:[#allocation2 + $0xc8] sm:$0xff] %vm4116_vm4, %v4071_v45  ;;  %4123 = vst.msk [vmem:[#allocation2 + $0x30] sm:$0xff] %vm4116_vm4, %v4033_v18 }
 0xc32   : > { %v10154_v44 = vpop.f32.mrb[112].mxu1  ;;  %v5881_v30 = vpop.permute.xlu0 %5880 }
 0xc33   : > { %v5843_v5 = vpop.permute.xlu1 %5842  ;;  %7642 = vrot.lane.b32.xlu0 %v10154_v44, %s12159_s15  ;;  %5952 = vst.msk [vmem:[#allocation2 + $0xc8] sm:$0xff] %vm5926_vm5, %v5881_v30  ;;  %v7110_v1 = vpop.f32.mrb[113].mxu1 }
 0xc34   : > { %5933 = vst.msk [vmem:[#allocation2 + $0x30] sm:$0xff] %vm5926_vm5, %v5843_v5  ;;  %7640 = vrot.lane.b32.xlu1 %v7110_v1, %s12159_s15 }
 0xc36   : > { %v4039_v0 = vpop.permute.xlu0 %4038 }
 0xc37   : > { %v4069_v35 = vpop.permute.xlu1 %4068  ;;  %4126 = vst.msk [vmem:[#allocation2 + $0x48] sm:$0xff] %vm4116_vm4, %v4039_v0 }
 0xc38   : > { %4141 = vst.msk [vmem:[#allocation2 + $0xc0] sm:$0xff] %vm4116_vm4, %v4069_v35 }
 0xc3a   : > { %v10157_v24 = vpop.f32.mrb[114].mxu1  ;;  %v5849_v50 = vpop.permute.xlu0 %5848 }
 0xc3b   : > { %v5879_v62 = vpop.permute.xlu1 %5878  ;;  %7646 = vrot.lane.b32.xlu0 %v10157_v24, %s12159_s15  ;;  %5936 = vst.msk [vmem:[#allocation2 + $0x48] sm:$0xff] %vm5926_vm5, %v5849_v50  ;;  %v7120_v33 = vpop.f32.mrb[115].mxu1 }
 0xc3c   : > { %5951 = vst.msk [vmem:[#allocation2 + $0xc0] sm:$0xff] %vm5926_vm5, %v5879_v62  ;;  %7644 = vrot.lane.b32.xlu1 %v7120_v33, %s12159_s15 }
 0xc3e   : > { %v4075_v47 = vpop.permute.xlu0 %4074 }
 0xc3f   : > { %v4037_v13 = vpop.permute.xlu1 %4036  ;;  %4144 = vst.msk [vmem:[#allocation2 + $0xd8] sm:$0xff] %vm4116_vm4, %v4075_v47 }
 0xc40   : > { %4125 = vst.msk [vmem:[#allocation2 + $0x40] sm:$0xff] %vm4116_vm4, %v4037_v13  ;;  %v16467_v13 = vld [vmem:[#allocation34_spill] sm:$0xff] }
 0xc42   : > { %v10160_v2 = vpop.f32.mrb[116].mxu1  ;;  %v5885_v28 = vpop.permute.xlu0 %5884 }
 0xc43   : > { %v5847_v59 = vpop.permute.xlu1 %5846  ;;  %7650 = vrot.lane.b32.xlu0 %v10160_v2, %s12159_s15  ;;  %5954 = vst.msk [vmem:[#allocation2 + $0xd8] sm:$0xff] %vm5926_vm5, %v5885_v28  ;;  %v7130_v34 = vpop.f32.mrb[117].mxu1 }
 0xc44   : > { %5935 = vst.msk [vmem:[#allocation2 + $0x40] sm:$0xff] %vm5926_vm5, %v5847_v59  ;;  %7648 = vrot.lane.b32.xlu1 %v7130_v34, %s12159_s15 }
 0xc46   : > { %v4043_v51 = vpop.permute.xlu0 %4042 }
 0xc47   : > { %v4073_v15 = vpop.permute.xlu1 %4072  ;;  %4128 = vst.msk [vmem:[#allocation2 + $0x58] sm:$0xff] %vm4116_vm4, %v4043_v51 }
 0xc48   : > { %4143 = vst.msk [vmem:[#allocation2 + $0xd0] sm:$0xff] %vm4116_vm4, %v4073_v15 }
 0xc4a   : > { %v10163_v17 = vpop.f32.mrb[118].mxu1  ;;  %v5853_v32 = vpop.permute.xlu0 %5852 }
 0xc4b   : > { %v5883_v61 = vpop.permute.xlu1 %5882  ;;  %7654 = vrot.lane.b32.xlu0 %v10163_v17, %s12159_s15  ;;  %5938 = vst.msk [vmem:[#allocation2 + $0x58] sm:$0xff] %vm5926_vm5, %v5853_v32  ;;  %v7140_v14 = vpop.f32.mrb[119].mxu1 }
 0xc4c   : > { %5953 = vst.msk [vmem:[#allocation2 + $0xd0] sm:$0xff] %vm5926_vm5, %v5883_v61  ;;  %7652 = vrot.lane.b32.xlu1 %v7140_v14, %s12159_s15 }
 0xc4e   : > { %v4079_v36 = vpop.permute.xlu0 %4078 }
 0xc4f   : > { %v4041_v49 = vpop.permute.xlu1 %4040  ;;  %4146 = vst.msk [vmem:[#allocation2 + $0xe8] sm:$0xff] %vm4116_vm4, %v4079_v36 }
 0xc50   : > { %4127 = vst.msk [vmem:[#allocation2 + $0x50] sm:$0xff] %vm4116_vm4, %v4041_v49 }
 0xc52   : > { %v5889_v11 = vpop.permute.xlu0 %5888 }
 0xc53   : > { %v5851_v43 = vpop.permute.xlu1 %5850  ;;  %5956 = vst.msk [vmem:[#allocation2 + $0xe8] sm:$0xff] %vm5926_vm5, %v5889_v11 }
 0xc54   : > { %5937 = vst.msk [vmem:[#allocation2 + $0x50] sm:$0xff] %vm5926_vm5, %v5851_v43 }
 0xc57   : > { %v4077_v37 = vpop.permute.xlu1 %4076 }
 0xc58   : > { %4145 = vst.msk [vmem:[#allocation2 + $0xe0] sm:$0xff] %vm4116_vm4, %v4077_v37 }
 0xc5b   : > { %v5887_v9 = vpop.permute.xlu1 %5886 }
 0xc5c   : > { %5955 = vst.msk [vmem:[#allocation2 + $0xe0] sm:$0xff] %vm5926_vm5, %v5887_v9 }
 0xc5f   : > { %v4045_v26 = vpop.permute.xlu1 %4044  ;;  %v10182_v48 = vpop.f32.mrb[144].mxu0 }
 0xc60   : > { %4129 = vst.msk [vmem:[#allocation2 + $0x60] sm:$0xff] %vm4116_vm4, %v4045_v26  ;;  %v7263_v46 = vpop.f32.mrb[145].mxu0 }
 0xc6b   : > { %v10185_v25 = vpop.f32.mrb[146].mxu0 }
 0xc6c   : > { %v7273_v23 = vpop.f32.mrb[147].mxu0 }
 0xc77   : > { %v10188_v57 = vpop.f32.mrb[148].mxu0 }
 0xc78   : > { %v7283_v4 = vpop.f32.mrb[149].mxu0 }
 0xc7f   : > { %v10210_v21 = vpop.f32.mrb[120].mxu1 }
 0xc80   : > { %7674 = vrot.lane.b32.xlu0 %v10210_v21, %s12159_s15  ;;  %v7416_v38 = vpop.f32.mrb[121].mxu1 }
 0xc81   : > { %7672 = vrot.lane.b32.xlu1 %v7416_v38, %s12159_s15 }
 0xc83   : > { %v10213_v58 = vpop.f32.mrb[122].mxu1 }
 0xc84   : > { %v10191_v19 = vpop.f32.mrb[150].mxu0  ;;  %7658 = vrot.lane.b32.xlu0 %v10182_v48, %s12159_s15  ;;  %v7426_v20 = vpop.f32.mrb[123].mxu1 }
 0xc85   : > { %v7293_v41 = vpop.f32.mrb[151].mxu0  ;;  %7656 = vrot.lane.b32.xlu1 %v7263_v46, %s12159_s15 }
 0xc87   : > { %v10216_v31 = vpop.f32.mrb[124].mxu1 }
 0xc88   : > { %7678 = vrot.lane.b32.xlu0 %v10213_v58, %s12159_s15  ;;  %v7436_v27 = vpop.f32.mrb[125].mxu1 }
 0xc89   : > { %7676 = vrot.lane.b32.xlu1 %v7426_v20, %s12159_s15 }
 0xc8b   : > { %v10219_v40 = vpop.f32.mrb[126].mxu1 }
 0xc8c   : > { %7662 = vrot.lane.b32.xlu0 %v10185_v25, %s12159_s15  ;;  %v7446_v53 = vpop.f32.mrb[127].mxu1 }
 0xc8d   : > { %7660 = vrot.lane.b32.xlu1 %v7273_v23, %s12159_s15 }
 0xc90   : > { %7682 = vrot.lane.b32.xlu0 %v10216_v31, %s12159_s15 }
 0xc91   : > { %7680 = vrot.lane.b32.xlu1 %v7436_v27, %s12159_s15 }
 0xc94   : > { %7686 = vrot.lane.b32.xlu0 %v10219_v40, %s12159_s15 }
 0xc95   : > { %7670 = vrot.lane.b32.xlu1 %v10191_v19, %s12159_s15 }
 0xc98   : > { %7668 = vrot.lane.b32.xlu0 %v7293_v41, %s12159_s15 }
 0xc99   : > { %5854 = vrot.lane.b32.xlu1 %v16461_v8, %s12158_s28 }
 0xc9c   : > { %4046 = vrot.lane.b32.xlu0 %v16462_v29, %s12157_s27 }
 0xc9d   : > { %4080 = vrot.lane.b32.xlu1 %v16463_v16, %s12157_s27 }
 0xca0   : > { %5856 = vrot.lane.b32.xlu0 %v16464_v52, %s12158_s28 }
 0xca1   : > { %7664 = vrot.lane.b32.xlu1 %v7283_v4, %s12159_s15 }
 0xca4   : > { %4082 = vrot.lane.b32.xlu0 %v16465_v55, %s12157_s27 }
 0xca5   : > { %v7643_v12 = vpop.permute.xlu0 %7642  ;;  %5890 = vrot.lane.b32.xlu1 %v16466_v56, %s12158_s28 }
 0xca6   : > { %7738 = vst.msk [vmem:[#allocation2 + $0x8] sm:$0xff] %vm7736_vm6, %v7643_v12  ;;  %v7641_v63 = vpop.permute.xlu1 %7640 }
 0xca7   : > { %7737 = vst.msk [vmem:[#allocation2] sm:$0xff] %vm7736_vm6, %v7641_v63 }
 0xca8   : > { %7666 = vrot.lane.b32.xlu0 %v10188_v57, %s12159_s15 }
 0xca9   : > { %7684 = vrot.lane.b32.xlu1 %v7446_v53, %s12159_s15 }
 0xcad   : > { %v7647_v39 = vpop.permute.xlu0 %7646  ;;  %v7770_v42 = vld [vmem:[#allocation2 + $0x8] sm:$0xff] }
 0xcae   : > { %7740 = vst.msk [vmem:[#allocation2 + $0x18] sm:$0xff] %vm7736_vm6, %v7647_v39  ;;  %v7645_v3 = vpop.permute.xlu1 %7644  ;;  %v7769_v60 = vld [vmem:[#allocation2] sm:$0xff] }
 0xcaf   : > { %7739 = vst.msk [vmem:[#allocation2 + $0x10] sm:$0xff] %vm7736_vm6, %v7645_v3  ;;  %10256 = vmatprep.mubr.msk.f32.mxu0 %vm303_vm0, %v7769_v60 }
 0xcb0   : > { %10257 = vmatmul.mubr.msk.f32.vlgmr.msra.gmra.mrb[160].mxu0 %vm303_vm0, %v7770_v42 }
 0xcb5   : > { %v7651_v6 = vpop.permute.xlu0 %7650  ;;  %v7772_v10 = vld [vmem:[#allocation2 + $0x18] sm:$0xff] }
 0xcb6   : > { %7742 = vst.msk [vmem:[#allocation2 + $0x28] sm:$0xff] %vm7736_vm6, %v7651_v6  ;;  %v7649_v54 = vpop.permute.xlu1 %7648  ;;  %v7771_v22 = vld [vmem:[#allocation2 + $0x10] sm:$0xff] }
 0xcb7   : > { %7741 = vst.msk [vmem:[#allocation2 + $0x20] sm:$0xff] %vm7736_vm6, %v7649_v54  ;;  %10259 = vmatprep.mubr.msk.f32.mxu0 %vm303_vm0, %v7771_v22 }
 0xcb8   : > { %10260 = vmatmul.mubr.msk.f32.gmra.mrb[162].mxu0 %vm303_vm0, %v7772_v10 }
 0xcbd   : > { %v7655_v7 = vpop.permute.xlu0 %7654  ;;  %v7774_v44 = vld [vmem:[#allocation2 + $0x28] sm:$0xff] }
 0xcbe   : > { %7744 = vst.msk [vmem:[#allocation2 + $0x38] sm:$0xff] %vm7736_vm6, %v7655_v7  ;;  %v7653_v45 = vpop.permute.xlu1 %7652  ;;  %v7773_v18 = vld [vmem:[#allocation2 + $0x20] sm:$0xff] }
 0xcbf   : > { %7743 = vst.msk [vmem:[#allocation2 + $0x30] sm:$0xff] %vm7736_vm6, %v7653_v45  ;;  %10262 = vmatprep.mubr.msk.f32.mxu0 %vm303_vm0, %v7773_v18 }
 0xcc0   : > { %10263 = vmatmul.mubr.msk.f32.gmra.mrb[164].mxu0 %vm303_vm0, %v7774_v44 }
 0xcc5   : > { %v7776_v0 = vld [vmem:[#allocation2 + $0x38] sm:$0xff] }
 0xcc6   : > { %v10238_v30 = vpop.f32.mrb[152].mxu0  ;;  %v7775_v5 = vld [vmem:[#allocation2 + $0x30] sm:$0xff] }
 0xcc7   : > { %v7569_v1 = vpop.f32.mrb[153].mxu0  ;;  %10265 = vmatprep.mubr.msk.f32.mxu0 %vm303_vm0, %v7775_v5  ;;  %7690 = vrot.lane.b32.xlu0 %v10238_v30, %s12159_s15 }
 0xcc8   : > { %10266 = vmatmul.mubr.msk.f32.gmra.mrb[166].mxu0 %vm303_vm0, %v7776_v0  ;;  %7688 = vrot.lane.b32.xlu1 %v7569_v1, %s12159_s15  ;;  %v15851_v1 = vld [vmem:[%s15964_s5] ss:$0 sm:$0xff] }
 0xcca   : > { %v10241_v35 = vpop.f32.mrb[154].mxu0 }
 0xccb   : > { %v7579_v24 = vpop.f32.mrb[155].mxu0  ;;  %7694 = vrot.lane.b32.xlu0 %v10241_v35, %s12159_s15 }
 0xccc   : > { %7692 = vrot.lane.b32.xlu1 %v7579_v24, %s12159_s15 }
 0xcce   : > { %v10244_v50 = vpop.f32.mrb[156].mxu0 }
 0xccf   : > { %v7589_v62 = vpop.f32.mrb[157].mxu0  ;;  %7698 = vrot.lane.b32.xlu0 %v10244_v50, %s12159_s15 }
 0xcd0   : > { %7696 = vrot.lane.b32.xlu1 %v7589_v62, %s12159_s15 }
 0xcd2   : > { %v10247_v33 = vpop.f32.mrb[158].mxu0 }
 0xcd3   : > { %v7599_v47 = vpop.f32.mrb[159].mxu0 }
 0xcd4   : > { %7700 = vrot.lane.b32.xlu0 %v7599_v47, %s12159_s15  ;;  %5892 = vrot.lane.b32.xlu1 %v16467_v13, %s12158_s28 }
 0xcd8   : > { %7702 = vrot.lane.b32.xlu1 %v10247_v33, %s12159_s15 }
 0xcf2   : > { %v7675_v2 = vpop.permute.xlu0 %7674 }
 0xcf3   : > { %7754 = vst.msk [vmem:[#allocation2 + $0x88] sm:$0xff] %vm7736_vm6, %v7675_v2  ;;  %v7673_v28 = vpop.permute.xlu1 %7672 }
 0xcf4   : > { %7753 = vst.msk [vmem:[#allocation2 + $0x80] sm:$0xff] %vm7736_vm6, %v7673_v28 }
 0xcf6   : > { %v7659_v59 = vpop.permute.xlu0 %7658 }
 0xcf7   : > { %7746 = vst.msk [vmem:[#allocation2 + $0x48] sm:$0xff] %vm7736_vm6, %v7659_v59  ;;  %v7657_v34 = vpop.permute.xlu1 %7656 }
 0xcf8   : > { %7745 = vst.msk [vmem:[#allocation2 + $0x40] sm:$0xff] %vm7736_vm6, %v7657_v34 }
 0xcfa   : > { %v7679_v51 = vpop.permute.xlu0 %7678  ;;  %v7786_v41 = vld [vmem:[#allocation2 + $0x88] sm:$0xff] }
 0xcfb   : > { %7756 = vst.msk [vmem:[#allocation2 + $0x98] sm:$0xff] %vm7736_vm6, %v7679_v51  ;;  %v7677_v15 = vpop.permute.xlu1 %7676  ;;  %v7785_v38 = vld [vmem:[#allocation2 + $0x80] sm:$0xff] }
 0xcfc   : > { %7755 = vst.msk [vmem:[#allocation2 + $0x90] sm:$0xff] %vm7736_vm6, %v7677_v15 }
 0xcfe   : > { %v7663_v17 = vpop.permute.xlu0 %7662  ;;  %v7778_v14 = vld [vmem:[#allocation2 + $0x48] sm:$0xff] }
 0xcff   : > { %7748 = vst.msk [vmem:[#allocation2 + $0x58] sm:$0xff] %vm7736_vm6, %v7663_v17  ;;  %v7661_v32 = vpop.permute.xlu1 %7660  ;;  %v7777_v61 = vld [vmem:[#allocation2 + $0x40] sm:$0xff] }
 0xd00   : > { %7747 = vst.msk [vmem:[#allocation2 + $0x50] sm:$0xff] %vm7736_vm6, %v7661_v32  ;;  %10268 = vmatprep.mubr.msk.f32.mxu0 %vm303_vm0, %v7777_v61 }
 0xd01   : > { %10269 = vmatmul.mubr.msk.f32.gmra.mrb[168].mxu0 %vm303_vm0, %v7778_v14 }
 0xd02   : > { %v7683_v36 = vpop.permute.xlu0 %7682  ;;  %v7788_v53 = vld [vmem:[#allocation2 + $0x98] sm:$0xff] }
 0xd03   : > { %7758 = vst.msk [vmem:[#allocation2 + $0xa8] sm:$0xff] %vm7736_vm6, %v7683_v36  ;;  %v7681_v49 = vpop.permute.xlu1 %7680  ;;  %v7787_v20 = vld [vmem:[#allocation2 + $0x90] sm:$0xff] }
 0xd04   : > { %7757 = vst.msk [vmem:[#allocation2 + $0xa0] sm:$0xff] %vm7736_vm6, %v7681_v49 }
 0xd06   : > { %v7687_v11 = vpop.permute.xlu0 %7686  ;;  %v7780_v9 = vld [vmem:[#allocation2 + $0x58] sm:$0xff] }
 0xd07   : > { %7760 = vst.msk [vmem:[#allocation2 + $0xb8] sm:$0xff] %vm7736_vm6, %v7687_v11  ;;  %v7671_v43 = vpop.permute.xlu1 %7670  ;;  %v7779_v37 = vld [vmem:[#allocation2 + $0x50] sm:$0xff] }
 0xd08   : > { %7752 = vst.msk [vmem:[#allocation2 + $0x78] sm:$0xff] %vm7736_vm6, %v7671_v43  ;;  %10271 = vmatprep.mubr.msk.f32.mxu0 %vm303_vm0, %v7779_v37 }
 0xd09   : > { %10272 = vmatmul.mubr.msk.f32.gmra.mrb[170].mxu0 %vm303_vm0, %v7780_v9 }
 0xd0a   : > { %v7669_v26 = vpop.permute.xlu0 %7668  ;;  %v7790_v29 = vld [vmem:[#allocation2 + $0xa8] sm:$0xff] }
 0xd0b   : > { %7751 = vst.msk [vmem:[#allocation2 + $0x70] sm:$0xff] %vm7736_vm6, %v7669_v26  ;;  %v5855_v48 = vpop.permute.xlu1 %5854  ;;  %v7789_v8 = vld [vmem:[#allocation2 + $0xa0] sm:$0xff] }
 0xd0c   : > { %5939 = vst.msk [vmem:[#allocation2 + $0x60] sm:$0xff] %vm5926_vm5, %v5855_v48 }
 0xd0e   : > { %v4047_v46 = vpop.permute.xlu0 %4046  ;;  %v7792_v55 = vld [vmem:[#allocation2 + $0xb8] sm:$0xff] }
 0xd0f   : > { %4130 = vst.msk [vmem:[#allocation2 + $0x68] sm:$0xff] %vm4116_vm4, %v4047_v46  ;;  %v4081_v25 = vpop.permute.xlu1 %4080  ;;  %v7784_v21 = vld [vmem:[#allocation2 + $0x78] sm:$0xff] }
 0xd10   : > { %4147 = vst.msk [vmem:[#allocation2 + $0xf0] sm:$0xff] %vm4116_vm4, %v4081_v25 }
 0xd12   : > { %v5857_v23 = vpop.permute.xlu0 %5856  ;;  %v7783_v57 = vld [vmem:[#allocation2 + $0x70] sm:$0xff] }
 0xd13   : > { %5940 = vst.msk [vmem:[#allocation2 + $0x68] sm:$0xff] %vm5926_vm5, %v5857_v23  ;;  %v7665_v4 = vpop.permute.xlu1 %7664  ;;  %10277 = vmatprep.mubr.msk.f32.mxu1 %vm303_vm0, %v7783_v57 }
 0xd14   : > { %7749 = vst.msk [vmem:[#allocation2 + $0x60] sm:$0xff] %vm7736_vm6, %v7665_v4  ;;  %10278 = vmatmul.mubr.msk.f32.vlgmr.msra.gmra.mrb[128].mxu1 %vm303_vm0, %v7784_v21 }
 0xd15   : > { %10280 = vmatprep.mubr.msk.f32.mxu1 %vm303_vm0, %v7785_v38 }
 0xd16   : > { %v4083_v19 = vpop.permute.xlu0 %4082 }
 0xd17   : > { %4148 = vst.msk [vmem:[#allocation2 + $0xf8] sm:$0xff] %vm4116_vm4, %v4083_v19  ;;  %v5891_v58 = vpop.permute.xlu1 %5890 }
 0xd18   : > { %5957 = vst.msk [vmem:[#allocation2 + $0xf0] sm:$0xff] %vm5926_vm5, %v5891_v58  ;;  %10281 = vmatmul.mubr.msk.f32.gmra.mrb[130].mxu1 %vm303_vm0, %v7786_v41 }
 0xd19   : > { %10283 = vmatprep.mubr.msk.f32.mxu1 %vm303_vm0, %v7787_v20 }
 0xd1a   : > { %v7667_v31 = vpop.permute.xlu0 %7666 }
 0xd1b   : > { %7750 = vst.msk [vmem:[#allocation2 + $0x68] sm:$0xff] %vm7736_vm6, %v7667_v31  ;;  %v7685_v27 = vpop.permute.xlu1 %7684  ;;  %v7781_v40 = vld [vmem:[#allocation2 + $0x60] sm:$0xff] }
 0xd1c   : > { %7759 = vst.msk [vmem:[#allocation2 + $0xb0] sm:$0xff] %vm7736_vm6, %v7685_v27  ;;  %10274 = vmatprep.mubr.msk.f32.mxu0 %vm303_vm0, %v7781_v40  ;;  %10284 = vmatmul.mubr.msk.f32.gmra.mrb[132].mxu1 %vm303_vm0, %v7788_v53 }
 0xd1d   : > { %10286 = vmatprep.mubr.msk.f32.mxu1 %vm303_vm0, %v7789_v8 }
 0xd20   : > { %10287 = vmatmul.mubr.msk.f32.gmra.mrb[134].mxu1 %vm303_vm0, %v7790_v29 }
 0xd22   : > { %v7782_v16 = vld [vmem:[#allocation2 + $0x68] sm:$0xff] }
 0xd23   : > { %10275 = vmatmul.mubr.msk.f32.gmra.mrb[172].mxu0 %vm303_vm0, %v7782_v16  ;;  %v7791_v52 = vld [vmem:[#allocation2 + $0xb0] sm:$0xff] }
 0xd24   : > { %10289 = vmatprep.mubr.msk.f32.mxu1 %vm303_vm0, %v7791_v52 }
 0xd25   : > { %10290 = vmatmul.mubr.msk.f32.gmra.mrb[136].mxu1 %vm303_vm0, %v7792_v55 }
 0xd39   : > { %v7691_v12 = vpop.permute.xlu0 %7690 }
 0xd3a   : > { %7762 = vst.msk [vmem:[#allocation2 + $0xc8] sm:$0xff] %vm7736_vm6, %v7691_v12  ;;  %v7689_v56 = vpop.permute.xlu1 %7688 }
 0xd3b   : > { %7761 = vst.msk [vmem:[#allocation2 + $0xc0] sm:$0xff] %vm7736_vm6, %v7689_v56 }
 0xd3d   : > { %v7695_v63 = vpop.permute.xlu0 %7694 }
 0xd3e   : > { %7764 = vst.msk [vmem:[#allocation2 + $0xd8] sm:$0xff] %vm7736_vm6, %v7695_v63  ;;  %v7693_v39 = vpop.permute.xlu1 %7692 }
 0xd3f   : > { %7763 = vst.msk [vmem:[#allocation2 + $0xd0] sm:$0xff] %vm7736_vm6, %v7693_v39 }
 0xd41   : > { %v7699_v3 = vpop.permute.xlu0 %7698  ;;  %v7794_v6 = vld [vmem:[#allocation2 + $0xc8] sm:$0xff] }
 0xd42   : > { %7766 = vst.msk [vmem:[#allocation2 + $0xe8] sm:$0xff] %vm7736_vm6, %v7699_v3  ;;  %v7697_v60 = vpop.permute.xlu1 %7696  ;;  %v7793_v42 = vld [vmem:[#allocation2 + $0xc0] sm:$0xff] }
 0xd43   : > { %7765 = vst.msk [vmem:[#allocation2 + $0xe0] sm:$0xff] %vm7736_vm6, %v7697_v60  ;;  %10292 = vmatprep.mubr.msk.f32.mxu1 %vm303_vm0, %v7793_v42 }
 0xd44   : > { %10293 = vmatmul.mubr.msk.f32.gmra.mrb[138].mxu1 %vm303_vm0, %v7794_v6 }
 0xd45   : > { %v7796_v7 = vld [vmem:[#allocation2 + $0xd8] sm:$0xff] }
 0xd46   : > { %v7701_v54 = vpop.permute.xlu0 %7700  ;;  %v5893_v22 = vpop.permute.xlu1 %5892  ;;  %v7795_v10 = vld [vmem:[#allocation2 + $0xd0] sm:$0xff] }
 0xd47   : > { %7767 = vst.msk [vmem:[#allocation2 + $0xf0] sm:$0xff] %vm7736_vm6, %v7701_v54  ;;  %10295 = vmatprep.mubr.msk.f32.mxu1 %vm303_vm0, %v7795_v10 }
 0xd48   : > { %5958 = vst.msk [vmem:[#allocation2 + $0xf8] sm:$0xff] %vm5926_vm5, %v5893_v22  ;;  %10296 = vmatmul.mubr.msk.f32.gmra.mrb[140].mxu1 %vm303_vm0, %v7796_v7 }
 0xd49   : > { %v7798_v44 = vld [vmem:[#allocation2 + $0xe8] sm:$0xff] }
 0xd4a   : > { %v7703_v45 = vpop.permute.xlu1 %7702  ;;  %v7797_v18 = vld [vmem:[#allocation2 + $0xe0] sm:$0xff] }
 0xd4b   : > { %7768 = vst.msk [vmem:[#allocation2 + $0xf8] sm:$0xff] %vm7736_vm6, %v7703_v45  ;;  %10298 = vmatprep.mubr.msk.f32.mxu1 %vm303_vm0, %v7797_v18 }
 0xd4c   : > { %10299 = vmatmul.mubr.msk.f32.gmra.mrb[142].mxu1 %vm303_vm0, %v7798_v44 }
 0xd4e   : > { %v7799_v30 = vld [vmem:[#allocation2 + $0xf0] sm:$0xff] }
 0xd4f   : > { %10301 = vmatprep.mubr.msk.f32.mxu1 %vm303_vm0, %v7799_v30 }
 0xd52   : > { %v7800_v5 = vld [vmem:[#allocation2 + $0xf8] sm:$0xff] }
 0xd53   : > { %10302 = vmatmul.mubr.msk.f32.gmra.mrb[144].mxu1 %vm303_vm0, %v7800_v5 }
 0xd83   : > { %v10258_v0 = vpop.f32.mrb[160].mxu0 }
 0xd84   : > { %v7980_v35 = vadd.f32 %v10258_v0, %v15851_v1  ;;  %v7974_v24 = vpop.f32.mrb[161].mxu0 }
 0xd85   : > { %v7975_v50 = vadd.f32 %v15851_v1, %v7974_v24 }
 0xd86   : > { %8134 = vst.msk [vmem:[%s15858_s20 + $0x8] sm:$0xff] %vm303_vm0, %v7980_v35 }
 0xd87   : > { %8133 = vst.msk [vmem:[%s15858_s20] sm:$0xff] %vm303_vm0, %v7975_v50 }
 0xd8b   : > { %v10261_v62 = vpop.f32.mrb[162].mxu0 }
 0xd8c   : > { %v7990_v33 = vadd.f32 %v10261_v62, %v15851_v1  ;;  %v7984_v47 = vpop.f32.mrb[163].mxu0 }
 0xd8d   : > { %v7985_v13 = vadd.f32 %v15851_v1, %v7984_v47 }
 0xd8e   : > { %8136 = vst.msk [vmem:[%s15858_s20 + $0x18] sm:$0xff] %vm303_vm0, %v7990_v33 }
 0xd8f   : > { %8135 = vst.msk [vmem:[%s15858_s20 + $0x10] sm:$0xff] %vm303_vm0, %v7985_v13 }
 0xd93   : > { %v10264_v2 = vpop.f32.mrb[164].mxu0 }
 0xd94   : > { %v8000_v28 = vadd.f32 %v10264_v2, %v15851_v1  ;;  %v7994_v59 = vpop.f32.mrb[165].mxu0 }
 0xd95   : > { %v7995_v34 = vadd.f32 %v15851_v1, %v7994_v59 }
 0xd96   : > { %8138 = vst.msk [vmem:[%s15858_s20 + $0x28] sm:$0xff] %vm303_vm0, %v8000_v28 }
 0xd97   : > { %8137 = vst.msk [vmem:[%s15858_s20 + $0x20] sm:$0xff] %vm303_vm0, %v7995_v34 }
 0xd9b   : > { %v10267_v51 = vpop.f32.mrb[166].mxu0 }
 0xd9c   : > { %v8010_v15 = vadd.f32 %v10267_v51, %v15851_v1  ;;  %v8004_v17 = vpop.f32.mrb[167].mxu0 }
 0xd9d   : > { %v8005_v32 = vadd.f32 %v15851_v1, %v8004_v17 }
 0xd9e   : > { %8140 = vst.msk [vmem:[%s15858_s20 + $0x38] sm:$0xff] %vm303_vm0, %v8010_v15 }
 0xd9f   : > { %8139 = vst.msk [vmem:[%s15858_s20 + $0x30] sm:$0xff] %vm303_vm0, %v8005_v32 }
 0xdd4   : > { %v10270_v61 = vpop.f32.mrb[168].mxu0 }
 0xdd5   : > { %v8020_v14 = vadd.f32 %v10270_v61, %v15851_v1  ;;  %v8014_v36 = vpop.f32.mrb[169].mxu0 }
 0xdd6   : > { %v8015_v49 = vadd.f32 %v15851_v1, %v8014_v36 }
 0xdd7   : > { %8142 = vst.msk [vmem:[%s15858_s20 + $0x48] sm:$0xff] %vm303_vm0, %v8020_v14 }
 0xdd8   : > { %8141 = vst.msk [vmem:[%s15858_s20 + $0x40] sm:$0xff] %vm303_vm0, %v8015_v49 }
 0xddc   : > { %v10273_v11 = vpop.f32.mrb[170].mxu0 }
 0xddd   : > { %v8030_v43 = vadd.f32 %v10273_v11, %v15851_v1  ;;  %v8024_v37 = vpop.f32.mrb[171].mxu0 }
 0xdde   : > { %v8025_v9 = vadd.f32 %v15851_v1, %v8024_v37 }
 0xddf   : > { %8144 = vst.msk [vmem:[%s15858_s20 + $0x58] sm:$0xff] %vm303_vm0, %v8030_v43 }
 0xde0   : > { %8143 = vst.msk [vmem:[%s15858_s20 + $0x50] sm:$0xff] %vm303_vm0, %v8025_v9 }
 0xde7   : > { %v10279_v26 = vpop.f32.mrb[128].mxu1 }
 0xde8   : > { %v8050_v48 = vadd.f32 %v10279_v26, %v15851_v1  ;;  %v8044_v46 = vpop.f32.mrb[129].mxu1 }
 0xde9   : > { %v8045_v25 = vadd.f32 %v15851_v1, %v8044_v46 }
 0xdea   : > { %8148 = vst.msk [vmem:[%s15858_s20 + $0x78] sm:$0xff] %vm303_vm0, %v8050_v48 }
 0xdeb   : > { %8147 = vst.msk [vmem:[%s15858_s20 + $0x70] sm:$0xff] %vm303_vm0, %v8045_v25  ;;  %v10282_v23 = vpop.f32.mrb[130].mxu1 }
 0xdec   : > { %v8060_v57 = vadd.f32 %v10282_v23, %v15851_v1  ;;  %v8054_v4 = vpop.f32.mrb[131].mxu1 }
 0xded   : > { %v8055_v21 = vadd.f32 %v15851_v1, %v8054_v4 }
 0xdee   : > { %8150 = vst.msk [vmem:[%s15858_s20 + $0x88] sm:$0xff] %vm303_vm0, %v8060_v57 }
 0xdef   : > { %8149 = vst.msk [vmem:[%s15858_s20 + $0x80] sm:$0xff] %vm303_vm0, %v8055_v21  ;;  %v10285_v38 = vpop.f32.mrb[132].mxu1 }
 0xdf0   : > { %v8070_v19 = vadd.f32 %v10285_v38, %v15851_v1  ;;  %v8064_v58 = vpop.f32.mrb[133].mxu1 }
 0xdf1   : > { %v8065_v41 = vadd.f32 %v15851_v1, %v8064_v58 }
 0xdf2   : > { %8152 = vst.msk [vmem:[%s15858_s20 + $0x98] sm:$0xff] %vm303_vm0, %v8070_v19 }
 0xdf3   : > { %8151 = vst.msk [vmem:[%s15858_s20 + $0x90] sm:$0xff] %vm303_vm0, %v8065_v41  ;;  %v10288_v20 = vpop.f32.mrb[134].mxu1 }
 0xdf4   : > { %v8074_v31 = vpop.f32.mrb[135].mxu1  ;;  %v8080_v8 = vadd.f32 %v10288_v20, %v15851_v1 }
 0xdf5   : > { %v8075_v52 = vadd.f32 %v15851_v1, %v8074_v31 }
 0xdf6   : > { %v10276_v27 = vpop.f32.mrb[172].mxu0  ;;  %8154 = vst.msk [vmem:[%s15858_s20 + $0xa8] sm:$0xff] %vm303_vm0, %v8080_v8 }
 0xdf7   : > { %v8040_v40 = vadd.f32 %v10276_v27, %v15851_v1  ;;  %v8034_v53 = vpop.f32.mrb[173].mxu0  ;;  %8153 = vst.msk [vmem:[%s15858_s20 + $0xa0] sm:$0xff] %vm303_vm0, %v8075_v52 }
 0xdf8   : > { %v8035_v29 = vadd.f32 %v15851_v1, %v8034_v53  ;;  %v10291_v16 = vpop.f32.mrb[136].mxu1 }
 0xdf9   : > { %8146 = vst.msk [vmem:[%s15858_s20 + $0x68] sm:$0xff] %vm303_vm0, %v8040_v40  ;;  %v8090_v55 = vadd.f32 %v10291_v16, %v15851_v1  ;;  %v8084_v12 = vpop.f32.mrb[137].mxu1 }
 0xdfa   : > { %8145 = vst.msk [vmem:[%s15858_s20 + $0x60] sm:$0xff] %vm303_vm0, %v8035_v29  ;;  %v8085_v56 = vadd.f32 %v15851_v1, %v8084_v12 }
 0xdfb   : > { %8156 = vst.msk [vmem:[%s15858_s20 + $0xb8] sm:$0xff] %vm303_vm0, %v8090_v55 }
 0xdfc   : > { %8155 = vst.msk [vmem:[%s15858_s20 + $0xb0] sm:$0xff] %vm303_vm0, %v8085_v56 }
 0xe17   : > { %v10294_v63 = vpop.f32.mrb[138].mxu1 }
 0xe18   : > { %v8100_v39 = vadd.f32 %v10294_v63, %v15851_v1  ;;  %v8094_v3 = vpop.f32.mrb[139].mxu1 }
 0xe19   : > { %v8095_v60 = vadd.f32 %v15851_v1, %v8094_v3 }
 0xe1a   : > { %8158 = vst.msk [vmem:[%s15858_s20 + $0xc8] sm:$0xff] %vm303_vm0, %v8100_v39 }
 0xe1b   : > { %8157 = vst.msk [vmem:[%s15858_s20 + $0xc0] sm:$0xff] %vm303_vm0, %v8095_v60  ;;  %v10297_v42 = vpop.f32.mrb[140].mxu1 }
 0xe1c   : > { %v8110_v6 = vadd.f32 %v10297_v42, %v15851_v1  ;;  %v8104_v54 = vpop.f32.mrb[141].mxu1 }
 0xe1d   : > { %v8105_v22 = vadd.f32 %v15851_v1, %v8104_v54 }
 0xe1e   : > { %8160 = vst.msk [vmem:[%s15858_s20 + $0xd8] sm:$0xff] %vm303_vm0, %v8110_v6 }
 0xe1f   : > { %8159 = vst.msk [vmem:[%s15858_s20 + $0xd0] sm:$0xff] %vm303_vm0, %v8105_v22  ;;  %v10300_v10 = vpop.f32.mrb[142].mxu1 }
 0xe20   : > { %v8120_v7 = vadd.f32 %v10300_v10, %v15851_v1  ;;  %v8114_v45 = vpop.f32.mrb[143].mxu1 }
 0xe21   : > { %v8115_v18 = vadd.f32 %v15851_v1, %v8114_v45 }
 0xe22   : > { %8162 = vst.msk [vmem:[%s15858_s20 + $0xe8] sm:$0xff] %vm303_vm0, %v8120_v7 }
 0xe23   : > { %8161 = vst.msk [vmem:[%s15858_s20 + $0xe0] sm:$0xff] %vm303_vm0, %v8115_v18 }
 0xe26   : > { %v10303_v44 = vpop.f32.mrb[144].mxu1 }
 0xe27   : > { %v8130_v30 = vadd.f32 %v10303_v44, %v15851_v1  ;;  %v8124_v5 = vpop.f32.mrb[145].mxu1 }
 0xe28   : > { %v8125_v0 = vadd.f32 %v15851_v1, %v8124_v5 }
 0xe29   : > { %8164 = vst.msk [vmem:[%s15858_s20 + $0xf8] sm:$0xff] %vm303_vm0, %v8130_v30 }
 0xe2a   : > { %8163 = vst.msk [vmem:[%s15858_s20 + $0xf0] sm:$0xff] %vm303_vm0, %v8125_v0 }
 0xe2b PF: > { %s16_s21 = sadd.s32 1, %s12144_s21  }
 0xe2c   : > { %p13_p4 = scmp.ge.s32.totalorder %s16_s21, 4  }
 0xe2e   :  { %15 = sbr.rel (!%p13_p4) target bundleno = 1 (0x1), region = 77 }

</bundles_post_ra>
